<compile_context>
chip_gen: v5e
topology: v5e:2x2
jax: 0.10.0
libtpu: 0.0.40
codegen_flags: <defaults>
</compile_context>

<pallas_src>
import functools

import jax
import jax.numpy as jnp
from jax.experimental import pallas as pl
from jax.experimental.pallas import tpu as pltpu

EPS = 1e-5
SLOPE = 0.2

# (C_in, C_out, kernel, stride) for the 8 Conv1d layers
CONV_CFG = [
    (1, 4, 8, 4),
    (4, 8, 8, 4),
    (8, 16, 5, 3),
    (16, 16, 5, 2),
    (16, 32, 5, 2),
    (32, 64, 3, 2),
    (64, 64, 3, 2),
    (64, 64, 3, 2),
]
FC_IN = 64 * 20       # required by nn.Linear(64*20, 64)
TM_L1 = 2048          # lane tile for the layer-1 grid over M = B*L_out1


# ---------------------------------------------------------------- Pallas kernels
def _conv1_kernel(p_ref, w_ref, y_ref, sum_ref, sumsq_ref):
    """Layer-1 pass 1: tiled conv matmul + per-channel sum/sumsq accumulation.

    p: [Cin*k, TM] bf16   w: [Cout, Cin*k] bf16
    y: [Cout, TM] f32 (pre-BN conv output tile)
    sum/sumsq: [Cout, 1] f32 accumulators (constant block index across the grid).
    Zero-padded M columns contribute 0 to both sums, so no masking is needed.
    """
    @pl.when(pl.program_id(0) == 0)
    def _init():
        sum_ref[...] = jnp.zeros_like(sum_ref)
        sumsq_ref[...] = jnp.zeros_like(sumsq_ref)

    y = jnp.dot(w_ref[...], p_ref[...], preferred_element_type=jnp.float32)
    y_ref[...] = y
    sum_ref[...] += jnp.sum(y, axis=-1, keepdims=True)
    sumsq_ref[...] += jnp.sum(y * y, axis=-1, keepdims=True)


def _bn1_kernel(y_ref, sum_ref, sumsq_ref, g_ref, b_ref, o_ref, *, count):
    """Layer-1 pass 2: normalize with the batch stats + LeakyReLU, output bf16."""
    inv_n = 1.0 / count
    mean = sum_ref[...] * inv_n                                  # [Cout, 1]
    var = jnp.maximum(sumsq_ref[...] * inv_n - mean * mean, 0.0)  # biased variance
    scale = g_ref[...] * jax.lax.rsqrt(var + EPS)
    shift = b_ref[...] - mean * scale
    z = y_ref[...] * scale + shift
    o_ref[...] = jnp.where(z >= 0.0, z, SLOPE * z).astype(o_ref.dtype)


def _conv_bn_lrelu_kernel(p_ref, w_ref, g_ref, b_ref, o_ref):
    """Layers 2-8 (single block, whole batch): matmul + train-mode BN + LeakyReLU.

    p: [Cin*k, M] bf16   w: [Cout, Cin*k] bf16   g,b: [Cout, 1] f32   o: [Cout, M] bf16
    M = B * L_out, so axis=-1 statistics are exactly BatchNorm1d's batch statistics.
    """
    y = jnp.dot(w_ref[...], p_ref[...], preferred_element_type=jnp.float32)
    mean = jnp.mean(y, axis=-1, keepdims=True)
    var = jnp.maximum(jnp.mean(y * y, axis=-1, keepdims=True) - mean * mean, 0.0)
    scale = g_ref[...] * jax.lax.rsqrt(var + EPS)
    shift = b_ref[...] - mean * scale
    z = y * scale + shift
    o_ref[...] = jnp.where(z >= 0.0, z, SLOPE * z).astype(o_ref.dtype)


def _head_kernel(x_ref, w1_ref, b1_ref, w2_ref, b2_ref, o_ref):
    """Flatten -> Linear(1280,64) -> LeakyReLU -> Linear(64,1) -> Sigmoid.

    x: [B, 1280] bf16, w1: [1280, 64] bf16, b1: [1, 64] f32, w2: [1, 64] f32, b2: [1,1] f32.
    The N=1 second Linear is a VPU lane reduction; sigmoid is numerically stable.
    """
    h = jnp.dot(x_ref[...], w1_ref[...], preferred_element_type=jnp.float32) + b1_ref[...]
    h = jnp.where(h >= 0.0, h, SLOPE * h)
    logit = jnp.sum(h * w2_ref[...], axis=-1, keepdims=True) + b2_ref[...]   # [B, 1]
    ez = jnp.exp(-jnp.abs(logit))
    o_ref[...] = jnp.where(logit >= 0.0, 1.0 / (1.0 + ez), ez / (1.0 + ez))


# ---------------------------------------------------------------- wrappers
def _vmem():
    return pl.BlockSpec(memory_space=pltpu.MemorySpace.VMEM)


def conv1(patches, w, cout, kdim, tm):
    """Layer-1 pass 1. patches: [kdim, M_pad] bf16 (M_pad multiple of tm)."""
    m_pad = patches.shape[1]
    nt = m_pad // tm
    return pl.pallas_call(
        _conv1_kernel,
        grid=(nt,),
        in_specs=[pl.BlockSpec((kdim, tm), lambda i: (0, i)),
                  pl.BlockSpec((cout, kdim), lambda i: (0, 0))],
        out_specs=[pl.BlockSpec((cout, tm), lambda i: (0, i)),
                   pl.BlockSpec((cout, 1), lambda i: (0, 0)),
                   pl.BlockSpec((cout, 1), lambda i: (0, 0))],
        out_shape=[jax.ShapeDtypeStruct((cout, m_pad), jnp.float32),
                   jax.ShapeDtypeStruct((cout, 1), jnp.float32),
                   jax.ShapeDtypeStruct((cout, 1), jnp.float32)],
        compiler_params=pltpu.CompilerParams(dimension_semantics=("arbitrary",)),
    )(patches, w)


def bn1_lrelu(y, ssum, ssq, gamma, beta, count, tm):
    """Layer-1 pass 2 (normalize + LeakyReLU), gridded & megacore-parallel."""
    cout, m_pad = y.shape
    nt = m_pad // tm
    kern = functools.partial(_bn1_kernel, count=float(count))
    return pl.pallas_call(
        kern,
        grid=(nt,),
        in_specs=[pl.BlockSpec((cout, tm), lambda i: (0, i)),
                  pl.BlockSpec((cout, 1), lambda i: (0, 0)),
                  pl.BlockSpec((cout, 1), lambda i: (0, 0)),
                  pl.BlockSpec((cout, 1), lambda i: (0, 0)),
                  pl.BlockSpec((cout, 1), lambda i: (0, 0))],
        out_specs=pl.BlockSpec((cout, tm), lambda i: (0, i)),
        out_shape=jax.ShapeDtypeStruct((cout, m_pad), jnp.bfloat16),
        compiler_params=pltpu.CompilerParams(dimension_semantics=("parallel",)),
    )(y, ssum, ssq, gamma, beta)


def conv_bn_lrelu(patches, w, gamma, beta):
    """Layers 2-8: whole-batch single-block fused conv + BN + LeakyReLU."""
    cout = w.shape[0]
    m = patches.shape[1]
    return pl.pallas_call(
        _conv_bn_lrelu_kernel,
        out_shape=jax.ShapeDtypeStruct((cout, m), jnp.bfloat16),
        in_specs=[_vmem(), _vmem(), _vmem(), _vmem()],
        out_specs=_vmem(),
    )(patches, w, gamma, beta)


def head(x, w1, b1, w2, b2):
    B = x.shape[0]
    return pl.pallas_call(
        _head_kernel,
        out_shape=jax.ShapeDtypeStruct((B, 1), jnp.float32),
        in_specs=[_vmem(), _vmem(), _vmem(), _vmem(), _vmem()],
        out_specs=_vmem(),
    )(x, w1, b1, w2, b2)


# ---------------------------------------------------------------- glue (plain JAX)
def _im2col_t(h, k, s):
    """h: [C, B, L_in] -> transposed patches [C*k, B*L_out] (row c*k+j, col b*L_out+t)."""
    C, B, L_in = h.shape
    L_out = (L_in - k) // s + 1
    offs = jnp.arange(L_out)[:, None] * s + jnp.arange(k)[None, :]   # [L_out, k]
    p = h[:, :, offs]                                                # [C, B, L_out, k]
    p = p.transpose(0, 3, 1, 2).reshape(C * k, B * L_out)
    return p, L_out


def init_params(key):
    """Weights are stored pre-reshaped ([Cout, Cin*k]) and pre-cast to bf16."""
    params = {"conv_w": [], "bn": []}
    for (cin, cout, k, _s) in CONV_CFG:
        key, k1, k2, k3 = jax.random.split(key, 4)
        w = jax.random.normal(k1, (cout, cin, k), jnp.float32) * (1.0 / (cin * k)) ** 0.5
        params["conv_w"].append(w.reshape(cout, cin * k).astype(jnp.bfloat16))
        gamma = 1.0 + 0.1 * jax.random.normal(k2, (cout, 1), jnp.float32)
        beta = 0.1 * jax.random.normal(k3, (cout, 1), jnp.float32)
        params["bn"].append((gamma, beta))
    key, k1, k2, k3, k4 = jax.random.split(key, 5)
    params["fc1_w"] = (jax.random.normal(k1, (FC_IN, 64), jnp.float32)
                       * (1.0 / FC_IN) ** 0.5).astype(jnp.bfloat16)
    params["fc1_b"] = 0.1 * jax.random.normal(k2, (1, 64), jnp.float32)
    params["fc2_w"] = jax.random.normal(k3, (1, 64), jnp.float32) * (1.0 / 64.0) ** 0.5
    params["fc2_b"] = 0.1 * jax.random.normal(k4, (1, 1), jnp.float32)
    return params


def discriminator_forward(params, x):
    """x: [B, 1, L] (NCL as in PyTorch). Returns [B, 1] sigmoid probabilities."""
    B, _, L0 = x.shape

    # ---- layer 1: gridded over M = B*L_out with two-pass BatchNorm ----
    cin, cout, k, s = CONV_CFG[0]
    L1 = (L0 - k) // s + 1
    M1 = B * L1
    offs = jnp.arange(L1)[:, None] * s + jnp.arange(k)[None, :]          # [L1, k]
    p1 = x[:, 0, :][:, offs]                                             # [B, L1, k]
    p1 = p1.transpose(2, 0, 1).reshape(k, M1).astype(jnp.bfloat16)       # [k, M1]
    m_pad = pl.cdiv(M1, TM_L1) * TM_L1
    p1 = jnp.pad(p1, ((0, 0), (0, m_pad - M1)))                          # zero pad lanes

    y1, s1, s2 = conv1(p1, params["conv_w"][0], cout, cin * k, TM_L1)
    g1, b1 = params["bn"][0]
    h = bn1_lrelu(y1, s1, s2, g1, b1, M1, TM_L1)                         # [cout, m_pad] bf16
    h = h[:, :M1].reshape(cout, B, L1)

    # ---- layers 2-8: tiny fused single-block kernels (batch-global BN stats) ----
    for (cin, cout, k, s), w, (g, b) in zip(CONV_CFG[1:], params["conv_w"][1:],
                                            params["bn"][1:]):
        patches, L_out = _im2col_t(h, k, s)                              # [cin*k, B*L_out]
        hflat = conv_bn_lrelu(patches, w, g, b)                          # [cout, B*L_out]
        h = hflat.reshape(cout, B, L_out)

    # ---- Flatten (PyTorch order: channel-major) + MLP head ----
    flat = h.transpose(1, 0, 2).reshape(B, -1)                           # [B, 64*20] bf16
    return head(flat, params["fc1_w"], params["fc1_b"], params["fc2_w"], params["fc2_b"])


def required_input_length():
    """Smallest L0 such that the conv stack produces length 20 (for Linear(64*20, 64))."""
    L = 20
    for (_cin, _cout, k, s) in reversed(CONV_CFG):
        L = (L - 1) * s + k
    return L


if __name__ == "__main__":
    L0 = required_input_length()   # 32548 — fixed by the Linear(64*20, 64) in the spec
    L = L0
    for (_ci, _co, k, s) in CONV_CFG:
        L = (L - k) // s + 1
    assert L == 20, L

    key = jax.random.PRNGKey(0)
    key, pkey, xkey = jax.random.split(key, 3)
    params = init_params(pkey)

    B = 2
    x = jax.random.normal(xkey, (B, 1, L0), jnp.float32)   # NCL layout

    out = jax.jit(discriminator_forward)(params, x)
    out = jax.block_until_ready(out)
    assert out.shape == (B, 1)
    assert bool(jnp.all((out >= 0.0) & (out <= 1.0)))       # also catches NaN/Inf
    print("KERNEL_OK")
</pallas_src>

<mosaic_0001>
module attributes {stable_mosaic.version = 11 : i64} {
  func.func @_conv1_kernel(%arg0: i32, %arg1: memref<8x2048xbf16, #tpu.memory_space<vmem>>, %arg2: memref<4x8xbf16, #tpu.memory_space<vmem>>, %arg3: memref<4x2048xf32, #tpu.memory_space<vmem>>, %arg4: memref<4x1xf32, #tpu.memory_space<vmem>>, %arg5: memref<4x1xf32, #tpu.memory_space<vmem>>) attributes {dimension_semantics = [#tpu.dimension_semantics<arbitrary>], iteration_bounds = array<i64: 8>, scalar_prefetch = 0 : i64, scratch_operands = 0 : i64, tpu.core_type = #tpu.core_type<tc>, window_params = [{transform_indices = @transform_0, window_bounds = array<i64: 8, 2048>}, {pipeline_mode = #tpu.pipeline_mode<synchronous>, transform_indices = @transform_1, window_bounds = array<i64: 4, 8>}, {transform_indices = @transform_2, window_bounds = array<i64: 4, 2048>}, {pipeline_mode = #tpu.pipeline_mode<synchronous>, transform_indices = @transform_3, window_bounds = array<i64: 4, 1>}, {pipeline_mode = #tpu.pipeline_mode<synchronous>, transform_indices = @transform_4, window_bounds = array<i64: 4, 1>}]} {
    %c0_i32 = arith.constant 0 : i32
    %0 = arith.cmpi eq, %arg0, %c0_i32 : i32
    %1 = arith.extui %0 : i1 to i32
    %c0_i32_0 = arith.constant 0 : i32
    %2 = arith.cmpi ne, %1, %c0_i32_0 : i32
    scf.if %2 {
      %cst_16 = arith.constant 0.000000e+00 : f32
      %18 = vector.broadcast %cst_16 : f32 to vector<4x1xf32>
      %c0_17 = arith.constant 0 : index
      %c0_18 = arith.constant 0 : index
      %19 = vector.load %arg4[%c0_17, %c0_18] : memref<4x1xf32, #tpu.memory_space<vmem>>, vector<4x1xf32>
      tpu.vector_store %arg4[%c0_17, %c0_18], %18 {strides = array<i32>} : memref<4x1xf32, #tpu.memory_space<vmem>>, vector<4x1xf32>,
      %cst_19 = arith.constant 0.000000e+00 : f32
      %20 = vector.broadcast %cst_19 : f32 to vector<4x1xf32>
      %c0_20 = arith.constant 0 : index
      %c0_21 = arith.constant 0 : index
      %21 = vector.load %arg5[%c0_20, %c0_21] : memref<4x1xf32, #tpu.memory_space<vmem>>, vector<4x1xf32>
      tpu.vector_store %arg5[%c0_20, %c0_21], %20 {strides = array<i32>} : memref<4x1xf32, #tpu.memory_space<vmem>>, vector<4x1xf32>,
    } else {
    }
    %c0 = arith.constant 0 : index
    %c0_1 = arith.constant 0 : index
    %3 = vector.load %arg2[%c0, %c0_1] : memref<4x8xbf16, #tpu.memory_space<vmem>>, vector<4x8xbf16>
    %c0_2 = arith.constant 0 : index
    %c0_3 = arith.constant 0 : index
    %4 = vector.load %arg1[%c0_2, %c0_3] : memref<8x2048xbf16, #tpu.memory_space<vmem>>, vector<8x2048xbf16>
    %cst = arith.constant dense<0.000000e+00> : vector<4x2048xf32>
    %5 = tpu.matmul %3, %4, %cst {dimension_numbers = #tpu.dot_dimension_numbers<[1], [0], [0], [1], [0, 0, 1, 1], [], []>} : vector<4x8xbf16>, vector<8x2048xbf16>, vector<4x2048xf32> -> vector<4x2048xf32>
    %c0_4 = arith.constant 0 : index
    %c0_5 = arith.constant 0 : index
    %6 = vector.load %arg3[%c0_4, %c0_5] : memref<4x2048xf32, #tpu.memory_space<vmem>>, vector<4x2048xf32>
    tpu.vector_store %arg3[%c0_4, %c0_5], %5 {strides = array<i32>} : memref<4x2048xf32, #tpu.memory_space<vmem>>, vector<4x2048xf32>,
    %c0_6 = arith.constant 0 : index
    %c0_7 = arith.constant 0 : index
    %7 = vector.load %arg4[%c0_6, %c0_7] : memref<4x1xf32, #tpu.memory_space<vmem>>, vector<4x1xf32>
    %cst_8 = arith.constant dense<0.000000e+00> : vector<4xf32>
    %8 = vector.multi_reduction <add>, %5, %cst_8 [1] : vector<4x2048xf32> to vector<4xf32>
    %9 = vector.shape_cast %8 : vector<4xf32> to vector<4x1xf32>
    %10 = arith.addf %7, %9 : vector<4x1xf32>
    %c0_9 = arith.constant 0 : index
    %c0_10 = arith.constant 0 : index
    %11 = vector.load %arg4[%c0_9, %c0_10] : memref<4x1xf32, #tpu.memory_space<vmem>>, vector<4x1xf32>
    tpu.vector_store %arg4[%c0_9, %c0_10], %10 {strides = array<i32>} : memref<4x1xf32, #tpu.memory_space<vmem>>, vector<4x1xf32>,
    %c0_11 = arith.constant 0 : index
    %c0_12 = arith.constant 0 : index
    %12 = vector.load %arg5[%c0_11, %c0_12] : memref<4x1xf32, #tpu.memory_space<vmem>>, vector<4x1xf32>
    %13 = arith.mulf %5, %5 : vector<4x2048xf32>
    %cst_13 = arith.constant dense<0.000000e+00> : vector<4xf32>
    %14 = vector.multi_reduction <add>, %13, %cst_13 [1] : vector<4x2048xf32> to vector<4xf32>
    %15 = vector.shape_cast %14 : vector<4xf32> to vector<4x1xf32>
    %16 = arith.addf %12, %15 : vector<4x1xf32>
    %c0_14 = arith.constant 0 : index
    %c0_15 = arith.constant 0 : index
    %17 = vector.load %arg5[%c0_14, %c0_15] : memref<4x1xf32, #tpu.memory_space<vmem>>, vector<4x1xf32>
    tpu.vector_store %arg5[%c0_14, %c0_15], %16 {strides = array<i32>} : memref<4x1xf32, #tpu.memory_space<vmem>>, vector<4x1xf32>,
    return
  }
  func.func @transform_0(%arg0: i32) -> (i32, i32) {
    %c0_i32 = arith.constant 0 : i32
    %c0_i32_0 = arith.constant 0 : i32
    return %c0_i32, %arg0 : i32, i32
  }
  func.func @transform_1(%arg0: i32) -> (i32, i32) {
    %c0_i32 = arith.constant 0 : i32
    %c0_i32_0 = arith.constant 0 : i32
    %c0_i32_1 = arith.constant 0 : i32
    return %c0_i32, %c0_i32_0 : i32, i32
  }
  func.func @transform_2(%arg0: i32) -> (i32, i32) {
    %c0_i32 = arith.constant 0 : i32
    %c0_i32_0 = arith.constant 0 : i32
    return %c0_i32, %arg0 : i32, i32
  }
  func.func @transform_3(%arg0: i32) -> (i32, i32) {
    %c0_i32 = arith.constant 0 : i32
    %c0_i32_0 = arith.constant 0 : i32
    %c0_i32_1 = arith.constant 0 : i32
    return %c0_i32, %c0_i32_0 : i32, i32
  }
  func.func @transform_4(%arg0: i32) -> (i32, i32) {
    %c0_i32 = arith.constant 0 : i32
    %c0_i32_0 = arith.constant 0 : i32
    %c0_i32_1 = arith.constant 0 : i32
    return %c0_i32, %c0_i32_0 : i32, i32
  }
}

module attributes {stable_mosaic.version = 11 : i64} {
  func.func @_bn1_kernel(%arg0: i32, %arg1: memref<4x2048xf32, #tpu.memory_space<vmem>>, %arg2: memref<4x1xf32, #tpu.memory_space<vmem>>, %arg3: memref<4x1xf32, #tpu.memory_space<vmem>>, %arg4: memref<4x1xf32, #tpu.memory_space<vmem>>, %arg5: memref<4x1xf32, #tpu.memory_space<vmem>>, %arg6: memref<4x2048xbf16, #tpu.memory_space<vmem>>) attributes {dimension_semantics = [#tpu.dimension_semantics<parallel>], iteration_bounds = array<i64: 8>, scalar_prefetch = 0 : i64, scratch_operands = 0 : i64, tpu.core_type = #tpu.core_type<tc>, window_params = [{transform_indices = @transform_0, window_bounds = array<i64: 4, 2048>}, {pipeline_mode = #tpu.pipeline_mode<synchronous>, transform_indices = @transform_1, window_bounds = array<i64: 4, 1>}, {pipeline_mode = #tpu.pipeline_mode<synchronous>, transform_indices = @transform_2, window_bounds = array<i64: 4, 1>}, {pipeline_mode = #tpu.pipeline_mode<synchronous>, transform_indices = @transform_3, window_bounds = array<i64: 4, 1>}, {pipeline_mode = #tpu.pipeline_mode<synchronous>, transform_indices = @transform_4, window_bounds = array<i64: 4, 1>}, {transform_indices = @transform_5, window_bounds = array<i64: 4, 2048>}]} {
    %c0 = arith.constant 0 : index
    %c0_0 = arith.constant 0 : index
    %0 = vector.load %arg2[%c0, %c0_0] : memref<4x1xf32, #tpu.memory_space<vmem>>, vector<4x1xf32>
    %cst = arith.constant 6.14552628E-5 : f32
    %1 = vector.broadcast %cst : f32 to vector<4x1xf32>
    %2 = arith.mulf %0, %1 : vector<4x1xf32>
    %c0_1 = arith.constant 0 : index
    %c0_2 = arith.constant 0 : index
    %3 = vector.load %arg3[%c0_1, %c0_2] : memref<4x1xf32, #tpu.memory_space<vmem>>, vector<4x1xf32>
    %cst_3 = arith.constant 6.14552628E-5 : f32
    %4 = vector.broadcast %cst_3 : f32 to vector<4x1xf32>
    %5 = arith.mulf %3, %4 : vector<4x1xf32>
    %6 = arith.mulf %2, %2 : vector<4x1xf32>
    %7 = arith.subf %5, %6 : vector<4x1xf32>
    %cst_4 = arith.constant 0.000000e+00 : f32
    %8 = vector.broadcast %cst_4 : f32 to vector<4x1xf32>
    %9 = arith.maximumf %7, %8 : vector<4x1xf32>
    %c0_5 = arith.constant 0 : index
    %c0_6 = arith.constant 0 : index
    %10 = vector.load %arg4[%c0_5, %c0_6] : memref<4x1xf32, #tpu.memory_space<vmem>>, vector<4x1xf32>
    %cst_7 = arith.constant 9.99999974E-6 : f32
    %11 = vector.broadcast %cst_7 : f32 to vector<4x1xf32>
    %12 = arith.addf %9, %11 : vector<4x1xf32>
    %13 = math.rsqrt %12 : vector<4x1xf32>
    %14 = arith.mulf %10, %13 : vector<4x1xf32>
    %c0_8 = arith.constant 0 : index
    %c0_9 = arith.constant 0 : index
    %15 = vector.load %arg5[%c0_8, %c0_9] : memref<4x1xf32, #tpu.memory_space<vmem>>, vector<4x1xf32>
    %16 = arith.mulf %2, %14 : vector<4x1xf32>
    %17 = arith.subf %15, %16 : vector<4x1xf32>
    %c0_10 = arith.constant 0 : index
    %c0_11 = arith.constant 0 : index
    %18 = vector.load %arg1[%c0_10, %c0_11] : memref<4x2048xf32, #tpu.memory_space<vmem>>, vector<4x2048xf32>
    %19 = vector.broadcast %14 : vector<4x1xf32> to vector<4x2048xf32>
    %20 = arith.mulf %18, %19 : vector<4x2048xf32>
    %21 = vector.broadcast %17 : vector<4x1xf32> to vector<4x2048xf32>
    %22 = arith.addf %20, %21 : vector<4x2048xf32>
    %cst_12 = arith.constant 0.000000e+00 : f32
    %23 = vector.broadcast %cst_12 : f32 to vector<4x2048xf32>
    %24 = arith.cmpf oge, %22, %23 : vector<4x2048xf32>
    %cst_13 = arith.constant 2.000000e-01 : f32
    %25 = vector.broadcast %cst_13 : f32 to vector<4x2048xf32>
    %26 = arith.mulf %25, %22 : vector<4x2048xf32>
    %27 = arith.select %24, %22, %26 : vector<4x2048xi1>, vector<4x2048xf32>
    %28 = arith.truncf %27 : vector<4x2048xf32> to vector<4x2048xbf16>
    %c0_14 = arith.constant 0 : index
    %c0_15 = arith.constant 0 : index
    %29 = vector.load %arg6[%c0_14, %c0_15] : memref<4x2048xbf16, #tpu.memory_space<vmem>>, vector<4x2048xbf16>
    tpu.vector_store %arg6[%c0_14, %c0_15], %28 {strides = array<i32>} : memref<4x2048xbf16, #tpu.memory_space<vmem>>, vector<4x2048xbf16>,
    return
  }
  func.func @transform_0(%arg0: i32) -> (i32, i32) {
    %c0_i32 = arith.constant 0 : i32
    %c0_i32_0 = arith.constant 0 : i32
    return %c0_i32, %arg0 : i32, i32
  }
  func.func @transform_1(%arg0: i32) -> (i32, i32) {
    %c0_i32 = arith.constant 0 : i32
    %c0_i32_0 = arith.constant 0 : i32
    %c0_i32_1 = arith.constant 0 : i32
    return %c0_i32, %c0_i32_0 : i32, i32
  }
  func.func @transform_2(%arg0: i32) -> (i32, i32) {
    %c0_i32 = arith.constant 0 : i32
    %c0_i32_0 = arith.constant 0 : i32
    %c0_i32_1 = arith.constant 0 : i32
    return %c0_i32, %c0_i32_0 : i32, i32
  }
  func.func @transform_3(%arg0: i32) -> (i32, i32) {
    %c0_i32 = arith.constant 0 : i32
    %c0_i32_0 = arith.constant 0 : i32
    %c0_i32_1 = arith.constant 0 : i32
    return %c0_i32, %c0_i32_0 : i32, i32
  }
  func.func @transform_4(%arg0: i32) -> (i32, i32) {
    %c0_i32 = arith.constant 0 : i32
    %c0_i32_0 = arith.constant 0 : i32
    %c0_i32_1 = arith.constant 0 : i32
    return %c0_i32, %c0_i32_0 : i32, i32
  }
  func.func @transform_5(%arg0: i32) -> (i32, i32) {
    %c0_i32 = arith.constant 0 : i32
    %c0_i32_0 = arith.constant 0 : i32
    return %c0_i32, %arg0 : i32, i32
  }
}

module attributes {stable_mosaic.version = 11 : i64} {
  func.func @_conv_bn_lrelu_kernel(%arg0: memref<32x4066xbf16, #tpu.memory_space<vmem>>, %arg1: memref<8x32xbf16, #tpu.memory_space<vmem>>, %arg2: memref<8x1xf32, #tpu.memory_space<vmem>>, %arg3: memref<8x1xf32, #tpu.memory_space<vmem>>, %arg4: memref<8x4066xbf16, #tpu.memory_space<vmem>>) attributes {dimension_semantics = [], scalar_prefetch = 0 : i64, scratch_operands = 0 : i64, tpu.core_type = #tpu.core_type<tc>} {
    %c0 = arith.constant 0 : index
    %c0_0 = arith.constant 0 : index
    %0 = vector.load %arg1[%c0, %c0_0] : memref<8x32xbf16, #tpu.memory_space<vmem>>, vector<8x32xbf16>
    %c0_1 = arith.constant 0 : index
    %c0_2 = arith.constant 0 : index
    %1 = vector.load %arg0[%c0_1, %c0_2] : memref<32x4066xbf16, #tpu.memory_space<vmem>>, vector<32x4066xbf16>
    %cst = arith.constant dense<0.000000e+00> : vector<8x4066xf32>
    %2 = tpu.matmul %0, %1, %cst {dimension_numbers = #tpu.dot_dimension_numbers<[1], [0], [0], [1], [0, 0, 1, 1], [], []>} : vector<8x32xbf16>, vector<32x4066xbf16>, vector<8x4066xf32> -> vector<8x4066xf32>
    %cst_3 = arith.constant dense<0.000000e+00> : vector<8xf32>
    %3 = vector.multi_reduction <add>, %2, %cst_3 [1] : vector<8x4066xf32> to vector<8xf32>
    %4 = vector.shape_cast %3 : vector<8xf32> to vector<8x1xf32>
    %cst_4 = arith.constant 4.066000e+03 : f32
    %5 = vector.broadcast %cst_4 : f32 to vector<8x1xf32>
    %6 = arith.divf %4, %5 : vector<8x1xf32>
    %7 = arith.mulf %2, %2 : vector<8x4066xf32>
    %cst_5 = arith.constant dense<0.000000e+00> : vector<8xf32>
    %8 = vector.multi_reduction <add>, %7, %cst_5 [1] : vector<8x4066xf32> to vector<8xf32>
    %9 = vector.shape_cast %8 : vector<8xf32> to vector<8x1xf32>
    %cst_6 = arith.constant 4.066000e+03 : f32
    %10 = vector.broadcast %cst_6 : f32 to vector<8x1xf32>
    %11 = arith.divf %9, %10 : vector<8x1xf32>
    %12 = arith.mulf %6, %6 : vector<8x1xf32>
    %13 = arith.subf %11, %12 : vector<8x1xf32>
    %cst_7 = arith.constant 0.000000e+00 : f32
    %14 = vector.broadcast %cst_7 : f32 to vector<8x1xf32>
    %15 = arith.maximumf %13, %14 : vector<8x1xf32>
    %c0_8 = arith.constant 0 : index
    %c0_9 = arith.constant 0 : index
    %16 = vector.load %arg2[%c0_8, %c0_9] : memref<8x1xf32, #tpu.memory_space<vmem>>, vector<8x1xf32>
    %cst_10 = arith.constant 9.99999974E-6 : f32
    %17 = vector.broadcast %cst_10 : f32 to vector<8x1xf32>
    %18 = arith.addf %15, %17 : vector<8x1xf32>
    %19 = math.rsqrt %18 : vector<8x1xf32>
    %20 = arith.mulf %16, %19 : vector<8x1xf32>
    %c0_11 = arith.constant 0 : index
    %c0_12 = arith.constant 0 : index
    %21 = vector.load %arg3[%c0_11, %c0_12] : memref<8x1xf32, #tpu.memory_space<vmem>>, vector<8x1xf32>
    %22 = arith.mulf %6, %20 : vector<8x1xf32>
    %23 = arith.subf %21, %22 : vector<8x1xf32>
    %24 = vector.broadcast %20 : vector<8x1xf32> to vector<8x4066xf32>
    %25 = arith.mulf %2, %24 : vector<8x4066xf32>
    %26 = vector.broadcast %23 : vector<8x1xf32> to vector<8x4066xf32>
    %27 = arith.addf %25, %26 : vector<8x4066xf32>
    %cst_13 = arith.constant 0.000000e+00 : f32
    %28 = vector.broadcast %cst_13 : f32 to vector<8x4066xf32>
    %29 = arith.cmpf oge, %27, %28 : vector<8x4066xf32>
    %cst_14 = arith.constant 2.000000e-01 : f32
    %30 = vector.broadcast %cst_14 : f32 to vector<8x4066xf32>
    %31 = arith.mulf %30, %27 : vector<8x4066xf32>
    %32 = arith.select %29, %27, %31 : vector<8x4066xi1>, vector<8x4066xf32>
    %33 = arith.truncf %32 : vector<8x4066xf32> to vector<8x4066xbf16>
    %c0_15 = arith.constant 0 : index
    %c0_16 = arith.constant 0 : index
    %34 = vector.load %arg4[%c0_15, %c0_16] : memref<8x4066xbf16, #tpu.memory_space<vmem>>, vector<8x4066xbf16>
    tpu.vector_store %arg4[%c0_15, %c0_16], %33 {strides = array<i32>} : memref<8x4066xbf16, #tpu.memory_space<vmem>>, vector<8x4066xbf16>,
    return
  }
}

module attributes {stable_mosaic.version = 11 : i64} {
  func.func @_conv_bn_lrelu_kernel(%arg0: memref<40x1354xbf16, #tpu.memory_space<vmem>>, %arg1: memref<16x40xbf16, #tpu.memory_space<vmem>>, %arg2: memref<16x1xf32, #tpu.memory_space<vmem>>, %arg3: memref<16x1xf32, #tpu.memory_space<vmem>>, %arg4: memref<16x1354xbf16, #tpu.memory_space<vmem>>) attributes {dimension_semantics = [], scalar_prefetch = 0 : i64, scratch_operands = 0 : i64, tpu.core_type = #tpu.core_type<tc>} {
    %c0 = arith.constant 0 : index
    %c0_0 = arith.constant 0 : index
    %0 = vector.load %arg1[%c0, %c0_0] : memref<16x40xbf16, #tpu.memory_space<vmem>>, vector<16x40xbf16>
    %c0_1 = arith.constant 0 : index
    %c0_2 = arith.constant 0 : index
    %1 = vector.load %arg0[%c0_1, %c0_2] : memref<40x1354xbf16, #tpu.memory_space<vmem>>, vector<40x1354xbf16>
    %cst = arith.constant dense<0.000000e+00> : vector<16x1354xf32>
    %2 = tpu.matmul %0, %1, %cst {dimension_numbers = #tpu.dot_dimension_numbers<[1], [0], [0], [1], [0, 0, 1, 1], [], []>} : vector<16x40xbf16>, vector<40x1354xbf16>, vector<16x1354xf32> -> vector<16x1354xf32>
    %cst_3 = arith.constant dense<0.000000e+00> : vector<16xf32>
    %3 = vector.multi_reduction <add>, %2, %cst_3 [1] : vector<16x1354xf32> to vector<16xf32>
    %4 = vector.shape_cast %3 : vector<16xf32> to vector<16x1xf32>
    %cst_4 = arith.constant 1.354000e+03 : f32
    %5 = vector.broadcast %cst_4 : f32 to vector<16x1xf32>
    %6 = arith.divf %4, %5 : vector<16x1xf32>
    %7 = arith.mulf %2, %2 : vector<16x1354xf32>
    %cst_5 = arith.constant dense<0.000000e+00> : vector<16xf32>
    %8 = vector.multi_reduction <add>, %7, %cst_5 [1] : vector<16x1354xf32> to vector<16xf32>
    %9 = vector.shape_cast %8 : vector<16xf32> to vector<16x1xf32>
    %cst_6 = arith.constant 1.354000e+03 : f32
    %10 = vector.broadcast %cst_6 : f32 to vector<16x1xf32>
    %11 = arith.divf %9, %10 : vector<16x1xf32>
    %12 = arith.mulf %6, %6 : vector<16x1xf32>
    %13 = arith.subf %11, %12 : vector<16x1xf32>
    %cst_7 = arith.constant 0.000000e+00 : f32
    %14 = vector.broadcast %cst_7 : f32 to vector<16x1xf32>
    %15 = arith.maximumf %13, %14 : vector<16x1xf32>
    %c0_8 = arith.constant 0 : index
    %c0_9 = arith.constant 0 : index
    %16 = vector.load %arg2[%c0_8, %c0_9] : memref<16x1xf32, #tpu.memory_space<vmem>>, vector<16x1xf32>
    %cst_10 = arith.constant 9.99999974E-6 : f32
    %17 = vector.broadcast %cst_10 : f32 to vector<16x1xf32>
    %18 = arith.addf %15, %17 : vector<16x1xf32>
    %19 = math.rsqrt %18 : vector<16x1xf32>
    %20 = arith.mulf %16, %19 : vector<16x1xf32>
    %c0_11 = arith.constant 0 : index
    %c0_12 = arith.constant 0 : index
    %21 = vector.load %arg3[%c0_11, %c0_12] : memref<16x1xf32, #tpu.memory_space<vmem>>, vector<16x1xf32>
    %22 = arith.mulf %6, %20 : vector<16x1xf32>
    %23 = arith.subf %21, %22 : vector<16x1xf32>
    %24 = vector.broadcast %20 : vector<16x1xf32> to vector<16x1354xf32>
    %25 = arith.mulf %2, %24 : vector<16x1354xf32>
    %26 = vector.broadcast %23 : vector<16x1xf32> to vector<16x1354xf32>
    %27 = arith.addf %25, %26 : vector<16x1354xf32>
    %cst_13 = arith.constant 0.000000e+00 : f32
    %28 = vector.broadcast %cst_13 : f32 to vector<16x1354xf32>
    %29 = arith.cmpf oge, %27, %28 : vector<16x1354xf32>
    %cst_14 = arith.constant 2.000000e-01 : f32
    %30 = vector.broadcast %cst_14 : f32 to vector<16x1354xf32>
    %31 = arith.mulf %30, %27 : vector<16x1354xf32>
    %32 = arith.select %29, %27, %31 : vector<16x1354xi1>, vector<16x1354xf32>
    %33 = arith.truncf %32 : vector<16x1354xf32> to vector<16x1354xbf16>
    %c0_15 = arith.constant 0 : index
    %c0_16 = arith.constant 0 : index
    %34 = vector.load %arg4[%c0_15, %c0_16] : memref<16x1354xbf16, #tpu.memory_space<vmem>>, vector<16x1354xbf16>
    tpu.vector_store %arg4[%c0_15, %c0_16], %33 {strides = array<i32>} : memref<16x1354xbf16, #tpu.memory_space<vmem>>, vector<16x1354xbf16>,
    return
  }
}

module attributes {stable_mosaic.version = 11 : i64} {
  func.func @_conv_bn_lrelu_kernel(%arg0: memref<80x674xbf16, #tpu.memory_space<vmem>>, %arg1: memref<16x80xbf16, #tpu.memory_space<vmem>>, %arg2: memref<16x1xf32, #tpu.memory_space<vmem>>, %arg3: memref<16x1xf32, #tpu.memory_space<vmem>>, %arg4: memref<16x674xbf16, #tpu.memory_space<vmem>>) attributes {dimension_semantics = [], scalar_prefetch = 0 : i64, scratch_operands = 0 : i64, tpu.core_type = #tpu.core_type<tc>} {
    %c0 = arith.constant 0 : index
    %c0_0 = arith.constant 0 : index
    %0 = vector.load %arg1[%c0, %c0_0] : memref<16x80xbf16, #tpu.memory_space<vmem>>, vector<16x80xbf16>
    %c0_1 = arith.constant 0 : index
    %c0_2 = arith.constant 0 : index
    %1 = vector.load %arg0[%c0_1, %c0_2] : memref<80x674xbf16, #tpu.memory_space<vmem>>, vector<80x674xbf16>
    %cst = arith.constant dense<0.000000e+00> : vector<16x674xf32>
    %2 = tpu.matmul %0, %1, %cst {dimension_numbers = #tpu.dot_dimension_numbers<[1], [0], [0], [1], [0, 0, 1, 1], [], []>} : vector<16x80xbf16>, vector<80x674xbf16>, vector<16x674xf32> -> vector<16x674xf32>
    %cst_3 = arith.constant dense<0.000000e+00> : vector<16xf32>
    %3 = vector.multi_reduction <add>, %2, %cst_3 [1] : vector<16x674xf32> to vector<16xf32>
    %4 = vector.shape_cast %3 : vector<16xf32> to vector<16x1xf32>
    %cst_4 = arith.constant 6.740000e+02 : f32
    %5 = vector.broadcast %cst_4 : f32 to vector<16x1xf32>
    %6 = arith.divf %4, %5 : vector<16x1xf32>
    %7 = arith.mulf %2, %2 : vector<16x674xf32>
    %cst_5 = arith.constant dense<0.000000e+00> : vector<16xf32>
    %8 = vector.multi_reduction <add>, %7, %cst_5 [1] : vector<16x674xf32> to vector<16xf32>
    %9 = vector.shape_cast %8 : vector<16xf32> to vector<16x1xf32>
    %cst_6 = arith.constant 6.740000e+02 : f32
    %10 = vector.broadcast %cst_6 : f32 to vector<16x1xf32>
    %11 = arith.divf %9, %10 : vector<16x1xf32>
    %12 = arith.mulf %6, %6 : vector<16x1xf32>
    %13 = arith.subf %11, %12 : vector<16x1xf32>
    %cst_7 = arith.constant 0.000000e+00 : f32
    %14 = vector.broadcast %cst_7 : f32 to vector<16x1xf32>
    %15 = arith.maximumf %13, %14 : vector<16x1xf32>
    %c0_8 = arith.constant 0 : index
    %c0_9 = arith.constant 0 : index
    %16 = vector.load %arg2[%c0_8, %c0_9] : memref<16x1xf32, #tpu.memory_space<vmem>>, vector<16x1xf32>
    %cst_10 = arith.constant 9.99999974E-6 : f32
    %17 = vector.broadcast %cst_10 : f32 to vector<16x1xf32>
    %18 = arith.addf %15, %17 : vector<16x1xf32>
    %19 = math.rsqrt %18 : vector<16x1xf32>
    %20 = arith.mulf %16, %19 : vector<16x1xf32>
    %c0_11 = arith.constant 0 : index
    %c0_12 = arith.constant 0 : index
    %21 = vector.load %arg3[%c0_11, %c0_12] : memref<16x1xf32, #tpu.memory_space<vmem>>, vector<16x1xf32>
    %22 = arith.mulf %6, %20 : vector<16x1xf32>
    %23 = arith.subf %21, %22 : vector<16x1xf32>
    %24 = vector.broadcast %20 : vector<16x1xf32> to vector<16x674xf32>
    %25 = arith.mulf %2, %24 : vector<16x674xf32>
    %26 = vector.broadcast %23 : vector<16x1xf32> to vector<16x674xf32>
    %27 = arith.addf %25, %26 : vector<16x674xf32>
    %cst_13 = arith.constant 0.000000e+00 : f32
    %28 = vector.broadcast %cst_13 : f32 to vector<16x674xf32>
    %29 = arith.cmpf oge, %27, %28 : vector<16x674xf32>
    %cst_14 = arith.constant 2.000000e-01 : f32
    %30 = vector.broadcast %cst_14 : f32 to vector<16x674xf32>
    %31 = arith.mulf %30, %27 : vector<16x674xf32>
    %32 = arith.select %29, %27, %31 : vector<16x674xi1>, vector<16x674xf32>
    %33 = arith.truncf %32 : vector<16x674xf32> to vector<16x674xbf16>
    %c0_15 = arith.constant 0 : index
    %c0_16 = arith.constant 0 : index
    %34 = vector.load %arg4[%c0_15, %c0_16] : memref<16x674xbf16, #tpu.memory_space<vmem>>, vector<16x674xbf16>
    tpu.vector_store %arg4[%c0_15, %c0_16], %33 {strides = array<i32>} : memref<16x674xbf16, #tpu.memory_space<vmem>>, vector<16x674xbf16>,
    return
  }
}

module attributes {stable_mosaic.version = 11 : i64} {
  func.func @_conv_bn_lrelu_kernel(%arg0: memref<80x334xbf16, #tpu.memory_space<vmem>>, %arg1: memref<32x80xbf16, #tpu.memory_space<vmem>>, %arg2: memref<32x1xf32, #tpu.memory_space<vmem>>, %arg3: memref<32x1xf32, #tpu.memory_space<vmem>>, %arg4: memref<32x334xbf16, #tpu.memory_space<vmem>>) attributes {dimension_semantics = [], scalar_prefetch = 0 : i64, scratch_operands = 0 : i64, tpu.core_type = #tpu.core_type<tc>} {
    %c0 = arith.constant 0 : index
    %c0_0 = arith.constant 0 : index
    %0 = vector.load %arg1[%c0, %c0_0] : memref<32x80xbf16, #tpu.memory_space<vmem>>, vector<32x80xbf16>
    %c0_1 = arith.constant 0 : index
    %c0_2 = arith.constant 0 : index
    %1 = vector.load %arg0[%c0_1, %c0_2] : memref<80x334xbf16, #tpu.memory_space<vmem>>, vector<80x334xbf16>
    %cst = arith.constant dense<0.000000e+00> : vector<32x334xf32>
    %2 = tpu.matmul %0, %1, %cst {dimension_numbers = #tpu.dot_dimension_numbers<[1], [0], [0], [1], [0, 0, 1, 1], [], []>} : vector<32x80xbf16>, vector<80x334xbf16>, vector<32x334xf32> -> vector<32x334xf32>
    %cst_3 = arith.constant dense<0.000000e+00> : vector<32xf32>
    %3 = vector.multi_reduction <add>, %2, %cst_3 [1] : vector<32x334xf32> to vector<32xf32>
    %4 = vector.shape_cast %3 : vector<32xf32> to vector<32x1xf32>
    %cst_4 = arith.constant 3.340000e+02 : f32
    %5 = vector.broadcast %cst_4 : f32 to vector<32x1xf32>
    %6 = arith.divf %4, %5 : vector<32x1xf32>
    %7 = arith.mulf %2, %2 : vector<32x334xf32>
    %cst_5 = arith.constant dense<0.000000e+00> : vector<32xf32>
    %8 = vector.multi_reduction <add>, %7, %cst_5 [1] : vector<32x334xf32> to vector<32xf32>
    %9 = vector.shape_cast %8 : vector<32xf32> to vector<32x1xf32>
    %cst_6 = arith.constant 3.340000e+02 : f32
    %10 = vector.broadcast %cst_6 : f32 to vector<32x1xf32>
    %11 = arith.divf %9, %10 : vector<32x1xf32>
    %12 = arith.mulf %6, %6 : vector<32x1xf32>
    %13 = arith.subf %11, %12 : vector<32x1xf32>
    %cst_7 = arith.constant 0.000000e+00 : f32
    %14 = vector.broadcast %cst_7 : f32 to vector<32x1xf32>
    %15 = arith.maximumf %13, %14 : vector<32x1xf32>
    %c0_8 = arith.constant 0 : index
    %c0_9 = arith.constant 0 : index
    %16 = vector.load %arg2[%c0_8, %c0_9] : memref<32x1xf32, #tpu.memory_space<vmem>>, vector<32x1xf32>
    %cst_10 = arith.constant 9.99999974E-6 : f32
    %17 = vector.broadcast %cst_10 : f32 to vector<32x1xf32>
    %18 = arith.addf %15, %17 : vector<32x1xf32>
    %19 = math.rsqrt %18 : vector<32x1xf32>
    %20 = arith.mulf %16, %19 : vector<32x1xf32>
    %c0_11 = arith.constant 0 : index
    %c0_12 = arith.constant 0 : index
    %21 = vector.load %arg3[%c0_11, %c0_12] : memref<32x1xf32, #tpu.memory_space<vmem>>, vector<32x1xf32>
    %22 = arith.mulf %6, %20 : vector<32x1xf32>
    %23 = arith.subf %21, %22 : vector<32x1xf32>
    %24 = vector.broadcast %20 : vector<32x1xf32> to vector<32x334xf32>
    %25 = arith.mulf %2, %24 : vector<32x334xf32>
    %26 = vector.broadcast %23 : vector<32x1xf32> to vector<32x334xf32>
    %27 = arith.addf %25, %26 : vector<32x334xf32>
    %cst_13 = arith.constant 0.000000e+00 : f32
    %28 = vector.broadcast %cst_13 : f32 to vector<32x334xf32>
    %29 = arith.cmpf oge, %27, %28 : vector<32x334xf32>
    %cst_14 = arith.constant 2.000000e-01 : f32
    %30 = vector.broadcast %cst_14 : f32 to vector<32x334xf32>
    %31 = arith.mulf %30, %27 : vector<32x334xf32>
    %32 = arith.select %29, %27, %31 : vector<32x334xi1>, vector<32x334xf32>
    %33 = arith.truncf %32 : vector<32x334xf32> to vector<32x334xbf16>
    %c0_15 = arith.constant 0 : index
    %c0_16 = arith.constant 0 : index
    %34 = vector.load %arg4[%c0_15, %c0_16] : memref<32x334xbf16, #tpu.memory_space<vmem>>, vector<32x334xbf16>
    tpu.vector_store %arg4[%c0_15, %c0_16], %33 {strides = array<i32>} : memref<32x334xbf16, #tpu.memory_space<vmem>>, vector<32x334xbf16>,
    return
  }
}

module attributes {stable_mosaic.version = 11 : i64} {
  func.func @_conv_bn_lrelu_kernel(%arg0: memref<96x166xbf16, #tpu.memory_space<vmem>>, %arg1: memref<64x96xbf16, #tpu.memory_space<vmem>>, %arg2: memref<64x1xf32, #tpu.memory_space<vmem>>, %arg3: memref<64x1xf32, #tpu.memory_space<vmem>>, %arg4: memref<64x166xbf16, #tpu.memory_space<vmem>>) attributes {dimension_semantics = [], scalar_prefetch = 0 : i64, scratch_operands = 0 : i64, tpu.core_type = #tpu.core_type<tc>} {
    %c0 = arith.constant 0 : index
    %c0_0 = arith.constant 0 : index
    %0 = vector.load %arg1[%c0, %c0_0] : memref<64x96xbf16, #tpu.memory_space<vmem>>, vector<64x96xbf16>
    %c0_1 = arith.constant 0 : index
    %c0_2 = arith.constant 0 : index
    %1 = vector.load %arg0[%c0_1, %c0_2] : memref<96x166xbf16, #tpu.memory_space<vmem>>, vector<96x166xbf16>
    %cst = arith.constant dense<0.000000e+00> : vector<64x166xf32>
    %2 = tpu.matmul %0, %1, %cst {dimension_numbers = #tpu.dot_dimension_numbers<[1], [0], [0], [1], [0, 0, 1, 1], [], []>} : vector<64x96xbf16>, vector<96x166xbf16>, vector<64x166xf32> -> vector<64x166xf32>
    %cst_3 = arith.constant dense<0.000000e+00> : vector<64xf32>
    %3 = vector.multi_reduction <add>, %2, %cst_3 [1] : vector<64x166xf32> to vector<64xf32>
    %4 = vector.shape_cast %3 : vector<64xf32> to vector<64x1xf32>
    %cst_4 = arith.constant 1.660000e+02 : f32
    %5 = vector.broadcast %cst_4 : f32 to vector<64x1xf32>
    %6 = arith.divf %4, %5 : vector<64x1xf32>
    %7 = arith.mulf %2, %2 : vector<64x166xf32>
    %cst_5 = arith.constant dense<0.000000e+00> : vector<64xf32>
    %8 = vector.multi_reduction <add>, %7, %cst_5 [1] : vector<64x166xf32> to vector<64xf32>
    %9 = vector.shape_cast %8 : vector<64xf32> to vector<64x1xf32>
    %cst_6 = arith.constant 1.660000e+02 : f32
    %10 = vector.broadcast %cst_6 : f32 to vector<64x1xf32>
    %11 = arith.divf %9, %10 : vector<64x1xf32>
    %12 = arith.mulf %6, %6 : vector<64x1xf32>
    %13 = arith.subf %11, %12 : vector<64x1xf32>
    %cst_7 = arith.constant 0.000000e+00 : f32
    %14 = vector.broadcast %cst_7 : f32 to vector<64x1xf32>
    %15 = arith.maximumf %13, %14 : vector<64x1xf32>
    %c0_8 = arith.constant 0 : index
    %c0_9 = arith.constant 0 : index
    %16 = vector.load %arg2[%c0_8, %c0_9] : memref<64x1xf32, #tpu.memory_space<vmem>>, vector<64x1xf32>
    %cst_10 = arith.constant 9.99999974E-6 : f32
    %17 = vector.broadcast %cst_10 : f32 to vector<64x1xf32>
    %18 = arith.addf %15, %17 : vector<64x1xf32>
    %19 = math.rsqrt %18 : vector<64x1xf32>
    %20 = arith.mulf %16, %19 : vector<64x1xf32>
    %c0_11 = arith.constant 0 : index
    %c0_12 = arith.constant 0 : index
    %21 = vector.load %arg3[%c0_11, %c0_12] : memref<64x1xf32, #tpu.memory_space<vmem>>, vector<64x1xf32>
    %22 = arith.mulf %6, %20 : vector<64x1xf32>
    %23 = arith.subf %21, %22 : vector<64x1xf32>
    %24 = vector.broadcast %20 : vector<64x1xf32> to vector<64x166xf32>
    %25 = arith.mulf %2, %24 : vector<64x166xf32>
    %26 = vector.broadcast %23 : vector<64x1xf32> to vector<64x166xf32>
    %27 = arith.addf %25, %26 : vector<64x166xf32>
    %cst_13 = arith.constant 0.000000e+00 : f32
    %28 = vector.broadcast %cst_13 : f32 to vector<64x166xf32>
    %29 = arith.cmpf oge, %27, %28 : vector<64x166xf32>
    %cst_14 = arith.constant 2.000000e-01 : f32
    %30 = vector.broadcast %cst_14 : f32 to vector<64x166xf32>
    %31 = arith.mulf %30, %27 : vector<64x166xf32>
    %32 = arith.select %29, %27, %31 : vector<64x166xi1>, vector<64x166xf32>
    %33 = arith.truncf %32 : vector<64x166xf32> to vector<64x166xbf16>
    %c0_15 = arith.constant 0 : index
    %c0_16 = arith.constant 0 : index
    %34 = vector.load %arg4[%c0_15, %c0_16] : memref<64x166xbf16, #tpu.memory_space<vmem>>, vector<64x166xbf16>
    tpu.vector_store %arg4[%c0_15, %c0_16], %33 {strides = array<i32>} : memref<64x166xbf16, #tpu.memory_space<vmem>>, vector<64x166xbf16>,
    return
  }
}

module attributes {stable_mosaic.version = 11 : i64} {
  func.func @_conv_bn_lrelu_kernel(%arg0: memref<192x82xbf16, #tpu.memory_space<vmem>>, %arg1: memref<64x192xbf16, #tpu.memory_space<vmem>>, %arg2: memref<64x1xf32, #tpu.memory_space<vmem>>, %arg3: memref<64x1xf32, #tpu.memory_space<vmem>>, %arg4: memref<64x82xbf16, #tpu.memory_space<vmem>>) attributes {dimension_semantics = [], scalar_prefetch = 0 : i64, scratch_operands = 0 : i64, tpu.core_type = #tpu.core_type<tc>} {
    %c0 = arith.constant 0 : index
    %c0_0 = arith.constant 0 : index
    %0 = vector.load %arg1[%c0, %c0_0] : memref<64x192xbf16, #tpu.memory_space<vmem>>, vector<64x192xbf16>
    %c0_1 = arith.constant 0 : index
    %c0_2 = arith.constant 0 : index
    %1 = vector.load %arg0[%c0_1, %c0_2] : memref<192x82xbf16, #tpu.memory_space<vmem>>, vector<192x82xbf16>
    %cst = arith.constant dense<0.000000e+00> : vector<64x82xf32>
    %2 = tpu.matmul %0, %1, %cst {dimension_numbers = #tpu.dot_dimension_numbers<[1], [0], [0], [1], [0, 0, 1, 1], [], []>} : vector<64x192xbf16>, vector<192x82xbf16>, vector<64x82xf32> -> vector<64x82xf32>
    %cst_3 = arith.constant dense<0.000000e+00> : vector<64xf32>
    %3 = vector.multi_reduction <add>, %2, %cst_3 [1] : vector<64x82xf32> to vector<64xf32>
    %4 = vector.shape_cast %3 : vector<64xf32> to vector<64x1xf32>
    %cst_4 = arith.constant 8.200000e+01 : f32
    %5 = vector.broadcast %cst_4 : f32 to vector<64x1xf32>
    %6 = arith.divf %4, %5 : vector<64x1xf32>
    %7 = arith.mulf %2, %2 : vector<64x82xf32>
    %cst_5 = arith.constant dense<0.000000e+00> : vector<64xf32>
    %8 = vector.multi_reduction <add>, %7, %cst_5 [1] : vector<64x82xf32> to vector<64xf32>
    %9 = vector.shape_cast %8 : vector<64xf32> to vector<64x1xf32>
    %cst_6 = arith.constant 8.200000e+01 : f32
    %10 = vector.broadcast %cst_6 : f32 to vector<64x1xf32>
    %11 = arith.divf %9, %10 : vector<64x1xf32>
    %12 = arith.mulf %6, %6 : vector<64x1xf32>
    %13 = arith.subf %11, %12 : vector<64x1xf32>
    %cst_7 = arith.constant 0.000000e+00 : f32
    %14 = vector.broadcast %cst_7 : f32 to vector<64x1xf32>
    %15 = arith.maximumf %13, %14 : vector<64x1xf32>
    %c0_8 = arith.constant 0 : index
    %c0_9 = arith.constant 0 : index
    %16 = vector.load %arg2[%c0_8, %c0_9] : memref<64x1xf32, #tpu.memory_space<vmem>>, vector<64x1xf32>
    %cst_10 = arith.constant 9.99999974E-6 : f32
    %17 = vector.broadcast %cst_10 : f32 to vector<64x1xf32>
    %18 = arith.addf %15, %17 : vector<64x1xf32>
    %19 = math.rsqrt %18 : vector<64x1xf32>
    %20 = arith.mulf %16, %19 : vector<64x1xf32>
    %c0_11 = arith.constant 0 : index
    %c0_12 = arith.constant 0 : index
    %21 = vector.load %arg3[%c0_11, %c0_12] : memref<64x1xf32, #tpu.memory_space<vmem>>, vector<64x1xf32>
    %22 = arith.mulf %6, %20 : vector<64x1xf32>
    %23 = arith.subf %21, %22 : vector<64x1xf32>
    %24 = vector.broadcast %20 : vector<64x1xf32> to vector<64x82xf32>
    %25 = arith.mulf %2, %24 : vector<64x82xf32>
    %26 = vector.broadcast %23 : vector<64x1xf32> to vector<64x82xf32>
    %27 = arith.addf %25, %26 : vector<64x82xf32>
    %cst_13 = arith.constant 0.000000e+00 : f32
    %28 = vector.broadcast %cst_13 : f32 to vector<64x82xf32>
    %29 = arith.cmpf oge, %27, %28 : vector<64x82xf32>
    %cst_14 = arith.constant 2.000000e-01 : f32
    %30 = vector.broadcast %cst_14 : f32 to vector<64x82xf32>
    %31 = arith.mulf %30, %27 : vector<64x82xf32>
    %32 = arith.select %29, %27, %31 : vector<64x82xi1>, vector<64x82xf32>
    %33 = arith.truncf %32 : vector<64x82xf32> to vector<64x82xbf16>
    %c0_15 = arith.constant 0 : index
    %c0_16 = arith.constant 0 : index
    %34 = vector.load %arg4[%c0_15, %c0_16] : memref<64x82xbf16, #tpu.memory_space<vmem>>, vector<64x82xbf16>
    tpu.vector_store %arg4[%c0_15, %c0_16], %33 {strides = array<i32>} : memref<64x82xbf16, #tpu.memory_space<vmem>>, vector<64x82xbf16>,
    return
  }
}

module attributes {stable_mosaic.version = 11 : i64} {
  func.func @_conv_bn_lrelu_kernel(%arg0: memref<192x40xbf16, #tpu.memory_space<vmem>>, %arg1: memref<64x192xbf16, #tpu.memory_space<vmem>>, %arg2: memref<64x1xf32, #tpu.memory_space<vmem>>, %arg3: memref<64x1xf32, #tpu.memory_space<vmem>>, %arg4: memref<64x40xbf16, #tpu.memory_space<vmem>>) attributes {dimension_semantics = [], scalar_prefetch = 0 : i64, scratch_operands = 0 : i64, tpu.core_type = #tpu.core_type<tc>} {
    %c0 = arith.constant 0 : index
    %c0_0 = arith.constant 0 : index
    %0 = vector.load %arg1[%c0, %c0_0] : memref<64x192xbf16, #tpu.memory_space<vmem>>, vector<64x192xbf16>
    %c0_1 = arith.constant 0 : index
    %c0_2 = arith.constant 0 : index
    %1 = vector.load %arg0[%c0_1, %c0_2] : memref<192x40xbf16, #tpu.memory_space<vmem>>, vector<192x40xbf16>
    %cst = arith.constant dense<0.000000e+00> : vector<64x40xf32>
    %2 = tpu.matmul %0, %1, %cst {dimension_numbers = #tpu.dot_dimension_numbers<[1], [0], [0], [1], [0, 0, 1, 1], [], []>} : vector<64x192xbf16>, vector<192x40xbf16>, vector<64x40xf32> -> vector<64x40xf32>
    %cst_3 = arith.constant dense<0.000000e+00> : vector<64xf32>
    %3 = vector.multi_reduction <add>, %2, %cst_3 [1] : vector<64x40xf32> to vector<64xf32>
    %4 = vector.shape_cast %3 : vector<64xf32> to vector<64x1xf32>
    %cst_4 = arith.constant 4.000000e+01 : f32
    %5 = vector.broadcast %cst_4 : f32 to vector<64x1xf32>
    %6 = arith.divf %4, %5 : vector<64x1xf32>
    %7 = arith.mulf %2, %2 : vector<64x40xf32>
    %cst_5 = arith.constant dense<0.000000e+00> : vector<64xf32>
    %8 = vector.multi_reduction <add>, %7, %cst_5 [1] : vector<64x40xf32> to vector<64xf32>
    %9 = vector.shape_cast %8 : vector<64xf32> to vector<64x1xf32>
    %cst_6 = arith.constant 4.000000e+01 : f32
    %10 = vector.broadcast %cst_6 : f32 to vector<64x1xf32>
    %11 = arith.divf %9, %10 : vector<64x1xf32>
    %12 = arith.mulf %6, %6 : vector<64x1xf32>
    %13 = arith.subf %11, %12 : vector<64x1xf32>
    %cst_7 = arith.constant 0.000000e+00 : f32
    %14 = vector.broadcast %cst_7 : f32 to vector<64x1xf32>
    %15 = arith.maximumf %13, %14 : vector<64x1xf32>
    %c0_8 = arith.constant 0 : index
    %c0_9 = arith.constant 0 : index
    %16 = vector.load %arg2[%c0_8, %c0_9] : memref<64x1xf32, #tpu.memory_space<vmem>>, vector<64x1xf32>
    %cst_10 = arith.constant 9.99999974E-6 : f32
    %17 = vector.broadcast %cst_10 : f32 to vector<64x1xf32>
    %18 = arith.addf %15, %17 : vector<64x1xf32>
    %19 = math.rsqrt %18 : vector<64x1xf32>
    %20 = arith.mulf %16, %19 : vector<64x1xf32>
    %c0_11 = arith.constant 0 : index
    %c0_12 = arith.constant 0 : index
    %21 = vector.load %arg3[%c0_11, %c0_12] : memref<64x1xf32, #tpu.memory_space<vmem>>, vector<64x1xf32>
    %22 = arith.mulf %6, %20 : vector<64x1xf32>
    %23 = arith.subf %21, %22 : vector<64x1xf32>
    %24 = vector.broadcast %20 : vector<64x1xf32> to vector<64x40xf32>
    %25 = arith.mulf %2, %24 : vector<64x40xf32>
    %26 = vector.broadcast %23 : vector<64x1xf32> to vector<64x40xf32>
    %27 = arith.addf %25, %26 : vector<64x40xf32>
    %cst_13 = arith.constant 0.000000e+00 : f32
    %28 = vector.broadcast %cst_13 : f32 to vector<64x40xf32>
    %29 = arith.cmpf oge, %27, %28 : vector<64x40xf32>
    %cst_14 = arith.constant 2.000000e-01 : f32
    %30 = vector.broadcast %cst_14 : f32 to vector<64x40xf32>
    %31 = arith.mulf %30, %27 : vector<64x40xf32>
    %32 = arith.select %29, %27, %31 : vector<64x40xi1>, vector<64x40xf32>
    %33 = arith.truncf %32 : vector<64x40xf32> to vector<64x40xbf16>
    %c0_15 = arith.constant 0 : index
    %c0_16 = arith.constant 0 : index
    %34 = vector.load %arg4[%c0_15, %c0_16] : memref<64x40xbf16, #tpu.memory_space<vmem>>, vector<64x40xbf16>
    tpu.vector_store %arg4[%c0_15, %c0_16], %33 {strides = array<i32>} : memref<64x40xbf16, #tpu.memory_space<vmem>>, vector<64x40xbf16>,
    return
  }
}

module attributes {stable_mosaic.version = 11 : i64} {
  func.func @_head_kernel(%arg0: memref<2x1280xbf16, #tpu.memory_space<vmem>>, %arg1: memref<1280x64xbf16, #tpu.memory_space<vmem>>, %arg2: memref<1x64xf32, #tpu.memory_space<vmem>>, %arg3: memref<1x64xf32, #tpu.memory_space<vmem>>, %arg4: memref<1x1xf32, #tpu.memory_space<vmem>>, %arg5: memref<2x1xf32, #tpu.memory_space<vmem>>) attributes {dimension_semantics = [], scalar_prefetch = 0 : i64, scratch_operands = 0 : i64, tpu.core_type = #tpu.core_type<tc>} {
    %c0 = arith.constant 0 : index
    %c0_0 = arith.constant 0 : index
    %0 = vector.load %arg0[%c0, %c0_0] : memref<2x1280xbf16, #tpu.memory_space<vmem>>, vector<2x1280xbf16>
    %c0_1 = arith.constant 0 : index
    %c0_2 = arith.constant 0 : index
    %1 = vector.load %arg1[%c0_1, %c0_2] : memref<1280x64xbf16, #tpu.memory_space<vmem>>, vector<1280x64xbf16>
    %cst = arith.constant dense<0.000000e+00> : vector<2x64xf32>
    %2 = tpu.matmul %0, %1, %cst {dimension_numbers = #tpu.dot_dimension_numbers<[1], [0], [0], [1], [0, 0, 1, 1], [], []>} : vector<2x1280xbf16>, vector<1280x64xbf16>, vector<2x64xf32> -> vector<2x64xf32>
    %c0_3 = arith.constant 0 : index
    %c0_4 = arith.constant 0 : index
    %3 = vector.load %arg2[%c0_3, %c0_4] : memref<1x64xf32, #tpu.memory_space<vmem>>, vector<1x64xf32>
    %4 = vector.broadcast %3 : vector<1x64xf32> to vector<2x64xf32>
    %5 = arith.addf %2, %4 : vector<2x64xf32>
    %cst_5 = arith.constant 0.000000e+00 : f32
    %6 = vector.broadcast %cst_5 : f32 to vector<2x64xf32>
    %7 = arith.cmpf oge, %5, %6 : vector<2x64xf32>
    %cst_6 = arith.constant 2.000000e-01 : f32
    %8 = vector.broadcast %cst_6 : f32 to vector<2x64xf32>
    %9 = arith.mulf %8, %5 : vector<2x64xf32>
    %10 = arith.select %7, %5, %9 : vector<2x64xi1>, vector<2x64xf32>
    %c0_7 = arith.constant 0 : index
    %c0_8 = arith.constant 0 : index
    %11 = vector.load %arg3[%c0_7, %c0_8] : memref<1x64xf32, #tpu.memory_space<vmem>>, vector<1x64xf32>
    %12 = vector.broadcast %11 : vector<1x64xf32> to vector<2x64xf32>
    %13 = arith.mulf %10, %12 : vector<2x64xf32>
    %cst_9 = arith.constant dense<0.000000e+00> : vector<2xf32>
    %14 = vector.multi_reduction <add>, %13, %cst_9 [1] : vector<2x64xf32> to vector<2xf32>
    %15 = vector.shape_cast %14 : vector<2xf32> to vector<2x1xf32>
    %c0_10 = arith.constant 0 : index
    %c0_11 = arith.constant 0 : index
    %16 = vector.load %arg4[%c0_10, %c0_11] : memref<1x1xf32, #tpu.memory_space<vmem>>, vector<1x1xf32>
    %17 = vector.broadcast %16 : vector<1x1xf32> to vector<2x1xf32>
    %18 = arith.addf %15, %17 : vector<2x1xf32>
    %19 = math.absf %18 : vector<2x1xf32>
    %cst_12 = arith.constant 0.000000e+00 : f32
    %20 = vector.broadcast %cst_12 : f32 to vector<2x1xf32>
    %21 = arith.subf %20, %19 : vector<2x1xf32>
    %22 = math.exp %21 : vector<2x1xf32>
    %cst_13 = arith.constant 0.000000e+00 : f32
    %23 = vector.broadcast %cst_13 : f32 to vector<2x1xf32>
    %24 = arith.cmpf oge, %18, %23 : vector<2x1xf32>
    %cst_14 = arith.constant 1.000000e+00 : f32
    %25 = vector.broadcast %cst_14 : f32 to vector<2x1xf32>
    %26 = arith.addf %25, %22 : vector<2x1xf32>
    %cst_15 = arith.constant 1.000000e+00 : f32
    %27 = vector.broadcast %cst_15 : f32 to vector<2x1xf32>
    %28 = arith.divf %27, %26 : vector<2x1xf32>
    %cst_16 = arith.constant 1.000000e+00 : f32
    %29 = vector.broadcast %cst_16 : f32 to vector<2x1xf32>
    %30 = arith.addf %29, %22 : vector<2x1xf32>
    %31 = arith.divf %22, %30 : vector<2x1xf32>
    %32 = arith.select %24, %28, %31 : vector<2x1xi1>, vector<2x1xf32>
    %c0_17 = arith.constant 0 : index
    %c0_18 = arith.constant 0 : index
    %33 = vector.load %arg5[%c0_17, %c0_18] : memref<2x1xf32, #tpu.memory_space<vmem>>, vector<2x1xf32>
    tpu.vector_store %arg5[%c0_17, %c0_18], %32 {strides = array<i32>} : memref<2x1xf32, #tpu.memory_space<vmem>>, vector<2x1xf32>,
    return
  }
}

</mosaic_0001>

<bundles_post_ra>
// kernel: discriminator_forward.11
= control target key start
LH: loop header
LB: loop body
LE: loop exit
PB: predicated region body
PF: predicated region fallthrough
CT: control target
= control target key end

     0   :  { %s555_s18 = smov 0   ;;  %s612_s0 = inlined_call_operand.vmem [shape: f32[4,16384], index: 0, kind: input, shape index: {}]   ;;  %s613_s1 = inlined_call_operand.vmem [shape: f32[4,1], index: 1, kind: input, shape index: {}]   ;;  %s614_s2 = inlined_call_operand.vmem [shape: f32[4,1], index: 2, kind: input, shape index: {}]   ;;  %s615_s3 = inlined_call_operand.vmem [shape: f32[4,1], index: 3, kind: input, shape index: {}]   ;;  %s616_s4 = inlined_call_operand.vmem [shape: f32[4,1], index: 4, kind: input, shape index: {}]   ;;  %s617_s5 = inlined_call_operand.vmem [shape: bf16[4,16384], index: 5, kind: output, shape index: {}]  }
   0x1 LB: > { %s491_s19 = sadd.s32 4294967295, %s521_s18   ;;  %p495_p0 = scmp.ge.s32.totalorder %s521_s18, 1  ;;  %s521_s18 = sphi %s555_s18, %s15_s18  }
   0x2   : > { %p188_p1 = scmp.lt.s32.totalorder %s521_s18, 9 }
   0x4   : > { %p189_p2 = pnand %p495_p0, %p188_p1 }
   0x5   : > { %s496_s28 = sshll.u32 (!%p189_p2), %s491_s19, 4 }
   0x6   : > { %192 = sbr.rel (%p189_p2) target bundleno = 202 (0xca), region = 40  ;;  %p217_p3 = scmp.lt.s32.totalorder (!%p189_p2), %s496_s28, 127 }
   0xb   : > { %v228_v0 = vld [vmem:[%s613_s1] sm:$0xf]  ;;  %v523_v2 = vmov 0   ;;  %s619_s28 = smov (!%p217_p3, %s496_s28), 127  ;;  %v524_v21 = vmov 839922192  }
   0xc   : > { %v230_v1 = vld [vmem:[%s614_s2] sm:$0xf]  ;;  %512 = vset.pattern.permute.xlu0 %v523_v2  ;;  %v229_v3 = vmul.f32 6.145526e-05, %v228_v0  ;;  %v264_v22 = vunpack.c.l.s4 %v524_v21  ;;  %s497_s29 = sshll.u32 %s619_s28, 2  ;;  %vm396_vm7 = vcmask 1041408  }
   0xd   : > { %v231_v4 = vmul.f32 6.145526e-05, %v230_v1  ;;  %v235_v14 = vld [vmem:[%s615_s3] sm:$0xf]  ;;  %s220_s7 = scalar_lea.vmem %s612_s0, %s497_s29  ;;  %vm400_vm8 = vcmask 1045508   ;;  %vm404_vm9 = vcmask 1043456  }
   0xe   : > { %v232_v5 = vmul.f32 %v229_v3, %v229_v3  ;;  %v248_v19 = vld [vmem:[%s616_s4] sm:$0xf]  ;;  %v265_v23 = vunpack.c.0.s8 %v264_v22  ;;  %v252_v27 = vld [vmem:[%s220_s7 + $0x8] sm:$0xff]  ;;  %v253_v28 = vld [vmem:[%s220_s7 + $0x10] sm:$0xff]  ;;  %s499_s8 = sshll.u32 %s619_s28, 1 }
   0xf   : > { %v251_v26 = vld [vmem:[%s220_s7] sm:$0xff]  ;;  %v254_v29 = vld [vmem:[%s220_s7 + $0x18] sm:$0xff]  ;;  %v256_v41 = vld [vmem:[%s220_s7 + $0x28] sm:$0xff]  ;;  %s589_s11 = scalar_lea.vmem %s617_s5, %s499_s8 }
  0x10   : > { %v233_v6 = vsub.f32 %v231_v4, %v232_v5  ;;  %v255_v40 = vld [vmem:[%s220_s7 + $0x20] sm:$0xff]  ;;  %v257_v42 = vld [vmem:[%s220_s7 + $0x30] sm:$0xff]  ;;  %v258_v43 = vld [vmem:[%s220_s7 + $0x38] sm:$0xff] }
  0x12   : > { %v234_v7 = vmax.f32 %v233_v6, 0.0 }
  0x14   : > { %v236_v8 = vadd.f32 1e-05, %v234_v7 }
  0x16   : > { %513 = vrsqrt.f32 %v236_v8  ;;  %vm243_vm0 = vweird.f32 %v236_v8 }
  0x1c   : > { %v514_v9 = vpop.eup %513 }
  0x1d   : > { %v238_v10 = vmul.f32 %v514_v9, %v236_v8  ;;  %vm244_vm1 = vweird.f32 %v514_v9 }
  0x1e   : > { %vm245_vm2 = vmor %vm243_vm0, %vm244_vm1 }
  0x1f   : > { %v239_v11 = vmul.f32 %v514_v9, %v238_v10 }
  0x21   : > { %v240_v12 = vmul.f32 0.5, %v239_v11 }
  0x23   : > { %v241_v13 = vsub.f32 1.5, %v240_v12 }
  0x25   : > { %v242_v15 = vmul.f32 %v514_v9, %v241_v13 }
  0x27   : > { %v246_v16 = vsel %vm245_vm2, %v514_v9, %v242_v15 }
  0x28   : > { %v247_v17 = vmul.f32 %v246_v16, %v235_v14 }
  0x2a   : > { %261 = vperm.xlu0 %512, %v247_v17   ;;  %v249_v18 = vmul.f32 %v247_v17, %v229_v3 }
  0x2c   : > { %v250_v20 = vsub.f32 %v248_v19, %v249_v18 }
  0x32   : > { %278 = vperm.xlu0 %512, %v250_v20  }
  0x9c   : > { %v262_v24 = vpop.permute.xlu0 %261 }
  0x9d   : > { %v266_v25 = vperm.slane %v262_v24, %v265_v23 }
  0x9f   : > { %v268_v30 = vmul.f32 %v266_v25, %v251_v26  ;;  %v269_v32 = vmul.f32 %v266_v25, %v252_v27  ;;  %v270_v33 = vmul.f32 %v266_v25, %v253_v28  ;;  %v271_v34 = vmul.f32 %v266_v25, %v254_v29 }
  0xa0   : > { %v272_v47 = vmul.f32 %v266_v25, %v255_v40  ;;  %v273_v48 = vmul.f32 %v266_v25, %v256_v41  ;;  %v274_v50 = vmul.f32 %v266_v25, %v257_v42  ;;  %v275_v51 = vmul.f32 %v266_v25, %v258_v43 }
  0xa4   : > { %v279_v31 = vpop.permute.xlu0 %278 }
  0xa5   : > { %v283_v35 = vperm.slane %v279_v31, %v265_v23 }
  0xa7   : > { %v285_v36 = vadd.f32 %v283_v35, %v268_v30  ;;  %v286_v37 = vadd.f32 %v283_v35, %v269_v32  ;;  %v287_v38 = vadd.f32 %v283_v35, %v270_v33  ;;  %v288_v39 = vadd.f32 %v283_v35, %v271_v34 }
  0xa8   : > { %v289_v54 = vadd.f32 %v283_v35, %v272_v47  ;;  %v290_v57 = vadd.f32 %v283_v35, %v273_v48  ;;  %v291_v58 = vadd.f32 %v283_v35, %v274_v50  ;;  %v292_v59 = vadd.f32 %v283_v35, %v275_v51 }
  0xa9   : > { %vm293_vm3 = vcmp.ge.f32.partialorder %v285_v36, 0.0  ;;  %vm294_vm4 = vcmp.ge.f32.partialorder %v286_v37, 0.0  ;;  %vm295_vm5 = vcmp.ge.f32.partialorder %v287_v38, 0.0  ;;  %vm296_vm6 = vcmp.ge.f32.partialorder %v288_v39, 0.0 }
  0xaa   : > { %v301_v44 = vmul.f32 0.2, %v285_v36  ;;  %v302_v45 = vmul.f32 0.2, %v286_v37  ;;  %v303_v46 = vmul.f32 0.2, %v287_v38 }
  0xab   : > { %v304_v49 = vmul.f32 0.2, %v288_v39  ;;  %vm297_vm10 = vcmp.ge.f32.partialorder %v289_v54, 0.0  ;;  %vm298_vm11 = vcmp.ge.f32.partialorder %v290_v57, 0.0  ;;  %vm299_vm12 = vcmp.ge.f32.partialorder %v291_v58, 0.0 }
  0xac   : > { %v309_v52 = vsel %vm293_vm3, %v285_v36, %v301_v44  ;;  %v310_v53 = vsel %vm294_vm4, %v286_v37, %v302_v45  ;;  %v311_v55 = vsel %vm295_vm5, %v287_v38, %v303_v46  ;;  %vm300_vm13 = vcmp.ge.f32.partialorder %v292_v59, 0.0 }
  0xad   : > { %v312_v56 = vsel %vm296_vm6, %v288_v39, %v304_v49  ;;  %325 = vst [vmem:[#allocation1] ss:$2 sm:$0xff] %v309_v52  ;;  %v305_v60 = vmul.f32 0.2, %v289_v54  ;;  %v306_v61 = vmul.f32 0.2, %v290_v57 }
  0xae   : > { %327 = vst [vmem:[#allocation1 + $0x10] ss:$2 sm:$0xff] %v310_v53  ;;  %v307_v62 = vmul.f32 0.2, %v291_v58  ;;  %v308_v63 = vmul.f32 0.2, %v292_v59 }
  0xaf   : > { %329 = vst [vmem:[#allocation1 + $0x20] ss:$2 sm:$0xff] %v311_v55  ;;  %v313_v8 = vsel %vm297_vm10, %v289_v54, %v305_v60  ;;  %v314_v9 = vsel %vm298_vm11, %v290_v57, %v306_v61 }
  0xb0   : > { %331 = vst [vmem:[#allocation1 + $0x30] ss:$2 sm:$0xff] %v312_v56  ;;  %v315_v17 = vsel %vm299_vm12, %v291_v58, %v307_v62  ;;  %v316_v18 = vsel %vm300_vm13, %v292_v59, %v308_v63 }
  0xb4   : > { %v332_v0 = vld.sshfl [vmem:[#allocation1] sm:$0xff pattern:$0x75316420]  ;;  %v333_v1 = vld.sshfl [vmem:[#allocation1 + $0x8] sm:$0xff pattern:$0x75316420] }
  0xb5   : > { %v334_v2 = vld.sshfl [vmem:[#allocation1 + $0x10] sm:$0xff pattern:$0x75316420]  ;;  %v335_v3 = vld.sshfl [vmem:[#allocation1 + $0x18] sm:$0xff pattern:$0x75316420]  ;;  %v368_v4 = vpack.c.bf16 %v333_v1, %v332_v0 }
  0xb6   : > { %v336_v5 = vld.sshfl [vmem:[#allocation1 + $0x20] sm:$0xff pattern:$0x75316420]  ;;  %v337_v6 = vld.sshfl [vmem:[#allocation1 + $0x28] sm:$0xff pattern:$0x75316420]  ;;  %v369_v7 = vpack.c.bf16 %v335_v3, %v334_v2 }
  0xb7   : > { %v338_v10 = vld.sshfl [vmem:[#allocation1 + $0x30] sm:$0xff pattern:$0x75316420]  ;;  %v339_v11 = vld.sshfl [vmem:[#allocation1 + $0x38] sm:$0xff pattern:$0x75316420]  ;;  %v370_v12 = vpack.c.bf16 %v337_v6, %v336_v5 }
  0xb8   : > { %340 = vst [vmem:[#allocation1] ss:$2 sm:$0xff] %v313_v8  ;;  %v371_v13 = vpack.c.bf16 %v339_v11, %v338_v10  ;;  %v384_v14 = vrot.slane %v368_v4, 2  ;;  %v385_v15 = vrot.slane %v369_v7, 4  ;;  %v386_v16 = vrot.slane %v369_v7, 6 }
  0xb9   : > { %341 = vst [vmem:[#allocation1 + $0x10] ss:$2 sm:$0xff] %v314_v9  ;;  %v387_v19 = vrot.slane %v370_v12, 2 }
  0xba   : > { %342 = vst [vmem:[#allocation1 + $0x20] ss:$2 sm:$0xff] %v315_v17  ;;  %v388_v20 = vrot.slane %v371_v13, 4  ;;  %v389_v21 = vrot.slane %v371_v13, 6  ;;  %v399_v22 = vsel %vm396_vm7, %v368_v4, %v384_v14  ;;  %v403_v23 = vsel %vm400_vm8, %v385_v15, %v386_v16 }
  0xbb   : > { %343 = vst [vmem:[#allocation1 + $0x30] ss:$2 sm:$0xff] %v316_v18  ;;  %v405_v24 = vsel %vm404_vm9, %v399_v22, %v403_v23  ;;  %v408_v25 = vsel %vm396_vm7, %v370_v12, %v387_v19 }
  0xbc   : > { %v411_v26 = vsel %vm400_vm8, %v388_v20, %v389_v21  ;;  %431 = vst [vmem:[%s589_s11] sm:$0xff] %v405_v24 }
  0xbd   : > { %v412_v27 = vsel %vm404_vm9, %v408_v25, %v411_v26 }
  0xbe   : > { %432 = vst [vmem:[%s589_s11 + $0x8] sm:$0xff] %v412_v27 }
  0xbf   : > { %v344_v28 = vld.sshfl [vmem:[#allocation1] sm:$0xff pattern:$0x75316420]  ;;  %v345_v29 = vld.sshfl [vmem:[#allocation1 + $0x8] sm:$0xff pattern:$0x75316420] }
  0xc0   : > { %v346_v30 = vld.sshfl [vmem:[#allocation1 + $0x10] sm:$0xff pattern:$0x75316420]  ;;  %v347_v31 = vld.sshfl [vmem:[#allocation1 + $0x18] sm:$0xff pattern:$0x75316420]  ;;  %v372_v32 = vpack.c.bf16 %v345_v29, %v344_v28 }
  0xc1   : > { %v348_v33 = vld.sshfl [vmem:[#allocation1 + $0x20] sm:$0xff pattern:$0x75316420]  ;;  %v349_v34 = vld.sshfl [vmem:[#allocation1 + $0x28] sm:$0xff pattern:$0x75316420]  ;;  %v373_v35 = vpack.c.bf16 %v347_v31, %v346_v30 }
  0xc2   : > { %v350_v36 = vld.sshfl [vmem:[#allocation1 + $0x30] sm:$0xff pattern:$0x75316420]  ;;  %v351_v37 = vld.sshfl [vmem:[#allocation1 + $0x38] sm:$0xff pattern:$0x75316420]  ;;  %v374_v38 = vpack.c.bf16 %v349_v34, %v348_v33 }
  0xc3   : > { %v375_v39 = vpack.c.bf16 %v351_v37, %v350_v36  ;;  %v390_v40 = vrot.slane %v372_v32, 2  ;;  %v391_v41 = vrot.slane %v373_v35, 4  ;;  %v392_v42 = vrot.slane %v373_v35, 6 }
  0xc4   : > { %v393_v43 = vrot.slane %v374_v38, 2 }
  0xc5   : > { %v394_v44 = vrot.slane %v375_v39, 4  ;;  %v395_v45 = vrot.slane %v375_v39, 6  ;;  %v415_v46 = vsel %vm396_vm7, %v372_v32, %v390_v40  ;;  %v418_v47 = vsel %vm400_vm8, %v391_v41, %v392_v42 }
  0xc6   : > { %v419_v48 = vsel %vm404_vm9, %v415_v46, %v418_v47  ;;  %v422_v49 = vsel %vm396_vm7, %v374_v38, %v393_v43 }
  0xc7   : > { %v425_v50 = vsel %vm400_vm8, %v394_v44, %v395_v45  ;;  %433 = vst [vmem:[%s589_s11 + $0x10] sm:$0xff] %v419_v48 }
  0xc8   : > { %v426_v51 = vsel %vm404_vm9, %v422_v49, %v425_v50 }
  0xc9   : > { %434 = vst [vmem:[%s589_s11 + $0x18] sm:$0xff] %v426_v51 }
  0xca PF: > { %s15_s18 = sadd.s32 1, %s521_s18  }
  0xcb   : > { %p12_p4 = scmp.ge.s32.totalorder %s15_s18, 10  }
  0xcd   :  { %14 = sbr.rel (!%p12_p4) target bundleno = 1 (0x1), region = 73 }

// kernel: discriminator_forward.10
= control target key start
LH: loop header
LB: loop body
LE: loop exit
PB: predicated region body
PF: predicated region fallthrough
CT: control target
= control target key end

     0   :  { %s790_s15 = smov 0   ;;  %s920_s0 = inlined_call_operand.vmem [shape: bf16[8,16384], index: 0, kind: input, shape index: {}]   ;;  %s921_s1 = inlined_call_operand.vmem [shape: bf16[4,8], index: 1, kind: input, shape index: {}]   ;;  %s922_s2 = inlined_call_operand.vmem [shape: f32[4,16384], index: 2, kind: output, shape index: {0}]   ;;  %s923_s3 = inlined_call_operand.vmem [shape: f32[4,1], index: 3, kind: output, shape index: {1}]   ;;  %s924_s4 = inlined_call_operand.vmem [shape: f32[4,1], index: 4, kind: output, shape index: {2}]  }
   0x1 LB: > { %s719_s16 = sadd.s32 4294967295, %s762_s15   ;;  %p723_p0 = scmp.ge.s32.totalorder %s762_s15, 1  ;;  %s762_s15 = sphi %s790_s15, %s15_s15  }
   0x2   : > { %p158_p1 = scmp.lt.s32.totalorder %s762_s15, 9 }
   0x4   : > { %p159_p2 = pnand %p723_p0, %p158_p1 }
   0x5   : > { %s724_s17 = sshll.u32 (!%p159_p2), %s719_s16, 4  ;;  %p728_p4 = scmp.ne.s32.totalorder (!%p159_p2), %s719_s16, 0 }
   0x6   : > { %162 = sbr.rel (%p159_p2) target bundleno = 341 (0x155), region = 28  ;;  %p185_p3 = scmp.lt.s32.totalorder (!%p159_p2), %s724_s17, 127 }
   0xb   : > { %s926_s17 = smov (!%p185_p3, %s724_s17), 127  ;;  %200 = sbr.rel (%p728_p4) target bundleno = 19 (0x13), region = 32 }
   0xc   : > { %s725_s18 = sshll.u32 %s926_s17, 2 }
   0xd   : > { %s801_s21 = scalar_lea.vmem %s920_s0, %s725_s18  ;;  %s806_s24 = scalar_lea.vmem %s922_s2, %s725_s18 }
  0x10   : > { %vm201_vm0 = vcmask 3072   ;;  %v764_v0 = vmov 0.0  }
  0x11   : > { %202 = vst.msk [vmem:[%s923_s3] sm:$0xf] %vm201_vm0, %v764_v0 }
  0x12   : > { %203 = vst.msk [vmem:[%s924_s4] sm:$0xf] %vm201_vm0, %v764_v0 }
  0x13 PF: > { %v205_v1 = vld [vmem:[%s801_s21] sm:$0xff]  ;;  %vm257_vm1 = vcmask 1043456   ;;  %v206_v2 = vld [vmem:[%s801_s21 + $0x8] sm:$0xff]  ;;  %v208_v7 = vld [vmem:[%s801_s21 + $0x18] sm:$0xff]  ;;  %vm253_vm2 = vcmask 64512   ;;  %vm597_vm3 = vcmask 3072  }
  0x14   : > { %v221_v3 = vunpack.c.l.b16 %v205_v1  ;;  %v222_v4 = vunpack.c.h.b16 %v205_v1  ;;  %v223_v5 = vunpack.c.l.b16 %v206_v2  ;;  %v224_v6 = vunpack.c.h.b16 %v206_v2  ;;  %v207_v8 = vld [vmem:[%s801_s21 + $0x10] sm:$0xff]  ;;  %v210_v21 = vld [vmem:[%s801_s21 + $0x28] sm:$0xff]  ;;  %v209_v22 = vld [vmem:[%s801_s21 + $0x20] sm:$0xff] }
  0x15   : > { %v227_v9 = vunpack.c.l.b16 %v208_v7  ;;  %v225_v10 = vunpack.c.l.b16 %v207_v8  ;;  %v228_v11 = vunpack.c.h.b16 %v208_v7  ;;  %v226_v12 = vunpack.c.h.b16 %v207_v8  ;;  %v204_v27 = vld [vmem:[%s921_s1] sm:$0x3]  ;;  %v212_v44 = vld [vmem:[%s801_s21 + $0x38] sm:$0xff]  ;;  %v211_v45 = vld [vmem:[%s801_s21 + $0x30] sm:$0xff] }
  0x16   : > { %v237_v13 = vpack.c.b16 %v221_v3, %v221_v3  ;;  %v238_v14 = vpack.c.b16 %v222_v4, %v222_v4  ;;  %v239_v15 = vpack.c.b16 %v223_v5, %v223_v5  ;;  %v240_v16 = vpack.c.b16 %v224_v6, %v224_v6 }
  0x17   : > { %v243_v17 = vpack.c.b16 %v227_v9, %v227_v9  ;;  %v241_v18 = vpack.c.b16 %v225_v10, %v225_v10  ;;  %v244_v19 = vpack.c.b16 %v228_v11, %v228_v11  ;;  %v242_v20 = vpack.c.b16 %v226_v12, %v226_v12 }
  0x18   : > { %v259_v23 = vsel %vm257_vm1, %v237_v13, 0  ;;  %v262_v24 = vsel %vm257_vm1, %v238_v14, 0  ;;  %v265_v25 = vsel %vm257_vm1, %v239_v15, 0  ;;  %v268_v26 = vsel %vm257_vm1, %v240_v16, 0 }
  0x19   : > { %313 = vmatpush.bf16.msra.mxu0 %v259_v23  ;;  %326 = vmatpush.bf16.msra.mxu1 %v262_v24  ;;  %v277_v28 = vsel %vm257_vm1, %v243_v17, 0  ;;  %v271_v29 = vsel %vm257_vm1, %v241_v18, 0  ;;  %v231_v30 = vunpack.c.l.b16 %v210_v21  ;;  %v229_v31 = vunpack.c.l.b16 %v209_v22 }
  0x1a   : > { %339 = vmatpush.bf16.msra.mxu2 %v265_v25  ;;  %352 = vmatpush.bf16.msra.mxu3 %v268_v26  ;;  %v232_v32 = vunpack.c.h.b16 %v210_v21  ;;  %v230_v33 = vunpack.c.h.b16 %v209_v22  ;;  %v280_v34 = vsel %vm257_vm1, %v244_v19, 0  ;;  %v274_v35 = vsel %vm257_vm1, %v242_v20, 0 }
  0x1b   : > { %v247_v36 = vpack.c.b16 %v231_v30, %v231_v30  ;;  %v245_v37 = vpack.c.b16 %v229_v31, %v229_v31  ;;  %v235_v46 = vunpack.c.l.b16 %v212_v44  ;;  %v233_v47 = vunpack.c.l.b16 %v211_v45 }
  0x1c   : > { %729 = vmatmul.msk.bf16.vlgmr.msra.gmra.mxu0 %vm253_vm2, %v204_v27  ;;  %730 = vmatmul.msk.bf16.vlgmr.msra.gmra.mxu1 %vm253_vm2, %v204_v27  ;;  %v248_v38 = vpack.c.b16 %v232_v32, %v232_v32  ;;  %v246_v39 = vpack.c.b16 %v230_v33, %v230_v33  ;;  %v236_v48 = vunpack.c.h.b16 %v212_v44  ;;  %v234_v49 = vunpack.c.h.b16 %v211_v45 }
  0x1d   : > { %365 = vmatpush.bf16.msrb.mxu0 %v271_v29  ;;  %731 = vmatmul.msk.bf16.vlgmr.msra.gmra.mxu2 %vm253_vm2, %v204_v27  ;;  %v289_v40 = vsel %vm257_vm1, %v247_v36, 0  ;;  %v283_v41 = vsel %vm257_vm1, %v245_v37, 0  ;;  %v251_v50 = vpack.c.b16 %v235_v46, %v235_v46  ;;  %v249_v51 = vpack.c.b16 %v233_v47, %v233_v47 }
  0x1e   : > { %391 = vmatpush.bf16.msrb.mxu2 %v277_v28  ;;  %732 = vmatmul.msk.bf16.vlgmr.msra.gmra.mxu3 %vm253_vm2, %v204_v27  ;;  %v292_v42 = vsel %vm257_vm1, %v248_v38, 0  ;;  %v286_v43 = vsel %vm257_vm1, %v246_v39, 0  ;;  %v252_v52 = vpack.c.b16 %v236_v48, %v236_v48  ;;  %v250_v53 = vpack.c.b16 %v234_v49, %v234_v49 }
  0x1f   : > { %404 = vmatpush.bf16.msrb.mxu3 %v280_v34  ;;  %378 = vmatpush.bf16.msrb.mxu1 %v274_v35  ;;  %v301_v54 = vsel %vm257_vm1, %v251_v50, 0  ;;  %v295_v55 = vsel %vm257_vm1, %v249_v51, 0 }
  0x20   : > { %v304_v56 = vsel %vm257_vm1, %v252_v52, 0  ;;  %v298_v57 = vsel %vm257_vm1, %v250_v53, 0 }
  0x21   : > { %417 = vmatpush.bf16.msra.mxu0 %v283_v41 }
  0x22   : > { %443 = vmatpush.bf16.msra.mxu2 %v289_v40 }
  0x23   : > { %456 = vmatpush.bf16.msra.mxu3 %v292_v42  ;;  %430 = vmatpush.bf16.msra.mxu1 %v286_v43 }
  0x2c   : > { %733 = vmatmul.msk.bf16.vlgmr.msrb.gmra.mxu0 %vm253_vm2, %v204_v27  ;;  %734 = vmatmul.msk.bf16.vlgmr.msrb.gmra.mxu1 %vm253_vm2, %v204_v27 }
  0x2d   : > { %735 = vmatmul.msk.bf16.vlgmr.msrb.gmra.mxu2 %vm253_vm2, %v204_v27  ;;  %469 = vmatpush.bf16.msrb.mxu0 %v295_v55 }
  0x2e   : > { %736 = vmatmul.msk.bf16.vlgmr.msrb.gmra.mxu3 %vm253_vm2, %v204_v27  ;;  %495 = vmatpush.bf16.msrb.mxu2 %v301_v54 }
  0x2f   : > { %508 = vmatpush.bf16.msrb.mxu3 %v304_v56  ;;  %482 = vmatpush.bf16.msrb.mxu1 %v298_v57 }
  0x3c   : > { %737 = vmatmul.msk.bf16.vlgmr.msra.gmra.mxu0 %vm253_vm2, %v204_v27  ;;  %738 = vmatmul.msk.bf16.vlgmr.msra.gmra.mxu1 %vm253_vm2, %v204_v27 }
  0x3d   : > { %739 = vmatmul.msk.bf16.vlgmr.msra.gmra.mxu2 %vm253_vm2, %v204_v27 }
  0x3e   : > { %740 = vmatmul.msk.bf16.vlgmr.msra.gmra.mxu3 %vm253_vm2, %v204_v27 }
  0x4c   : > { %741 = vmatmul.msk.bf16.vlgmr.msrb.gmra.mxu0 %vm253_vm2, %v204_v27  ;;  %742 = vmatmul.msk.bf16.vlgmr.msrb.gmra.mxu1 %vm253_vm2, %v204_v27 }
  0x4d   : > { %743 = vmatmul.msk.bf16.vlgmr.msrb.gmra.mxu2 %vm253_vm2, %v204_v27 }
  0x4e   : > { %744 = vmatmul.msk.bf16.vlgmr.msrb.gmra.mxu3 %vm253_vm2, %v204_v27 }
  0x99   : > { %v315_v58 = vpop.f32.mrf.mxu0  ;;  %v328_v59 = vpop.f32.mrf.mxu1 }
  0x9a   : > { %v530_v60 = vrot.slane %v328_v59, 4  ;;  %v563_v6 = vsel %vm257_vm1, %v315_v58, 0.0  ;;  %v564_v7 = vsel %vm257_vm1, %v328_v59, 0.0  ;;  %v600_v11 = vmul.f32 %v315_v58, %v315_v58 }
  0x9b   : > { %v601_v12 = vmul.f32 %v328_v59, %v328_v59  ;;  %v565_v14 = vadd.f32 %v564_v7, %v563_v6 }
  0x9c   : > { %v538_v61 = vsel %vm257_vm1, %v315_v58, %v530_v60  ;;  %v616_v18 = vsel %vm257_vm1, %v600_v11, 0.0 }
  0x9d   : > { %554 = vst [vmem:[%s806_s24] sm:$0xff] %v538_v61  ;;  %v617_v19 = vsel %vm257_vm1, %v601_v12, 0.0 }
  0x9e   : > { %v618_v29 = vadd.f32 %v617_v19, %v616_v18 }
  0xa0   : > { %v341_v62 = vpop.f32.mrf.mxu2 }
  0xa1   : > { %v354_v63 = vpop.f32.mrf.mxu3  ;;  %v317_v1 = vpop.f32.mrf.mxu0  ;;  %v566_v13 = vsel %vm257_vm1, %v341_v62, 0.0  ;;  %v602_v16 = vmul.f32 %v341_v62, %v341_v62 }
  0xa2   : > { %v531_v0 = vrot.slane %v354_v63, 4  ;;  %v330_v2 = vpop.f32.mrf.mxu1  ;;  %v567_v17 = vadd.f32 %v566_v13, %v565_v14  ;;  %v568_v20 = vsel %vm257_vm1, %v354_v63, 0.0  ;;  %v603_v24 = vmul.f32 %v354_v63, %v354_v63 }
  0xa3   : > { %v619_v23 = vsel %vm257_vm1, %v602_v16, 0.0 }
  0xa4   : > { %v539_v3 = vsel %vm257_vm1, %v341_v62, %v531_v0  ;;  %v569_v30 = vadd.f32 %v568_v20, %v567_v17  ;;  %v620_v33 = vadd.f32 %v619_v23, %v618_v29  ;;  %v621_v35 = vsel %vm257_vm1, %v603_v24, 0.0 }
  0xa5   : > { %555 = vst [vmem:[%s806_s24 + $0x8] sm:$0xff] %v539_v3 }
  0xa6   : > { %v622_v40 = vadd.f32 %v621_v35, %v620_v33 }
  0xa8   : > { %v343_v4 = vpop.f32.mrf.mxu2 }
  0xa9   : > { %v356_v5 = vpop.f32.mrf.mxu3  ;;  %v367_v8 = vpop.f32.mrf.mxu0 }
  0xaa   : > { %v380_v9 = vpop.f32.mrf.mxu1  ;;  %v570_v25 = vsel %vm257_vm1, %v367_v8, 0.0  ;;  %v604_v31 = vmul.f32 %v367_v8, %v367_v8 }
  0xab   : > { %v532_v10 = vrot.slane %v380_v9, 4  ;;  %v571_v34 = vadd.f32 %v570_v25, %v569_v30  ;;  %v572_v36 = vsel %vm257_vm1, %v380_v9, 0.0  ;;  %v605_v38 = vmul.f32 %v380_v9, %v380_v9 }
  0xac   : > { %v623_v37 = vsel %vm257_vm1, %v604_v31, 0.0 }
  0xad   : > { %v540_v15 = vsel %vm257_vm1, %v367_v8, %v532_v10  ;;  %v573_v41 = vadd.f32 %v572_v36, %v571_v34  ;;  %v624_v47 = vadd.f32 %v623_v37, %v622_v40  ;;  %v625_v50 = vsel %vm257_vm1, %v605_v38, 0.0 }
  0xae   : > { %556 = vst [vmem:[%s806_s24 + $0x10] sm:$0xff] %v540_v15 }
  0xaf   : > { %v626_v56 = vadd.f32 %v625_v50, %v624_v47 }
  0xb0   : > { %v393_v21 = vpop.f32.mrf.mxu2 }
  0xb1   : > { %v406_v22 = vpop.f32.mrf.mxu3  ;;  %v369_v27 = vpop.f32.mrf.mxu0  ;;  %v574_v39 = vsel %vm257_vm1, %v393_v21, 0.0  ;;  %v606_v44 = vmul.f32 %v393_v21, %v393_v21 }
  0xb2   : > { %v533_v26 = vrot.slane %v406_v22, 4  ;;  %v382_v28 = vpop.f32.mrf.mxu1  ;;  %v575_v48 = vadd.f32 %v574_v39, %v573_v41  ;;  %v576_v51 = vsel %vm257_vm1, %v406_v22, 0.0  ;;  %v607_v54 = vmul.f32 %v406_v22, %v406_v22 }
  0xb3   : > { %v627_v53 = vsel %vm257_vm1, %v606_v44, 0.0 }
  0xb4   : > { %v541_v32 = vsel %vm257_vm1, %v393_v21, %v533_v26  ;;  %v577_v57 = vadd.f32 %v576_v51, %v575_v48  ;;  %v628_v59 = vadd.f32 %v627_v53, %v626_v56  ;;  %v629_v63 = vsel %vm257_vm1, %v607_v54, 0.0  ;;  %v562_v56 = vld [vmem:[%s923_s3] sm:$0xf] }
  0xb5   : > { %557 = vst [vmem:[%s806_s24 + $0x18] sm:$0xff] %v541_v32 }
  0xb6   : > { %v630_v8 = vadd.f32 %v629_v63, %v628_v59  ;;  %v599_v59 = vld [vmem:[%s924_s4] sm:$0xf] }
  0xb8   : > { %v395_v42 = vpop.f32.mrf.mxu2 }
  0xb9   : > { %v408_v43 = vpop.f32.mrf.mxu3  ;;  %v419_v45 = vpop.f32.mrf.mxu0 }
  0xba   : > { %v432_v46 = vpop.f32.mrf.mxu1  ;;  %v578_v55 = vsel %vm257_vm1, %v419_v45, 0.0  ;;  %v608_v58 = vmul.f32 %v419_v45, %v419_v45 }
  0xbb   : > { %v534_v49 = vrot.slane %v432_v46, 4  ;;  %v579_v60 = vadd.f32 %v578_v55, %v577_v57  ;;  %v580_v0 = vsel %vm257_vm1, %v432_v46, 0.0  ;;  %v609_v5 = vmul.f32 %v432_v46, %v432_v46 }
  0xbc   : > { %v631_v4 = vsel %vm257_vm1, %v608_v58, 0.0 }
  0xbd   : > { %v542_v52 = vsel %vm257_vm1, %v419_v45, %v534_v49  ;;  %v581_v9 = vadd.f32 %v580_v0, %v579_v60  ;;  %v632_v11 = vadd.f32 %v631_v4, %v630_v8  ;;  %v633_v13 = vsel %vm257_vm1, %v609_v5, 0.0 }
  0xbe   : > { %558 = vst [vmem:[%s806_s24 + $0x20] sm:$0xff] %v542_v52 }
  0xbf   : > { %v634_v21 = vadd.f32 %v633_v13, %v632_v11 }
  0xc0   : > { %v445_v61 = vpop.f32.mrf.mxu2 }
  0xc1   : > { %v458_v62 = vpop.f32.mrf.mxu3  ;;  %v421_v2 = vpop.f32.mrf.mxu0  ;;  %v582_v6 = vsel %vm257_vm1, %v445_v61, 0.0  ;;  %v610_v10 = vmul.f32 %v445_v61, %v445_v61 }
  0xc2   : > { %v535_v1 = vrot.slane %v458_v62, 4  ;;  %v434_v3 = vpop.f32.mrf.mxu1  ;;  %v583_v12 = vadd.f32 %v582_v6, %v581_v9  ;;  %v584_v14 = vsel %vm257_vm1, %v458_v62, 0.0  ;;  %v611_v18 = vmul.f32 %v458_v62, %v458_v62 }
  0xc3   : > { %v635_v17 = vsel %vm257_vm1, %v610_v10, 0.0 }
  0xc4   : > { %v543_v7 = vsel %vm257_vm1, %v445_v61, %v535_v1  ;;  %v585_v22 = vadd.f32 %v584_v14, %v583_v12  ;;  %v636_v26 = vadd.f32 %v635_v17, %v634_v21  ;;  %v637_v29 = vsel %vm257_vm1, %v611_v18, 0.0 }
  0xc5   : > { %559 = vst [vmem:[%s806_s24 + $0x28] sm:$0xff] %v543_v7 }
  0xc6   : > { %v638_v33 = vadd.f32 %v637_v29, %v636_v26 }
  0xc8   : > { %v447_v15 = vpop.f32.mrf.mxu2 }
  0xc9   : > { %v460_v16 = vpop.f32.mrf.mxu3  ;;  %v471_v19 = vpop.f32.mrf.mxu0 }
  0xca   : > { %v484_v20 = vpop.f32.mrf.mxu1  ;;  %v586_v23 = vsel %vm257_vm1, %v471_v19, 0.0  ;;  %v612_v25 = vmul.f32 %v471_v19, %v471_v19 }
  0xcb   : > { %v536_v24 = vrot.slane %v484_v20, 4  ;;  %v587_v27 = vadd.f32 %v586_v23, %v585_v22  ;;  %v588_v30 = vsel %vm257_vm1, %v484_v20, 0.0  ;;  %v613_v32 = vmul.f32 %v484_v20, %v484_v20 }
  0xcc   : > { %v639_v31 = vsel %vm257_vm1, %v612_v25, 0.0 }
  0xcd   : > { %v544_v28 = vsel %vm257_vm1, %v471_v19, %v536_v24  ;;  %v589_v36 = vadd.f32 %v588_v30, %v587_v27  ;;  %v640_v42 = vadd.f32 %v639_v31, %v638_v33  ;;  %v641_v45 = vsel %vm257_vm1, %v613_v32, 0.0 }
  0xce   : > { %560 = vst [vmem:[%s806_s24 + $0x30] sm:$0xff] %v544_v28 }
  0xcf   : > { %v642_v50 = vadd.f32 %v641_v45, %v640_v42 }
  0xd0   : > { %v497_v34 = vpop.f32.mrf.mxu2 }
  0xd1   : > { %v510_v35 = vpop.f32.mrf.mxu3  ;;  %v614_v37 = vmul.f32 %v497_v34, %v497_v34  ;;  %v473_v39 = vpop.f32.mrf.mxu0  ;;  %v590_v41 = vsel %vm257_vm1, %v497_v34, 0.0 }
  0xd2   : > { %v537_v38 = vrot.slane %v510_v35, 4  ;;  %v486_v40 = vpop.f32.mrf.mxu1  ;;  %v591_v43 = vadd.f32 %v590_v41, %v589_v36  ;;  %v592_v44 = vsel %vm257_vm1, %v510_v35, 0.0  ;;  %v615_v48 = vmul.f32 %v510_v35, %v510_v35 }
  0xd3   : > { %v643_v49 = vsel %vm257_vm1, %v614_v37, 0.0 }
  0xd4   : > { %v545_v46 = vsel %vm257_vm1, %v497_v34, %v537_v38  ;;  %v593_v47 = vadd.f32 %v592_v44, %v591_v43  ;;  %v644_v53 = vadd.f32 %v643_v49, %v642_v50  ;;  %v645_v54 = vsel %vm257_vm1, %v615_v48, 0.0 }
  0xd5   : > { %561 = vst [vmem:[%s806_s24 + $0x38] sm:$0xff] %v545_v46 }
  0xd6   : > { %594 = vadd.xlane.f32.xlu0 %v593_v47  ;;  %v646_v55 = vadd.f32 %v645_v54, %v644_v53 }
  0xd8   : > { %v499_v51 = vpop.f32.mrf.mxu2 }
  0xd9   : > { %v512_v52 = vpop.f32.mrf.mxu3 }
  0xde   : > { %647 = vadd.xlane.f32.xlu0 %v646_v55 }
 0x149   : > { %v595_v57 = vpop.xlane.xlu0 %594 }
 0x14a   : > { %v596_v58 = vadd.f32 %v595_v57, %v562_v56 }
 0x14c   : > { %598 = vst.msk [vmem:[%s923_s3] sm:$0xf] %vm597_vm3, %v596_v58 }
 0x151   : > { %v648_v60 = vpop.xlane.xlu0 %647 }
 0x152   : > { %v649_v61 = vadd.f32 %v648_v60, %v599_v59 }
 0x154   : > { %650 = vst.msk [vmem:[%s924_s4] sm:$0xf] %vm597_vm3, %v649_v61 }
 0x155 PF: > { %s15_s15 = sadd.s32 1, %s762_s15  }
 0x156   : > { %p12_p5 = scmp.ge.s32.totalorder %s15_s15, 10  }
 0x158   :  { %14 = sbr.rel (!%p12_p5) target bundleno = 1 (0x1), region = 78 }

// kernel: discriminator_forward.12
= control target key start
LH: loop header
LB: loop body
LE: loop exit
PB: predicated region body
PF: predicated region fallthrough
CT: control target
= control target key end

     0   :  { %vm403_vm0 = vcmask 261120   ;;  %vm853_vm1 = vcmask 801792   ;;  %s2505_s0 = inlined_call_operand.vmem [shape: bf16[32,4066], index: 0, kind: input, shape index: {}]   ;;  %s2506_s1 = inlined_call_operand.vmem [shape: bf16[8,32], index: 1, kind: input, shape index: {}]   ;;  %s2507_s2 = inlined_call_operand.vmem [shape: f32[8,1], index: 2, kind: input, shape index: {}]   ;;  %s2508_s3 = inlined_call_operand.vmem [shape: f32[8,1], index: 3, kind: input, shape index: {}]   ;;  %s2509_s4 = inlined_call_operand.vmem [shape: bf16[8,4066], index: 4, kind: output, shape index: {}]  }
   0x1   :  { %v1291_v0 = vld [vmem:[%s2505_s0 + $0x100] sm:$0xf]  ;;  %v1481_v2 = vld [vmem:[%s2505_s0 + $0x104] sm:$0xf]  ;;  %v1299_v5 = vld [vmem:[%s2505_s0 + $0x108] sm:$0xf] }
   0x2   :  { %v1497_v1 = vld [vmem:[%s2505_s0 + $0x17c] sm:$0xf0]  ;;  %v1293_v4 = vld [vmem:[%s2505_s0 + $0x180] sm:$0xf0]  ;;  %v1498_v6 = vld [vmem:[%s2505_s0 + $0x184] sm:$0xf0] }
   0x3   :  { %v1292_v3 = vor.u32 %v1497_v1, %v1291_v0  ;;  %v1296_v7 = vor.u32 %v1481_v2, %v1293_v4  ;;  %v1300_v8 = vor.u32 %v1498_v6, %v1299_v5  ;;  %v1482_v9 = vld [vmem:[%s2505_s0 + $0x10c] sm:$0xf]  ;;  %v1163_v11 = vld [vmem:[%s2505_s0] sm:$0xf]  ;;  %v1449_v14 = vld [vmem:[%s2505_s0 + $0x4] sm:$0xf] }
   0x4   :  { %v1301_v10 = vld [vmem:[%s2505_s0 + $0x188] sm:$0xf0]  ;;  %v1465_v13 = vld [vmem:[%s2505_s0 + $0x7c] sm:$0xf0]  ;;  %v1165_v15 = vld [vmem:[%s2505_s0 + $0x80] sm:$0xf0] }
   0x5   :  { %413 = vmatpush.bf16.msra.mxu0 %v1292_v3  ;;  %v1304_v12 = vor.u32 %v1482_v9, %v1301_v10  ;;  %426 = vmatpush.bf16.msra.mxu1 %v1296_v7  ;;  %v1164_v16 = vor.u32 %v1465_v13, %v1163_v11  ;;  %v1168_v17 = vor.u32 %v1449_v14, %v1165_v15  ;;  %v1171_v18 = vld [vmem:[%s2505_s0 + $0x8] sm:$0xf]  ;;  %v1450_v20 = vld [vmem:[%s2505_s0 + $0xc] sm:$0xf]  ;;  %v1599_v23 = vld [vmem:[%s2506_s1] sm:$0xf] }
   0x6   :  { %439 = vmatpush.bf16.msra.mxu2 %v1300_v8  ;;  %v1466_v19 = vld [vmem:[%s2505_s0 + $0x84] sm:$0xf0]  ;;  %v1173_v22 = vld [vmem:[%s2505_s0 + $0x88] sm:$0xf0]  ;;  %v1315_v24 = vld [vmem:[%s2505_s0 + $0x118] sm:$0xf] }
   0x7   :  { %452 = vmatpush.bf16.msra.mxu3 %v1304_v12  ;;  %v1172_v21 = vor.u32 %v1466_v19, %v1171_v18  ;;  %v1176_v25 = vor.u32 %v1450_v20, %v1173_v22  ;;  %v1500_v26 = vld [vmem:[%s2505_s0 + $0x194] sm:$0xf0]  ;;  %v1484_v27 = vld [vmem:[%s2505_s0 + $0x11c] sm:$0xf]  ;;  %v1307_v31 = vld [vmem:[%s2505_s0 + $0x110] sm:$0xf] }
   0x8   :  { %v1317_v28 = vld [vmem:[%s2505_s0 + $0x198] sm:$0xf0]  ;;  %v1316_v29 = vor.u32 %v1500_v26, %v1315_v24  ;;  %v1499_v32 = vld [vmem:[%s2505_s0 + $0x18c] sm:$0xf0]  ;;  %v1483_v33 = vld [vmem:[%s2505_s0 + $0x114] sm:$0xf] }
   0x9   :  { %414 = vmatpush.bf16.msra.mxu0 %v1164_v16  ;;  %v1320_v30 = vor.u32 %v1484_v27, %v1317_v28  ;;  %427 = vmatpush.bf16.msra.mxu1 %v1168_v17  ;;  %v1308_v34 = vor.u32 %v1499_v32, %v1307_v31  ;;  %v1309_v35 = vld [vmem:[%s2505_s0 + $0x190] sm:$0xf0]  ;;  %v1187_v36 = vld [vmem:[%s2505_s0 + $0x18] sm:$0xf]  ;;  %v1452_v40 = vld [vmem:[%s2505_s0 + $0x1c] sm:$0xf] }
   0xa   :  { %440 = vmatpush.bf16.msra.mxu2 %v1172_v21  ;;  %v1468_v37 = vld [vmem:[%s2505_s0 + $0x94] sm:$0xf0]  ;;  %v1312_v38 = vor.u32 %v1483_v33, %v1309_v35  ;;  %v1189_v41 = vld [vmem:[%s2505_s0 + $0x98] sm:$0xf0]  ;;  %v1179_v42 = vld [vmem:[%s2505_s0 + $0x10] sm:$0xf] }
   0xb   :  { %453 = vmatpush.bf16.msra.mxu3 %v1176_v25  ;;  %v1188_v39 = vor.u32 %v1468_v37, %v1187_v36  ;;  %v1192_v43 = vor.u32 %v1452_v40, %v1189_v41  ;;  %v1467_v44 = vld [vmem:[%s2505_s0 + $0x8c] sm:$0xf0]  ;;  %v1451_v45 = vld [vmem:[%s2505_s0 + $0x14] sm:$0xf]  ;;  %v1331_v47 = vld [vmem:[%s2505_s0 + $0x128] sm:$0xf] }
   0xc   :  { %1417 = vmatmul.msk.bf16.vlgmr.msra.gmra.mxu0 %vm403_vm0, %v1599_v23  ;;  %v1181_v46 = vld [vmem:[%s2505_s0 + $0x90] sm:$0xf0]  ;;  %1418 = vmatmul.msk.bf16.vlgmr.msra.gmra.mxu1 %vm403_vm0, %v1599_v23  ;;  %v1502_v48 = vld [vmem:[%s2505_s0 + $0x1a4] sm:$0xf0]  ;;  %v1486_v49 = vld [vmem:[%s2505_s0 + $0x12c] sm:$0xf]  ;;  %v1180_v50 = vor.u32 %v1467_v44, %v1179_v42 }
   0xd   :  { %1419 = vmatmul.msk.bf16.vlgmr.msra.gmra.mxu2 %vm403_vm0, %v1599_v23  ;;  %465 = vmatpush.bf16.msrb.mxu0 %v1308_v34  ;;  %v1332_v51 = vor.u32 %v1502_v48, %v1331_v47  ;;  %v1333_v52 = vld [vmem:[%s2505_s0 + $0x1a8] sm:$0xf0]  ;;  %v1323_v53 = vld [vmem:[%s2505_s0 + $0x120] sm:$0xf]  ;;  %v1184_v55 = vor.u32 %v1451_v45, %v1181_v46  ;;  %v1485_v58 = vld [vmem:[%s2505_s0 + $0x124] sm:$0xf] }
   0xe   :  { %491 = vmatpush.bf16.msrb.mxu2 %v1316_v29  ;;  %1420 = vmatmul.msk.bf16.vlgmr.msra.gmra.mxu3 %vm403_vm0, %v1599_v23  ;;  %v1501_v54 = vld [vmem:[%s2505_s0 + $0x19c] sm:$0xf0]  ;;  %v1336_v56 = vor.u32 %v1486_v49, %v1333_v52  ;;  %v1325_v59 = vld [vmem:[%s2505_s0 + $0x1a0] sm:$0xf0]  ;;  %v1203_v60 = vld [vmem:[%s2505_s0 + $0x28] sm:$0xf] }
   0xf   :  { %504 = vmatpush.bf16.msrb.mxu3 %v1320_v30  ;;  %478 = vmatpush.bf16.msrb.mxu1 %v1312_v38  ;;  %v1324_v57 = vor.u32 %v1501_v54, %v1323_v53  ;;  %v1328_v61 = vor.u32 %v1485_v58, %v1325_v59  ;;  %v1470_v62 = vld [vmem:[%s2505_s0 + $0xa4] sm:$0xf0]  ;;  %v1454_v63 = vld [vmem:[%s2505_s0 + $0x2c] sm:$0xf]  ;;  %v1195_v3 = vld [vmem:[%s2505_s0 + $0x20] sm:$0xf] }
  0x10   :  { %v1205_v0 = vld [vmem:[%s2505_s0 + $0xa8] sm:$0xf0]  ;;  %v1204_v1 = vor.u32 %v1470_v62, %v1203_v60  ;;  %v1469_v4 = vld [vmem:[%s2505_s0 + $0x9c] sm:$0xf0]  ;;  %v1453_v5 = vld [vmem:[%s2505_s0 + $0x24] sm:$0xf] }
  0x11   :  { %v1208_v2 = vor.u32 %v1454_v63, %v1205_v0  ;;  %466 = vmatpush.bf16.msrb.mxu0 %v1180_v50  ;;  %v1197_v6 = vld [vmem:[%s2505_s0 + $0xa0] sm:$0xf0]  ;;  %v1196_v7 = vor.u32 %v1469_v4, %v1195_v3  ;;  %v1347_v9 = vld [vmem:[%s2505_s0 + $0x138] sm:$0xf]  ;;  %v1488_v11 = vld [vmem:[%s2505_s0 + $0x13c] sm:$0xf] }
  0x12   :  { %492 = vmatpush.bf16.msrb.mxu2 %v1188_v39  ;;  %v1200_v8 = vor.u32 %v1453_v5, %v1197_v6  ;;  %v1504_v10 = vld [vmem:[%s2505_s0 + $0x1b4] sm:$0xf0]  ;;  %v1349_v12 = vld [vmem:[%s2505_s0 + $0x1b8] sm:$0xf0]  ;;  %v1339_v13 = vld [vmem:[%s2505_s0 + $0x130] sm:$0xf] }
  0x13   :  { %505 = vmatpush.bf16.msrb.mxu3 %v1192_v43  ;;  %479 = vmatpush.bf16.msrb.mxu1 %v1184_v55  ;;  %v1503_v14 = vld [vmem:[%s2505_s0 + $0x1ac] sm:$0xf0]  ;;  %v1487_v15 = vld [vmem:[%s2505_s0 + $0x134] sm:$0xf]  ;;  %v1348_v17 = vor.u32 %v1504_v10, %v1347_v9  ;;  %v1352_v18 = vor.u32 %v1488_v11, %v1349_v12  ;;  %v1219_v20 = vld [vmem:[%s2505_s0 + $0x38] sm:$0xf] }
  0x14   :  { %v1341_v16 = vld [vmem:[%s2505_s0 + $0x1b0] sm:$0xf0]  ;;  %v1340_v19 = vor.u32 %v1503_v14, %v1339_v13  ;;  %v1472_v21 = vld [vmem:[%s2505_s0 + $0xb4] sm:$0xf0]  ;;  %v1456_v22 = vld [vmem:[%s2505_s0 + $0x3c] sm:$0xf] }
  0x15   :  { %517 = vmatpush.bf16.msra.mxu0 %v1324_v57  ;;  %v1344_v24 = vor.u32 %v1487_v15, %v1341_v16  ;;  %v1221_v25 = vld [vmem:[%s2505_s0 + $0xb8] sm:$0xf0]  ;;  %v1211_v26 = vld [vmem:[%s2505_s0 + $0x30] sm:$0xf]  ;;  %v1455_v28 = vld [vmem:[%s2505_s0 + $0x34] sm:$0xf]  ;;  %v1220_v30 = vor.u32 %v1472_v21, %v1219_v20 }
  0x16   :  { %543 = vmatpush.bf16.msra.mxu2 %v1332_v51  ;;  %v1471_v27 = vld [vmem:[%s2505_s0 + $0xac] sm:$0xf0]  ;;  %v1213_v29 = vld [vmem:[%s2505_s0 + $0xb0] sm:$0xf0]  ;;  %v1224_v31 = vor.u32 %v1456_v22, %v1221_v25  ;;  %v1363_v34 = vld [vmem:[%s2505_s0 + $0x148] sm:$0xf] }
  0x17   :  { %556 = vmatpush.bf16.msra.mxu3 %v1336_v56  ;;  %530 = vmatpush.bf16.msra.mxu1 %v1328_v61  ;;  %v1212_v32 = vor.u32 %v1471_v27, %v1211_v26  ;;  %v1216_v33 = vor.u32 %v1455_v28, %v1213_v29  ;;  %v1506_v35 = vld [vmem:[%s2505_s0 + $0x1c4] sm:$0xf0]  ;;  %v1490_v36 = vld [vmem:[%s2505_s0 + $0x14c] sm:$0xf]  ;;  %v1355_v38 = vld [vmem:[%s2505_s0 + $0x140] sm:$0xf] }
  0x18   :  { %v1365_v37 = vld [vmem:[%s2505_s0 + $0x1c8] sm:$0xf0]  ;;  %v1505_v39 = vld [vmem:[%s2505_s0 + $0x1bc] sm:$0xf0]  ;;  %v1489_v40 = vld [vmem:[%s2505_s0 + $0x144] sm:$0xf]  ;;  %v1364_v42 = vor.u32 %v1506_v35, %v1363_v34 }
  0x19   :  { %518 = vmatpush.bf16.msra.mxu0 %v1196_v7  ;;  %v1357_v41 = vld [vmem:[%s2505_s0 + $0x1c0] sm:$0xf0]  ;;  %v1368_v43 = vor.u32 %v1490_v36, %v1365_v37  ;;  %v1356_v44 = vor.u32 %v1505_v39, %v1355_v38  ;;  %v1235_v45 = vld [vmem:[%s2505_s0 + $0x48] sm:$0xf]  ;;  %v1458_v47 = vld [vmem:[%s2505_s0 + $0x4c] sm:$0xf] }
  0x1a   :  { %544 = vmatpush.bf16.msra.mxu2 %v1204_v1  ;;  %v1474_v46 = vld [vmem:[%s2505_s0 + $0xc4] sm:$0xf0]  ;;  %v1360_v48 = vor.u32 %v1489_v40, %v1357_v41  ;;  %v1237_v49 = vld [vmem:[%s2505_s0 + $0xc8] sm:$0xf0]  ;;  %v1227_v50 = vld [vmem:[%s2505_s0 + $0x40] sm:$0xf] }
  0x1b   :  { %557 = vmatpush.bf16.msra.mxu3 %v1208_v2  ;;  %531 = vmatpush.bf16.msra.mxu1 %v1200_v8  ;;  %v1473_v51 = vld [vmem:[%s2505_s0 + $0xbc] sm:$0xf0]  ;;  %v1457_v52 = vld [vmem:[%s2505_s0 + $0x44] sm:$0xf]  ;;  %v1236_v54 = vor.u32 %v1474_v46, %v1235_v45  ;;  %v1240_v55 = vor.u32 %v1458_v47, %v1237_v49  ;;  %v1379_v58 = vld [vmem:[%s2505_s0 + $0x158] sm:$0xf] }
  0x1c   :  { %1421 = vmatmul.msk.bf16.vlgmr.msrb.gmra.mxu0 %vm403_vm0, %v1599_v23  ;;  %1422 = vmatmul.msk.bf16.vlgmr.msrb.gmra.mxu1 %vm403_vm0, %v1599_v23  ;;  %v1229_v53 = vld [vmem:[%s2505_s0 + $0xc0] sm:$0xf0]  ;;  %v1228_v56 = vor.u32 %v1473_v51, %v1227_v50  ;;  %v1508_v59 = vld [vmem:[%s2505_s0 + $0x1d4] sm:$0xf0]  ;;  %v1492_v60 = vld [vmem:[%s2505_s0 + $0x15c] sm:$0xf] }
  0x1d   :  { %1423 = vmatmul.msk.bf16.vlgmr.msrb.gmra.mxu2 %vm403_vm0, %v1599_v23  ;;  %569 = vmatpush.bf16.msrb.mxu0 %v1340_v19  ;;  %v1232_v57 = vor.u32 %v1457_v52, %v1229_v53  ;;  %v1381_v61 = vld [vmem:[%s2505_s0 + $0x1d8] sm:$0xf0]  ;;  %v1371_v62 = vld [vmem:[%s2505_s0 + $0x150] sm:$0xf]  ;;  %v1491_v0 = vld [vmem:[%s2505_s0 + $0x154] sm:$0xf]  ;;  %v1380_v2 = vor.u32 %v1508_v59, %v1379_v58 }
  0x1e   :  { %1424 = vmatmul.msk.bf16.vlgmr.msrb.gmra.mxu3 %vm403_vm0, %v1599_v23  ;;  %595 = vmatpush.bf16.msrb.mxu2 %v1348_v17  ;;  %v1507_v63 = vld [vmem:[%s2505_s0 + $0x1cc] sm:$0xf0]  ;;  %v1373_v1 = vld [vmem:[%s2505_s0 + $0x1d0] sm:$0xf0]  ;;  %v1384_v3 = vor.u32 %v1492_v60, %v1381_v61  ;;  %v1251_v5 = vld [vmem:[%s2505_s0 + $0x58] sm:$0xf] }
  0x1f   :  { %608 = vmatpush.bf16.msrb.mxu3 %v1352_v18  ;;  %582 = vmatpush.bf16.msrb.mxu1 %v1344_v24  ;;  %v1372_v4 = vor.u32 %v1507_v63, %v1371_v62  ;;  %v1476_v6 = vld [vmem:[%s2505_s0 + $0xd4] sm:$0xf0]  ;;  %v1460_v7 = vld [vmem:[%s2505_s0 + $0x5c] sm:$0xf]  ;;  %v1376_v8 = vor.u32 %v1491_v0, %v1373_v1  ;;  %v1243_v10 = vld [vmem:[%s2505_s0 + $0x50] sm:$0xf] }
  0x20   :  { %v1253_v9 = vld [vmem:[%s2505_s0 + $0xd8] sm:$0xf0]  ;;  %v1475_v11 = vld [vmem:[%s2505_s0 + $0xcc] sm:$0xf0]  ;;  %v1459_v12 = vld [vmem:[%s2505_s0 + $0x54] sm:$0xf]  ;;  %v1252_v14 = vor.u32 %v1476_v6, %v1251_v5 }
  0x21   :  { %570 = vmatpush.bf16.msrb.mxu0 %v1212_v32  ;;  %v1245_v13 = vld [vmem:[%s2505_s0 + $0xd0] sm:$0xf0]  ;;  %v1256_v15 = vor.u32 %v1460_v7, %v1253_v9  ;;  %v1244_v16 = vor.u32 %v1475_v11, %v1243_v10  ;;  %v1395_v18 = vld [vmem:[%s2505_s0 + $0x168] sm:$0xf]  ;;  %v1494_v20 = vld [vmem:[%s2505_s0 + $0x16c] sm:$0xf] }
  0x22   :  { %596 = vmatpush.bf16.msrb.mxu2 %v1220_v30  ;;  %v1248_v17 = vor.u32 %v1459_v12, %v1245_v13  ;;  %v1510_v19 = vld [vmem:[%s2505_s0 + $0x1e4] sm:$0xf0]  ;;  %v1397_v21 = vld [vmem:[%s2505_s0 + $0x1e8] sm:$0xf0]  ;;  %v1387_v22 = vld [vmem:[%s2505_s0 + $0x160] sm:$0xf] }
  0x23   :  { %609 = vmatpush.bf16.msrb.mxu3 %v1224_v31  ;;  %583 = vmatpush.bf16.msrb.mxu1 %v1216_v33  ;;  %v1509_v24 = vld [vmem:[%s2505_s0 + $0x1dc] sm:$0xf0]  ;;  %v1493_v25 = vld [vmem:[%s2505_s0 + $0x164] sm:$0xf]  ;;  %v1396_v27 = vor.u32 %v1510_v19, %v1395_v18  ;;  %v1400_v28 = vor.u32 %v1494_v20, %v1397_v21  ;;  %v1267_v30 = vld [vmem:[%s2505_s0 + $0x68] sm:$0xf] }
  0x24   :  { %v1389_v26 = vld [vmem:[%s2505_s0 + $0x1e0] sm:$0xf0]  ;;  %v1388_v29 = vor.u32 %v1509_v24, %v1387_v22  ;;  %v1478_v31 = vld [vmem:[%s2505_s0 + $0xe4] sm:$0xf0]  ;;  %v1462_v32 = vld [vmem:[%s2505_s0 + $0x6c] sm:$0xf] }
  0x25   :  { %v1392_v33 = vor.u32 %v1493_v25, %v1389_v26  ;;  %v1269_v34 = vld [vmem:[%s2505_s0 + $0xe8] sm:$0xf0]  ;;  %v1259_v35 = vld [vmem:[%s2505_s0 + $0x60] sm:$0xf]  ;;  %v1461_v37 = vld [vmem:[%s2505_s0 + $0x64] sm:$0xf]  ;;  %v1268_v39 = vor.u32 %v1478_v31, %v1267_v30 }
  0x26   :  { %v1477_v36 = vld [vmem:[%s2505_s0 + $0xdc] sm:$0xf0]  ;;  %v1261_v38 = vld [vmem:[%s2505_s0 + $0xe0] sm:$0xf0]  ;;  %v1272_v40 = vor.u32 %v1462_v32, %v1269_v34  ;;  %v1496_v45 = vld [vmem:[%s2505_s0 + $0x17c] sm:$0xf] }
  0x27   :  { %v1260_v41 = vor.u32 %v1477_v36, %v1259_v35  ;;  %v1413_v46 = vld [vmem:[%s2505_s0 + $0x1f8] sm:$0xf0]  ;;  %v1403_v47 = vld [vmem:[%s2505_s0 + $0x170] sm:$0xf]  ;;  %v1495_v49 = vld [vmem:[%s2505_s0 + $0x174] sm:$0xf] }
  0x28   :  { %v1405_v50 = vld [vmem:[%s2505_s0 + $0x1f0] sm:$0xf0]  ;;  %v1416_v52 = vor.u32 %v1496_v45, %v1413_v46  ;;  %v1285_v58 = vld [vmem:[%s2505_s0 + $0xf8] sm:$0xf0]  ;;  %v1275_v59 = vld [vmem:[%s2505_s0 + $0x70] sm:$0xf] }
  0x29   :  { %v1479_v60 = vld [vmem:[%s2505_s0 + $0xec] sm:$0xf0]  ;;  %v1463_v61 = vld [vmem:[%s2505_s0 + $0x74] sm:$0xf] }
  0x2a   :  { %v1277_v62 = vld [vmem:[%s2505_s0 + $0xf0] sm:$0xf0]  ;;  %v1276_v1 = vor.u32 %v1479_v60, %v1275_v59 }
  0x2c   :  { %1425 = vmatmul.msk.bf16.vlgmr.msra.gmra.mxu0 %vm403_vm0, %v1599_v23  ;;  %1426 = vmatmul.msk.bf16.vlgmr.msra.gmra.mxu1 %vm403_vm0, %v1599_v23 }
  0x2d   :  { %1427 = vmatmul.msk.bf16.vlgmr.msra.gmra.mxu2 %vm403_vm0, %v1599_v23  ;;  %621 = vmatpush.bf16.msra.mxu0 %v1356_v44  ;;  %v1512_v44 = vld [vmem:[%s2505_s0 + $0x1f4] sm:$0xf0] }
  0x2e   :  { %1428 = vmatmul.msk.bf16.vlgmr.msra.gmra.mxu3 %vm403_vm0, %v1599_v23  ;;  %647 = vmatpush.bf16.msra.mxu2 %v1364_v42  ;;  %v1264_v42 = vor.u32 %v1461_v37, %v1261_v38 }
  0x2f   :  { %660 = vmatpush.bf16.msra.mxu3 %v1368_v43  ;;  %634 = vmatpush.bf16.msra.mxu1 %v1360_v48  ;;  %v1411_v43 = vld [vmem:[%s2505_s0 + $0x178] sm:$0xf]  ;;  %v1511_v48 = vld [vmem:[%s2505_s0 + $0x1ec] sm:$0xf0] }
  0x30   :  { %v1412_v51 = vor.u32 %v1512_v44, %v1411_v43  ;;  %v1404_v53 = vor.u32 %v1511_v48, %v1403_v47 }
  0x31   :  { %622 = vmatpush.bf16.msra.mxu0 %v1228_v56  ;;  %v1464_v56 = vld [vmem:[%s2505_s0 + $0x7c] sm:$0xf] }
  0x32   :  { %648 = vmatpush.bf16.msra.mxu2 %v1236_v54  ;;  %v1283_v54 = vld [vmem:[%s2505_s0 + $0x78] sm:$0xf]  ;;  %v1288_v0 = vor.u32 %v1464_v56, %v1285_v58 }
  0x33   :  { %661 = vmatpush.bf16.msra.mxu3 %v1240_v55  ;;  %635 = vmatpush.bf16.msra.mxu1 %v1232_v57  ;;  %v1480_v55 = vld [vmem:[%s2505_s0 + $0xf4] sm:$0xf0]  ;;  %v1408_v57 = vor.u32 %v1495_v49, %v1405_v50 }
  0x34   :  { %v1284_v63 = vor.u32 %v1480_v55, %v1283_v54 }
  0x3c   :  { %1429 = vmatmul.msk.bf16.vlgmr.msrb.gmra.mxu0 %vm403_vm0, %v1599_v23  ;;  %1430 = vmatmul.msk.bf16.vlgmr.msrb.gmra.mxu1 %vm403_vm0, %v1599_v23 }
  0x3d   :  { %1431 = vmatmul.msk.bf16.vlgmr.msrb.gmra.mxu2 %vm403_vm0, %v1599_v23  ;;  %673 = vmatpush.bf16.msrb.mxu0 %v1372_v4 }
  0x3e   :  { %1432 = vmatmul.msk.bf16.vlgmr.msrb.gmra.mxu3 %vm403_vm0, %v1599_v23  ;;  %699 = vmatpush.bf16.msrb.mxu2 %v1380_v2  ;;  %v1280_v2 = vor.u32 %v1463_v61, %v1277_v62 }
  0x3f   :  { %712 = vmatpush.bf16.msrb.mxu3 %v1384_v3  ;;  %686 = vmatpush.bf16.msrb.mxu1 %v1376_v8 }
  0x41   :  { %674 = vmatpush.bf16.msrb.mxu0 %v1244_v16 }
  0x42   :  { %700 = vmatpush.bf16.msrb.mxu2 %v1252_v14 }
  0x43   :  { %713 = vmatpush.bf16.msrb.mxu3 %v1256_v15  ;;  %687 = vmatpush.bf16.msrb.mxu1 %v1248_v17 }
  0x4c   :  { %1433 = vmatmul.msk.bf16.vlgmr.msra.gmra.mxu0 %vm403_vm0, %v1599_v23  ;;  %1434 = vmatmul.msk.bf16.vlgmr.msra.gmra.mxu1 %vm403_vm0, %v1599_v23 }
  0x4d   :  { %1435 = vmatmul.msk.bf16.vlgmr.msra.gmra.mxu2 %vm403_vm0, %v1599_v23  ;;  %725 = vmatpush.bf16.msra.mxu0 %v1388_v29 }
  0x4e   :  { %1436 = vmatmul.msk.bf16.vlgmr.msra.gmra.mxu3 %vm403_vm0, %v1599_v23  ;;  %751 = vmatpush.bf16.msra.mxu2 %v1396_v27 }
  0x4f   :  { %764 = vmatpush.bf16.msra.mxu3 %v1400_v28  ;;  %738 = vmatpush.bf16.msra.mxu1 %v1392_v33 }
  0x51   :  { %726 = vmatpush.bf16.msra.mxu0 %v1260_v41 }
  0x52   :  { %752 = vmatpush.bf16.msra.mxu2 %v1268_v39 }
  0x53   :  { %765 = vmatpush.bf16.msra.mxu3 %v1272_v40  ;;  %739 = vmatpush.bf16.msra.mxu1 %v1264_v42 }
  0x5c   :  { %1437 = vmatmul.msk.bf16.vlgmr.msrb.gmra.mxu0 %vm403_vm0, %v1599_v23  ;;  %1438 = vmatmul.msk.bf16.vlgmr.msrb.gmra.mxu1 %vm403_vm0, %v1599_v23 }
  0x5d   :  { %1439 = vmatmul.msk.bf16.vlgmr.msrb.gmra.mxu2 %vm403_vm0, %v1599_v23  ;;  %777 = vmatpush.bf16.msrb.mxu0 %v1404_v53 }
  0x5e   :  { %1440 = vmatmul.msk.bf16.vlgmr.msrb.gmra.mxu3 %vm403_vm0, %v1599_v23  ;;  %803 = vmatpush.bf16.msrb.mxu2 %v1412_v51 }
  0x5f   :  { %816 = vmatpush.bf16.msrb.mxu3 %v1416_v52  ;;  %790 = vmatpush.bf16.msrb.mxu1 %v1408_v57 }
  0x61   :  { %778 = vmatpush.bf16.msrb.mxu0 %v1276_v1 }
  0x62   :  { %804 = vmatpush.bf16.msrb.mxu2 %v1284_v63 }
  0x63   :  { %817 = vmatpush.bf16.msrb.mxu3 %v1288_v0  ;;  %791 = vmatpush.bf16.msrb.mxu1 %v1280_v2 }
  0x6c   :  { %1441 = vmatmul.msk.bf16.vlgmr.msra.gmra.mxu0 %vm403_vm0, %v1599_v23  ;;  %1442 = vmatmul.msk.bf16.vlgmr.msra.gmra.mxu1 %vm403_vm0, %v1599_v23 }
  0x6d   :  { %1443 = vmatmul.msk.bf16.vlgmr.msra.gmra.mxu2 %vm403_vm0, %v1599_v23 }
  0x6e   :  { %1444 = vmatmul.msk.bf16.vlgmr.msra.gmra.mxu3 %vm403_vm0, %v1599_v23 }
  0x7c   :  { %1445 = vmatmul.msk.bf16.vlgmr.msrb.gmra.mxu0 %vm403_vm0, %v1599_v23  ;;  %1446 = vmatmul.msk.bf16.vlgmr.msrb.gmra.mxu1 %vm403_vm0, %v1599_v23 }
  0x7d   :  { %1447 = vmatmul.msk.bf16.vlgmr.msrb.gmra.mxu2 %vm403_vm0, %v1599_v23 }
  0x7e   :  { %1448 = vmatmul.msk.bf16.vlgmr.msrb.gmra.mxu3 %vm403_vm0, %v1599_v23 }
  0x89   :  { %v2001_v3 = vpop.f32.mrf.mxu0  ;;  %v2003_v4 = vpop.f32.mrf.mxu1 }
  0x8a   :  { %v823_v20 = vadd.f32 %v2003_v4, %v2001_v3  ;;  %v866_v21 = vmul.f32 %v2001_v3, %v2001_v3  ;;  %v867_v22 = vmul.f32 %v2003_v4, %v2003_v4 }
  0x8c   :  { %v898_v27 = vadd.f32 %v867_v22, %v866_v21 }
  0x90   :  { %v2005_v5 = vpop.f32.mrf.mxu2 }
  0x91   :  { %v2007_v6 = vpop.f32.mrf.mxu3  ;;  %v418_v7 = vpop.f32.mrf.mxu0  ;;  %v824_v24 = vadd.f32 %v823_v20, %v2005_v5  ;;  %v868_v25 = vmul.f32 %v2005_v5, %v2005_v5 }
  0x92   :  { %v431_v8 = vpop.f32.mrf.mxu1  ;;  %v869_v33 = vmul.f32 %v2007_v6, %v2007_v6 }
  0x93   :  { %v825_v28 = vadd.f32 %v824_v24, %v2007_v6  ;;  %v899_v32 = vadd.f32 %v898_v27, %v868_v25 }
  0x95   :  { %v900_v36 = vadd.f32 %v899_v32, %v869_v33 }
  0x98   :  { %v444_v9 = vpop.f32.mrf.mxu2 }
  0x99   :  { %v457_v10 = vpop.f32.mrf.mxu3  ;;  %v2009_v11 = vpop.f32.mrf.mxu0 }
  0x9a   :  { %v2011_v12 = vpop.f32.mrf.mxu1  ;;  %v826_v34 = vadd.f32 %v825_v28, %v2009_v11  ;;  %v870_v35 = vmul.f32 %v2009_v11, %v2009_v11 }
  0x9b   :  { %v871_v40 = vmul.f32 %v2011_v12, %v2011_v12 }
  0x9c   :  { %v827_v37 = vadd.f32 %v826_v34, %v2011_v12  ;;  %v901_v39 = vadd.f32 %v900_v36, %v870_v35 }
  0x9e   :  { %v902_v46 = vadd.f32 %v901_v39, %v871_v40 }
  0xa0   :  { %v2013_v13 = vpop.f32.mrf.mxu2 }
  0xa1   :  { %v2015_v14 = vpop.f32.mrf.mxu3  ;;  %v470_v23 = vpop.f32.mrf.mxu0  ;;  %v828_v41 = vadd.f32 %v827_v37, %v2013_v13  ;;  %v872_v45 = vmul.f32 %v2013_v13, %v2013_v13 }
  0xa2   :  { %v483_v15 = vpop.f32.mrf.mxu1  ;;  %v873_v49 = vmul.f32 %v2015_v14, %v2015_v14 }
  0xa3   :  { %v829_v47 = vadd.f32 %v828_v41, %v2015_v14  ;;  %v903_v48 = vadd.f32 %v902_v46, %v872_v45 }
  0xa5   :  { %v904_v56 = vadd.f32 %v903_v48, %v873_v49 }
  0xa8   :  { %v496_v16 = vpop.f32.mrf.mxu2 }
  0xa9   :  { %v509_v17 = vpop.f32.mrf.mxu3  ;;  %v2017_v18 = vpop.f32.mrf.mxu0 }
  0xaa   :  { %v2019_v19 = vpop.f32.mrf.mxu1  ;;  %v830_v50 = vadd.f32 %v829_v47, %v2017_v18  ;;  %v874_v52 = vmul.f32 %v2017_v18, %v2017_v18 }
  0xab   :  { %v875_v59 = vmul.f32 %v2019_v19, %v2019_v19 }
  0xac   :  { %v831_v57 = vadd.f32 %v830_v50, %v2019_v19  ;;  %v905_v58 = vadd.f32 %v904_v56, %v874_v52 }
  0xae   :  { %v906_v63 = vadd.f32 %v905_v58, %v875_v59 }
  0xb0   :  { %v2030_v26 = vpop.f32.mrf.mxu2 }
  0xb1   :  { %v2033_v29 = vpop.f32.mrf.mxu3  ;;  %v522_v30 = vpop.f32.mrf.mxu0  ;;  %v832_v60 = vadd.f32 %v831_v57, %v2030_v26  ;;  %v876_v61 = vmul.f32 %v2030_v26, %v2030_v26 }
  0xb2   :  { %v535_v31 = vpop.f32.mrf.mxu1  ;;  %v877_v9 = vmul.f32 %v2033_v29, %v2033_v29 }
  0xb3   :  { %v833_v0 = vadd.f32 %v832_v60, %v2033_v29  ;;  %v907_v8 = vadd.f32 %v906_v63, %v876_v61 }
  0xb5   :  { %v908_v15 = vadd.f32 %v907_v8, %v877_v9 }
  0xb8   :  { %v548_v38 = vpop.f32.mrf.mxu2 }
  0xb9   :  { %v561_v42 = vpop.f32.mrf.mxu3  ;;  %v2044_v43 = vpop.f32.mrf.mxu0 }
  0xba   :  { %v2046_v44 = vpop.f32.mrf.mxu1  ;;  %v834_v10 = vadd.f32 %v833_v0, %v2044_v43  ;;  %v878_v23 = vmul.f32 %v2044_v43, %v2044_v43 }
  0xbb   :  { %v879_v21 = vmul.f32 %v2046_v44, %v2046_v44 }
  0xbc   :  { %v835_v16 = vadd.f32 %v834_v10, %v2046_v44  ;;  %v909_v20 = vadd.f32 %v908_v15, %v878_v23 }
  0xbe   :  { %v910_v30 = vadd.f32 %v909_v20, %v879_v21 }
  0xc0   :  { %v2054_v51 = vpop.f32.mrf.mxu2 }
  0xc1   :  { %v2058_v53 = vpop.f32.mrf.mxu3  ;;  %v574_v54 = vpop.f32.mrf.mxu0  ;;  %v836_v22 = vadd.f32 %v835_v16, %v2054_v51  ;;  %v880_v28 = vmul.f32 %v2054_v51, %v2054_v51 }
  0xc2   :  { %v587_v55 = vpop.f32.mrf.mxu1  ;;  %v881_v33 = vmul.f32 %v2058_v53, %v2058_v53 }
  0xc3   :  { %v837_v31 = vadd.f32 %v836_v22, %v2058_v53  ;;  %v911_v32 = vadd.f32 %v910_v30, %v880_v28 }
  0xc5   :  { %v912_v40 = vadd.f32 %v911_v32, %v881_v33 }
  0xc8   :  { %v600_v62 = vpop.f32.mrf.mxu2 }
  0xc9   :  { %v613_v1 = vpop.f32.mrf.mxu3  ;;  %v2067_v2 = vpop.f32.mrf.mxu0 }
  0xca   :  { %v2069_v7 = vpop.f32.mrf.mxu1  ;;  %v838_v34 = vadd.f32 %v837_v31, %v2067_v2  ;;  %v882_v36 = vmul.f32 %v2067_v2, %v2067_v2 }
  0xcb   :  { %v883_v45 = vmul.f32 %v2069_v7, %v2069_v7 }
  0xcc   :  { %v839_v41 = vadd.f32 %v838_v34, %v2069_v7  ;;  %v913_v42 = vadd.f32 %v912_v40, %v882_v36 }
  0xce   :  { %v914_v49 = vadd.f32 %v913_v42, %v883_v45 }
  0xd0   :  { %v2077_v17 = vpop.f32.mrf.mxu2 }
  0xd1   :  { %v2082_v24 = vpop.f32.mrf.mxu3  ;;  %v626_v25 = vpop.f32.mrf.mxu0  ;;  %v840_v46 = vadd.f32 %v839_v41, %v2077_v17  ;;  %v884_v47 = vmul.f32 %v2077_v17, %v2077_v17 }
  0xd2   :  { %v639_v27 = vpop.f32.mrf.mxu1  ;;  %v885_v57 = vmul.f32 %v2082_v24, %v2082_v24 }
  0xd3   :  { %v841_v50 = vadd.f32 %v840_v46, %v2082_v24  ;;  %v915_v56 = vadd.f32 %v914_v49, %v884_v47 }
  0xd5   :  { %v916_v60 = vadd.f32 %v915_v56, %v885_v57 }
  0xd8   :  { %v652_v35 = vpop.f32.mrf.mxu2 }
  0xd9   :  { %v665_v37 = vpop.f32.mrf.mxu3  ;;  %v2092_v38 = vpop.f32.mrf.mxu0 }
  0xda   :  { %v2094_v39 = vpop.f32.mrf.mxu1  ;;  %v842_v58 = vadd.f32 %v841_v50, %v2092_v38  ;;  %v886_v59 = vmul.f32 %v2092_v38, %v2092_v38 }
  0xdb   :  { %v887_v0 = vmul.f32 %v2094_v39, %v2094_v39 }
  0xdc   :  { %v843_v61 = vadd.f32 %v842_v58, %v2094_v39  ;;  %v917_v63 = vadd.f32 %v916_v60, %v886_v59 }
  0xde   :  { %v918_v15 = vadd.f32 %v917_v63, %v887_v0 }
  0xe0   :  { %v2102_v48 = vpop.f32.mrf.mxu2 }
  0xe1   :  { %v2105_v52 = vpop.f32.mrf.mxu3  ;;  %v678_v54 = vpop.f32.mrf.mxu0  ;;  %v844_v1 = vadd.f32 %v843_v61, %v2102_v48  ;;  %v888_v23 = vmul.f32 %v2102_v48, %v2102_v48 }
  0xe2   :  { %v691_v55 = vpop.f32.mrf.mxu1  ;;  %v889_v21 = vmul.f32 %v2105_v52, %v2105_v52 }
  0xe3   :  { %v845_v16 = vadd.f32 %v844_v1, %v2105_v52  ;;  %v919_v20 = vadd.f32 %v918_v15, %v888_v23 }
  0xe5   :  { %v920_v32 = vadd.f32 %v919_v20, %v889_v21 }
  0xe8   :  { %v704_v62 = vpop.f32.mrf.mxu2 }
  0xe9   :  { %v717_v8 = vpop.f32.mrf.mxu3  ;;  %v2116_v9 = vpop.f32.mrf.mxu0 }
  0xea   :  { %v2118_v10 = vpop.f32.mrf.mxu1  ;;  %v846_v22 = vadd.f32 %v845_v16, %v2116_v9  ;;  %v890_v27 = vmul.f32 %v2116_v9, %v2116_v9 }
  0xeb   :  { %v891_v35 = vmul.f32 %v2118_v10, %v2118_v10 }
  0xec   :  { %v847_v33 = vadd.f32 %v846_v22, %v2118_v10  ;;  %v921_v34 = vadd.f32 %v920_v32, %v890_v27 }
  0xee   :  { %v922_v41 = vadd.f32 %v921_v34, %v891_v35  ;;  %v1522_v35 = vmov 0  }
  0xef   :  { %1515 = vset.pattern.permute.xlu1 %v1522_v35  ;;  %1516 = vset.pattern.permute.xlu0 %v1522_v35 }
  0xf0   :  { %v2126_v25 = vpop.f32.mrf.mxu2 }
  0xf1   :  { %v2130_v28 = vpop.f32.mrf.mxu3  ;;  %v730_v30 = vpop.f32.mrf.mxu0  ;;  %v848_v36 = vadd.f32 %v847_v33, %v2126_v25  ;;  %v892_v37 = vmul.f32 %v2126_v25, %v2126_v25 }
  0xf2   :  { %v743_v31 = vpop.f32.mrf.mxu1  ;;  %v893_v50 = vmul.f32 %v2130_v28, %v2130_v28 }
  0xf3   :  { %v849_v42 = vadd.f32 %v848_v36, %v2130_v28  ;;  %v923_v49 = vadd.f32 %v922_v41, %v892_v37  ;;  %v1521_v31 = vmov 4066.0  }
  0xf4   :  { %1517 = vrcp.f32 %v1521_v31 }
  0xf5   :  { %v924_v56 = vadd.f32 %v923_v49, %v893_v50 }
  0xf8   :  { %v756_v40 = vpop.f32.mrf.mxu2 }
  0xf9   :  { %v769_v45 = vpop.f32.mrf.mxu3  ;;  %v2139_v46 = vpop.f32.mrf.mxu0 }
  0xfa   :  { %v2141_v47 = vpop.f32.mrf.mxu1  ;;  %v850_v54 = vadd.f32 %v849_v42, %v2139_v46  ;;  %v894_v55 = vmul.f32 %v2139_v46, %v2139_v46  ;;  %v1518_v32 = vpop.eup %1517 }
  0xfb   :  { %v895_v60 = vmul.f32 %v2141_v47, %v2141_v47  ;;  %v859_v33 = vmul.f32 4066.0, %v1518_v32  ;;  %vm863_vm2 = vweird.f32 %v1518_v32 }
  0xfc   :  { %v851_v57 = vadd.f32 %v850_v54, %v2141_v47  ;;  %v925_v59 = vadd.f32 %v924_v56, %v894_v55 }
  0xfd   :  { %v860_v34 = vsub.f32 1.0, %v859_v33 }
  0xfe   :  { %v926_v16 = vadd.f32 %v925_v59, %v895_v60 }
  0xff   :  { %v861_v36 = vmul.f32 %v1518_v32, %v860_v34 }
 0x100   :  { %v2149_v58 = vpop.f32.mrf.mxu2 }
 0x101   :  { %v2153_v61 = vpop.f32.mrf.mxu3  ;;  %v782_v62 = vpop.f32.mrf.mxu0  ;;  %v852_v63 = vadd.f32 %v851_v57, %v2149_v58  ;;  %v896_v8 = vmul.f32 %v2149_v58, %v2149_v58  ;;  %v862_v37 = vadd.f32 %v1518_v32, %v861_v36 }
 0x102   :  { %v795_v0 = vpop.f32.mrf.mxu1  ;;  %v854_v1 = vsel %vm853_vm1, %v2153_v61, 0.0  ;;  %v897_v15 = vmul.f32 %v2153_v61, %v2153_v61 }
 0x103   :  { %v855_v23 = vadd.f32 %v854_v1, %v852_v63  ;;  %v927_v20 = vadd.f32 %v926_v16, %v896_v8  ;;  %v864_v41 = vsel %vm863_vm2, %v1518_v32, %v862_v37  ;;  %v936_v0 = vld [vmem:[%s2507_s2] sm:$0xff] }
 0x104   :  { %v928_v22 = vsel %vm853_vm1, %v897_v15, 0.0  ;;  %v949_v16 = vld [vmem:[%s2508_s3] sm:$0xff] }
 0x105   :  { %856 = vadd.xlane.f32.xlu0 %v855_v23  ;;  %v929_v30 = vadd.f32 %v928_v22, %v927_v20 }
 0x108   :  { %v808_v21 = vpop.f32.mrf.mxu2 }
 0x109   :  { %v821_v27 = vpop.f32.mrf.mxu3 }
 0x10d   :  { %930 = vadd.xlane.f32.xlu0 %v929_v30 }
 0x178   :  { %v857_v40 = vpop.xlane.xlu0 %856 }
 0x179   :  { %v865_v42 = vmul.f32 %v864_v41, %v857_v40 }
 0x17b   :  { %v933_v49 = vmul.f32 %v865_v42, %v865_v42 }
 0x180   :  { %v931_v45 = vpop.xlane.xlu0 %930 }
 0x181   :  { %v932_v50 = vmul.f32 %v931_v45, %v864_v41 }
 0x183   :  { %v934_v54 = vsub.f32 %v932_v50, %v933_v49 }
 0x185   :  { %v935_v55 = vmax.f32 %v934_v54, 0.0 }
 0x187   :  { %v937_v56 = vadd.f32 1e-05, %v935_v55 }
 0x189   :  { %1519 = vrsqrt.f32 %v937_v56  ;;  %vm944_vm4 = vweird.f32 %v937_v56 }
 0x18f   :  { %v1520_v57 = vpop.eup %1519 }
 0x190   :  { %v939_v59 = vmul.f32 %v1520_v57, %v937_v56  ;;  %vm945_vm3 = vweird.f32 %v1520_v57 }
 0x191   :  { %vm946_vm5 = vmor %vm944_vm4, %vm945_vm3 }
 0x192   :  { %v940_v60 = vmul.f32 %v1520_v57, %v939_v59 }
 0x194   :  { %v941_v62 = vmul.f32 0.5, %v940_v60 }
 0x196   :  { %v942_v63 = vsub.f32 1.5, %v941_v62 }
 0x198   :  { %v943_v1 = vmul.f32 %v1520_v57, %v942_v63 }
 0x19a   :  { %v947_v8 = vsel %vm946_vm5, %v1520_v57, %v943_v1 }
 0x19b   :  { %v948_v23 = vmul.f32 %v947_v8, %v936_v0 }
 0x19d   :  { %954 = vperm.xlu1 %1515, %v948_v23   ;;  %v950_v15 = vmul.f32 %v948_v23, %v865_v42 }
 0x19f   :  { %v951_v20 = vsub.f32 %v949_v16, %v950_v15 }
 0x1a5   :  { %991 = vperm.xlu1 %1515, %v951_v20  }
 0x20f   :  { %v955_v21 = vpop.permute.xlu1 %954 }
 0x210   :  { %v957_v22 = vmul.f32 %v955_v21, %v2001_v3  ;;  %v958_v27 = vmul.f32 %v955_v21, %v2003_v4  ;;  %v959_v30 = vmul.f32 %v955_v21, %v2005_v5  ;;  %v960_v31 = vmul.f32 %v955_v21, %v2007_v6 }
 0x211   :  { %v961_v32 = vmul.f32 %v955_v21, %v2009_v11  ;;  %v962_v33 = vmul.f32 %v955_v21, %v2011_v12  ;;  %v963_v34 = vmul.f32 %v955_v21, %v2013_v13  ;;  %v964_v35 = vmul.f32 %v955_v21, %v2015_v14 }
 0x212   :  { %v965_v36 = vmul.f32 %v955_v21, %v2017_v18  ;;  %v966_v37 = vmul.f32 %v955_v21, %v2019_v19  ;;  %v967_v3 = vmul.f32 %v955_v21, %v2030_v26  ;;  %v968_v4 = vmul.f32 %v955_v21, %v2033_v29 }
 0x213   :  { %v969_v5 = vmul.f32 %v955_v21, %v2044_v43  ;;  %v970_v6 = vmul.f32 %v955_v21, %v2046_v44  ;;  %v971_v11 = vmul.f32 %v955_v21, %v2054_v51  ;;  %v972_v12 = vmul.f32 %v955_v21, %v2058_v53 }
 0x214   :  { %v973_v13 = vmul.f32 %v955_v21, %v2067_v2  ;;  %v974_v14 = vmul.f32 %v955_v21, %v2069_v7  ;;  %v975_v18 = vmul.f32 %v955_v21, %v2077_v17  ;;  %v976_v19 = vmul.f32 %v955_v21, %v2082_v24 }
 0x215   :  { %v977_v26 = vmul.f32 %v955_v21, %v2092_v38  ;;  %v978_v29 = vmul.f32 %v955_v21, %v2094_v39  ;;  %v979_v43 = vmul.f32 %v955_v21, %v2102_v48  ;;  %v980_v44 = vmul.f32 %v955_v21, %v2105_v52 }
 0x216   :  { %v981_v51 = vmul.f32 %v955_v21, %v2116_v9  ;;  %v982_v53 = vmul.f32 %v955_v21, %v2118_v10  ;;  %v983_v2 = vmul.f32 %v955_v21, %v2126_v25  ;;  %v984_v7 = vmul.f32 %v955_v21, %v2130_v28 }
 0x217   :  { %v2192_v40 = vpop.permute.xlu1 %991  ;;  %v985_v17 = vmul.f32 %v955_v21, %v2139_v46  ;;  %v986_v24 = vmul.f32 %v955_v21, %v2141_v47  ;;  %v987_v38 = vmul.f32 %v955_v21, %v2149_v58  ;;  %v988_v39 = vmul.f32 %v955_v21, %v2153_v61 }
 0x218   :  { %v2204_v48 = vadd.f32 %v2192_v40, %v957_v22  ;;  %v2207_v52 = vadd.f32 %v2192_v40, %v958_v27  ;;  %v2210_v9 = vadd.f32 %v2192_v40, %v959_v30  ;;  %v2213_v10 = vadd.f32 %v2192_v40, %v960_v31 }
 0x219   :  { %v2216_v25 = vadd.f32 %v2192_v40, %v961_v32  ;;  %v2219_v28 = vadd.f32 %v2192_v40, %v962_v33  ;;  %v2222_v46 = vadd.f32 %v2192_v40, %v963_v34  ;;  %v2225_v47 = vadd.f32 %v2192_v40, %v964_v35 }
 0x21a   :  { %v2228_v58 = vadd.f32 %v2192_v40, %v965_v36  ;;  %v2231_v61 = vadd.f32 %v2192_v40, %v966_v37  ;;  %v2234_v41 = vadd.f32 %v2192_v40, %v967_v3  ;;  %v2237_v42 = vadd.f32 %v2192_v40, %v968_v4 }
 0x21b   :  { %v2240_v45 = vadd.f32 %v2192_v40, %v969_v5  ;;  %v2243_v49 = vadd.f32 %v2192_v40, %v970_v6  ;;  %v2246_v50 = vadd.f32 %v2192_v40, %v971_v11  ;;  %v2249_v54 = vadd.f32 %v2192_v40, %v972_v12 }
 0x21c   :  { %v2252_v55 = vadd.f32 %v2192_v40, %v973_v13  ;;  %v2255_v56 = vadd.f32 %v2192_v40, %v974_v14  ;;  %v2258_v57 = vadd.f32 %v2192_v40, %v975_v18  ;;  %v2261_v59 = vadd.f32 %v2192_v40, %v976_v19 }
 0x21d   :  { %v2264_v60 = vadd.f32 %v2192_v40, %v977_v26  ;;  %v2267_v62 = vadd.f32 %v2192_v40, %v978_v29  ;;  %v2270_v63 = vadd.f32 %v2192_v40, %v979_v43  ;;  %v2273_v0 = vadd.f32 %v2192_v40, %v980_v44 }
 0x21e   :  { %v2276_v1 = vadd.f32 %v2192_v40, %v981_v51  ;;  %v2279_v8 = vadd.f32 %v2192_v40, %v982_v53  ;;  %v2282_v23 = vadd.f32 %v2192_v40, %v983_v2  ;;  %v2285_v15 = vadd.f32 %v2192_v40, %v984_v7 }
 0x21f   :  { %v2288_v16 = vadd.f32 %v2192_v40, %v985_v17  ;;  %v2291_v20 = vadd.f32 %v2192_v40, %v986_v24  ;;  %vm1026_vm6 = vcmp.ge.f32.partialorder %v2204_v48, 0.0  ;;  %vm1027_vm7 = vcmp.ge.f32.partialorder %v2207_v52, 0.0 }
 0x220   :  { %vm1028_vm8 = vcmp.ge.f32.partialorder %v2210_v9, 0.0  ;;  %vm1029_vm9 = vcmp.ge.f32.partialorder %v2213_v10, 0.0  ;;  %vm1030_vm10 = vcmp.ge.f32.partialorder %v2216_v25, 0.0  ;;  %vm1031_vm11 = vcmp.ge.f32.partialorder %v2219_v28, 0.0 }
 0x221   :  { %vm1032_vm12 = vcmp.ge.f32.partialorder %v2222_v46, 0.0  ;;  %vm1033_vm13 = vcmp.ge.f32.partialorder %v2225_v47, 0.0  ;;  %vm1034_vm14 = vcmp.ge.f32.partialorder %v2228_v58, 0.0  ;;  %vm1035_vm15 = vcmp.ge.f32.partialorder %v2231_v61, 0.0 }
 0x222   :  { %vm1036_vm0 = vcmp.ge.f32.partialorder %v2234_v41, 0.0  ;;  %vm1037_vm1 = vcmp.ge.f32.partialorder %v2237_v42, 0.0  ;;  %v1058_v21 = vmul.f32 0.2, %v2204_v48  ;;  %v1059_v22 = vmul.f32 0.2, %v2207_v52 }
 0x223   :  { %v1060_v27 = vmul.f32 0.2, %v2210_v9  ;;  %v2311_v30 = vadd.f32 %v2192_v40, %v987_v38  ;;  %v1061_v31 = vmul.f32 0.2, %v2213_v10  ;;  %v1062_v32 = vmul.f32 0.2, %v2216_v25 }
 0x224   :  { %v1063_v33 = vmul.f32 0.2, %v2219_v28  ;;  %v2319_v34 = vadd.f32 %v2192_v40, %v988_v39  ;;  %v1064_v35 = vmul.f32 0.2, %v2222_v46  ;;  %v1065_v36 = vmul.f32 0.2, %v2225_v47 }
 0x225   :  { %v1066_v37 = vmul.f32 0.2, %v2228_v58  ;;  %v1067_v3 = vmul.f32 0.2, %v2231_v61  ;;  %v1068_v4 = vmul.f32 0.2, %v2234_v41  ;;  %v1090_v6 = vsel %vm1026_vm6, %v2204_v48, %v1058_v21 }
 0x226   :  { %v1069_v5 = vmul.f32 0.2, %v2237_v42  ;;  %vm1046_vm2 = vcmp.ge.f32.partialorder %v2264_v60, 0.0  ;;  %v1070_v11 = vmul.f32 0.2, %v2240_v45  ;;  %v1091_v14 = vsel %vm1027_vm7, %v2207_v52, %v1059_v22 }
 0x227   :  { %v1071_v12 = vmul.f32 0.2, %v2243_v49  ;;  %v1072_v13 = vmul.f32 0.2, %v2246_v50  ;;  %vm1048_vm4 = vcmp.ge.f32.partialorder %v2270_v63, 0.0  ;;  %v1092_v29 = vsel %vm1028_vm8, %v2210_v9, %v1060_v27 }
 0x228   :  { %v1073_v18 = vmul.f32 0.2, %v2249_v54  ;;  %v1074_v19 = vmul.f32 0.2, %v2252_v55  ;;  %v1075_v26 = vmul.f32 0.2, %v2255_v56  ;;  %v1093_v51 = vsel %vm1029_vm9, %v2213_v10, %v1061_v31 }
 0x229   :  { %vm1050_vm6 = vcmp.ge.f32.partialorder %v2276_v1, 0.0  ;;  %v1076_v43 = vmul.f32 0.2, %v2258_v57  ;;  %v1077_v40 = vmul.f32 0.2, %v2261_v59  ;;  %vm1052_vm7 = vcmp.ge.f32.partialorder %v2282_v23, 0.0 }
 0x22a   :  { %v1078_v44 = vmul.f32 0.2, %v2264_v60  ;;  %vm1053_vm5 = vcmp.ge.f32.partialorder %v2285_v15, 0.0  ;;  %v1079_v53 = vmul.f32 0.2, %v2267_v62  ;;  %v1094_v17 = vsel %vm1030_vm10, %v2216_v25, %v1062_v32 }
 0x22b   :  { %v1080_v2 = vmul.f32 0.2, %v2270_v63  ;;  %v1081_v7 = vmul.f32 0.2, %v2273_v0  ;;  %vm1054_vm8 = vcmp.ge.f32.partialorder %v2288_v16, 0.0  ;;  %vm1055_vm3 = vcmp.ge.f32.partialorder %v2291_v20, 0.0 }
 0x22c   :  { %v1082_v24 = vmul.f32 0.2, %v2276_v1  ;;  %v1095_v38 = vsel %vm1031_vm11, %v2219_v28, %v1063_v33  ;;  %v1096_v39 = vsel %vm1032_vm12, %v2222_v46, %v1064_v35  ;;  %v1097_v48 = vsel %vm1033_vm13, %v2225_v47, %v1065_v36 }
 0x22d   :  { %vm1056_vm9 = vcmp.ge.f32.partialorder %v2311_v30, 0.0  ;;  %v1083_v52 = vmul.f32 0.2, %v2279_v8  ;;  %v1084_v9 = vmul.f32 0.2, %v2282_v23  ;;  %v1098_v10 = vsel %vm1034_vm14, %v2228_v58, %v1066_v37 }
 0x22e   :  { %v1099_v25 = vsel %vm1035_vm15, %v2231_v61, %v1067_v3  ;;  %v1100_v28 = vsel %vm1036_vm0, %v2234_v41, %v1068_v4  ;;  %v1101_v46 = vsel %vm1037_vm1, %v2237_v42, %v1069_v5  ;;  %v1122_v47 = vpack.c.bf16 %v1091_v14, %v1090_v6 }
 0x22f   :  { %v1123_v21 = vpack.c.bf16 %v1093_v51, %v1092_v29  ;;  %vm2510_vm10 = vcmp.ge.f32.partialorder %v2240_v45, 0.0  ;;  %vm2511_vm11 = vcmp.ge.f32.partialorder %v2243_v49, 0.0  ;;  %v1124_v27 = vpack.c.bf16 %v1095_v38, %v1094_v17 }
 0x230   :  { %v1102_v22 = vsel %vm2510_vm10, %v2240_v45, %v1070_v11  ;;  %v1103_v58 = vsel %vm2511_vm11, %v2243_v49, %v1071_v12  ;;  %v1125_v61 = vpack.c.bf16 %v1097_v48, %v1096_v39  ;;  %v1085_v31 = vmul.f32 0.2, %v2285_v15  ;;  %1138 = vst [vmem:[%s2509_s4] sm:$0xff] %v1122_v47 }
 0x231   :  { %vm2512_vm12 = vcmp.ge.f32.partialorder %v2246_v50, 0.0  ;;  %vm2513_vm13 = vcmp.ge.f32.partialorder %v2249_v54, 0.0  ;;  %v1126_v32 = vpack.c.bf16 %v1099_v25, %v1098_v10  ;;  %v1086_v45 = vmul.f32 0.2, %v2288_v16  ;;  %1139 = vst [vmem:[%s2509_s4 + $0x8] sm:$0xff] %v1123_v21 }
 0x232   :  { %v1104_v41 = vsel %vm2512_vm12, %v2246_v50, %v1072_v13  ;;  %v1105_v42 = vsel %vm2513_vm13, %v2249_v54, %v1073_v18  ;;  %vm2514_vm14 = vcmp.ge.f32.partialorder %v2252_v55, 0.0  ;;  %vm2515_vm15 = vcmp.ge.f32.partialorder %v2255_v56, 0.0  ;;  %1140 = vst [vmem:[%s2509_s4 + $0x10] sm:$0xff] %v1124_v27 }
 0x233   :  { %v1106_v49 = vsel %vm2514_vm14, %v2252_v55, %v1074_v19  ;;  %v1107_v33 = vsel %vm2515_vm15, %v2255_v56, %v1075_v26  ;;  %v1127_v50 = vpack.c.bf16 %v1101_v46, %v1100_v28  ;;  %v1087_v54 = vmul.f32 0.2, %v2291_v20  ;;  %1141 = vst [vmem:[%s2509_s4 + $0x18] sm:$0xff] %v1125_v61 }
 0x234   :  { %vm2516_vm0 = vcmp.ge.f32.partialorder %v2258_v57, 0.0  ;;  %vm2517_vm1 = vcmp.ge.f32.partialorder %v2261_v59, 0.0  ;;  %v1128_v55 = vpack.c.bf16 %v1103_v58, %v1102_v22  ;;  %v1088_v56 = vmul.f32 0.2, %v2311_v30  ;;  %1142 = vst [vmem:[%s2509_s4 + $0x20] sm:$0xff] %v1126_v32 }
 0x235   :  { %v1108_v35 = vsel %vm2516_vm0, %v2258_v57, %v1076_v43  ;;  %v1109_v36 = vsel %vm2517_vm1, %v2261_v59, %v1077_v40  ;;  %v1110_v37 = vsel %vm1046_vm2, %v2264_v60, %v1078_v44  ;;  %vm2518_vm10 = vcmp.ge.f32.partialorder %v2267_v62, 0.0  ;;  %1143 = vst [vmem:[%s2509_s4 + $0x28] sm:$0xff] %v1127_v50 }
 0x236   :  { %v1111_v3 = vsel %vm2518_vm10, %v2267_v62, %v1079_v53  ;;  %v1129_v57 = vpack.c.bf16 %v1105_v42, %v1104_v41  ;;  %v1089_v59 = vmul.f32 0.2, %v2319_v34  ;;  %v1112_v4 = vsel %vm1048_vm4, %v2270_v63, %v1080_v2  ;;  %1144 = vst [vmem:[%s2509_s4 + $0x30] sm:$0xff] %v1128_v55 }
 0x237   :  { %vm2519_vm11 = vcmp.ge.f32.partialorder %v2273_v0, 0.0  ;;  %v1130_v60 = vpack.c.bf16 %v1107_v33, %v1106_v49  ;;  %vm1057_vm2 = vcmp.ge.f32.partialorder %v2319_v34, 0.0  ;;  %v1114_v62 = vsel %vm1050_vm6, %v2276_v1, %v1082_v24 }
 0x238   :  { %v1113_v5 = vsel %vm2519_vm11, %v2273_v0, %v1081_v7  ;;  %vm2520_vm12 = vcmp.ge.f32.partialorder %v2279_v8, 0.0  ;;  %v1131_v63 = vpack.c.bf16 %v1109_v36, %v1108_v35  ;;  %v1116_v0 = vsel %vm1052_vm7, %v2282_v23, %v1084_v9  ;;  %1145 = vst [vmem:[%s2509_s4 + $0x38] sm:$0xff] %v1129_v57 }
 0x239   :  { %v1115_v6 = vsel %vm2520_vm12, %v2279_v8, %v1083_v52  ;;  %v1117_v11 = vsel %vm1053_vm5, %v2285_v15, %v1085_v31  ;;  %v1132_v12 = vpack.c.bf16 %v1111_v3, %v1110_v37  ;;  %v1118_v1 = vsel %vm1054_vm8, %v2288_v16, %v1086_v45  ;;  %1146 = vst [vmem:[%s2509_s4 + $0x40] sm:$0xff] %v1130_v60 }
 0x23a   :  { %v1119_v8 = vsel %vm1055_vm3, %v2291_v20, %v1087_v54  ;;  %v1133_v13 = vpack.c.bf16 %v1113_v5, %v1112_v4  ;;  %v1120_v23 = vsel %vm1056_vm9, %v2311_v30, %v1088_v56  ;;  %v1121_v15 = vsel %vm1057_vm2, %v2319_v34, %v1089_v59  ;;  %1147 = vst [vmem:[%s2509_s4 + $0x48] sm:$0xff] %v1131_v63 }
 0x23b   :  { %v1134_v14 = vpack.c.bf16 %v1115_v6, %v1114_v62  ;;  %vm1153_vm4 = vcmask 1043456   ;;  %vm1154_vm5 = vcmask 801796   ;;  %v1135_v16 = vpack.c.bf16 %v1117_v11, %v1116_v0  ;;  %1148 = vst [vmem:[%s2509_s4 + $0x50] sm:$0xff] %v1132_v12 }
 0x23c   :  { %v1136_v20 = vpack.c.bf16 %v1119_v8, %v1118_v1  ;;  %v1137_v30 = vpack.c.bf16 %v1121_v15, %v1120_v23  ;;  %1149 = vst [vmem:[%s2509_s4 + $0x58] sm:$0xff] %v1133_v13  ;;  %vm1155_vm3 = vmor %vm1154_vm5, %vm1153_vm4 }
 0x23d   :  { %1150 = vst [vmem:[%s2509_s4 + $0x60] sm:$0xff] %v1134_v14 }
 0x23e   :  { %1151 = vst [vmem:[%s2509_s4 + $0x68] sm:$0xff] %v1135_v16 }
 0x23f   :  { %1152 = vst [vmem:[%s2509_s4 + $0x70] sm:$0xff] %v1136_v20 }
 0x240   :  { %1156 = vst.msk [vmem:[%s2509_s4 + $0x78] sm:$0xff] %vm1155_vm3, %v1137_v30 }

// kernel: discriminator_forward.13
= control target key start
LH: loop header
LB: loop body
LE: loop exit
PB: predicated region body
PF: predicated region fallthrough
CT: control target
= control target key end

     0   :  { %vm199_vm0 = vcmask 1043456   ;;  %vm195_vm1 = vcmask 326656   ;;  %vm396_vm2 = vcmask 605184   ;;  %s1260_s0 = inlined_call_operand.vmem [shape: bf16[40,1354], index: 0, kind: input, shape index: {}]   ;;  %s1261_s1 = inlined_call_operand.vmem [shape: bf16[16,40], index: 1, kind: input, shape index: {}]   ;;  %s1262_s2 = inlined_call_operand.vmem [shape: f32[16,1], index: 2, kind: input, shape index: {}]   ;;  %s1263_s3 = inlined_call_operand.vmem [shape: f32[16,1], index: 3, kind: input, shape index: {}]   ;;  %s1264_s4 = inlined_call_operand.vmem [shape: bf16[16,1354], index: 4, kind: output, shape index: {}]  }
   0x1   :  { %v44_v0 = vld [vmem:[%s1260_s0 + $0xb0] sm:$0xff]  ;;  %v45_v1 = vld [vmem:[%s1260_s0 + $0xb8] sm:$0xff]  ;;  %v790_v7 = vld [vmem:[%s1260_s0 + $0x80] sm:$0xf0] }
   0x2   :  { %v129_v2 = vunpack.c.l.b16 %v44_v0  ;;  %v130_v3 = vunpack.c.h.b16 %v44_v0  ;;  %v131_v4 = vunpack.c.l.b16 %v45_v1  ;;  %v132_v5 = vunpack.c.h.b16 %v45_v1  ;;  %v720_v6 = vld [vmem:[%s1260_s0 + $0x58] sm:$0xf]  ;;  %v785_v12 = vld [vmem:[%s1260_s0 + $0x5c] sm:$0xf]  ;;  %v722_v13 = vld [vmem:[%s1260_s0 + $0x84] sm:$0xf0] }
   0x3   :  { %v728_v14 = vld [vmem:[%s1260_s0 + $0x60] sm:$0xf]  ;;  %v791_v15 = vld [vmem:[%s1260_s0 + $0x88] sm:$0xf0]  ;;  %v786_v16 = vld [vmem:[%s1260_s0 + $0x64] sm:$0xf]  ;;  %v721_v23 = vor.u32 %v790_v7, %v720_v6  ;;  %v725_v24 = vor.u32 %v785_v12, %v722_v13 }
   0x4   :  { %v162_v8 = vpack.c.b16 %v129_v2, %v129_v2  ;;  %v163_v9 = vpack.c.b16 %v130_v3, %v130_v3  ;;  %v164_v10 = vpack.c.b16 %v131_v4, %v131_v4  ;;  %v165_v11 = vpack.c.b16 %v132_v5, %v132_v5  ;;  %v730_v17 = vld [vmem:[%s1260_s0 + $0x8c] sm:$0xf0]  ;;  %v676_v22 = vld [vmem:[%s1260_s0] sm:$0xf]  ;;  %v779_v25 = vld [vmem:[%s1260_s0 + $0x28] sm:$0xf0] }
   0x5   :  { %v774_v26 = vld [vmem:[%s1260_s0 + $0x4] sm:$0xf]  ;;  %v678_v27 = vld [vmem:[%s1260_s0 + $0x2c] sm:$0xf0]  ;;  %v729_v28 = vor.u32 %v791_v15, %v728_v14  ;;  %v733_v29 = vor.u32 %v786_v16, %v730_v17  ;;  %v684_v30 = vld [vmem:[%s1260_s0 + $0x8] sm:$0xf]  ;;  %v677_v40 = vor.u32 %v779_v25, %v676_v22 }
   0x6   :  { %v201_v18 = vsel %vm199_vm0, %v162_v8, 0  ;;  %v204_v19 = vsel %vm199_vm0, %v163_v9, 0  ;;  %v207_v20 = vsel %vm199_vm0, %v164_v10, 0  ;;  %v210_v21 = vsel %vm199_vm0, %v165_v11, 0  ;;  %v47_v31 = vld [vmem:[%s1260_s0 + $0xc8] sm:$0xff]  ;;  %v46_v32 = vld [vmem:[%s1260_s0 + $0xc0] sm:$0xff] }
   0x7   :  { %238 = vmatpush.bf16.msra.mxu0 %v201_v18  ;;  %252 = vmatpush.bf16.msra.mxu1 %v204_v19  ;;  %v780_v33 = vld [vmem:[%s1260_s0 + $0x30] sm:$0xf0]  ;;  %v775_v34 = vld [vmem:[%s1260_s0 + $0xc] sm:$0xf]  ;;  %v686_v35 = vld [vmem:[%s1260_s0 + $0x34] sm:$0xf0]  ;;  %v135_v36 = vunpack.c.l.b16 %v47_v31  ;;  %v133_v37 = vunpack.c.l.b16 %v46_v32  ;;  %v134_v38 = vunpack.c.h.b16 %v46_v32  ;;  %v136_v39 = vunpack.c.h.b16 %v47_v31 }
   0x8   :  { %266 = vmatpush.bf16.msra.mxu2 %v207_v20  ;;  %280 = vmatpush.bf16.msra.mxu3 %v210_v21  ;;  %v681_v41 = vor.u32 %v774_v26, %v678_v27  ;;  %v685_v44 = vor.u32 %v780_v33, %v684_v30  ;;  %v689_v45 = vor.u32 %v775_v34, %v686_v35  ;;  %v901_v46 = vld [vmem:[%s1261_s1] sm:$0xff]  ;;  %v744_v48 = vld [vmem:[%s1260_s0 + $0x70] sm:$0xf]  ;;  %v793_v49 = vld [vmem:[%s1260_s0 + $0x98] sm:$0xf0] }
   0x9   :  { %v168_v42 = vpack.c.b16 %v135_v36, %v135_v36  ;;  %v166_v43 = vpack.c.b16 %v133_v37, %v133_v37  ;;  %v167_v47 = vpack.c.b16 %v134_v38, %v134_v38  ;;  %v169_v50 = vpack.c.b16 %v136_v39, %v136_v39  ;;  %v48_v51 = vld [vmem:[%s1260_s0 + $0xd0] sm:$0xff]  ;;  %v736_v54 = vld [vmem:[%s1260_s0 + $0x68] sm:$0xf]  ;;  %v49_v56 = vld [vmem:[%s1260_s0 + $0xd8] sm:$0xf] }
   0xa   :  { %v792_v55 = vld [vmem:[%s1260_s0 + $0x90] sm:$0xf0]  ;;  %v137_v57 = vunpack.c.l.b16 %v48_v51  ;;  %v787_v58 = vld [vmem:[%s1260_s0 + $0x6c] sm:$0xf]  ;;  %v738_v59 = vld [vmem:[%s1260_s0 + $0x94] sm:$0xf0]  ;;  %v139_v61 = vunpack.c.l.b16 %v49_v56  ;;  %v745_v63 = vor.u32 %v793_v49, %v744_v48  ;;  %v138_v7 = vunpack.c.h.b16 %v48_v51 }
   0xb   :  { %239 = vmatpush.bf16.msra.mxu0 %v721_v23  ;;  %253 = vmatpush.bf16.msra.mxu1 %v725_v24  ;;  %v219_v52 = vsel %vm199_vm0, %v168_v42, 0  ;;  %v213_v53 = vsel %vm199_vm0, %v166_v43, 0  ;;  %v700_v60 = vld [vmem:[%s1260_s0 + $0x18] sm:$0xf]  ;;  %v216_v62 = vsel %vm199_vm0, %v167_v47, 0  ;;  %v222_v0 = vsel %vm199_vm0, %v169_v50, 0 }
   0xc   :  { %267 = vmatpush.bf16.msra.mxu2 %v729_v28  ;;  %281 = vmatpush.bf16.msra.mxu3 %v733_v29  ;;  %v737_v1 = vor.u32 %v792_v55, %v736_v54  ;;  %v788_v2 = vld [vmem:[%s1260_s0 + $0x74] sm:$0xf]  ;;  %v746_v3 = vld [vmem:[%s1260_s0 + $0x9c] sm:$0xf0]  ;;  %v782_v4 = vld [vmem:[%s1260_s0 + $0x40] sm:$0xf0]  ;;  %v172_v8 = vpack.c.b16 %v139_v61, %v139_v61  ;;  %v170_v9 = vpack.c.b16 %v137_v57, %v137_v57 }
   0xd   :  { %v692_v5 = vld [vmem:[%s1260_s0 + $0x10] sm:$0xf]  ;;  %v781_v6 = vld [vmem:[%s1260_s0 + $0x38] sm:$0xf0]  ;;  %v741_v10 = vor.u32 %v787_v58, %v738_v59  ;;  %v749_v11 = vor.u32 %v788_v2, %v746_v3  ;;  %v776_v12 = vld [vmem:[%s1260_s0 + $0x14] sm:$0xf]  ;;  %v701_v13 = vor.u32 %v782_v4, %v700_v60  ;;  %v171_v18 = vpack.c.b16 %v138_v7, %v138_v7 }
   0xe   :  { %v693_v14 = vor.u32 %v781_v6, %v692_v5  ;;  %v694_v15 = vld [vmem:[%s1260_s0 + $0x3c] sm:$0xf0]  ;;  %v777_v16 = vld [vmem:[%s1260_s0 + $0x1c] sm:$0xf]  ;;  %v702_v17 = vld [vmem:[%s1260_s0 + $0x44] sm:$0xf0] }
   0xf   :  { %240 = vmatpush.bf16.msra.mxu0 %v677_v40  ;;  %254 = vmatpush.bf16.msra.mxu1 %v681_v41  ;;  %v760_v19 = vld [vmem:[%s1260_s0 + $0x80] sm:$0xf]  ;;  %v795_v20 = vld [vmem:[%s1260_s0 + $0xa8] sm:$0xf0]  ;;  %v231_v21 = vsel %vm199_vm0, %v172_v8, 0  ;;  %v225_v22 = vsel %vm199_vm0, %v170_v9, 0  ;;  %v697_v25 = vor.u32 %v776_v12, %v694_v15  ;;  %v705_v26 = vor.u32 %v777_v16, %v702_v17 }
  0x10   :  { %268 = vmatpush.bf16.msra.mxu2 %v685_v44  ;;  %282 = vmatpush.bf16.msra.mxu3 %v689_v45  ;;  %v752_v23 = vld [vmem:[%s1260_s0 + $0x78] sm:$0xf]  ;;  %v794_v24 = vld [vmem:[%s1260_s0 + $0xa0] sm:$0xf0]  ;;  %v228_v27 = vsel %vm199_vm0, %v171_v18, 0  ;;  %v761_v28 = vor.u32 %v795_v20, %v760_v19 }
  0x11   :  { %v753_v29 = vor.u32 %v794_v24, %v752_v23  ;;  %v789_v30 = vld [vmem:[%s1260_s0 + $0x7c] sm:$0xf]  ;;  %v754_v31 = vld [vmem:[%s1260_s0 + $0xa4] sm:$0xf0]  ;;  %v784_v34 = vld [vmem:[%s1260_s0 + $0x50] sm:$0xf0] }
  0x12   :  { %762 = vmatmul.msk.bf16.vlgmr.msra.gmra.mxu0 %vm195_vm1, %v901_v46  ;;  %763 = vmatmul.msk.bf16.vlgmr.msra.gmra.mxu1 %vm195_vm1, %v901_v46  ;;  %v716_v32 = vld [vmem:[%s1260_s0 + $0x28] sm:$0xf]  ;;  %v757_v33 = vor.u32 %v789_v30, %v754_v31  ;;  %v708_v35 = vld [vmem:[%s1260_s0 + $0x20] sm:$0xf]  ;;  %v783_v36 = vld [vmem:[%s1260_s0 + $0x48] sm:$0xf0] }
  0x13   :  { %294 = vmatpush.bf16.msrb.mxu0 %v213_v53  ;;  %764 = vmatmul.msk.bf16.vlgmr.msra.gmra.mxu2 %vm195_vm1, %v901_v46  ;;  %v778_v37 = vld [vmem:[%s1260_s0 + $0x24] sm:$0xf]  ;;  %v710_v38 = vld [vmem:[%s1260_s0 + $0x4c] sm:$0xf0]  ;;  %v717_v39 = vor.u32 %v784_v34, %v716_v32  ;;  %v709_v40 = vor.u32 %v783_v36, %v708_v35 }
  0x14   :  { %322 = vmatpush.bf16.msrb.mxu2 %v219_v52  ;;  %765 = vmatmul.msk.bf16.vlgmr.msra.gmra.mxu3 %vm195_vm1, %v901_v46  ;;  %v713_v41 = vor.u32 %v778_v37, %v710_v38 }
  0x15   :  { %308 = vmatpush.bf16.msrb.mxu1 %v216_v62  ;;  %336 = vmatpush.bf16.msrb.mxu3 %v222_v0 }
  0x17   :  { %295 = vmatpush.bf16.msrb.mxu0 %v737_v1 }
  0x18   :  { %323 = vmatpush.bf16.msrb.mxu2 %v745_v63 }
  0x19   :  { %309 = vmatpush.bf16.msrb.mxu1 %v741_v10  ;;  %337 = vmatpush.bf16.msrb.mxu3 %v749_v11 }
  0x1b   :  { %296 = vmatpush.bf16.msrb.mxu0 %v693_v14 }
  0x1c   :  { %324 = vmatpush.bf16.msrb.mxu2 %v701_v13 }
  0x1d   :  { %310 = vmatpush.bf16.msrb.mxu1 %v697_v25  ;;  %338 = vmatpush.bf16.msrb.mxu3 %v705_v26 }
  0x1f   :  { %350 = vmatpush.bf16.msra.mxu0 %v225_v22 }
  0x20   :  { %378 = vmatpush.bf16.msra.mxu2 %v231_v21 }
  0x21   :  { %364 = vmatpush.bf16.msra.mxu1 %v228_v27 }
  0x22   :  { %766 = vmatmul.msk.bf16.vlgmr.msrb.gmra.mxu0 %vm195_vm1, %v901_v46  ;;  %767 = vmatmul.msk.bf16.vlgmr.msrb.gmra.mxu1 %vm195_vm1, %v901_v46 }
  0x23   :  { %351 = vmatpush.bf16.msra.mxu0 %v753_v29  ;;  %768 = vmatmul.msk.bf16.vlgmr.msrb.gmra.mxu2 %vm195_vm1, %v901_v46 }
  0x24   :  { %379 = vmatpush.bf16.msra.mxu2 %v761_v28  ;;  %769 = vmatmul.msk.bf16.vlgmr.msrb.gmra.mxu3 %vm195_vm1, %v901_v46 }
  0x25   :  { %365 = vmatpush.bf16.msra.mxu1 %v757_v33 }
  0x27   :  { %352 = vmatpush.bf16.msra.mxu0 %v709_v40 }
  0x28   :  { %380 = vmatpush.bf16.msra.mxu2 %v717_v39 }
  0x29   :  { %366 = vmatpush.bf16.msra.mxu1 %v713_v41 }
  0x32   :  { %770 = vmatmul.msk.bf16.vlgmr.msra.gmra.mxu0 %vm195_vm1, %v901_v46  ;;  %771 = vmatmul.msk.bf16.vlgmr.msra.gmra.mxu1 %vm195_vm1, %v901_v46 }
  0x33   :  { %772 = vmatmul.msk.bf16.vlgmr.msra.gmra.mxu2 %vm195_vm1, %v901_v46 }
  0x8f   :  { %v1022_v42 = vpop.f32.mrf.mxu0  ;;  %v1024_v43 = vpop.f32.mrf.mxu1 }
  0x90   :  { %v423_v49 = vmul.f32 %v1022_v42, %v1022_v42  ;;  %v424_v50 = vmul.f32 %v1024_v43, %v1024_v43  ;;  %v387_v46 = vadd.f32 %v1024_v43, %v1022_v42 }
  0x92   :  { %v445_v51 = vadd.f32 %v424_v50, %v423_v49 }
  0x96   :  { %v1026_v44 = vpop.f32.mrf.mxu2 }
  0x97   :  { %v1028_v45 = vpop.f32.mrf.mxu3  ;;  %v1030_v47 = vpop.f32.mrf.mxu0  ;;  %v425_v52 = vmul.f32 %v1026_v44, %v1026_v44  ;;  %v388_v57 = vadd.f32 %v387_v46, %v1026_v44 }
  0x98   :  { %v1032_v48 = vpop.f32.mrf.mxu1  ;;  %v426_v59 = vmul.f32 %v1028_v45, %v1028_v45  ;;  %v434_v60 = vmul.f32 %v1030_v47, %v1030_v47 }
  0x99   :  { %v446_v58 = vadd.f32 %v445_v51, %v425_v52  ;;  %v435_v61 = vmul.f32 %v1032_v48, %v1032_v48  ;;  %v389_v62 = vadd.f32 %v388_v57, %v1028_v45  ;;  %v401_v0 = vadd.f32 %v1032_v48, %v1030_v47 }
  0x9b   :  { %v447_v1 = vadd.f32 %v446_v58, %v426_v59  ;;  %v458_v7 = vadd.f32 %v435_v61, %v434_v60 }
  0x9e   :  { %v1042_v53 = vpop.f32.mrf.mxu2 }
  0x9f   :  { %v1044_v54 = vpop.f32.mrf.mxu3  ;;  %v1046_v55 = vpop.f32.mrf.mxu0  ;;  %v436_v2 = vmul.f32 %v1042_v53, %v1042_v53  ;;  %v402_v8 = vadd.f32 %v401_v0, %v1042_v53 }
  0xa0   :  { %v1048_v56 = vpop.f32.mrf.mxu1  ;;  %v427_v63 = vmul.f32 %v1046_v55, %v1046_v55  ;;  %v390_v3 = vadd.f32 %v389_v62, %v1046_v55  ;;  %v437_v13 = vmul.f32 %v1044_v54, %v1044_v54 }
  0xa1   :  { %v428_v10 = vmul.f32 %v1048_v56, %v1048_v56  ;;  %v459_v12 = vadd.f32 %v458_v7, %v436_v2  ;;  %v403_v16 = vadd.f32 %v402_v8, %v1044_v54 }
  0xa2   :  { %v448_v9 = vadd.f32 %v447_v1, %v427_v63  ;;  %v391_v14 = vadd.f32 %v390_v3, %v1048_v56 }
  0xa3   :  { %v460_v20 = vadd.f32 %v459_v12, %v437_v13 }
  0xa4   :  { %v449_v17 = vadd.f32 %v448_v9, %v428_v10 }
  0xa6   :  { %v1065_v4 = vpop.f32.mrf.mxu2 }
  0xa7   :  { %v1067_v5 = vpop.f32.mrf.mxu0  ;;  %v1074_v11 = vpop.f32.mrf.mxu3  ;;  %v429_v15 = vmul.f32 %v1065_v4, %v1065_v4  ;;  %v392_v18 = vadd.f32 %v391_v14, %v1065_v4 }
  0xa8   :  { %v1069_v6 = vpop.f32.mrf.mxu1  ;;  %v438_v19 = vmul.f32 %v1067_v5, %v1067_v5  ;;  %v404_v22 = vadd.f32 %v403_v16, %v1067_v5  ;;  %v430_v23 = vmul.f32 %v1074_v11, %v1074_v11  ;;  %v807_v16 = vmov 1354.0  }
  0xa9   :  { %v450_v21 = vadd.f32 %v449_v17, %v429_v15  ;;  %v393_v27 = vadd.f32 %v392_v18, %v1074_v11  ;;  %v439_v29 = vmul.f32 %v1069_v6, %v1069_v6  ;;  %801 = vrcp.f32 %v807_v16 }
  0xaa   :  { %v461_v26 = vadd.f32 %v460_v20, %v438_v19  ;;  %v405_v31 = vadd.f32 %v404_v22, %v1069_v6 }
  0xab   :  { %v451_v32 = vadd.f32 %v450_v21, %v430_v23  ;;  %v808_v23 = vmov 0  }
  0xac   :  { %v462_v36 = vadd.f32 %v461_v26, %v439_v29  ;;  %798 = vset.pattern.permute.xlu2 %v808_v23  ;;  %799 = vset.pattern.permute.xlu0 %v808_v23 }
  0xad   :  { %800 = vset.pattern.permute.xlu1 %v808_v23 }
  0xae   :  { %v1088_v24 = vpop.f32.mrf.mxu2 }
  0xaf   :  { %v1090_v25 = vpop.f32.mrf.mxu0  ;;  %v440_v33 = vmul.f32 %v1088_v24, %v1088_v24  ;;  %v1103_v35 = vpop.f32.mrf.mxu3  ;;  %v406_v37 = vadd.f32 %v405_v31, %v1088_v24 }
  0xb0   :  { %v431_v28 = vmul.f32 %v1090_v25, %v1090_v25  ;;  %v1097_v30 = vpop.f32.mrf.mxu1  ;;  %v394_v34 = vadd.f32 %v393_v27, %v1090_v25  ;;  %v441_v41 = vmul.f32 %v1103_v35, %v1103_v35  ;;  %v802_v17 = vpop.eup %801 }
  0xb1   :  { %v432_v38 = vmul.f32 %v1097_v30, %v1097_v30  ;;  %v463_v40 = vadd.f32 %v462_v36, %v440_v33  ;;  %v407_v57 = vadd.f32 %v406_v37, %v1103_v35  ;;  %v415_v18 = vmul.f32 1354.0, %v802_v17 }
  0xb2   :  { %v452_v39 = vadd.f32 %v451_v32, %v431_v28  ;;  %v395_v50 = vadd.f32 %v394_v34, %v1097_v30  ;;  %vm419_vm3 = vweird.f32 %v802_v17 }
  0xb3   :  { %v464_v62 = vadd.f32 %v463_v40, %v441_v41  ;;  %v416_v19 = vsub.f32 1.0, %v415_v18 }
  0xb4   :  { %v453_v60 = vadd.f32 %v452_v39, %v432_v38 }
  0xb5   :  { %v417_v20 = vmul.f32 %v802_v17, %v416_v19  ;;  %v506_v19 = vld [vmem:[%s1263_s3 + $0x8] sm:$0xff] }
  0xb6   :  { %v1110_v49 = vpop.f32.mrf.mxu2 }
  0xb7   :  { %v1113_v46 = vpop.f32.mrf.mxu0  ;;  %v397_v51 = vsel %vm396_vm2, %v1110_v49, 0.0  ;;  %v433_v52 = vmul.f32 %v1110_v49, %v1110_v49  ;;  %v418_v21 = vadd.f32 %v802_v17, %v417_v20 }
  0xb8   :  { %v442_v58 = vmul.f32 %v1113_v46, %v1113_v46  ;;  %v398_v59 = vadd.f32 %v397_v51, %v395_v50  ;;  %v408_v63 = vadd.f32 %v407_v57, %v1113_v46  ;;  %v1124_v1 = vpop.f32.mrf.mxu1 }
  0xb9   :  { %v454_v61 = vsel %vm396_vm2, %v433_v52, 0.0  ;;  %v443_v7 = vmul.f32 %v1124_v1, %v1124_v1  ;;  %v420_v22 = vsel %vm419_vm3, %v802_v17, %v418_v21 }
  0xba   :  { %399 = vadd.xlane.f32.xlu0 %v398_v59  ;;  %v455_v0 = vadd.f32 %v454_v61, %v453_v60  ;;  %v465_v2 = vadd.f32 %v464_v62, %v442_v58  ;;  %v409_v3 = vadd.f32 %v408_v63, %v1124_v1  ;;  %v479_v63 = vld [vmem:[%s1262_s2] sm:$0xff] }
  0xbc   :  { %456 = vadd.xlane.f32.xlu1 %v455_v0  ;;  %v466_v13 = vadd.f32 %v465_v2, %v443_v7 }
  0xbe   :  { %v1129_v8 = vpop.f32.mrf.mxu2 }
  0xbf   :  { %v410_v9 = vsel %vm396_vm2, %v1129_v8, 0.0  ;;  %v444_v10 = vmul.f32 %v1129_v8, %v1129_v8 }
  0xc0   :  { %v411_v12 = vadd.f32 %v410_v9, %v409_v3 }
  0xc1   :  { %v467_v14 = vsel %vm396_vm2, %v444_v10, 0.0  ;;  %v505_v10 = vld [vmem:[%s1263_s3] sm:$0xff] }
  0xc2   :  { %412 = vadd.xlane.f32.xlu0 %v411_v12  ;;  %v468_v15 = vadd.f32 %v467_v14, %v466_v13 }
  0xc4   :  { %469 = vadd.xlane.f32.xlu1 %v468_v15  ;;  %v480_v15 = vld [vmem:[%s1262_s2 + $0x8] sm:$0xff] }
 0x12d   :  { %v400_v26 = vpop.xlane.xlu0 %399 }
 0x12e   :  { %v421_v27 = vmul.f32 %v420_v22, %v400_v26 }
 0x12f   :  { %v457_v28 = vpop.xlane.xlu1 %456 }
 0x130   :  { %v473_v29 = vmul.f32 %v421_v27, %v421_v27  ;;  %v471_v31 = vmul.f32 %v457_v28, %v420_v22 }
 0x132   :  { %v475_v32 = vsub.f32 %v471_v31, %v473_v29 }
 0x134   :  { %v477_v33 = vmax.f32 %v475_v32, 0.0 }
 0x135   :  { %v413_v34 = vpop.xlane.xlu0 %412 }
 0x136   :  { %v481_v36 = vadd.f32 1e-05, %v477_v33  ;;  %v422_v37 = vmul.f32 %v420_v22, %v413_v34 }
 0x137   :  { %v470_v38 = vpop.xlane.xlu1 %469 }
 0x138   :  { %803 = vrsqrt.f32 %v481_v36  ;;  %v474_v39 = vmul.f32 %v422_v37, %v422_v37  ;;  %v472_v40 = vmul.f32 %v470_v38, %v420_v22  ;;  %vm489_vm5 = vweird.f32 %v481_v36 }
 0x13a   :  { %v476_v41 = vsub.f32 %v472_v40, %v474_v39 }
 0x13c   :  { %v478_v50 = vmax.f32 %v476_v41, 0.0 }
 0x13e   :  { %v804_v51 = vpop.eup %803  ;;  %v482_v52 = vadd.f32 1e-05, %v478_v50 }
 0x13f   :  { %v484_v57 = vmul.f32 %v804_v51, %v481_v36  ;;  %vm490_vm4 = vweird.f32 %v804_v51 }
 0x140   :  { %805 = vrsqrt.f32 %v482_v52  ;;  %vm491_vm6 = vmor %vm489_vm5, %vm490_vm4  ;;  %vm499_vm8 = vweird.f32 %v482_v52  ;;  %vm658_vm5 = vcmask 601088  }
 0x141   :  { %v485_v58 = vmul.f32 %v804_v51, %v484_v57 }
 0x143   :  { %v486_v59 = vmul.f32 0.5, %v485_v58 }
 0x145   :  { %v487_v60 = vsub.f32 1.5, %v486_v59 }
 0x146   :  { %v806_v61 = vpop.eup %805 }
 0x147   :  { %v494_v62 = vmul.f32 %v806_v61, %v482_v52  ;;  %v488_v0 = vmul.f32 %v804_v51, %v487_v60  ;;  %vm500_vm7 = vweird.f32 %v806_v61 }
 0x148   :  { %vm501_vm9 = vmor %vm499_vm8, %vm500_vm7 }
 0x149   :  { %v495_v2 = vmul.f32 %v806_v61, %v494_v62  ;;  %v492_v3 = vsel %vm491_vm6, %v804_v51, %v488_v0 }
 0x14a   :  { %v503_v7 = vmul.f32 %v492_v3, %v479_v63 }
 0x14b   :  { %v496_v9 = vmul.f32 0.5, %v495_v2 }
 0x14c   :  { %513 = vperm.xlu2 %798, %v503_v7   ;;  %v507_v12 = vmul.f32 %v503_v7, %v421_v27 }
 0x14d   :  { %v497_v13 = vsub.f32 1.5, %v496_v9 }
 0x14e   :  { %v509_v14 = vsub.f32 %v505_v10, %v507_v12 }
 0x14f   :  { %v498_v16 = vmul.f32 %v806_v61, %v497_v13 }
 0x150   :  { %545 = vperm.xlu0 %799, %v509_v14  }
 0x151   :  { %v502_v17 = vsel %vm501_vm9, %v806_v61, %v498_v16 }
 0x152   :  { %v504_v18 = vmul.f32 %v502_v17, %v480_v15 }
 0x154   :  { %518 = vperm.xlu2 %798, %v504_v18   ;;  %v508_v20 = vmul.f32 %v504_v18, %v422_v37 }
 0x156   :  { %v510_v21 = vsub.f32 %v506_v19, %v508_v20 }
 0x158   :  { %550 = vperm.xlu1 %800, %v510_v21  }
 0x1a6   :  { %v514_v22 = vpop.permute.xlu2 %513 }
 0x1a7   :  { %v521_v26 = vmul.f32 %v514_v22, %v1022_v42  ;;  %v522_v27 = vmul.f32 %v514_v22, %v1024_v43  ;;  %v523_v28 = vmul.f32 %v514_v22, %v1026_v44  ;;  %v524_v29 = vmul.f32 %v514_v22, %v1028_v45 }
 0x1a8   :  { %v525_v31 = vmul.f32 %v514_v22, %v1046_v55  ;;  %v526_v32 = vmul.f32 %v514_v22, %v1048_v56  ;;  %v527_v33 = vmul.f32 %v514_v22, %v1065_v4  ;;  %v528_v34 = vmul.f32 %v514_v22, %v1074_v11 }
 0x1a9   :  { %v529_v36 = vmul.f32 %v514_v22, %v1090_v25  ;;  %v530_v43 = vmul.f32 %v514_v22, %v1097_v30  ;;  %v531_v44 = vmul.f32 %v514_v22, %v1110_v49 }
 0x1ae   :  { %v519_v23 = vpop.permute.xlu2 %518 }
 0x1af   :  { %v1158_v37 = vmul.f32 %v519_v23, %v1030_v47  ;;  %v1161_v42 = vmul.f32 %v519_v23, %v1032_v48  ;;  %v1166_v45 = vmul.f32 %v519_v23, %v1042_v53  ;;  %v1169_v55 = vmul.f32 %v519_v23, %v1044_v54 }
 0x1b0   :  { %v1172_v56 = vmul.f32 %v519_v23, %v1067_v5  ;;  %v1175_v4 = vmul.f32 %v519_v23, %v1069_v6  ;;  %v1178_v47 = vmul.f32 %v519_v23, %v1088_v24  ;;  %v1181_v48 = vmul.f32 %v519_v23, %v1103_v35 }
 0x1b1   :  { %v1184_v11 = vmul.f32 %v519_v23, %v1113_v46  ;;  %v1187_v53 = vmul.f32 %v519_v23, %v1124_v1  ;;  %v542_v1 = vmul.f32 %v519_v23, %v1129_v8 }
 0x1c2   :  { %v546_v54 = vpop.permute.xlu0 %545 }
 0x1c3   :  { %v553_v25 = vadd.f32 %v546_v54, %v521_v26  ;;  %v554_v30 = vadd.f32 %v546_v54, %v522_v27  ;;  %v555_v5 = vadd.f32 %v546_v54, %v523_v28  ;;  %v556_v49 = vadd.f32 %v546_v54, %v524_v29 }
 0x1c4   :  { %v557_v38 = vadd.f32 %v546_v54, %v525_v31  ;;  %v558_v6 = vadd.f32 %v546_v54, %v526_v32  ;;  %v559_v39 = vadd.f32 %v546_v54, %v527_v33  ;;  %v560_v40 = vadd.f32 %v546_v54, %v528_v34 }
 0x1c5   :  { %v561_v24 = vadd.f32 %v546_v54, %v529_v36  ;;  %v562_v41 = vadd.f32 %v546_v54, %v530_v43  ;;  %v563_v50 = vadd.f32 %v546_v54, %v531_v44  ;;  %vm575_vm10 = vcmp.ge.f32.partialorder %v553_v25, 0.0 }
 0x1c6   :  { %vm576_vm11 = vcmp.ge.f32.partialorder %v554_v30, 0.0  ;;  %vm577_vm12 = vcmp.ge.f32.partialorder %v555_v5, 0.0  ;;  %vm578_vm13 = vcmp.ge.f32.partialorder %v556_v49, 0.0  ;;  %vm579_vm14 = vcmp.ge.f32.partialorder %v557_v38, 0.0 }
 0x1c7   :  { %vm580_vm15 = vcmp.ge.f32.partialorder %v558_v6, 0.0  ;;  %vm581_vm0 = vcmp.ge.f32.partialorder %v559_v39, 0.0  ;;  %vm582_vm1 = vcmp.ge.f32.partialorder %v560_v40, 0.0  ;;  %vm583_vm2 = vcmp.ge.f32.partialorder %v561_v24, 0.0 }
 0x1c8   :  { %vm584_vm3 = vcmp.ge.f32.partialorder %v562_v41, 0.0  ;;  %vm585_vm4 = vcmp.ge.f32.partialorder %v563_v50, 0.0  ;;  %v597_v35 = vmul.f32 0.2, %v553_v25  ;;  %v598_v46 = vmul.f32 0.2, %v554_v30 }
 0x1c9   :  { %v599_v51 = vmul.f32 0.2, %v555_v5  ;;  %v600_v52 = vmul.f32 0.2, %v556_v49  ;;  %v601_v57 = vmul.f32 0.2, %v557_v38 }
 0x1ca   :  { %v602_v58 = vmul.f32 0.2, %v558_v6  ;;  %v603_v59 = vmul.f32 0.2, %v559_v39  ;;  %v604_v60 = vmul.f32 0.2, %v560_v40  ;;  %v619_v61 = vsel %vm575_vm10, %v553_v25, %v597_v35  ;;  %v551_v10 = vpop.permute.xlu1 %550 }
 0x1cb   :  { %v605_v62 = vmul.f32 0.2, %v561_v24  ;;  %v606_v63 = vmul.f32 0.2, %v562_v41  ;;  %v607_v0 = vmul.f32 0.2, %v563_v50  ;;  %v620_v2 = vsel %vm576_vm11, %v554_v30, %v598_v46 }
 0x1cc   :  { %v621_v3 = vsel %vm577_vm12, %v555_v5, %v599_v51  ;;  %v622_v7 = vsel %vm578_vm13, %v556_v49, %v600_v52  ;;  %v623_v9 = vsel %vm579_vm14, %v557_v38, %v601_v57  ;;  %v624_v8 = vsel %vm580_vm15, %v558_v6, %v602_v58 }
 0x1cd   :  { %v625_v12 = vsel %vm581_vm0, %v559_v39, %v603_v59  ;;  %v626_v13 = vsel %vm582_vm1, %v560_v40, %v604_v60  ;;  %v627_v14 = vsel %vm583_vm2, %v561_v24, %v605_v62  ;;  %v628_v15 = vsel %vm584_vm3, %v562_v41, %v606_v63 }
 0x1ce   :  { %v629_v16 = vsel %vm585_vm4, %v563_v50, %v607_v0  ;;  %v641_v17 = vpack.c.bf16 %v620_v2, %v619_v61  ;;  %v642_v18 = vpack.c.bf16 %v622_v7, %v621_v3  ;;  %v643_v19 = vpack.c.bf16 %v624_v8, %v623_v9 }
 0x1cf   :  { %v644_v20 = vpack.c.bf16 %v626_v13, %v625_v12  ;;  %v645_v21 = vpack.c.bf16 %v628_v15, %v627_v14  ;;  %v646_v22 = vpack.c.bf16 %v629_v16, %v629_v16  ;;  %v564_v23 = vadd.f32 %v551_v10, %v1158_v37 }
 0x1d0   :  { %653 = vst [vmem:[%s1264_s4] sm:$0xff] %v641_v17  ;;  %v565_v26 = vadd.f32 %v551_v10, %v1161_v42  ;;  %v566_v27 = vadd.f32 %v551_v10, %v1166_v45  ;;  %v567_v28 = vadd.f32 %v551_v10, %v1169_v55  ;;  %v568_v29 = vadd.f32 %v551_v10, %v1172_v56 }
 0x1d1   :  { %654 = vst [vmem:[%s1264_s4 + $0x8] sm:$0xff] %v642_v18  ;;  %v569_v31 = vadd.f32 %v551_v10, %v1175_v4  ;;  %v570_v32 = vadd.f32 %v551_v10, %v1178_v47  ;;  %v571_v33 = vadd.f32 %v551_v10, %v1181_v48  ;;  %v572_v34 = vadd.f32 %v551_v10, %v1184_v11 }
 0x1d2   :  { %655 = vst [vmem:[%s1264_s4 + $0x10] sm:$0xff] %v643_v19  ;;  %v573_v36 = vadd.f32 %v551_v10, %v1187_v53  ;;  %v574_v37 = vadd.f32 %v551_v10, %v542_v1  ;;  %vm586_vm6 = vcmp.ge.f32.partialorder %v564_v23, 0.0  ;;  %vm587_vm7 = vcmp.ge.f32.partialorder %v565_v26, 0.0 }
 0x1d3   :  { %656 = vst [vmem:[%s1264_s4 + $0x18] sm:$0xff] %v644_v20  ;;  %vm588_vm8 = vcmp.ge.f32.partialorder %v566_v27, 0.0  ;;  %vm589_vm9 = vcmp.ge.f32.partialorder %v567_v28, 0.0  ;;  %vm590_vm10 = vcmp.ge.f32.partialorder %v568_v29, 0.0  ;;  %vm591_vm11 = vcmp.ge.f32.partialorder %v569_v31, 0.0 }
 0x1d4   :  { %657 = vst [vmem:[%s1264_s4 + $0x20] sm:$0xff] %v645_v21  ;;  %vm592_vm12 = vcmp.ge.f32.partialorder %v570_v32, 0.0  ;;  %vm593_vm13 = vcmp.ge.f32.partialorder %v571_v33, 0.0  ;;  %vm594_vm14 = vcmp.ge.f32.partialorder %v572_v34, 0.0  ;;  %vm595_vm15 = vcmp.ge.f32.partialorder %v573_v36, 0.0 }
 0x1d5   :  { %659 = vst.msk [vmem:[%s1264_s4 + $0x28] sm:$0xf] %vm658_vm5, %v646_v22  ;;  %vm596_vm0 = vcmp.ge.f32.partialorder %v574_v37, 0.0  ;;  %v608_v42 = vmul.f32 0.2, %v564_v23 }
 0x1d6   :  { %v609_v43 = vmul.f32 0.2, %v565_v26  ;;  %v610_v44 = vmul.f32 0.2, %v566_v27  ;;  %v611_v45 = vmul.f32 0.2, %v567_v28 }
 0x1d7   :  { %v612_v55 = vmul.f32 0.2, %v568_v29  ;;  %v613_v56 = vmul.f32 0.2, %v569_v31  ;;  %v614_v4 = vmul.f32 0.2, %v570_v32  ;;  %v630_v47 = vsel %vm586_vm6, %v564_v23, %v608_v42 }
 0x1d8   :  { %v615_v48 = vmul.f32 0.2, %v571_v33  ;;  %v616_v11 = vmul.f32 0.2, %v572_v34  ;;  %v617_v53 = vmul.f32 0.2, %v573_v36  ;;  %v631_v54 = vsel %vm587_vm7, %v565_v26, %v609_v43 }
 0x1d9   :  { %v618_v25 = vmul.f32 0.2, %v574_v37  ;;  %v632_v30 = vsel %vm588_vm8, %v566_v27, %v610_v44  ;;  %v633_v5 = vsel %vm589_vm9, %v567_v28, %v611_v45  ;;  %v634_v49 = vsel %vm590_vm10, %v568_v29, %v612_v55 }
 0x1da   :  { %v635_v38 = vsel %vm591_vm11, %v569_v31, %v613_v56  ;;  %v636_v6 = vsel %vm592_vm12, %v570_v32, %v614_v4  ;;  %v637_v39 = vsel %vm593_vm13, %v571_v33, %v615_v48  ;;  %v638_v40 = vsel %vm594_vm14, %v572_v34, %v616_v11 }
 0x1db   :  { %v639_v24 = vsel %vm595_vm15, %v573_v36, %v617_v53  ;;  %v640_v41 = vsel %vm596_vm0, %v574_v37, %v618_v25  ;;  %v647_v50 = vpack.c.bf16 %v631_v54, %v630_v47  ;;  %v648_v35 = vpack.c.bf16 %v633_v5, %v632_v30 }
 0x1dc   :  { %v649_v46 = vpack.c.bf16 %v635_v38, %v634_v49  ;;  %v650_v1 = vpack.c.bf16 %v637_v39, %v636_v6  ;;  %v651_v51 = vpack.c.bf16 %v639_v24, %v638_v40  ;;  %v652_v52 = vpack.c.bf16 %v640_v41, %v640_v41 }
 0x1dd   :  { %660 = vst [vmem:[%s1264_s4 + $0x2c] sm:$0xff] %v647_v50 }
 0x1de   :  { %661 = vst [vmem:[%s1264_s4 + $0x34] sm:$0xff] %v648_v35 }
 0x1df   :  { %662 = vst [vmem:[%s1264_s4 + $0x3c] sm:$0xff] %v649_v46 }
 0x1e0   :  { %663 = vst [vmem:[%s1264_s4 + $0x44] sm:$0xff] %v650_v1 }
 0x1e1   :  { %664 = vst [vmem:[%s1264_s4 + $0x4c] sm:$0xff] %v651_v51 }
 0x1e2   :  { %665 = vst.msk [vmem:[%s1264_s4 + $0x54] sm:$0xf] %vm658_vm5, %v652_v52 }

// kernel: discriminator_forward.14
= control target key start
LH: loop header
LB: loop body
LE: loop exit
PB: predicated region body
PF: predicated region fallthrough
CT: control target
= control target key end

     0   :  { %vm205_vm0 = vcmask 654336   ;;  %vm297_vm1 = vcmask 277504   ;;  %vm475_vm9 = vcmask 1043456   ;;  %vm476_vm10 = vcmask 277508   ;;  %s991_s0 = inlined_call_operand.vmem [shape: bf16[80,674], index: 0, kind: input, shape index: {}]   ;;  %s992_s1 = inlined_call_operand.vmem [shape: bf16[16,80], index: 1, kind: input, shape index: {}]   ;;  %s993_s2 = inlined_call_operand.vmem [shape: f32[16,1], index: 2, kind: input, shape index: {}]   ;;  %s994_s3 = inlined_call_operand.vmem [shape: f32[16,1], index: 3, kind: input, shape index: {}]   ;;  %s995_s4 = inlined_call_operand.vmem [shape: bf16[16,674], index: 4, kind: output, shape index: {}]  }
   0x1   :  { %v588_v0 = vld [vmem:[%s991_s0 + $0xc0] sm:$0xf]  ;;  %v644_v1 = vld [vmem:[%s991_s0 + $0xd4] sm:$0xf0]  ;;  %v641_v2 = vld [vmem:[%s991_s0 + $0xc4] sm:$0xf] }
   0x2   :  { %v589_v3 = vor.u32 %v644_v1, %v588_v0  ;;  %v590_v4 = vld [vmem:[%s991_s0 + $0xd8] sm:$0xf0]  ;;  %v596_v5 = vld [vmem:[%s991_s0 + $0xc8] sm:$0xf]  ;;  %v645_v6 = vld [vmem:[%s991_s0 + $0xdc] sm:$0xf0] }
   0x3   :  { %v593_v7 = vor.u32 %v641_v2, %v590_v4  ;;  %v597_v8 = vor.u32 %v645_v6, %v596_v5  ;;  %v642_v9 = vld [vmem:[%s991_s0 + $0xcc] sm:$0xf]  ;;  %v598_v10 = vld [vmem:[%s991_s0 + $0xe0] sm:$0xf0]  ;;  %v564_v11 = vld [vmem:[%s991_s0 + $0x90] sm:$0xf] }
   0x4   :  { %212 = vmatpush.bf16.msra.mxu0 %v589_v3  ;;  %v601_v12 = vor.u32 %v642_v9, %v598_v10  ;;  %v638_v13 = vld [vmem:[%s991_s0 + $0xa4] sm:$0xf0]  ;;  %v635_v14 = vld [vmem:[%s991_s0 + $0x94] sm:$0xf]  ;;  %v566_v15 = vld [vmem:[%s991_s0 + $0xa8] sm:$0xf0] }
   0x5   :  { %226 = vmatpush.bf16.msra.mxu1 %v593_v7  ;;  %240 = vmatpush.bf16.msra.mxu2 %v597_v8  ;;  %v565_v16 = vor.u32 %v638_v13, %v564_v11  ;;  %v569_v17 = vor.u32 %v635_v14, %v566_v15  ;;  %v572_v18 = vld [vmem:[%s991_s0 + $0x98] sm:$0xf]  ;;  %v639_v19 = vld [vmem:[%s991_s0 + $0xac] sm:$0xf0]  ;;  %v636_v20 = vld [vmem:[%s991_s0 + $0x9c] sm:$0xf] }
   0x6   :  { %254 = vmatpush.bf16.msra.mxu3 %v601_v12  ;;  %v573_v21 = vor.u32 %v639_v19, %v572_v18  ;;  %v574_v22 = vld [vmem:[%s991_s0 + $0xb0] sm:$0xf0]  ;;  %v540_v23 = vld [vmem:[%s991_s0 + $0x60] sm:$0xf]  ;;  %v632_v24 = vld [vmem:[%s991_s0 + $0x74] sm:$0xf0] }
   0x7   :  { %v577_v25 = vor.u32 %v636_v20, %v574_v22  ;;  %v629_v26 = vld [vmem:[%s991_s0 + $0x64] sm:$0xf]  ;;  %v542_v27 = vld [vmem:[%s991_s0 + $0x78] sm:$0xf0]  ;;  %v548_v28 = vld [vmem:[%s991_s0 + $0x68] sm:$0xf]  ;;  %v541_v29 = vor.u32 %v632_v24, %v540_v23 }
   0x8   :  { %213 = vmatpush.bf16.msra.mxu0 %v565_v16  ;;  %v633_v30 = vld [vmem:[%s991_s0 + $0x7c] sm:$0xf0]  ;;  %v630_v31 = vld [vmem:[%s991_s0 + $0x6c] sm:$0xf]  ;;  %v550_v32 = vld [vmem:[%s991_s0 + $0x80] sm:$0xf0]  ;;  %v545_v33 = vor.u32 %v629_v26, %v542_v27 }
   0x9   :  { %227 = vmatpush.bf16.msra.mxu1 %v569_v17  ;;  %241 = vmatpush.bf16.msra.mxu2 %v573_v21  ;;  %v549_v34 = vor.u32 %v633_v30, %v548_v28  ;;  %v516_v35 = vld [vmem:[%s991_s0 + $0x30] sm:$0xf]  ;;  %v626_v36 = vld [vmem:[%s991_s0 + $0x44] sm:$0xf0]  ;;  %v623_v37 = vld [vmem:[%s991_s0 + $0x34] sm:$0xf]  ;;  %v553_v38 = vor.u32 %v630_v31, %v550_v32 }
   0xa   :  { %255 = vmatpush.bf16.msra.mxu3 %v577_v25  ;;  %v518_v39 = vld [vmem:[%s991_s0 + $0x48] sm:$0xf0]  ;;  %v524_v40 = vld [vmem:[%s991_s0 + $0x38] sm:$0xf]  ;;  %v627_v41 = vld [vmem:[%s991_s0 + $0x4c] sm:$0xf0]  ;;  %v517_v44 = vor.u32 %v626_v36, %v516_v35 }
   0xb   :  { %v624_v42 = vld [vmem:[%s991_s0 + $0x3c] sm:$0xf]  ;;  %v526_v43 = vld [vmem:[%s991_s0 + $0x50] sm:$0xf0]  ;;  %v492_v45 = vld [vmem:[%s991_s0] sm:$0xf]  ;;  %v521_v46 = vor.u32 %v623_v37, %v518_v39  ;;  %v525_v47 = vor.u32 %v627_v41, %v524_v40 }
   0xc   :  { %214 = vmatpush.bf16.msra.mxu0 %v541_v29  ;;  %v620_v48 = vld [vmem:[%s991_s0 + $0x14] sm:$0xf0]  ;;  %v617_v49 = vld [vmem:[%s991_s0 + $0x4] sm:$0xf]  ;;  %v494_v50 = vld [vmem:[%s991_s0 + $0x18] sm:$0xf0]  ;;  %v529_v51 = vor.u32 %v624_v42, %v526_v43 }
   0xd   :  { %228 = vmatpush.bf16.msra.mxu1 %v545_v33  ;;  %242 = vmatpush.bf16.msra.mxu2 %v549_v34  ;;  %v500_v52 = vld [vmem:[%s991_s0 + $0x8] sm:$0xf]  ;;  %v621_v53 = vld [vmem:[%s991_s0 + $0x1c] sm:$0xf0]  ;;  %v618_v54 = vld [vmem:[%s991_s0 + $0xc] sm:$0xf]  ;;  %v493_v58 = vor.u32 %v620_v48, %v492_v45  ;;  %v497_v61 = vor.u32 %v617_v49, %v494_v50 }
   0xe   :  { %256 = vmatpush.bf16.msra.mxu3 %v553_v38  ;;  %v502_v55 = vld [vmem:[%s991_s0 + $0x20] sm:$0xf0]  ;;  %v604_v56 = vld [vmem:[%s991_s0 + $0xd0] sm:$0xf]  ;;  %v646_v57 = vld [vmem:[%s991_s0 + $0xe4] sm:$0xf0]  ;;  %v501_v62 = vor.u32 %v621_v53, %v500_v52 }
   0xf   :  { %v643_v59 = vld [vmem:[%s991_s0 + $0xd4] sm:$0xf]  ;;  %v606_v60 = vld [vmem:[%s991_s0 + $0xe8] sm:$0xf0]  ;;  %v505_v63 = vor.u32 %v618_v54, %v502_v55  ;;  %v605_v0 = vor.u32 %v646_v57, %v604_v56  ;;  %v616_v2 = vld [vmem:[%s992_s1] sm:$0xff] }
  0x10   :  { %215 = vmatpush.bf16.msra.mxu0 %v517_v44  ;;  %v609_v1 = vor.u32 %v643_v59, %v606_v60  ;;  %v580_v3 = vld [vmem:[%s991_s0 + $0xa0] sm:$0xf]  ;;  %v640_v4 = vld [vmem:[%s991_s0 + $0xb4] sm:$0xf0]  ;;  %v637_v5 = vld [vmem:[%s991_s0 + $0xa4] sm:$0xf] }
  0x11   :  { %229 = vmatpush.bf16.msra.mxu1 %v521_v46  ;;  %243 = vmatpush.bf16.msra.mxu2 %v525_v47  ;;  %v582_v6 = vld [vmem:[%s991_s0 + $0xb8] sm:$0xf0]  ;;  %v581_v7 = vor.u32 %v640_v4, %v580_v3  ;;  %v556_v9 = vld [vmem:[%s991_s0 + $0x70] sm:$0xf]  ;;  %v634_v10 = vld [vmem:[%s991_s0 + $0x84] sm:$0xf0] }
  0x12   :  { %257 = vmatpush.bf16.msra.mxu3 %v529_v51  ;;  %v585_v8 = vor.u32 %v637_v5, %v582_v6  ;;  %v631_v11 = vld [vmem:[%s991_s0 + $0x74] sm:$0xf]  ;;  %v558_v12 = vld [vmem:[%s991_s0 + $0x88] sm:$0xf0]  ;;  %v557_v13 = vor.u32 %v634_v10, %v556_v9  ;;  %v532_v15 = vld [vmem:[%s991_s0 + $0x40] sm:$0xf] }
  0x13   :  { %v561_v14 = vor.u32 %v631_v11, %v558_v12  ;;  %v628_v16 = vld [vmem:[%s991_s0 + $0x54] sm:$0xf0]  ;;  %v625_v17 = vld [vmem:[%s991_s0 + $0x44] sm:$0xf]  ;;  %v534_v18 = vld [vmem:[%s991_s0 + $0x58] sm:$0xf0] }
  0x14   :  { %216 = vmatpush.bf16.msra.mxu0 %v493_v58  ;;  %v533_v19 = vor.u32 %v628_v16, %v532_v15  ;;  %v537_v20 = vor.u32 %v625_v17, %v534_v18  ;;  %v508_v21 = vld [vmem:[%s991_s0 + $0x10] sm:$0xf]  ;;  %v622_v22 = vld [vmem:[%s991_s0 + $0x24] sm:$0xf0]  ;;  %v619_v23 = vld [vmem:[%s991_s0 + $0x14] sm:$0xf] }
  0x15   :  { %230 = vmatpush.bf16.msra.mxu1 %v497_v61  ;;  %244 = vmatpush.bf16.msra.mxu2 %v501_v62  ;;  %v510_v24 = vld [vmem:[%s991_s0 + $0x28] sm:$0xf0]  ;;  %v509_v25 = vor.u32 %v622_v22, %v508_v21  ;;  %v658_v11 = vmov 674.0   ;;  %v659_v18 = vmov 0  }
  0x16   :  { %258 = vmatpush.bf16.msra.mxu3 %v505_v63  ;;  %v513_v26 = vor.u32 %v619_v23, %v510_v24  ;;  %652 = vrcp.f32 %v658_v11  ;;  %649 = vset.pattern.permute.xlu2 %v659_v18 }
  0x17   :  { %610 = vmatmul.msk.bf16.vlgmr.msra.gmra.mxu0 %vm205_vm0, %v616_v2  ;;  %650 = vset.pattern.permute.xlu0 %v659_v18 }
  0x18   :  { %268 = vmatpush.bf16.msrb.mxu0 %v605_v0  ;;  %611 = vmatmul.msk.bf16.vlgmr.msra.gmra.mxu1 %vm205_vm0, %v616_v2 }
  0x19   :  { %282 = vmatpush.bf16.msrb.mxu1 %v609_v1  ;;  %612 = vmatmul.msk.bf16.vlgmr.msra.gmra.mxu2 %vm205_vm0, %v616_v2 }
  0x1a   :  { %613 = vmatmul.msk.bf16.vlgmr.msra.gmra.mxu3 %vm205_vm0, %v616_v2  ;;  %651 = vset.pattern.permute.xlu1 %v659_v18 }
  0x1c   :  { %269 = vmatpush.bf16.msrb.mxu0 %v581_v7  ;;  %v653_v12 = vpop.eup %652 }
  0x1d   :  { %283 = vmatpush.bf16.msrb.mxu1 %v585_v8  ;;  %vm315_vm2 = vweird.f32 %v653_v12 }
  0x20   :  { %270 = vmatpush.bf16.msrb.mxu0 %v557_v13  ;;  %v311_v13 = vmul.f32 674.0, %v653_v12 }
  0x21   :  { %284 = vmatpush.bf16.msrb.mxu1 %v561_v14 }
  0x22   :  { %v312_v14 = vsub.f32 1.0, %v311_v13 }
  0x24   :  { %271 = vmatpush.bf16.msrb.mxu0 %v533_v19  ;;  %v313_v15 = vmul.f32 %v653_v12, %v312_v14 }
  0x25   :  { %285 = vmatpush.bf16.msrb.mxu1 %v537_v20 }
  0x26   :  { %v314_v16 = vadd.f32 %v653_v12, %v313_v15 }
  0x28   :  { %272 = vmatpush.bf16.msrb.mxu0 %v509_v25  ;;  %v316_v17 = vsel %vm315_vm2, %v653_v12, %v314_v16 }
  0x29   :  { %286 = vmatpush.bf16.msrb.mxu1 %v513_v26 }
  0x2b   :  { %614 = vmatmul.msk.bf16.vlgmr.msrb.gmra.mxu0 %vm205_vm0, %v616_v2 }
  0x2c   :  { %615 = vmatmul.msk.bf16.vlgmr.msrb.gmra.mxu1 %vm205_vm0, %v616_v2 }
  0x94   :  { %v874_v27 = vpop.f32.mrf.mxu0 }
  0x95   :  { %v876_v28 = vpop.f32.mrf.mxu1  ;;  %v319_v31 = vmul.f32 %v874_v27, %v874_v27 }
  0x96   :  { %v320_v32 = vmul.f32 %v876_v28, %v876_v28  ;;  %v293_v35 = vadd.f32 %v876_v28, %v874_v27 }
  0x98   :  { %v331_v37 = vadd.f32 %v320_v32, %v319_v31 }
  0x9c   :  { %v878_v29 = vpop.f32.mrf.mxu2  ;;  %v880_v30 = vpop.f32.mrf.mxu0 }
  0x9d   :  { %v886_v33 = vpop.f32.mrf.mxu1  ;;  %v888_v34 = vpop.f32.mrf.mxu3  ;;  %v321_v36 = vmul.f32 %v878_v29, %v878_v29  ;;  %v294_v38 = vadd.f32 %v293_v35, %v878_v29  ;;  %v325_v43 = vmul.f32 %v880_v30, %v880_v30 }
  0x9e   :  { %v322_v40 = vmul.f32 %v888_v34, %v888_v34  ;;  %v326_v44 = vmul.f32 %v886_v33, %v886_v33  ;;  %v302_v45 = vadd.f32 %v886_v33, %v880_v30 }
  0x9f   :  { %v332_v39 = vadd.f32 %v331_v37, %v321_v36  ;;  %v295_v42 = vadd.f32 %v294_v38, %v888_v34 }
  0xa0   :  { %v339_v55 = vadd.f32 %v326_v44, %v325_v43 }
  0xa1   :  { %v333_v51 = vadd.f32 %v332_v39, %v322_v40 }
  0xa4   :  { %v897_v41 = vpop.f32.mrf.mxu2 }
  0xa5   :  { %v327_v47 = vmul.f32 %v897_v41, %v897_v41  ;;  %v915_v52 = vpop.f32.mrf.mxu3  ;;  %v303_v56 = vadd.f32 %v302_v45, %v897_v41 }
  0xa6   :  { %v328_v61 = vmul.f32 %v915_v52, %v915_v52 }
  0xa7   :  { %v340_v60 = vadd.f32 %v339_v55, %v327_v47  ;;  %v304_v63 = vadd.f32 %v303_v56, %v915_v52 }
  0xa8   :  { %v906_v46 = vpop.f32.mrf.mxu0 }
  0xa9   :  { %v323_v48 = vmul.f32 %v906_v46, %v906_v46  ;;  %v912_v49 = vpop.f32.mrf.mxu1  ;;  %v296_v50 = vadd.f32 %v295_v42, %v906_v46  ;;  %v341_v1 = vadd.f32 %v340_v60, %v328_v61 }
  0xaa   :  { %v298_v53 = vsel %vm297_vm1, %v912_v49, 0.0  ;;  %v324_v54 = vmul.f32 %v912_v49, %v912_v49 }
  0xab   :  { %v299_v57 = vadd.f32 %v298_v53, %v296_v50  ;;  %v334_v58 = vadd.f32 %v333_v51, %v323_v48  ;;  %v355_v51 = vld [vmem:[%s993_s2] sm:$0xff] }
  0xac   :  { %v335_v59 = vsel %vm297_vm1, %v324_v54, 0.0 }
  0xad   :  { %300 = vadd.xlane.f32.xlu0 %v299_v57  ;;  %v336_v62 = vadd.f32 %v335_v59, %v334_v58  ;;  %v381_v58 = vld [vmem:[%s994_s3] sm:$0xff] }
  0xaf   :  { %337 = vadd.xlane.f32.xlu1 %v336_v62  ;;  %v356_v62 = vld [vmem:[%s993_s2 + $0x8] sm:$0xff] }
  0xb0   :  { %v926_v0 = vpop.f32.mrf.mxu0 }
  0xb1   :  { %v305_v2 = vadd.f32 %v304_v63, %v926_v0  ;;  %v329_v3 = vmul.f32 %v926_v0, %v926_v0  ;;  %v931_v4 = vpop.f32.mrf.mxu1 }
  0xb2   :  { %v306_v5 = vsel %vm297_vm1, %v931_v4, 0.0  ;;  %v330_v6 = vmul.f32 %v931_v4, %v931_v4 }
  0xb3   :  { %v307_v7 = vadd.f32 %v306_v5, %v305_v2  ;;  %v342_v8 = vadd.f32 %v341_v1, %v329_v3  ;;  %v382_v3 = vld [vmem:[%s994_s3 + $0x8] sm:$0xff] }
  0xb4   :  { %v343_v9 = vsel %vm297_vm1, %v330_v6, 0.0  ;;  %vm964_vm1 = vmor %vm476_vm10, %vm475_vm9 }
  0xb5   :  { %308 = vadd.xlane.f32.xlu0 %v307_v7  ;;  %v344_v10 = vadd.f32 %v343_v9, %v342_v8 }
  0xb7   :  { %345 = vadd.xlane.f32.xlu1 %v344_v10 }
 0x120   :  { %v301_v19 = vpop.xlane.xlu0 %300 }
 0x121   :  { %v317_v20 = vmul.f32 %v316_v17, %v301_v19 }
 0x122   :  { %v338_v21 = vpop.xlane.xlu1 %337 }
 0x123   :  { %v349_v22 = vmul.f32 %v317_v20, %v317_v20  ;;  %v347_v23 = vmul.f32 %v338_v21, %v316_v17 }
 0x125   :  { %v351_v24 = vsub.f32 %v347_v23, %v349_v22 }
 0x127   :  { %v353_v25 = vmax.f32 %v351_v24, 0.0 }
 0x128   :  { %v309_v26 = vpop.xlane.xlu0 %308 }
 0x129   :  { %v357_v31 = vadd.f32 1e-05, %v353_v25  ;;  %v318_v32 = vmul.f32 %v316_v17, %v309_v26 }
 0x12a   :  { %v346_v35 = vpop.xlane.xlu1 %345 }
 0x12b   :  { %654 = vrsqrt.f32 %v357_v31  ;;  %v350_v36 = vmul.f32 %v318_v32, %v318_v32  ;;  %v348_v37 = vmul.f32 %v346_v35, %v316_v17  ;;  %vm365_vm4 = vweird.f32 %v357_v31 }
 0x12d   :  { %v352_v38 = vsub.f32 %v348_v37, %v350_v36 }
 0x12f   :  { %v354_v39 = vmax.f32 %v352_v38, 0.0 }
 0x131   :  { %v655_v40 = vpop.eup %654  ;;  %v358_v42 = vadd.f32 1e-05, %v354_v39 }
 0x132   :  { %v360_v43 = vmul.f32 %v655_v40, %v357_v31  ;;  %vm366_vm3 = vweird.f32 %v655_v40 }
 0x133   :  { %656 = vrsqrt.f32 %v358_v42  ;;  %vm367_vm5 = vmor %vm365_vm4, %vm366_vm3  ;;  %vm375_vm7 = vweird.f32 %v358_v42 }
 0x134   :  { %v361_v44 = vmul.f32 %v655_v40, %v360_v43 }
 0x136   :  { %v362_v45 = vmul.f32 0.5, %v361_v44 }
 0x138   :  { %v363_v47 = vsub.f32 1.5, %v362_v45 }
 0x139   :  { %v657_v48 = vpop.eup %656 }
 0x13a   :  { %v370_v50 = vmul.f32 %v657_v48, %v358_v42  ;;  %v364_v53 = vmul.f32 %v655_v40, %v363_v47  ;;  %vm376_vm6 = vweird.f32 %v657_v48 }
 0x13b   :  { %vm377_vm8 = vmor %vm375_vm7, %vm376_vm6 }
 0x13c   :  { %v371_v54 = vmul.f32 %v657_v48, %v370_v50  ;;  %v368_v55 = vsel %vm367_vm5, %v655_v40, %v364_v53 }
 0x13d   :  { %v379_v56 = vmul.f32 %v368_v55, %v355_v51 }
 0x13e   :  { %v372_v57 = vmul.f32 0.5, %v371_v54 }
 0x13f   :  { %389 = vperm.xlu2 %649, %v379_v56   ;;  %v383_v59 = vmul.f32 %v379_v56, %v317_v20 }
 0x140   :  { %v373_v60 = vsub.f32 1.5, %v372_v57 }
 0x141   :  { %v385_v61 = vsub.f32 %v381_v58, %v383_v59 }
 0x142   :  { %v374_v63 = vmul.f32 %v657_v48, %v373_v60 }
 0x143   :  { %411 = vperm.xlu0 %650, %v385_v61  }
 0x144   :  { %v378_v1 = vsel %vm377_vm8, %v657_v48, %v374_v63 }
 0x145   :  { %v380_v2 = vmul.f32 %v378_v1, %v356_v62 }
 0x147   :  { %394 = vperm.xlu2 %649, %v380_v2   ;;  %v384_v5 = vmul.f32 %v380_v2, %v318_v32 }
 0x149   :  { %v386_v6 = vsub.f32 %v382_v3, %v384_v5 }
 0x14b   :  { %416 = vperm.xlu1 %651, %v386_v6  }
 0x199   :  { %v390_v7 = vpop.permute.xlu2 %389 }
 0x19a   :  { %v397_v9 = vmul.f32 %v390_v7, %v874_v27  ;;  %v398_v10 = vmul.f32 %v390_v7, %v876_v28  ;;  %v399_v11 = vmul.f32 %v390_v7, %v878_v29  ;;  %v400_v12 = vmul.f32 %v390_v7, %v888_v34 }
 0x19b   :  { %v401_v13 = vmul.f32 %v390_v7, %v906_v46  ;;  %v402_v14 = vmul.f32 %v390_v7, %v912_v49 }
 0x1a1   :  { %v395_v8 = vpop.permute.xlu2 %394 }
 0x1a2   :  { %v403_v20 = vmul.f32 %v395_v8, %v880_v30  ;;  %v404_v27 = vmul.f32 %v395_v8, %v886_v33  ;;  %v405_v46 = vmul.f32 %v395_v8, %v897_v41  ;;  %v406_v24 = vmul.f32 %v395_v8, %v915_v52 }
 0x1a3   :  { %v407_v36 = vmul.f32 %v395_v8, %v926_v0  ;;  %v408_v37 = vmul.f32 %v395_v8, %v931_v4 }
 0x1b5   :  { %v412_v15 = vpop.permute.xlu0 %411 }
 0x1b6   :  { %v419_v16 = vadd.f32 %v412_v15, %v397_v9  ;;  %v420_v17 = vadd.f32 %v412_v15, %v398_v10  ;;  %v421_v18 = vadd.f32 %v412_v15, %v399_v11  ;;  %v422_v19 = vadd.f32 %v412_v15, %v400_v12 }
 0x1b7   :  { %v423_v28 = vadd.f32 %v412_v15, %v401_v13  ;;  %v424_v21 = vadd.f32 %v412_v15, %v402_v14 }
 0x1b8   :  { %vm431_vm11 = vcmp.ge.f32.partialorder %v419_v16, 0.0  ;;  %vm432_vm12 = vcmp.ge.f32.partialorder %v420_v17, 0.0  ;;  %vm433_vm13 = vcmp.ge.f32.partialorder %v421_v18, 0.0  ;;  %vm434_vm14 = vcmp.ge.f32.partialorder %v422_v19, 0.0 }
 0x1b9   :  { %vm435_vm15 = vcmp.ge.f32.partialorder %v423_v28, 0.0  ;;  %vm436_vm0 = vcmp.ge.f32.partialorder %v424_v21, 0.0  ;;  %v443_v29 = vmul.f32 0.2, %v419_v16  ;;  %v444_v34 = vmul.f32 0.2, %v420_v17 }
 0x1ba   :  { %v445_v49 = vmul.f32 0.2, %v421_v18  ;;  %v446_v22 = vmul.f32 0.2, %v422_v19  ;;  %v447_v23 = vmul.f32 0.2, %v423_v28 }
 0x1bb   :  { %v448_v30 = vmul.f32 0.2, %v424_v21  ;;  %v455_v25 = vsel %vm431_vm11, %v419_v16, %v443_v29  ;;  %v456_v33 = vsel %vm432_vm12, %v420_v17, %v444_v34 }
 0x1bc   :  { %v457_v26 = vsel %vm433_vm13, %v421_v18, %v445_v49  ;;  %v458_v31 = vsel %vm434_vm14, %v422_v19, %v446_v22  ;;  %v459_v32 = vsel %vm435_vm15, %v423_v28, %v447_v23  ;;  %v467_v35 = vpack.c.bf16 %v456_v33, %v455_v25 }
 0x1bd   :  { %v460_v38 = vsel %vm436_vm0, %v424_v21, %v448_v30  ;;  %v468_v52 = vpack.c.bf16 %v458_v31, %v457_v26  ;;  %v417_v39 = vpop.permute.xlu1 %416 }
 0x1be   :  { %v469_v40 = vpack.c.bf16 %v460_v38, %v459_v32  ;;  %473 = vst [vmem:[%s995_s4] sm:$0xff] %v467_v35  ;;  %v425_v42 = vadd.f32 %v417_v39, %v403_v20  ;;  %v426_v43 = vadd.f32 %v417_v39, %v404_v27  ;;  %v427_v0 = vadd.f32 %v417_v39, %v405_v46 }
 0x1bf   :  { %474 = vst [vmem:[%s995_s4 + $0x8] sm:$0xff] %v468_v52  ;;  %v428_v4 = vadd.f32 %v417_v39, %v406_v24  ;;  %v429_v44 = vadd.f32 %v417_v39, %v407_v36  ;;  %v430_v45 = vadd.f32 %v417_v39, %v408_v37 }
 0x1c0   :  { %478 = vst.msk [vmem:[%s995_s4 + $0x10] sm:$0xff] %vm964_vm1, %v469_v40  ;;  %vm437_vm2 = vcmp.ge.f32.partialorder %v425_v42, 0.0  ;;  %vm438_vm3 = vcmp.ge.f32.partialorder %v426_v43, 0.0  ;;  %vm439_vm4 = vcmp.ge.f32.partialorder %v427_v0, 0.0  ;;  %v449_v47 = vmul.f32 0.2, %v425_v42 }
 0x1c1   :  { %vm440_vm5 = vcmp.ge.f32.partialorder %v428_v4, 0.0  ;;  %vm441_vm6 = vcmp.ge.f32.partialorder %v429_v44, 0.0  ;;  %vm442_vm7 = vcmp.ge.f32.partialorder %v430_v45, 0.0  ;;  %v450_v48 = vmul.f32 0.2, %v426_v43 }
 0x1c2   :  { %v451_v50 = vmul.f32 0.2, %v427_v0  ;;  %v452_v51 = vmul.f32 0.2, %v428_v4  ;;  %v453_v53 = vmul.f32 0.2, %v429_v44  ;;  %v461_v54 = vsel %vm437_vm2, %v425_v42, %v449_v47 }
 0x1c3   :  { %v454_v55 = vmul.f32 0.2, %v430_v45  ;;  %v462_v56 = vsel %vm438_vm3, %v426_v43, %v450_v48 }
 0x1c4   :  { %v463_v57 = vsel %vm439_vm4, %v427_v0, %v451_v50  ;;  %v464_v58 = vsel %vm440_vm5, %v428_v4, %v452_v51  ;;  %v465_v59 = vsel %vm441_vm6, %v429_v44, %v453_v53  ;;  %v470_v60 = vpack.c.bf16 %v462_v56, %v461_v54 }
 0x1c5   :  { %v466_v61 = vsel %vm442_vm7, %v430_v45, %v454_v55  ;;  %v471_v62 = vpack.c.bf16 %v464_v58, %v463_v57 }
 0x1c6   :  { %v472_v63 = vpack.c.bf16 %v466_v61, %v465_v59  ;;  %479 = vst [vmem:[%s995_s4 + $0x18] sm:$0xff] %v470_v60 }
 0x1c7   :  { %480 = vst [vmem:[%s995_s4 + $0x20] sm:$0xff] %v471_v62 }
 0x1c8   :  { %481 = vst.msk [vmem:[%s995_s4 + $0x28] sm:$0xff] %vm964_vm1, %v472_v63 }

// kernel: discriminator_forward.15
= control target key start
LH: loop header
LB: loop body
LE: loop exit
PB: predicated region body
PF: predicated region fallthrough
CT: control target
= control target key end

     0   :  { %vm132_vm0 = vcmask 654336   ;;  %vm197_vm1 = vcmask 637952   ;;  %s837_s0 = inlined_call_operand.vmem [shape: bf16[80,334], index: 0, kind: input, shape index: {}]   ;;  %s838_s1 = inlined_call_operand.vmem [shape: bf16[32,80], index: 1, kind: input, shape index: {}]   ;;  %s839_s2 = inlined_call_operand.vmem [shape: f32[32,1], index: 2, kind: input, shape index: {}]   ;;  %s840_s3 = inlined_call_operand.vmem [shape: f32[32,1], index: 3, kind: input, shape index: {}]   ;;  %s841_s4 = inlined_call_operand.vmem [shape: bf16[32,334], index: 4, kind: output, shape index: {}]  }
   0x1   :  { %v519_v0 = vld [vmem:[%s837_s0 + $0x60] sm:$0xf]  ;;  %v550_v1 = vld [vmem:[%s837_s0 + $0x68] sm:$0xf0]  ;;  %v549_v2 = vld [vmem:[%s837_s0 + $0x64] sm:$0xf] }
   0x2   :  { %v520_v3 = vor.u32 %v550_v1, %v519_v0  ;;  %v521_v4 = vld [vmem:[%s837_s0 + $0x6c] sm:$0xf0]  ;;  %v527_v5 = vld [vmem:[%s837_s0 + $0x68] sm:$0xf]  ;;  %v551_v6 = vld [vmem:[%s837_s0 + $0x70] sm:$0xf0] }
   0x3   :  { %v524_v7 = vor.u32 %v549_v2, %v521_v4  ;;  %v528_v8 = vor.u32 %v551_v6, %v527_v5  ;;  %v507_v9 = vld [vmem:[%s837_s0 + $0x48] sm:$0xf]  ;;  %v547_v10 = vld [vmem:[%s837_s0 + $0x50] sm:$0xf0]  ;;  %v546_v11 = vld [vmem:[%s837_s0 + $0x4c] sm:$0xf] }
   0x4   :  { %142 = vmatpush.bf16.msra.mxu0 %v520_v3  ;;  %v508_v12 = vor.u32 %v547_v10, %v507_v9  ;;  %v509_v13 = vld [vmem:[%s837_s0 + $0x54] sm:$0xf0]  ;;  %v515_v14 = vld [vmem:[%s837_s0 + $0x50] sm:$0xf]  ;;  %v548_v15 = vld [vmem:[%s837_s0 + $0x58] sm:$0xf0]  ;;  %552 = vmatpush.bf16.msra.mxu3 %v520_v3 }
   0x5   :  { %161 = vmatpush.bf16.msra.mxu1 %v524_v7  ;;  %180 = vmatpush.bf16.msra.mxu2 %v528_v8  ;;  %v512_v16 = vor.u32 %v546_v11, %v509_v13  ;;  %v516_v17 = vor.u32 %v548_v15, %v515_v14  ;;  %v495_v18 = vld [vmem:[%s837_s0 + $0x30] sm:$0xf]  ;;  %v544_v19 = vld [vmem:[%s837_s0 + $0x38] sm:$0xf0]  ;;  %v543_v20 = vld [vmem:[%s837_s0 + $0x34] sm:$0xf] }
   0x6   :  { %v497_v21 = vld [vmem:[%s837_s0 + $0x3c] sm:$0xf0]  ;;  %v503_v22 = vld [vmem:[%s837_s0 + $0x38] sm:$0xf]  ;;  %v545_v23 = vld [vmem:[%s837_s0 + $0x40] sm:$0xf0]  ;;  %v496_v24 = vor.u32 %v544_v19, %v495_v18 }
   0x7   :  { %v500_v25 = vor.u32 %v543_v20, %v497_v21  ;;  %v504_v26 = vor.u32 %v545_v23, %v503_v22  ;;  %v483_v27 = vld [vmem:[%s837_s0 + $0x18] sm:$0xf]  ;;  %v541_v28 = vld [vmem:[%s837_s0 + $0x20] sm:$0xf0]  ;;  %v540_v29 = vld [vmem:[%s837_s0 + $0x1c] sm:$0xf] }
   0x8   :  { %143 = vmatpush.bf16.msra.mxu0 %v508_v12  ;;  %553 = vmatpush.bf16.msra.mxu3 %v508_v12  ;;  %v485_v30 = vld [vmem:[%s837_s0 + $0x24] sm:$0xf0]  ;;  %v491_v31 = vld [vmem:[%s837_s0 + $0x20] sm:$0xf]  ;;  %v542_v32 = vld [vmem:[%s837_s0 + $0x28] sm:$0xf0]  ;;  %v484_v33 = vor.u32 %v541_v28, %v483_v27 }
   0x9   :  { %162 = vmatpush.bf16.msra.mxu1 %v512_v16  ;;  %181 = vmatpush.bf16.msra.mxu2 %v516_v17  ;;  %v488_v34 = vor.u32 %v540_v29, %v485_v30  ;;  %v492_v35 = vor.u32 %v542_v32, %v491_v31  ;;  %v471_v36 = vld [vmem:[%s837_s0] sm:$0xf]  ;;  %v538_v37 = vld [vmem:[%s837_s0 + $0x8] sm:$0xf0]  ;;  %v537_v38 = vld [vmem:[%s837_s0 + $0x4] sm:$0xf] }
   0xa   :  { %v473_v39 = vld [vmem:[%s837_s0 + $0xc] sm:$0xf0]  ;;  %v479_v40 = vld [vmem:[%s837_s0 + $0x8] sm:$0xf]  ;;  %v539_v41 = vld [vmem:[%s837_s0 + $0x10] sm:$0xf0]  ;;  %v472_v42 = vor.u32 %v538_v37, %v471_v36 }
   0xb   :  { %v476_v43 = vor.u32 %v537_v38, %v473_v39  ;;  %v480_v44 = vor.u32 %v539_v41, %v479_v40  ;;  %v535_v45 = vld [vmem:[%s838_s1] sm:$0xff]  ;;  %v536_v46 = vld [vmem:[%s838_s1 + $0x8] sm:$0xff]  ;;  %v572_v31 = vmov 334.0   ;;  %v573_v38 = vmov 0  }
   0xc   :  { %144 = vmatpush.bf16.msra.mxu0 %v496_v24  ;;  %554 = vmatpush.bf16.msra.mxu3 %v496_v24  ;;  %562 = vrcp.f32 %v572_v31 }
   0xd   :  { %163 = vmatpush.bf16.msra.mxu1 %v500_v25  ;;  %182 = vmatpush.bf16.msra.mxu2 %v504_v26 }
   0xe   :  { %559 = vset.pattern.permute.xlu2 %v573_v38  ;;  %560 = vset.pattern.permute.xlu0 %v573_v38 }
   0xf   :  { %561 = vset.pattern.permute.xlu1 %v573_v38 }
  0x10   :  { %145 = vmatpush.bf16.msra.mxu0 %v484_v33  ;;  %555 = vmatpush.bf16.msra.mxu3 %v484_v33 }
  0x11   :  { %164 = vmatpush.bf16.msra.mxu1 %v488_v34  ;;  %183 = vmatpush.bf16.msra.mxu2 %v492_v35 }
  0x12   :  { %v563_v32 = vpop.eup %562 }
  0x13   :  { %v218_v33 = vmul.f32 334.0, %v563_v32  ;;  %vm222_vm2 = vweird.f32 %v563_v32 }
  0x14   :  { %146 = vmatpush.bf16.msra.mxu0 %v472_v42  ;;  %556 = vmatpush.bf16.msra.mxu3 %v472_v42 }
  0x15   :  { %165 = vmatpush.bf16.msra.mxu1 %v476_v43  ;;  %184 = vmatpush.bf16.msra.mxu2 %v480_v44  ;;  %v219_v34 = vsub.f32 1.0, %v218_v33  ;;  %v328_v33 = vld [vmem:[%s840_s3] sm:$0xff] }
  0x17   :  { %529 = vmatmul.msk.bf16.vlgmr.msra.gmra.mxu0 %vm132_vm0, %v535_v45  ;;  %530 = vmatmul.msk.bf16.vlgmr.msra.gmra.mxu3 %vm132_vm0, %v536_v46  ;;  %v220_v35 = vmul.f32 %v563_v32, %v219_v34  ;;  %v277_v34 = vld [vmem:[%s839_s2 + $0x8] sm:$0xff] }
  0x18   :  { %531 = vmatmul.msk.bf16.vlgmr.msra.gmra.mxu1 %vm132_vm0, %v535_v45  ;;  %533 = vmatmul.msk.bf16.vlgmr.msra.gmra.mxu2 %vm132_vm0, %v535_v45 }
  0x19   :  { %v221_v36 = vadd.f32 %v563_v32, %v220_v35 }
  0x1b   :  { %v223_v37 = vsel %vm222_vm2, %v563_v32, %v221_v36  ;;  %vm449_vm2 = vcmask 633856  }
  0x28   :  { %532 = vmatmul.msk.bf16.gmra.mxu1 %vm132_vm0, %v536_v46  ;;  %534 = vmatmul.msk.bf16.gmra.mxu2 %vm132_vm0, %v536_v46 }
  0x94   :  { %v695_v47 = vpop.f32.mrf.mxu0 }
  0x95   :  { %v697_v48 = vpop.f32.mrf.mxu1  ;;  %v228_v49 = vmul.f32 %v695_v47, %v695_v47 }
  0x96   :  { %v229_v50 = vmul.f32 %v697_v48, %v697_v48  ;;  %v196_v51 = vadd.f32 %v697_v48, %v695_v47 }
  0x98   :  { %v240_v53 = vadd.f32 %v229_v50, %v228_v49 }
  0x9a   :  { %v728_v5 = vpop.f32.mrf.mxu3 }
  0x9b   :  { %v705_v52 = vpop.f32.mrf.mxu2  ;;  %v234_v8 = vmul.f32 %v728_v5, %v728_v5 }
  0x9c   :  { %v198_v54 = vsel %vm197_vm1, %v705_v52, 0.0  ;;  %v230_v55 = vmul.f32 %v705_v52, %v705_v52  ;;  %v713_v58 = vpop.f32.mrf.mxu0 }
  0x9d   :  { %v711_v56 = vpop.f32.mrf.mxu1  ;;  %v199_v57 = vadd.f32 %v198_v54, %v196_v51  ;;  %v231_v61 = vmul.f32 %v713_v58, %v713_v58 }
  0x9e   :  { %v241_v59 = vsel %vm197_vm1, %v230_v55, 0.0  ;;  %v232_v62 = vmul.f32 %v711_v56, %v711_v56  ;;  %v202_v0 = vadd.f32 %v711_v56, %v713_v58 }
  0x9f   :  { %200 = vadd.xlane.f32.xlu0 %v199_v57  ;;  %v242_v60 = vadd.f32 %v241_v59, %v240_v53 }
  0xa0   :  { %v245_v4 = vadd.f32 %v232_v62, %v231_v61 }
  0xa1   :  { %243 = vadd.xlane.f32.xlu2 %v242_v60 }
  0xa2   :  { %v748_v20 = vpop.f32.mrf.mxu3 }
  0xa3   :  { %v720_v63 = vpop.f32.mrf.mxu2  ;;  %v237_v27 = vmul.f32 %v748_v20, %v748_v20 }
  0xa4   :  { %v233_v1 = vmul.f32 %v720_v63, %v720_v63  ;;  %v203_v2 = vsel %vm197_vm1, %v720_v63, 0.0 }
  0xa5   :  { %v204_v3 = vadd.f32 %v203_v2, %v202_v0  ;;  %v730_v6 = vpop.f32.mrf.mxu1 }
  0xa6   :  { %v246_v7 = vsel %vm197_vm1, %v233_v1, 0.0  ;;  %v235_v9 = vmul.f32 %v730_v6, %v730_v6  ;;  %v207_v11 = vadd.f32 %v730_v6, %v728_v5 }
  0xa7   :  { %205 = vadd.xlane.f32.xlu0 %v204_v3  ;;  %v247_v10 = vadd.f32 %v246_v7, %v245_v4 }
  0xa8   :  { %v250_v13 = vadd.f32 %v235_v9, %v234_v8 }
  0xa9   :  { %248 = vadd.xlane.f32.xlu2 %v247_v10 }
  0xab   :  { %v739_v12 = vpop.f32.mrf.mxu2 }
  0xac   :  { %v236_v14 = vmul.f32 %v739_v12, %v739_v12  ;;  %v208_v15 = vsel %vm197_vm1, %v739_v12, 0.0 }
  0xad   :  { %v209_v16 = vadd.f32 %v208_v15, %v207_v11  ;;  %v746_v19 = vpop.f32.mrf.mxu1 }
  0xae   :  { %v251_v17 = vsel %vm197_vm1, %v236_v14, 0.0  ;;  %v212_v21 = vadd.f32 %v746_v19, %v748_v20  ;;  %v238_v26 = vmul.f32 %v746_v19, %v746_v19 }
  0xaf   :  { %210 = vadd.xlane.f32.xlu1 %v209_v16  ;;  %v252_v18 = vadd.f32 %v251_v17, %v250_v13  ;;  %v276_v16 = vld [vmem:[%s839_s2] sm:$0xff] }
  0xb0   :  { %v255_v29 = vadd.f32 %v238_v26, %v237_v27 }
  0xb1   :  { %253 = vadd.xlane.f32.xlu0 %v252_v18 }
  0xb3   :  { %v752_v22 = vpop.f32.mrf.mxu2 }
  0xb4   :  { %v213_v23 = vsel %vm197_vm1, %v752_v22, 0.0  ;;  %v239_v25 = vmul.f32 %v752_v22, %v752_v22 }
  0xb5   :  { %v214_v24 = vadd.f32 %v213_v23, %v212_v21 }
  0xb6   :  { %v256_v28 = vsel %vm197_vm1, %v239_v25, 0.0 }
  0xb7   :  { %215 = vadd.xlane.f32.xlu1 %v214_v24  ;;  %v257_v30 = vadd.f32 %v256_v28, %v255_v29 }
  0xbf   :  { %258 = vadd.xlane.f32.xlu1 %v257_v30 }
 0x112   :  { %v201_v39 = vpop.xlane.xlu0 %200 }
 0x113   :  { %v224_v40 = vmul.f32 %v223_v37, %v201_v39 }
 0x114   :  { %v244_v41 = vpop.xlane.xlu2 %243 }
 0x115   :  { %v264_v42 = vmul.f32 %v224_v40, %v224_v40  ;;  %v260_v43 = vmul.f32 %v244_v41, %v223_v37 }
 0x117   :  { %v268_v44 = vsub.f32 %v260_v43, %v264_v42 }
 0x119   :  { %v272_v45 = vmax.f32 %v268_v44, 0.0 }
 0x11a   :  { %v206_v46 = vpop.xlane.xlu0 %205 }
 0x11b   :  { %v280_v49 = vadd.f32 1e-05, %v272_v45  ;;  %v763_v50 = vmul.f32 %v223_v37, %v206_v46 }
 0x11c   :  { %v249_v51 = vpop.xlane.xlu2 %248 }
 0x11d   :  { %564 = vrsqrt.f32 %v280_v49  ;;  %v265_v53 = vmul.f32 %v763_v50, %v763_v50  ;;  %v261_v54 = vmul.f32 %v249_v51, %v223_v37  ;;  %vm290_vm4 = vweird.f32 %v280_v49 }
 0x11f   :  { %v269_v55 = vsub.f32 %v261_v54, %v265_v53  ;;  %v278_v53 = vld [vmem:[%s839_s2 + $0x10] sm:$0xff] }
 0x121   :  { %v273_v57 = vmax.f32 %v269_v55, 0.0 }
 0x122   :  { %v211_v59 = vpop.xlane.xlu1 %210 }
 0x123   :  { %v565_v60 = vpop.eup %564  ;;  %v281_v61 = vadd.f32 1e-05, %v273_v57  ;;  %v767_v62 = vmul.f32 %v223_v37, %v211_v59 }
 0x124   :  { %v285_v0 = vmul.f32 %v565_v60, %v280_v49  ;;  %v254_v1 = vpop.xlane.xlu0 %253  ;;  %vm291_vm3 = vweird.f32 %v565_v60 }
 0x125   :  { %566 = vrsqrt.f32 %v281_v61  ;;  %v266_v2 = vmul.f32 %v767_v62, %v767_v62  ;;  %v262_v3 = vmul.f32 %v254_v1, %v223_v37  ;;  %vm292_vm5 = vmor %vm290_vm4, %vm291_vm3  ;;  %vm300_vm7 = vweird.f32 %v281_v61 }
 0x126   :  { %v286_v4 = vmul.f32 %v565_v60, %v285_v0  ;;  %v279_v0 = vld [vmem:[%s839_s2 + $0x18] sm:$0xff] }
 0x127   :  { %v270_v7 = vsub.f32 %v262_v3, %v266_v2 }
 0x128   :  { %v287_v8 = vmul.f32 0.5, %v286_v4  ;;  %v331_v4 = vld [vmem:[%s840_s3 + $0x18] sm:$0xff] }
 0x129   :  { %v274_v9 = vmax.f32 %v270_v7, 0.0 }
 0x12a   :  { %v288_v10 = vsub.f32 1.5, %v287_v8  ;;  %v216_v11 = vpop.xlane.xlu1 %215 }
 0x12b   :  { %v567_v13 = vpop.eup %566  ;;  %v282_v14 = vadd.f32 1e-05, %v274_v9  ;;  %v227_v23 = vmul.f32 %v223_v37, %v216_v11 }
 0x12c   :  { %v295_v15 = vmul.f32 %v567_v13, %v281_v61  ;;  %v289_v17 = vmul.f32 %v565_v60, %v288_v10  ;;  %vm301_vm6 = vweird.f32 %v567_v13  ;;  %v330_v10 = vld [vmem:[%s840_s3 + $0x10] sm:$0xff] }
 0x12d   :  { %568 = vrsqrt.f32 %v282_v14  ;;  %v267_v29 = vmul.f32 %v227_v23, %v227_v23  ;;  %vm302_vm8 = vmor %vm300_vm7, %vm301_vm6  ;;  %vm310_vm10 = vweird.f32 %v282_v14 }
 0x12e   :  { %v296_v18 = vmul.f32 %v567_v13, %v295_v15  ;;  %v293_v21 = vsel %vm292_vm5, %v565_v60, %v289_v17 }
 0x12f   :  { %v324_v24 = vmul.f32 %v293_v21, %v276_v16 }
 0x130   :  { %v297_v25 = vmul.f32 0.5, %v296_v18 }
 0x131   :  { %342 = vperm.xlu2 %559, %v324_v24   ;;  %v332_v31 = vmul.f32 %v324_v24, %v224_v40  ;;  %v329_v40 = vld [vmem:[%s840_s3 + $0x8] sm:$0xff] }
 0x132   :  { %v298_v26 = vsub.f32 1.5, %v297_v25  ;;  %v259_v27 = vpop.xlane.xlu1 %258 }
 0x133   :  { %v569_v28 = vpop.eup %568  ;;  %v263_v30 = vmul.f32 %v259_v27, %v223_v37  ;;  %v336_v42 = vsub.f32 %v328_v33, %v332_v31 }
 0x134   :  { %v305_v32 = vmul.f32 %v569_v28, %v282_v14  ;;  %v299_v35 = vmul.f32 %v567_v13, %v298_v26  ;;  %vm311_vm9 = vweird.f32 %v569_v28 }
 0x135   :  { %v271_v36 = vsub.f32 %v263_v30, %v267_v29  ;;  %vm312_vm11 = vmor %vm310_vm10, %vm311_vm9 }
 0x136   :  { %v306_v38 = vmul.f32 %v569_v28, %v305_v32  ;;  %v303_v39 = vsel %vm302_vm8, %v567_v13, %v299_v35 }
 0x137   :  { %v275_v41 = vmax.f32 %v271_v36, 0.0  ;;  %v325_v43 = vmul.f32 %v303_v39, %v277_v34 }
 0x138   :  { %v307_v37 = vmul.f32 0.5, %v306_v38 }
 0x139   :  { %v283_v44 = vadd.f32 1e-05, %v275_v41  ;;  %374 = vperm.xlu2 %559, %v336_v42   ;;  %347 = vperm.xlu0 %560, %v325_v43   ;;  %v333_v45 = vmul.f32 %v325_v43, %v763_v50 }
 0x13a   :  { %v308_v46 = vsub.f32 1.5, %v307_v37 }
 0x13b   :  { %570 = vrsqrt.f32 %v283_v44  ;;  %v337_v49 = vsub.f32 %v329_v40, %v333_v45  ;;  %vm320_vm13 = vweird.f32 %v283_v44 }
 0x13c   :  { %v309_v51 = vmul.f32 %v569_v28, %v308_v46 }
 0x13d   :  { %379 = vperm.xlu1 %561, %v337_v49  }
 0x13e   :  { %v313_v54 = vsel %vm312_vm11, %v569_v28, %v309_v51 }
 0x13f   :  { %v326_v59 = vmul.f32 %v313_v54, %v278_v53 }
 0x141   :  { %v571_v55 = vpop.eup %570  ;;  %v334_v9 = vmul.f32 %v326_v59, %v767_v62 }
 0x142   :  { %v315_v57 = vmul.f32 %v571_v55, %v283_v44  ;;  %vm321_vm12 = vweird.f32 %v571_v55 }
 0x143   :  { %vm322_vm14 = vmor %vm320_vm13, %vm321_vm12  ;;  %v338_v11 = vsub.f32 %v330_v10, %v334_v9 }
 0x144   :  { %v316_v60 = vmul.f32 %v571_v55, %v315_v57 }
 0x145   :  { %352 = vperm.xlu1 %561, %v326_v59  }
 0x146   :  { %v317_v61 = vmul.f32 0.5, %v316_v60 }
 0x148   :  { %v318_v50 = vsub.f32 1.5, %v317_v61 }
 0x14a   :  { %v319_v1 = vmul.f32 %v571_v55, %v318_v50 }
 0x14c   :  { %v323_v2 = vsel %vm322_vm14, %v571_v55, %v319_v1 }
 0x14d   :  { %v327_v3 = vmul.f32 %v323_v2, %v279_v0 }
 0x14f   :  { %357 = vperm.xlu2 %559, %v327_v3   ;;  %v335_v7 = vmul.f32 %v327_v3, %v227_v23 }
 0x151   :  { %v339_v8 = vsub.f32 %v331_v4, %v335_v7 }
 0x153   :  { %389 = vperm.xlu1 %561, %v339_v8  }
 0x157   :  { %384 = vperm.xlu2 %559, %v338_v11  }
 0x18b   :  { %v343_v13 = vpop.permute.xlu2 %342 }
 0x18c   :  { %v360_v14 = vmul.f32 %v343_v13, %v695_v47  ;;  %v361_v15 = vmul.f32 %v343_v13, %v697_v48  ;;  %v362_v16 = vmul.f32 %v343_v13, %v705_v52 }
 0x193   :  { %v375_v17 = vpop.permute.xlu2 %374 }
 0x194   :  { %v392_v18 = vadd.f32 %v375_v17, %v360_v14  ;;  %v393_v21 = vadd.f32 %v375_v17, %v361_v15  ;;  %v394_v23 = vadd.f32 %v375_v17, %v362_v16 }
 0x196   :  { %vm404_vm15 = vcmp.ge.f32.partialorder %v392_v18, 0.0  ;;  %vm405_vm0 = vcmp.ge.f32.partialorder %v393_v21, 0.0  ;;  %vm406_vm1 = vcmp.ge.f32.partialorder %v394_v23, 0.0  ;;  %v416_v62 = vmul.f32 0.2, %v392_v18 }
 0x197   :  { %v417_v24 = vmul.f32 0.2, %v393_v21  ;;  %v418_v25 = vmul.f32 0.2, %v394_v23 }
 0x198   :  { %v428_v26 = vsel %vm404_vm15, %v392_v18, %v416_v62 }
 0x199   :  { %v429_v27 = vsel %vm405_vm0, %v393_v21, %v417_v24  ;;  %v430_v28 = vsel %vm406_vm1, %v394_v23, %v418_v25 }
 0x19a   :  { %v440_v29 = vpack.c.bf16 %v429_v27, %v428_v26  ;;  %v441_v47 = vpack.c.bf16 %v430_v28, %v430_v28 }
 0x19c   :  { %448 = vst [vmem:[%s841_s4] sm:$0xff] %v440_v29 }
 0x19d   :  { %450 = vst.msk [vmem:[%s841_s4 + $0x8] sm:$0xf] %vm449_vm2, %v441_v47 }
 0x1a9   :  { %v358_v32 = vpop.permute.xlu2 %357 }
 0x1aa   :  { %v369_v61 = vmul.f32 %v358_v32, %v748_v20  ;;  %v370_v50 = vmul.f32 %v358_v32, %v746_v19  ;;  %v371_v0 = vmul.f32 %v358_v32, %v752_v22 }
 0x1ab   :  { %v348_v48 = vpop.permute.xlu0 %347 }
 0x1ac   :  { %v363_v52 = vmul.f32 %v348_v48, %v713_v58  ;;  %v364_v30 = vmul.f32 %v348_v48, %v711_v56  ;;  %v365_v31 = vmul.f32 %v348_v48, %v720_v63 }
 0x1af   :  { %v380_v33 = vpop.permute.xlu1 %379 }
 0x1b0   :  { %v395_v34 = vadd.f32 %v380_v33, %v363_v52  ;;  %v396_v35 = vadd.f32 %v380_v33, %v364_v30  ;;  %v397_v36 = vadd.f32 %v380_v33, %v365_v31 }
 0x1b1   :  { %v385_v46 = vpop.permute.xlu2 %384 }
 0x1b2   :  { %vm407_vm3 = vcmp.ge.f32.partialorder %v395_v34, 0.0  ;;  %vm408_vm4 = vcmp.ge.f32.partialorder %v396_v35, 0.0  ;;  %vm409_vm5 = vcmp.ge.f32.partialorder %v397_v36, 0.0  ;;  %v419_v38 = vmul.f32 0.2, %v395_v34 }
 0x1b3   :  { %v420_v39 = vmul.f32 0.2, %v396_v35  ;;  %v421_v41 = vmul.f32 0.2, %v397_v36 }
 0x1b4   :  { %v431_v42 = vsel %vm407_vm3, %v395_v34, %v419_v38 }
 0x1b5   :  { %v432_v43 = vsel %vm408_vm4, %v396_v35, %v420_v39  ;;  %v433_v37 = vsel %vm409_vm5, %v397_v36, %v421_v41 }
 0x1b6   :  { %v442_v40 = vpack.c.bf16 %v432_v43, %v431_v42  ;;  %v443_v58 = vpack.c.bf16 %v433_v37, %v433_v37 }
 0x1b7   :  { %v353_v44 = vpop.permute.xlu1 %352 }
 0x1b8   :  { %451 = vst [vmem:[%s841_s4 + $0xc] sm:$0xff] %v442_v40  ;;  %v366_v56 = vmul.f32 %v353_v44, %v728_v5  ;;  %v367_v63 = vmul.f32 %v353_v44, %v730_v6  ;;  %v368_v45 = vmul.f32 %v353_v44, %v739_v12 }
 0x1b9   :  { %452 = vst.msk [vmem:[%s841_s4 + $0x14] sm:$0xf] %vm449_vm2, %v443_v58 }
 0x1ba   :  { %v398_v49 = vadd.f32 %v385_v46, %v366_v56  ;;  %v399_v51 = vadd.f32 %v385_v46, %v367_v63  ;;  %v400_v53 = vadd.f32 %v385_v46, %v368_v45 }
 0x1bc   :  { %vm410_vm6 = vcmp.ge.f32.partialorder %v398_v49, 0.0  ;;  %vm411_vm7 = vcmp.ge.f32.partialorder %v399_v51, 0.0  ;;  %vm412_vm8 = vcmp.ge.f32.partialorder %v400_v53, 0.0  ;;  %v422_v54 = vmul.f32 0.2, %v398_v49 }
 0x1bd   :  { %v423_v55 = vmul.f32 0.2, %v399_v51  ;;  %v424_v57 = vmul.f32 0.2, %v400_v53 }
 0x1be   :  { %v434_v5 = vsel %vm410_vm6, %v398_v49, %v422_v54 }
 0x1bf   :  { %v435_v59 = vsel %vm411_vm7, %v399_v51, %v423_v55  ;;  %v436_v6 = vsel %vm412_vm8, %v400_v53, %v424_v57 }
 0x1c0   :  { %v444_v60 = vpack.c.bf16 %v435_v59, %v434_v5  ;;  %v445_v12 = vpack.c.bf16 %v436_v6, %v436_v6 }
 0x1c2   :  { %453 = vst [vmem:[%s841_s4 + $0x18] sm:$0xff] %v444_v60 }
 0x1c3   :  { %454 = vst.msk [vmem:[%s841_s4 + $0x20] sm:$0xf] %vm449_vm2, %v445_v12 }
 0x1c5   :  { %v390_v1 = vpop.permute.xlu1 %389 }
 0x1c6   :  { %v401_v2 = vadd.f32 %v390_v1, %v369_v61  ;;  %v402_v3 = vadd.f32 %v390_v1, %v370_v50  ;;  %v403_v4 = vadd.f32 %v390_v1, %v371_v0 }
 0x1c8   :  { %vm413_vm9 = vcmp.ge.f32.partialorder %v401_v2, 0.0  ;;  %vm414_vm10 = vcmp.ge.f32.partialorder %v402_v3, 0.0  ;;  %vm415_vm11 = vcmp.ge.f32.partialorder %v403_v4, 0.0  ;;  %v425_v7 = vmul.f32 0.2, %v401_v2 }
 0x1c9   :  { %v426_v8 = vmul.f32 0.2, %v402_v3  ;;  %v427_v9 = vmul.f32 0.2, %v403_v4 }
 0x1ca   :  { %v437_v10 = vsel %vm413_vm9, %v401_v2, %v425_v7 }
 0x1cb   :  { %v438_v11 = vsel %vm414_vm10, %v402_v3, %v426_v8  ;;  %v439_v13 = vsel %vm415_vm11, %v403_v4, %v427_v9 }
 0x1cc   :  { %v446_v14 = vpack.c.bf16 %v438_v11, %v437_v10  ;;  %v447_v15 = vpack.c.bf16 %v439_v13, %v439_v13 }
 0x1ce   :  { %455 = vst [vmem:[%s841_s4 + $0x24] sm:$0xff] %v446_v14 }
 0x1cf   :  { %456 = vst.msk [vmem:[%s841_s4 + $0x2c] sm:$0xf] %vm449_vm2, %v447_v15 }

// kernel: discriminator_forward.16
= control target key start
LH: loop header
LB: loop body
LE: loop exit
PB: predicated region body
PF: predicated region fallthrough
CT: control target
= control target key end

     0   :  { %vm118_vm0 = vcmask 785408   ;;  %vm189_vm1 = vcmask 310272   ;;  %s1161_s0 = inlined_call_operand.vmem [shape: bf16[96,166], index: 0, kind: input, shape index: {}]   ;;  %s1162_s1 = inlined_call_operand.vmem [shape: bf16[64,96], index: 1, kind: input, shape index: {}]   ;;  %s1163_s2 = inlined_call_operand.vmem [shape: f32[64,1], index: 2, kind: input, shape index: {}]   ;;  %s1164_s3 = inlined_call_operand.vmem [shape: f32[64,1], index: 3, kind: input, shape index: {}]   ;;  %s1165_s4 = inlined_call_operand.vmem [shape: bf16[64,166], index: 4, kind: output, shape index: {}]  }
   0x1   :  { %v686_v0 = vld [vmem:[%s1161_s0 + $0x50] sm:$0xf]  ;;  %v715_v1 = vld [vmem:[%s1161_s0 + $0x54] sm:$0xf0]  ;;  %v714_v2 = vld [vmem:[%s1161_s0 + $0x54] sm:$0xf] }
   0x2   :  { %v687_v3 = vor.u32 %v715_v1, %v686_v0  ;;  %v688_v4 = vld [vmem:[%s1161_s0 + $0x58] sm:$0xf0]  ;;  %v678_v5 = vld [vmem:[%s1161_s0 + $0x40] sm:$0xf]  ;;  %v713_v6 = vld [vmem:[%s1161_s0 + $0x44] sm:$0xf0] }
   0x3   :  { %v691_v7 = vor.u32 %v714_v2, %v688_v4  ;;  %v712_v8 = vld [vmem:[%s1161_s0 + $0x44] sm:$0xf]  ;;  %v680_v9 = vld [vmem:[%s1161_s0 + $0x48] sm:$0xf0]  ;;  %v679_v10 = vor.u32 %v713_v6, %v678_v5  ;;  %v670_v12 = vld [vmem:[%s1161_s0 + $0x30] sm:$0xf] }
   0x4   :  { %133 = vmatpush.bf16.msra.mxu0 %v687_v3  ;;  %716 = vmatpush.bf16.msra.mxu2 %v687_v3  ;;  %v683_v11 = vor.u32 %v712_v8, %v680_v9  ;;  %v711_v13 = vld [vmem:[%s1161_s0 + $0x34] sm:$0xf0]  ;;  %v710_v14 = vld [vmem:[%s1161_s0 + $0x34] sm:$0xf]  ;;  %v672_v15 = vld [vmem:[%s1161_s0 + $0x38] sm:$0xf0] }
   0x5   :  { %162 = vmatpush.bf16.msra.mxu1 %v691_v7  ;;  %722 = vmatpush.bf16.msra.mxu3 %v691_v7  ;;  %v671_v16 = vor.u32 %v711_v13, %v670_v12  ;;  %v675_v17 = vor.u32 %v710_v14, %v672_v15  ;;  %v662_v18 = vld [vmem:[%s1161_s0 + $0x20] sm:$0xf]  ;;  %v709_v19 = vld [vmem:[%s1161_s0 + $0x24] sm:$0xf0]  ;;  %v708_v20 = vld [vmem:[%s1161_s0 + $0x24] sm:$0xf] }
   0x6   :  { %v664_v21 = vld [vmem:[%s1161_s0 + $0x28] sm:$0xf0]  ;;  %v663_v22 = vor.u32 %v709_v19, %v662_v18  ;;  %v654_v24 = vld [vmem:[%s1161_s0 + $0x10] sm:$0xf]  ;;  %v707_v25 = vld [vmem:[%s1161_s0 + $0x14] sm:$0xf0] }
   0x7   :  { %v667_v23 = vor.u32 %v708_v20, %v664_v21  ;;  %v706_v26 = vld [vmem:[%s1161_s0 + $0x14] sm:$0xf]  ;;  %v656_v27 = vld [vmem:[%s1161_s0 + $0x18] sm:$0xf0]  ;;  %v655_v28 = vor.u32 %v707_v25, %v654_v24  ;;  %v646_v30 = vld [vmem:[%s1161_s0] sm:$0xf] }
   0x8   :  { %134 = vmatpush.bf16.msra.mxu0 %v679_v10  ;;  %717 = vmatpush.bf16.msra.mxu2 %v679_v10  ;;  %v659_v29 = vor.u32 %v706_v26, %v656_v27  ;;  %v705_v31 = vld [vmem:[%s1161_s0 + $0x4] sm:$0xf0]  ;;  %v704_v32 = vld [vmem:[%s1161_s0 + $0x4] sm:$0xf]  ;;  %v648_v33 = vld [vmem:[%s1161_s0 + $0x8] sm:$0xf0] }
   0x9   :  { %163 = vmatpush.bf16.msra.mxu1 %v683_v11  ;;  %723 = vmatpush.bf16.msra.mxu3 %v683_v11  ;;  %v647_v34 = vor.u32 %v705_v31, %v646_v30  ;;  %v651_v35 = vor.u32 %v704_v32, %v648_v33  ;;  %v700_v36 = vld [vmem:[%s1162_s1] sm:$0xff]  ;;  %v702_v37 = vld [vmem:[%s1162_s1 + $0x10] sm:$0xff]  ;;  %v701_v38 = vld [vmem:[%s1162_s1 + $0x8] sm:$0xff] }
   0xa   :  { %v703_v39 = vld [vmem:[%s1162_s1 + $0x18] sm:$0xff] }
   0xc   :  { %135 = vmatpush.bf16.msra.mxu0 %v671_v16  ;;  %718 = vmatpush.bf16.msra.mxu2 %v671_v16 }
   0xd   :  { %164 = vmatpush.bf16.msra.mxu1 %v675_v17  ;;  %724 = vmatpush.bf16.msra.mxu3 %v675_v17 }
  0x10   :  { %136 = vmatpush.bf16.msra.mxu0 %v663_v22  ;;  %719 = vmatpush.bf16.msra.mxu2 %v663_v22 }
  0x11   :  { %165 = vmatpush.bf16.msra.mxu1 %v667_v23  ;;  %725 = vmatpush.bf16.msra.mxu3 %v667_v23 }
  0x14   :  { %137 = vmatpush.bf16.msra.mxu0 %v655_v28  ;;  %720 = vmatpush.bf16.msra.mxu2 %v655_v28 }
  0x15   :  { %166 = vmatpush.bf16.msra.mxu1 %v659_v29  ;;  %726 = vmatpush.bf16.msra.mxu3 %v659_v29 }
  0x18   :  { %138 = vmatpush.bf16.msra.mxu0 %v647_v34  ;;  %721 = vmatpush.bf16.msra.mxu2 %v647_v34 }
  0x19   :  { %167 = vmatpush.bf16.msra.mxu1 %v651_v35  ;;  %727 = vmatpush.bf16.msra.mxu3 %v651_v35 }
  0x1b   :  { %692 = vmatmul.msk.bf16.vlgmr.msra.gmra.mxu0 %vm118_vm0, %v700_v36  ;;  %694 = vmatmul.msk.bf16.vlgmr.msra.gmra.mxu2 %vm118_vm0, %v702_v37 }
  0x1c   :  { %696 = vmatmul.msk.bf16.vlgmr.msra.gmra.mxu1 %vm118_vm0, %v700_v36  ;;  %698 = vmatmul.msk.bf16.vlgmr.msra.gmra.mxu3 %vm118_vm0, %v702_v37 }
  0x2b   :  { %693 = vmatmul.msk.bf16.gmra.mxu0 %vm118_vm0, %v701_v38  ;;  %695 = vmatmul.msk.bf16.gmra.mxu2 %vm118_vm0, %v703_v39 }
  0x2c   :  { %697 = vmatmul.msk.bf16.gmra.mxu1 %vm118_vm0, %v701_v38  ;;  %699 = vmatmul.msk.bf16.gmra.mxu3 %vm118_vm0, %v703_v39 }
  0x98   :  { %v862_v40 = vpop.f32.mrf.mxu0 }
  0x99   :  { %v864_v41 = vpop.f32.mrf.mxu1  ;;  %v237_v42 = vmul.f32 %v862_v40, %v862_v40 }
  0x9a   :  { %v190_v43 = vsel %vm189_vm1, %v864_v41, 0.0  ;;  %v238_v44 = vmul.f32 %v864_v41, %v864_v41 }
  0x9b   :  { %v191_v45 = vadd.f32 %v190_v43, %v862_v40 }
  0x9c   :  { %v253_v46 = vsel %vm189_vm1, %v238_v44, 0.0 }
  0x9d   :  { %192 = vadd.xlane.f32.xlu0 %v191_v45  ;;  %v254_v47 = vadd.f32 %v253_v46, %v237_v42  ;;  %v751_v42 = vmov 166.0  }
  0x9e   :  { %v874_v48 = vpop.f32.mrf.mxu2  ;;  %733 = vrcp.f32 %v751_v42 }
  0x9f   :  { %v876_v49 = vpop.f32.mrf.mxu3  ;;  %255 = vadd.xlane.f32.xlu2 %v254_v47  ;;  %v245_v57 = vmul.f32 %v874_v48, %v874_v48 }
  0xa0   :  { %v878_v50 = vpop.f32.mrf.mxu0  ;;  %v206_v51 = vsel %vm189_vm1, %v876_v49, 0.0  ;;  %v246_v53 = vmul.f32 %v876_v49, %v876_v49 }
  0xa1   :  { %v882_v52 = vpop.f32.mrf.mxu1  ;;  %v207_v56 = vadd.f32 %v206_v51, %v874_v48  ;;  %v239_v8 = vmul.f32 %v878_v50, %v878_v50 }
  0xa2   :  { %v194_v54 = vsel %vm189_vm1, %v882_v52, 0.0  ;;  %v269_v59 = vsel %vm189_vm1, %v246_v53, 0.0  ;;  %v240_v3 = vmul.f32 %v882_v52, %v882_v52  ;;  %v752_v53 = vmov 0  }
  0xa3   :  { %v195_v55 = vadd.f32 %v194_v54, %v878_v50  ;;  %v270_v63 = vadd.f32 %v269_v59, %v245_v57  ;;  %730 = vset.pattern.permute.xlu1 %v752_v53  ;;  %732 = vset.pattern.permute.xlu0 %v752_v53 }
  0xa4   :  { %v257_v12 = vsel %vm189_vm1, %v240_v3, 0.0  ;;  %v734_v43 = vpop.eup %733  ;;  %731 = vset.pattern.permute.xlu2 %v752_v53 }
  0xa5   :  { %196 = vadd.xlane.f32.xlu0 %v195_v55  ;;  %v258_v16 = vadd.f32 %v257_v12, %v239_v8  ;;  %v223_v44 = vmul.f32 166.0, %v734_v43  ;;  %vm227_vm2 = vweird.f32 %v734_v43 }
  0xa6   :  { %v892_v58 = vpop.f32.mrf.mxu2 }
  0xa7   :  { %v895_v60 = vpop.f32.mrf.mxu3  ;;  %208 = vadd.xlane.f32.xlu2 %v207_v56  ;;  %v247_v9 = vmul.f32 %v892_v58, %v892_v58  ;;  %v224_v45 = vsub.f32 1.0, %v223_v44 }
  0xa8   :  { %v897_v61 = vpop.f32.mrf.mxu0  ;;  %v210_v1 = vsel %vm189_vm1, %v895_v60, 0.0  ;;  %v248_v4 = vmul.f32 %v895_v60, %v895_v60 }
  0xa9   :  { %v899_v62 = vpop.f32.mrf.mxu1  ;;  %v211_v5 = vadd.f32 %v210_v1, %v892_v58  ;;  %v241_v23 = vmul.f32 %v897_v61, %v897_v61  ;;  %v225_v46 = vmul.f32 %v734_v43, %v224_v45 }
  0xaa   :  { %v198_v0 = vsel %vm189_vm1, %v899_v62, 0.0  ;;  %v273_v13 = vsel %vm189_vm1, %v248_v4, 0.0  ;;  %v242_v19 = vmul.f32 %v899_v62, %v899_v62 }
  0xab   :  { %v199_v2 = vadd.f32 %v198_v0, %v897_v61  ;;  %v274_v17 = vadd.f32 %v273_v13, %v247_v9  ;;  %v226_v47 = vadd.f32 %v734_v43, %v225_v46 }
  0xac   :  { %v261_v24 = vsel %vm189_vm1, %v242_v19, 0.0 }
  0xad   :  { %271 = vadd.xlane.f32.xlu0 %v270_v63  ;;  %200 = vadd.xlane.f32.xlu1 %v199_v2  ;;  %v262_v29 = vadd.f32 %v261_v24, %v241_v23  ;;  %v958_v51 = vsel %vm227_vm2, %v734_v43, %v226_v47 }
  0xae   :  { %v911_v6 = vpop.f32.mrf.mxu2 }
  0xaf   :  { %212 = vadd.xlane.f32.xlu2 %v211_v5  ;;  %v913_v7 = vpop.f32.mrf.mxu3  ;;  %v249_v10 = vmul.f32 %v911_v6, %v911_v6 }
  0xb0   :  { %v250_v11 = vmul.f32 %v913_v7, %v913_v7  ;;  %v930_v20 = vpop.f32.mrf.mxu0  ;;  %v214_v22 = vsel %vm189_vm1, %v913_v7, 0.0 }
  0xb1   :  { %v926_v15 = vpop.f32.mrf.mxu1  ;;  %v243_v25 = vmul.f32 %v930_v20, %v930_v20  ;;  %v215_v27 = vadd.f32 %v214_v22, %v911_v6 }
  0xb2   :  { %v277_v14 = vsel %vm189_vm1, %v250_v11, 0.0  ;;  %v244_v21 = vmul.f32 %v926_v15, %v926_v15  ;;  %v202_v34 = vsel %vm189_vm1, %v926_v15, 0.0 }
  0xb3   :  { %v278_v18 = vadd.f32 %v277_v14, %v249_v10  ;;  %v203_v37 = vadd.f32 %v202_v34, %v930_v20 }
  0xb4   :  { %v265_v28 = vsel %vm189_vm1, %v244_v21, 0.0 }
  0xb5   :  { %259 = vadd.xlane.f32.xlu0 %v258_v16  ;;  %275 = vadd.xlane.f32.xlu1 %v274_v17  ;;  %v266_v32 = vadd.f32 %v265_v28, %v243_v25 }
  0xb6   :  { %v947_v31 = vpop.f32.mrf.mxu2 }
  0xb7   :  { %279 = vadd.xlane.f32.xlu2 %v278_v18  ;;  %v941_v26 = vpop.f32.mrf.mxu3  ;;  %v251_v33 = vmul.f32 %v947_v31, %v947_v31 }
  0xb8   :  { %v252_v30 = vmul.f32 %v941_v26, %v941_v26  ;;  %v218_v38 = vsel %vm189_vm1, %v941_v26, 0.0 }
  0xb9   :  { %v219_v39 = vadd.f32 %v218_v38, %v947_v31 }
  0xba   :  { %v281_v35 = vsel %vm189_vm1, %v252_v30, 0.0 }
  0xbb   :  { %v282_v36 = vadd.f32 %v281_v35, %v251_v33 }
  0xbd   :  { %216 = vadd.xlane.f32.xlu0 %v215_v27  ;;  %263 = vadd.xlane.f32.xlu1 %v262_v29 }
  0xbf   :  { %267 = vadd.xlane.f32.xlu2 %v266_v32  ;;  %v317_v32 = vld [vmem:[%s1163_s2] sm:$0xff] }
  0xc5   :  { %283 = vadd.xlane.f32.xlu0 %v282_v36  ;;  %204 = vadd.xlane.f32.xlu1 %v203_v37 }
  0xcd   :  { %220 = vadd.xlane.f32.xlu1 %v219_v39 }
 0x110   :  { %v193_v54 = vpop.xlane.xlu0 %192 }
 0x111   :  { %v229_v55 = vmul.f32 %v958_v51, %v193_v54 }
 0x112   :  { %v256_v56 = vpop.xlane.xlu2 %255 }
 0x113   :  { %v293_v57 = vmul.f32 %v229_v55, %v229_v55  ;;  %v285_v59 = vmul.f32 %v256_v56, %v958_v51 }
 0x115   :  { %v301_v63 = vsub.f32 %v285_v59, %v293_v57 }
 0x117   :  { %v309_v0 = vmax.f32 %v301_v63, 0.0 }
 0x118   :  { %v197_v1 = vpop.xlane.xlu0 %196 }
 0x119   :  { %v325_v2 = vadd.f32 1e-05, %v309_v0  ;;  %v969_v17 = vmul.f32 %v958_v51, %v197_v1 }
 0x11a   :  { %v209_v3 = vpop.xlane.xlu2 %208 }
 0x11b   :  { %735 = vrsqrt.f32 %v325_v2  ;;  %v963_v4 = vmul.f32 %v958_v51, %v209_v3  ;;  %v294_v24 = vmul.f32 %v969_v17, %v969_v17  ;;  %vm339_vm4 = vweird.f32 %v325_v2 }
 0x11d   :  { %v297_v5 = vmul.f32 %v963_v4, %v963_v4 }
 0x120   :  { %v272_v8 = vpop.xlane.xlu0 %271  ;;  %v201_v9 = vpop.xlane.xlu1 %200 }
 0x121   :  { %v736_v10 = vpop.eup %735  ;;  %v289_v11 = vmul.f32 %v272_v8, %v958_v51  ;;  %v984_v42 = vmul.f32 %v958_v51, %v201_v9 }
 0x122   :  { %v334_v12 = vmul.f32 %v736_v10, %v325_v2  ;;  %v213_v13 = vpop.xlane.xlu2 %212  ;;  %vm340_vm3 = vweird.f32 %v736_v10  ;;  %v421_v2 = vld [vmem:[%s1164_s3] sm:$0xff] }
 0x123   :  { %v305_v14 = vsub.f32 %v289_v11, %v297_v5  ;;  %v972_v19 = vmul.f32 %v958_v51, %v213_v13  ;;  %vm341_vm5 = vmor %vm339_vm4, %vm340_vm3  ;;  %v295_v0 = vmul.f32 %v984_v42, %v984_v42 }
 0x124   :  { %v335_v16 = vmul.f32 %v736_v10, %v334_v12 }
 0x125   :  { %v313_v18 = vmax.f32 %v305_v14, 0.0  ;;  %v298_v28 = vmul.f32 %v972_v19, %v972_v19 }
 0x126   :  { %v336_v21 = vmul.f32 0.5, %v335_v16 }
 0x127   :  { %v329_v22 = vadd.f32 1e-05, %v313_v18 }
 0x128   :  { %v337_v23 = vsub.f32 1.5, %v336_v21  ;;  %v260_v25 = vpop.xlane.xlu0 %259  ;;  %v276_v27 = vpop.xlane.xlu1 %275 }
 0x129   :  { %737 = vrsqrt.f32 %v329_v22  ;;  %v286_v29 = vmul.f32 %v260_v25, %v958_v51  ;;  %v290_v30 = vmul.f32 %v276_v27, %v958_v51  ;;  %vm379_vm7 = vweird.f32 %v329_v22 }
 0x12a   :  { %v338_v33 = vmul.f32 %v736_v10, %v337_v23  ;;  %v280_v43 = vpop.xlane.xlu2 %279 }
 0x12b   :  { %v302_v34 = vsub.f32 %v286_v29, %v294_v24  ;;  %v306_v35 = vsub.f32 %v290_v30, %v298_v28  ;;  %v291_v56 = vmul.f32 %v280_v43, %v958_v51  ;;  %v321_v29 = vld [vmem:[%s1163_s2 + $0x20] sm:$0xff] }
 0x12c   :  { %v342_v36 = vsel %vm341_vm5, %v736_v10, %v338_v33 }
 0x12d   :  { %v310_v37 = vmax.f32 %v302_v34, 0.0  ;;  %v314_v38 = vmax.f32 %v306_v35, 0.0  ;;  %v413_v39 = vmul.f32 %v342_v36, %v317_v32 }
 0x12f   :  { %v738_v44 = vpop.eup %737  ;;  %v986_v45 = vadd.f32 1e-05, %v310_v37  ;;  %v988_v46 = vadd.f32 1e-05, %v314_v38  ;;  %447 = vperm.xlu1 %730, %v413_v39   ;;  %v429_v59 = vmul.f32 %v413_v39, %v229_v55  ;;  %v425_v39 = vld [vmem:[%s1164_s3 + $0x20] sm:$0xff] }
 0x130   :  { %v374_v47 = vmul.f32 %v738_v44, %v329_v22  ;;  %v217_v53 = vpop.xlane.xlu0 %216  ;;  %v264_v54 = vpop.xlane.xlu1 %263  ;;  %vm380_vm6 = vweird.f32 %v738_v44 }
 0x131   :  { %739 = vrsqrt.f32 %v986_v45  ;;  %v993_v57 = vmul.f32 %v958_v51, %v217_v53  ;;  %v287_v1 = vmul.f32 %v264_v54, %v958_v51  ;;  %v437_v10 = vsub.f32 %v421_v2, %v429_v59  ;;  %vm381_vm8 = vmor %vm379_vm7, %vm380_vm6 }
 0x132   :  { %v375_v63 = vmul.f32 %v738_v44, %v374_v47  ;;  %741 = vrsqrt.f32 %v988_v46  ;;  %v268_v21 = vpop.xlane.xlu2 %267  ;;  %vm349_vm10 = vweird.f32 %v986_v45  ;;  %vm389_vm13 = vweird.f32 %v988_v46 }
 0x133   :  { %v299_v3 = vmul.f32 %v993_v57, %v993_v57  ;;  %v303_v8 = vsub.f32 %v287_v1, %v295_v0  ;;  %v288_v33 = vmul.f32 %v268_v21, %v958_v51 }
 0x134   :  { %v376_v5 = vmul.f32 0.5, %v375_v63 }
 0x135   :  { %v307_v9 = vsub.f32 %v291_v56, %v299_v3  ;;  %v311_v11 = vmax.f32 %v303_v8, 0.0 }
 0x136   :  { %v377_v55 = vsub.f32 1.5, %v376_v5 }
 0x137   :  { %v740_v12 = vpop.eup %739  ;;  %v315_v13 = vmax.f32 %v307_v9, 0.0  ;;  %503 = vperm.xlu1 %730, %v437_v10   ;;  %v1007_v18 = vadd.f32 1e-05, %v311_v11 }
 0x138   :  { %v1004_v14 = vpop.eup %741  ;;  %v344_v16 = vmul.f32 %v740_v12, %v986_v45  ;;  %v205_v23 = vpop.xlane.xlu1 %204  ;;  %v378_v24 = vmul.f32 %v738_v44, %v377_v55  ;;  %vm350_vm9 = vweird.f32 %v740_v12 }
 0x139   :  { %v384_v25 = vmul.f32 %v1004_v14, %v988_v46  ;;  %v1011_v27 = vadd.f32 1e-05, %v315_v13  ;;  %v1014_v28 = vmul.f32 %v958_v51, %v205_v23  ;;  %743 = vrsqrt.f32 %v1007_v18  ;;  %v284_v54 = vpop.xlane.xlu0 %283  ;;  %vm351_vm11 = vmor %vm349_vm10, %vm350_vm9  ;;  %v422_v23 = vld [vmem:[%s1164_s3 + $0x8] sm:$0xff] }
 0x13a   :  { %v345_v22 = vmul.f32 %v740_v12, %v344_v16  ;;  %v382_v30 = vsel %vm381_vm8, %v738_v44, %v378_v24  ;;  %v292_v10 = vmul.f32 %v284_v54, %v958_v51  ;;  %vm390_vm12 = vweird.f32 %v1004_v14 }
 0x13b   :  { %v385_v32 = vmul.f32 %v1004_v14, %v384_v25  ;;  %745 = vrsqrt.f32 %v1011_v27  ;;  %v296_v34 = vmul.f32 %v1014_v28, %v1014_v28  ;;  %v417_v36 = vmul.f32 %v382_v30, %v321_v29  ;;  %vm1053_vm0 = vmor %vm389_vm13, %vm390_vm12 }
 0x13c   :  { %v346_v35 = vmul.f32 0.5, %v345_v22  ;;  %vm359_vm1 = vweird.f32 %v1007_v18  ;;  %vm399_vm2 = vweird.f32 %v1011_v27  ;;  %vm614_vm12 = vcmask 310276  }
 0x13d   :  { %v386_v37 = vmul.f32 0.5, %v385_v32  ;;  %v304_v38 = vsub.f32 %v288_v33, %v296_v34  ;;  %v433_v44 = vmul.f32 %v417_v36, %v963_v4  ;;  %v318_v4 = vld [vmem:[%s1163_s2 + $0x8] sm:$0xff] }
 0x13e   :  { %v347_v43 = vsub.f32 1.5, %v346_v35  ;;  %v319_v35 = vld [vmem:[%s1163_s2 + $0x10] sm:$0xff] }
 0x13f   :  { %v312_v47 = vmax.f32 %v304_v38, 0.0  ;;  %467 = vperm.xlu1 %730, %v417_v36   ;;  %v744_v53 = vpop.eup %743  ;;  %v441_v59 = vsub.f32 %v425_v39, %v433_v44  ;;  %v387_v1 = vsub.f32 1.5, %v386_v37  ;;  %v323_v37 = vld [vmem:[%s1163_s2 + $0x30] sm:$0xff] }
 0x140   :  { %v221_v56 = vpop.xlane.xlu1 %220  ;;  %v348_v63 = vmul.f32 %v740_v12, %v347_v43  ;;  %v354_v2 = vmul.f32 %v744_v53, %v1007_v18  ;;  %vm360_vm14 = vweird.f32 %v744_v53 }
 0x141   :  { %v746_v0 = vpop.eup %745  ;;  %v1032_v3 = vadd.f32 1e-05, %v312_v47  ;;  %v1035_v5 = vmul.f32 %v958_v51, %v221_v56  ;;  %523 = vperm.xlu0 %732, %v441_v59   ;;  %v388_v24 = vmul.f32 %v1004_v14, %v387_v1  ;;  %vm361_vm3 = vmor %vm359_vm1, %vm360_vm14  ;;  %v423_v1 = vld [vmem:[%s1164_s3 + $0x10] sm:$0xff] }
 0x142   :  { %v394_v45 = vmul.f32 %v746_v0, %v1011_v27  ;;  %v352_v8 = vsel %vm351_vm11, %v740_v12, %v348_v63  ;;  %v355_v9 = vmul.f32 %v744_v53, %v354_v2  ;;  %vm400_vm15 = vweird.f32 %v746_v0 }
 0x143   :  { %747 = vrsqrt.f32 %v1032_v3  ;;  %v300_v55 = vmul.f32 %v1035_v5, %v1035_v5  ;;  %v414_v13 = vmul.f32 %v352_v8, %v318_v4  ;;  %v392_v46 = vsel %vm1053_vm0, %v1004_v14, %v388_v24  ;;  %vm401_vm4 = vmor %vm399_vm2, %vm400_vm15 }
 0x144   :  { %v395_v11 = vmul.f32 %v746_v0, %v394_v45  ;;  %v356_v16 = vmul.f32 0.5, %v355_v9  ;;  %vm369_vm6 = vweird.f32 %v1032_v3  ;;  %vm613_vm11 = vcmask 1043456  }
 0x145   :  { %v308_v21 = vsub.f32 %v292_v10, %v300_v55  ;;  %452 = vperm.xlu2 %731, %v414_v13   ;;  %v430_v51 = vmul.f32 %v414_v13, %v969_v17  ;;  %v322_v17 = vld [vmem:[%s1163_s2 + $0x28] sm:$0xff]  ;;  %v424_v10 = vld [vmem:[%s1164_s3 + $0x18] sm:$0xff]  ;;  %vm1103_vm15 = vmor %vm614_vm12, %vm613_vm11 }
 0x146   :  { %v396_v12 = vmul.f32 0.5, %v395_v11  ;;  %v357_v25 = vsub.f32 1.5, %v356_v16  ;;  %v418_v44 = vmul.f32 %v392_v46, %v322_v17 }
 0x147   :  { %v316_v29 = vmax.f32 %v308_v21, 0.0  ;;  %v438_v30 = vsub.f32 %v422_v23, %v430_v51 }
 0x148   :  { %v397_v22 = vsub.f32 1.5, %v396_v12  ;;  %v358_v36 = vmul.f32 %v744_v53, %v357_v25  ;;  %v428_v12 = vld [vmem:[%s1164_s3 + $0x38] sm:$0xff] }
 0x149   :  { %v748_v33 = vpop.eup %747  ;;  %v332_v34 = vadd.f32 1e-05, %v316_v29  ;;  %508 = vperm.xlu0 %732, %v438_v30  }
 0x14a   :  { %v398_v38 = vmul.f32 %v746_v0, %v397_v22  ;;  %v364_v18 = vmul.f32 %v748_v33, %v1032_v3  ;;  %v362_v14 = vsel %vm361_vm3, %v744_v53, %v358_v36  ;;  %vm370_vm5 = vweird.f32 %v748_v33  ;;  %v320_v53 = vld [vmem:[%s1163_s2 + $0x18] sm:$0xff] }
 0x14b   :  { %749 = vrsqrt.f32 %v332_v34  ;;  %v415_v47 = vmul.f32 %v362_v14, %v319_v35  ;;  %vm371_vm7 = vmor %vm369_vm6, %vm370_vm5  ;;  %v324_v3 = vld [vmem:[%s1163_s2 + $0x38] sm:$0xff]  ;;  %vm409_vm9 = vweird.f32 %v332_v34  ;;  %v434_v22 = vmul.f32 %v418_v44, %v972_v19 }
 0x14c   :  { %v402_v39 = vsel %vm401_vm4, %v746_v0, %v398_v38  ;;  %v365_v43 = vmul.f32 %v748_v33, %v364_v18 }
 0x14d   :  { %v419_v54 = vmul.f32 %v402_v39, %v323_v37  ;;  %472 = vperm.xlu2 %731, %v418_v44   ;;  %v431_v27 = vmul.f32 %v415_v47, %v984_v42 }
 0x14e   :  { %v366_v56 = vmul.f32 0.5, %v365_v43 }
 0x14f   :  { %477 = vperm.xlu1 %730, %v419_v54   ;;  %v439_v8 = vsub.f32 %v423_v1, %v431_v27  ;;  %v435_v23 = vmul.f32 %v419_v54, %v993_v57  ;;  %v426_v57 = vld [vmem:[%s1164_s3 + $0x28] sm:$0xff] }
 0x150   :  { %v367_v59 = vsub.f32 1.5, %v366_v56  ;;  %v442_v30 = vsub.f32 %v426_v57, %v434_v22 }
 0x151   :  { %v750_v63 = vpop.eup %749  ;;  %457 = vperm.xlu0 %732, %v415_v47  }
 0x152   :  { %v368_v0 = vmul.f32 %v748_v33, %v367_v59  ;;  %v404_v2 = vmul.f32 %v750_v63, %v332_v34  ;;  %vm410_vm8 = vweird.f32 %v750_v63 }
 0x153   :  { %vm411_vm10 = vmor %vm409_vm9, %vm410_vm8 }
 0x154   :  { %v372_v4 = vsel %vm371_vm7, %v748_v33, %v368_v0  ;;  %v405_v45 = vmul.f32 %v750_v63, %v404_v2 }
 0x155   :  { %v416_v9 = vmul.f32 %v372_v4, %v320_v53  ;;  %513 = vperm.xlu2 %731, %v439_v8  }
 0x156   :  { %v406_v42 = vmul.f32 0.5, %v405_v45 }
 0x157   :  { %v432_v55 = vmul.f32 %v416_v9, %v1014_v28  ;;  %v427_v28 = vld [vmem:[%s1164_s3 + $0x30] sm:$0xff] }
 0x158   :  { %v407_v11 = vsub.f32 1.5, %v406_v42  ;;  %v443_v25 = vsub.f32 %v427_v28, %v435_v23 }
 0x159   :  { %v440_v13 = vsub.f32 %v424_v10, %v432_v55 }
 0x15a   :  { %v408_v16 = vmul.f32 %v750_v63, %v407_v11 }
 0x15b   :  { %518 = vperm.xlu1 %730, %v440_v13  }
 0x15c   :  { %v412_v21 = vsel %vm411_vm10, %v750_v63, %v408_v16 }
 0x15d   :  { %v420_v24 = vmul.f32 %v412_v21, %v324_v3  ;;  %462 = vperm.xlu2 %731, %v416_v9  }
 0x15f   :  { %v436_v51 = vmul.f32 %v420_v24, %v1035_v5 }
 0x161   :  { %v444_v29 = vsub.f32 %v428_v12, %v436_v51 }
 0x163   :  { %533 = vperm.xlu1 %730, %v443_v25   ;;  %538 = vperm.xlu0 %732, %v444_v29  }
 0x165   :  { %482 = vperm.xlu2 %731, %v420_v24  }
 0x16d   :  { %528 = vperm.xlu2 %731, %v442_v30  }
 0x19f   :  { %v453_v32 = vpop.permute.xlu2 %452 }
 0x1a0   :  { %v487_v2 = vmul.f32 %v453_v32, %v878_v50  ;;  %v488_v4 = vmul.f32 %v453_v32, %v882_v52 }
 0x1a1   :  { %v448_v33 = vpop.permute.xlu1 %447 }
 0x1a2   :  { %v485_v34 = vmul.f32 %v448_v33, %v862_v40  ;;  %v486_v17 = vmul.f32 %v448_v33, %v864_v41 }
 0x1a7   :  { %v473_v5 = vpop.permute.xlu2 %472 }
 0x1a8   :  { %v495_v23 = vmul.f32 %v473_v5, %v892_v58  ;;  %v496_v24 = vmul.f32 %v473_v5, %v895_v60 }
 0x1a9   :  { %v504_v46 = vpop.permute.xlu1 %503 }
 0x1aa   :  { %v541_v35 = vadd.f32 %v504_v46, %v485_v34  ;;  %v542_v36 = vadd.f32 %v504_v46, %v486_v17 }
 0x1ac   :  { %vm557_vm13 = vcmp.ge.f32.partialorder %v541_v35, 0.0  ;;  %vm558_vm14 = vcmp.ge.f32.partialorder %v542_v36, 0.0  ;;  %v573_v19 = vmul.f32 0.2, %v541_v35  ;;  %v574_v37 = vmul.f32 0.2, %v542_v36 }
 0x1ae   :  { %v589_v18 = vsel %vm557_vm13, %v541_v35, %v573_v19  ;;  %v590_v14 = vsel %vm558_vm14, %v542_v36, %v574_v37 }
 0x1af   :  { %v605_v39 = vpack.c.bf16 %v590_v14, %v589_v18  ;;  %v514_v40 = vpop.permute.xlu2 %513 }
 0x1b1   :  { %616 = vst.msk [vmem:[%s1165_s4] sm:$0xff] %vm1103_vm15, %v605_v39  ;;  %v468_v41 = vpop.permute.xlu1 %467 }
 0x1b2   :  { %v493_v43 = vmul.f32 %v468_v41, %v874_v48  ;;  %v494_v44 = vmul.f32 %v468_v41, %v876_v49 }
 0x1b3   :  { %v524_v47 = vpop.permute.xlu0 %523 }
 0x1b4   :  { %v549_v54 = vadd.f32 %v524_v47, %v493_v43  ;;  %v550_v56 = vadd.f32 %v524_v47, %v494_v44 }
 0x1b6   :  { %vm565_vm0 = vcmp.ge.f32.partialorder %v549_v54, 0.0  ;;  %vm566_vm1 = vcmp.ge.f32.partialorder %v550_v56, 0.0  ;;  %v581_v59 = vmul.f32 0.2, %v549_v54  ;;  %v582_v27 = vmul.f32 0.2, %v550_v56 }
 0x1b7   :  { %v463_v63 = vpop.permute.xlu2 %462 }
 0x1b8   :  { %v597_v1 = vsel %vm565_vm0, %v549_v54, %v581_v59  ;;  %v598_v53 = vsel %vm566_vm1, %v550_v56, %v582_v27  ;;  %v491_v22 = vmul.f32 %v463_v63, %v930_v20  ;;  %v492_v57 = vmul.f32 %v463_v63, %v926_v15 }
 0x1b9   :  { %v609_v0 = vpack.c.bf16 %v598_v53, %v597_v1 }
 0x1bb   :  { %620 = vst.msk [vmem:[%s1165_s4 + $0x20] sm:$0xff] %vm1103_vm15, %v609_v0  ;;  %v509_v48 = vpop.permute.xlu0 %508 }
 0x1bc   :  { %v543_v49 = vadd.f32 %v509_v48, %v487_v2  ;;  %v544_v45 = vadd.f32 %v509_v48, %v488_v4 }
 0x1be   :  { %vm559_vm2 = vcmp.ge.f32.partialorder %v543_v49, 0.0  ;;  %vm560_vm3 = vcmp.ge.f32.partialorder %v544_v45, 0.0  ;;  %v575_v8 = vmul.f32 0.2, %v543_v49  ;;  %v576_v9 = vmul.f32 0.2, %v544_v45 }
 0x1bf   :  { %v483_v42 = vpop.permute.xlu2 %482 }
 0x1c0   :  { %v591_v10 = vsel %vm559_vm2, %v543_v49, %v575_v8  ;;  %v592_v55 = vsel %vm560_vm3, %v544_v45, %v576_v9  ;;  %v499_v36 = vmul.f32 %v483_v42, %v947_v31  ;;  %v500_v37 = vmul.f32 %v483_v42, %v941_v26 }
 0x1c1   :  { %v606_v11 = vpack.c.bf16 %v592_v55, %v591_v10  ;;  %v478_v52 = vpop.permute.xlu1 %477 }
 0x1c2   :  { %v497_v18 = vmul.f32 %v478_v52, %v911_v6  ;;  %v498_v14 = vmul.f32 %v478_v52, %v913_v7 }
 0x1c3   :  { %617 = vst.msk [vmem:[%s1165_s4 + $0x8] sm:$0xff] %vm1103_vm15, %v606_v11  ;;  %v458_v50 = vpop.permute.xlu0 %457 }
 0x1c4   :  { %v489_v13 = vmul.f32 %v458_v50, %v897_v61  ;;  %v490_v3 = vmul.f32 %v458_v50, %v899_v62 }
 0x1c6   :  { %v545_v16 = vadd.f32 %v514_v40, %v489_v13  ;;  %v546_v21 = vadd.f32 %v514_v40, %v490_v3 }
 0x1c7   :  { %v529_v28 = vpop.permute.xlu2 %528 }
 0x1c8   :  { %vm561_vm4 = vcmp.ge.f32.partialorder %v545_v16, 0.0  ;;  %vm562_vm5 = vcmp.ge.f32.partialorder %v546_v21, 0.0  ;;  %v577_v12 = vmul.f32 0.2, %v545_v16  ;;  %v578_v51 = vmul.f32 0.2, %v546_v21 }
 0x1c9   :  { %v551_v25 = vadd.f32 %v529_v28, %v495_v23  ;;  %v552_v29 = vadd.f32 %v529_v28, %v496_v24 }
 0x1ca   :  { %v593_v61 = vsel %vm561_vm4, %v545_v16, %v577_v12  ;;  %v594_v30 = vsel %vm562_vm5, %v546_v21, %v578_v51 }
 0x1cb   :  { %v607_v62 = vpack.c.bf16 %v594_v30, %v593_v61  ;;  %vm567_vm6 = vcmp.ge.f32.partialorder %v551_v25, 0.0  ;;  %vm568_vm7 = vcmp.ge.f32.partialorder %v552_v29, 0.0  ;;  %v583_v32 = vmul.f32 0.2, %v551_v25 }
 0x1cc   :  { %v584_v58 = vmul.f32 0.2, %v552_v29 }
 0x1cd   :  { %v519_v33 = vpop.permute.xlu1 %518  ;;  %618 = vst.msk [vmem:[%s1165_s4 + $0x10] sm:$0xff] %vm1103_vm15, %v607_v62  ;;  %v599_v60 = vsel %vm567_vm6, %v551_v25, %v583_v32 }
 0x1ce   :  { %v547_v34 = vadd.f32 %v519_v33, %v491_v22  ;;  %v548_v17 = vadd.f32 %v519_v33, %v492_v57  ;;  %v600_v20 = vsel %vm568_vm7, %v552_v29, %v584_v58 }
 0x1cf   :  { %v610_v5 = vpack.c.bf16 %v600_v20, %v599_v60 }
 0x1d0   :  { %vm563_vm8 = vcmp.ge.f32.partialorder %v547_v34, 0.0  ;;  %vm564_vm9 = vcmp.ge.f32.partialorder %v548_v17, 0.0  ;;  %v579_v15 = vmul.f32 0.2, %v547_v34  ;;  %v580_v46 = vmul.f32 0.2, %v548_v17 }
 0x1d1   :  { %621 = vst.msk [vmem:[%s1165_s4 + $0x28] sm:$0xff] %vm1103_vm15, %v610_v5 }
 0x1d2   :  { %v595_v35 = vsel %vm563_vm8, %v547_v34, %v579_v15  ;;  %v596_v19 = vsel %vm564_vm9, %v548_v17, %v580_v46 }
 0x1d3   :  { %v608_v39 = vpack.c.bf16 %v596_v19, %v595_v35 }
 0x1d5   :  { %v539_v40 = vpop.permute.xlu0 %538  ;;  %v534_v41 = vpop.permute.xlu1 %533  ;;  %619 = vst.msk [vmem:[%s1165_s4 + $0x18] sm:$0xff] %vm1103_vm15, %v608_v39 }
 0x1d6   :  { %v555_v43 = vadd.f32 %v539_v40, %v499_v36  ;;  %v556_v44 = vadd.f32 %v539_v40, %v500_v37  ;;  %v553_v47 = vadd.f32 %v534_v41, %v497_v18  ;;  %v554_v31 = vadd.f32 %v534_v41, %v498_v14 }
 0x1d8   :  { %vm571_vm10 = vcmp.ge.f32.partialorder %v555_v43, 0.0  ;;  %vm572_vm11 = vcmp.ge.f32.partialorder %v556_v44, 0.0  ;;  %v587_v26 = vmul.f32 0.2, %v555_v43  ;;  %v588_v54 = vmul.f32 0.2, %v556_v44 }
 0x1d9   :  { %vm569_vm12 = vcmp.ge.f32.partialorder %v553_v47, 0.0  ;;  %vm570_vm13 = vcmp.ge.f32.partialorder %v554_v31, 0.0  ;;  %v585_v6 = vmul.f32 0.2, %v553_v47  ;;  %v586_v7 = vmul.f32 0.2, %v554_v31 }
 0x1da   :  { %v603_v56 = vsel %vm571_vm10, %v555_v43, %v587_v26  ;;  %v604_v59 = vsel %vm572_vm11, %v556_v44, %v588_v54 }
 0x1db   :  { %v612_v27 = vpack.c.bf16 %v604_v59, %v603_v56  ;;  %v601_v63 = vsel %vm569_vm12, %v553_v47, %v585_v6  ;;  %v602_v1 = vsel %vm570_vm13, %v554_v31, %v586_v7 }
 0x1dc   :  { %v611_v53 = vpack.c.bf16 %v602_v1, %v601_v63 }
 0x1dd   :  { %623 = vst.msk [vmem:[%s1165_s4 + $0x38] sm:$0xff] %vm1103_vm15, %v612_v27 }
 0x1de   :  { %622 = vst.msk [vmem:[%s1165_s4 + $0x30] sm:$0xff] %vm1103_vm15, %v611_v53 }

// kernel: discriminator_forward.17
= control target key start
LH: loop header
LB: loop body
LE: loop exit
PB: predicated region body
PF: predicated region fallthrough
CT: control target
= control target key end

     0   :  { %vm158_vm0 = vcmask 523264   ;;  %vm229_vm1 = vcmask 670720   ;;  %s1095_s0 = inlined_call_operand.vmem [shape: bf16[192,82], index: 0, kind: input, shape index: {}]   ;;  %s1096_s1 = inlined_call_operand.vmem [shape: bf16[64,192], index: 1, kind: input, shape index: {}]   ;;  %s1097_s2 = inlined_call_operand.vmem [shape: f32[64,1], index: 2, kind: input, shape index: {}]   ;;  %s1098_s3 = inlined_call_operand.vmem [shape: f32[64,1], index: 3, kind: input, shape index: {}]   ;;  %s1099_s4 = inlined_call_operand.vmem [shape: bf16[64,82], index: 4, kind: output, shape index: {}]  }
   0x1   :  { %v701_v0 = vld [vmem:[%s1095_s0 + $0x38] sm:$0xff]  ;;  %v700_v2 = vld [vmem:[%s1095_s0 + $0x30] sm:$0xff]  ;;  %v699_v4 = vld [vmem:[%s1095_s0 + $0x28] sm:$0xff] }
   0x2   :  { %v705_v1 = vld [vmem:[%s1095_s0 + $0x58] sm:$0xff]  ;;  %171 = vmatpush.bf16.msra.mxu0 %v701_v0  ;;  %706 = vmatpush.bf16.msra.mxu2 %v701_v0  ;;  %v704_v3 = vld [vmem:[%s1095_s0 + $0x50] sm:$0xff]  ;;  %v703_v5 = vld [vmem:[%s1095_s0 + $0x48] sm:$0xff] }
   0x3   :  { %714 = vmatpush.bf16.msra.mxu3 %v705_v1  ;;  %204 = vmatpush.bf16.msra.mxu1 %v705_v1  ;;  %v698_v6 = vld [vmem:[%s1095_s0 + $0x20] sm:$0xff]  ;;  %v688_v8 = vld [vmem:[%s1096_s1 + $0x14] sm:$0xf]  ;;  %v614_v9 = vld [vmem:[%s1096_s1 + $0x18] sm:$0xf0] }
   0x4   :  { %v702_v7 = vld [vmem:[%s1095_s0 + $0x40] sm:$0xff]  ;;  %v606_v11 = vld [vmem:[%s1096_s1 + $0x8] sm:$0xf0]  ;;  %v617_v12 = vor.u32 %v688_v8, %v614_v9  ;;  %v697_v13 = vld [vmem:[%s1095_s0 + $0x18] sm:$0xff] }
   0x5   :  { %v686_v10 = vld [vmem:[%s1096_s1 + $0x4] sm:$0xf]  ;;  %v696_v15 = vld [vmem:[%s1095_s0 + $0x10] sm:$0xff]  ;;  %v695_v16 = vld [vmem:[%s1095_s0 + $0x8] sm:$0xff] }
   0x6   :  { %172 = vmatpush.bf16.msra.mxu0 %v700_v2  ;;  %707 = vmatpush.bf16.msra.mxu2 %v700_v2  ;;  %v609_v14 = vor.u32 %v686_v10, %v606_v11  ;;  %v694_v17 = vld [vmem:[%s1095_s0] sm:$0xff]  ;;  %v687_v19 = vld [vmem:[%s1096_s1 + $0x4] sm:$0xf0]  ;;  %v622_v23 = vld [vmem:[%s1096_s1 + $0x28] sm:$0xf0] }
   0x7   :  { %715 = vmatpush.bf16.msra.mxu3 %v704_v3  ;;  %205 = vmatpush.bf16.msra.mxu1 %v704_v3  ;;  %v604_v18 = vld [vmem:[%s1096_s1] sm:$0xf]  ;;  %v691_v21 = vld [vmem:[%s1096_s1 + $0x24] sm:$0xf0]  ;;  %v690_v22 = vld [vmem:[%s1096_s1 + $0x24] sm:$0xf] }
   0x8   :  { %v620_v20 = vld [vmem:[%s1096_s1 + $0x20] sm:$0xf]  ;;  %v605_v24 = vor.u32 %v687_v19, %v604_v18  ;;  %v625_v26 = vor.u32 %v690_v22, %v622_v23  ;;  %v612_v27 = vld [vmem:[%s1096_s1 + $0x10] sm:$0xf]  ;;  %v689_v28 = vld [vmem:[%s1096_s1 + $0x14] sm:$0xf0] }
   0x9   :  { %v621_v25 = vor.u32 %v691_v21, %v620_v20  ;;  %v628_v29 = vld [vmem:[%s1096_s1 + $0x30] sm:$0xf]  ;;  %v693_v30 = vld [vmem:[%s1096_s1 + $0x34] sm:$0xf0]  ;;  %v692_v31 = vld [vmem:[%s1096_s1 + $0x34] sm:$0xf]  ;;  %v613_v33 = vor.u32 %v689_v28, %v612_v27 }
   0xa   :  { %173 = vmatpush.bf16.msra.mxu0 %v699_v4  ;;  %708 = vmatpush.bf16.msra.mxu2 %v699_v4  ;;  %v630_v32 = vld [vmem:[%s1096_s1 + $0x38] sm:$0xf0]  ;;  %v629_v34 = vor.u32 %v693_v30, %v628_v29  ;;  %v741_v20 = vmov 82.0   ;;  %v742_v27 = vmov 0  }
   0xb   :  { %716 = vmatpush.bf16.msra.mxu3 %v703_v5  ;;  %206 = vmatpush.bf16.msra.mxu1 %v703_v5  ;;  %v633_v35 = vor.u32 %v692_v31, %v630_v32  ;;  %723 = vrcp.f32 %v741_v20 }
   0xc   :  { %720 = vset.pattern.permute.xlu1 %v742_v27  ;;  %722 = vset.pattern.permute.xlu0 %v742_v27 }
   0xd   :  { %721 = vset.pattern.permute.xlu2 %v742_v27  ;;  %v437_v27 = vld [vmem:[%s1098_s3] sm:$0xff] }
   0xe   :  { %174 = vmatpush.bf16.msra.mxu0 %v698_v6  ;;  %709 = vmatpush.bf16.msra.mxu2 %v698_v6 }
   0xf   :  { %717 = vmatpush.bf16.msra.mxu3 %v702_v7  ;;  %207 = vmatpush.bf16.msra.mxu1 %v702_v7 }
  0x11   :  { %v724_v21 = vpop.eup %723 }
  0x12   :  { %683 = vmatmul.msk.bf16.vlgmr.msra.gmra.mxu3 %vm158_vm0, %v617_v12  ;;  %175 = vmatpush.bf16.msra.mxu0 %v697_v13  ;;  %v255_v22 = vmul.f32 82.0, %v724_v21  ;;  %vm259_vm2 = vweird.f32 %v724_v21 }
  0x13   :  { %710 = vmatpush.bf16.msra.mxu2 %v697_v13  ;;  %682 = vmatmul.msk.bf16.vlgmr.msra.gmra.mxu1 %vm158_vm0, %v609_v14 }
  0x14   :  { %v256_v23 = vsub.f32 1.0, %v255_v22 }
  0x16   :  { %176 = vmatpush.bf16.msra.mxu0 %v696_v15 }
  0x17   :  { %711 = vmatpush.bf16.msra.mxu2 %v696_v15 }
  0x1a   :  { %177 = vmatpush.bf16.msra.mxu0 %v695_v16 }
  0x1b   :  { %712 = vmatpush.bf16.msra.mxu2 %v695_v16 }
  0x1e   :  { %178 = vmatpush.bf16.msra.mxu0 %v694_v17 }
  0x1f   :  { %713 = vmatpush.bf16.msra.mxu2 %v694_v17 }
  0x21   :  { %179 = vmatmul.bf16.vlgmr.msra.gmra.mxu0 %v605_v24  ;;  %v257_v24 = vmul.f32 %v724_v21, %v256_v23 }
  0x22   :  { %189 = vmatmul.bf16.vlgmr.msra.gmra.mxu2 %v621_v25  ;;  %684 = vmatmul.msk.bf16.gmra.mxu3 %vm158_vm0, %v625_v26 }
  0x23   :  { %v258_v25 = vadd.f32 %v724_v21, %v257_v24 }
  0x25   :  { %v912_v26 = vsel %vm259_vm2, %v724_v21, %v258_v25 }
  0x31   :  { %184 = vmatmul.bf16.gmra.mxu0 %v613_v33 }
  0x32   :  { %194 = vmatmul.bf16.gmra.mxu2 %v629_v34  ;;  %685 = vmatmul.msk.bf16.gmra.mxu3 %vm158_vm0, %v633_v35 }
  0x90   :  { %v209_v37 = vpop.f32.mrf.mxu1 }
  0x95   :  { %v214_v36 = vpop.f32.mrf.mxu3 }
  0x98   :  { %v211_v46 = vpop.f32.mrf.mxu1 }
  0x9d   :  { %v216_v38 = vpop.f32.mrf.mxu3 }
  0x9e   :  { %v180_v39 = vpop.f32.mrf.mxu0 }
  0x9f   :  { %v856_v40 = vadd.f32 %v209_v37, %v180_v39 }
  0xa1   :  { %v230_v41 = vsel %vm229_vm1, %v856_v40, 0.0  ;;  %v269_v42 = vmul.f32 %v856_v40, %v856_v40 }
  0xa2   :  { %231 = vadd.xlane.f32.xlu0 %v230_v41 }
  0xa3   :  { %v277_v43 = vsel %vm229_vm1, %v269_v42, 0.0 }
  0xa4   :  { %278 = vadd.xlane.f32.xlu2 %v277_v43 }
  0xa5   :  { %v190_v44 = vpop.f32.mrf.mxu2  ;;  %v219_v45 = vpop.f32.mrf.mxu3 }
  0xa6   :  { %v863_v47 = vadd.f32 %v219_v45, %v190_v44  ;;  %v182_v48 = vpop.f32.mrf.mxu0 }
  0xa7   :  { %v865_v49 = vadd.f32 %v211_v46, %v182_v48 }
  0xa8   :  { %v242_v51 = vsel %vm229_vm1, %v863_v47, 0.0  ;;  %v273_v52 = vmul.f32 %v863_v47, %v863_v47 }
  0xa9   :  { %v233_v50 = vsel %vm229_vm1, %v865_v49, 0.0  ;;  %v270_v63 = vmul.f32 %v865_v49, %v865_v49 }
  0xaa   :  { %234 = vadd.xlane.f32.xlu0 %v233_v50  ;;  %v289_v58 = vsel %vm229_vm1, %v273_v52, 0.0 }
  0xab   :  { %v280_v4 = vsel %vm229_vm1, %v270_v63, 0.0 }
  0xac   :  { %243 = vadd.xlane.f32.xlu2 %v242_v51 }
  0xad   :  { %v192_v53 = vpop.f32.mrf.mxu2  ;;  %v221_v54 = vpop.f32.mrf.mxu3 }
  0xae   :  { %v185_v55 = vpop.f32.mrf.mxu0  ;;  %v873_v56 = vadd.f32 %v221_v54, %v192_v53 }
  0xaf   :  { %v875_v57 = vadd.f32 %v214_v36, %v185_v55 }
  0xb0   :  { %v245_v60 = vsel %vm229_vm1, %v873_v56, 0.0  ;;  %v274_v0 = vmul.f32 %v873_v56, %v873_v56 }
  0xb1   :  { %v236_v59 = vsel %vm229_vm1, %v875_v57, 0.0  ;;  %v271_v8 = vmul.f32 %v875_v57, %v875_v57 }
  0xb2   :  { %290 = vadd.xlane.f32.xlu0 %v289_v58  ;;  %237 = vadd.xlane.f32.xlu1 %v236_v59  ;;  %v292_v5 = vsel %vm229_vm1, %v274_v0, 0.0 }
  0xb3   :  { %v283_v14 = vsel %vm229_vm1, %v271_v8, 0.0 }
  0xb4   :  { %246 = vadd.xlane.f32.xlu2 %v245_v60 }
  0xb5   :  { %v195_v61 = vpop.f32.mrf.mxu2  ;;  %v224_v62 = vpop.f32.mrf.mxu3 }
  0xb6   :  { %v886_v1 = vadd.f32 %v224_v62, %v195_v61  ;;  %v187_v2 = vpop.f32.mrf.mxu0 }
  0xb7   :  { %v893_v7 = vadd.f32 %v216_v38, %v187_v2  ;;  %v333_v2 = vld [vmem:[%s1097_s2] sm:$0xff] }
  0xb8   :  { %v275_v3 = vmul.f32 %v886_v1, %v886_v1  ;;  %v248_v11 = vsel %vm229_vm1, %v886_v1, 0.0 }
  0xb9   :  { %v272_v12 = vmul.f32 %v893_v7, %v893_v7  ;;  %v239_v18 = vsel %vm229_vm1, %v893_v7, 0.0 }
  0xba   :  { %281 = vadd.xlane.f32.xlu0 %v280_v4  ;;  %293 = vadd.xlane.f32.xlu1 %v292_v5  ;;  %v295_v6 = vsel %vm229_vm1, %v275_v3, 0.0 }
  0xbb   :  { %v286_v15 = vsel %vm229_vm1, %v272_v12, 0.0 }
  0xbc   :  { %296 = vadd.xlane.f32.xlu2 %v295_v6 }
  0xbd   :  { %v197_v9 = vpop.f32.mrf.mxu2  ;;  %v226_v10 = vpop.f32.mrf.mxu3 }
  0xbe   :  { %v901_v13 = vadd.f32 %v226_v10, %v197_v9 }
  0xc0   :  { %v276_v16 = vmul.f32 %v901_v13, %v901_v13  ;;  %v251_v19 = vsel %vm229_vm1, %v901_v13, 0.0 }
  0xc2   :  { %249 = vadd.xlane.f32.xlu0 %v248_v11  ;;  %284 = vadd.xlane.f32.xlu1 %v283_v14  ;;  %v298_v17 = vsel %vm229_vm1, %v276_v16, 0.0 }
  0xc4   :  { %287 = vadd.xlane.f32.xlu2 %v286_v15 }
  0xca   :  { %299 = vadd.xlane.f32.xlu0 %v298_v17  ;;  %240 = vadd.xlane.f32.xlu1 %v239_v18 }
  0xd2   :  { %252 = vadd.xlane.f32.xlu1 %v251_v19 }
 0x115   :  { %v232_v28 = vpop.xlane.xlu0 %231 }
 0x116   :  { %v261_v29 = vmul.f32 %v912_v26, %v232_v28 }
 0x117   :  { %v279_v30 = vpop.xlane.xlu2 %278 }
 0x118   :  { %v309_v31 = vmul.f32 %v261_v29, %v261_v29  ;;  %v301_v32 = vmul.f32 %v279_v30, %v912_v26 }
 0x11a   :  { %v317_v33 = vsub.f32 %v301_v32, %v309_v31 }
 0x11c   :  { %v325_v34 = vmax.f32 %v317_v33, 0.0 }
 0x11d   :  { %v235_v35 = vpop.xlane.xlu0 %234 }
 0x11e   :  { %v341_v36 = vadd.f32 1e-05, %v325_v34  ;;  %v923_v51 = vmul.f32 %v912_v26, %v235_v35 }
 0x11f   :  { %v244_v37 = vpop.xlane.xlu2 %243 }
 0x120   :  { %725 = vrsqrt.f32 %v341_v36  ;;  %v917_v38 = vmul.f32 %v912_v26, %v244_v37  ;;  %v310_v59 = vmul.f32 %v923_v51, %v923_v51  ;;  %vm355_vm4 = vweird.f32 %v341_v36 }
 0x122   :  { %v313_v39 = vmul.f32 %v917_v38, %v917_v38 }
 0x125   :  { %v291_v41 = vpop.xlane.xlu0 %290  ;;  %v238_v42 = vpop.xlane.xlu1 %237 }
 0x126   :  { %v726_v43 = vpop.eup %725  ;;  %v305_v44 = vmul.f32 %v291_v41, %v912_v26  ;;  %v938_v11 = vmul.f32 %v912_v26, %v238_v42 }
 0x127   :  { %v350_v45 = vmul.f32 %v726_v43, %v341_v36  ;;  %v247_v46 = vpop.xlane.xlu2 %246  ;;  %vm356_vm3 = vweird.f32 %v726_v43 }
 0x128   :  { %v321_v48 = vsub.f32 %v305_v44, %v313_v39  ;;  %v926_v53 = vmul.f32 %v912_v26, %v247_v46  ;;  %vm357_vm5 = vmor %vm355_vm4, %vm356_vm3  ;;  %v311_v24 = vmul.f32 %v938_v11, %v938_v11 }
 0x129   :  { %v351_v50 = vmul.f32 %v726_v43, %v350_v45 }
 0x12a   :  { %v329_v52 = vmax.f32 %v321_v48, 0.0  ;;  %v314_v62 = vmul.f32 %v926_v53, %v926_v53 }
 0x12b   :  { %v352_v54 = vmul.f32 0.5, %v351_v50  ;;  %v337_v50 = vld [vmem:[%s1097_s2 + $0x20] sm:$0xff] }
 0x12c   :  { %v345_v55 = vadd.f32 1e-05, %v329_v52 }
 0x12d   :  { %v353_v58 = vsub.f32 1.5, %v352_v54  ;;  %v282_v60 = vpop.xlane.xlu0 %281  ;;  %v294_v61 = vpop.xlane.xlu1 %293 }
 0x12e   :  { %727 = vrsqrt.f32 %v345_v55  ;;  %v302_v63 = vmul.f32 %v282_v60, %v912_v26  ;;  %v306_v0 = vmul.f32 %v294_v61, %v912_v26  ;;  %vm395_vm7 = vweird.f32 %v345_v55 }
 0x12f   :  { %v354_v3 = vmul.f32 %v726_v43, %v353_v58  ;;  %v297_v12 = vpop.xlane.xlu2 %296 }
 0x130   :  { %v318_v4 = vsub.f32 %v302_v63, %v310_v59  ;;  %v322_v5 = vsub.f32 %v306_v0, %v314_v62  ;;  %v307_v20 = vmul.f32 %v297_v12, %v912_v26  ;;  %v441_v0 = vld [vmem:[%s1098_s3 + $0x20] sm:$0xff] }
 0x131   :  { %v358_v6 = vsel %vm357_vm5, %v726_v43, %v354_v3 }
 0x132   :  { %v326_v8 = vmax.f32 %v318_v4, 0.0  ;;  %v330_v9 = vmax.f32 %v322_v5, 0.0  ;;  %v429_v10 = vmul.f32 %v358_v6, %v333_v2 }
 0x134   :  { %v728_v14 = vpop.eup %727  ;;  %v940_v15 = vadd.f32 1e-05, %v326_v8  ;;  %v942_v16 = vadd.f32 1e-05, %v330_v9  ;;  %463 = vperm.xlu1 %720, %v429_v10   ;;  %v445_v22 = vmul.f32 %v429_v10, %v261_v29 }
 0x135   :  { %v390_v17 = vmul.f32 %v728_v14, %v345_v55  ;;  %v250_v18 = vpop.xlane.xlu0 %249  ;;  %v285_v19 = vpop.xlane.xlu1 %284  ;;  %vm396_vm6 = vweird.f32 %v728_v14 }
 0x136   :  { %729 = vrsqrt.f32 %v940_v15  ;;  %v947_v21 = vmul.f32 %v912_v26, %v250_v18  ;;  %v303_v25 = vmul.f32 %v285_v19, %v912_v26  ;;  %v453_v33 = vsub.f32 %v437_v27, %v445_v22  ;;  %vm397_vm8 = vmor %vm395_vm7, %vm396_vm6 }
 0x137   :  { %v391_v23 = vmul.f32 %v728_v14, %v390_v17  ;;  %731 = vrsqrt.f32 %v942_v16  ;;  %v288_v42 = vpop.xlane.xlu2 %287  ;;  %vm365_vm10 = vweird.f32 %v940_v15  ;;  %vm405_vm13 = vweird.f32 %v942_v16 }
 0x138   :  { %v315_v28 = vmul.f32 %v947_v21, %v947_v21  ;;  %v319_v31 = vsub.f32 %v303_v25, %v311_v24  ;;  %v304_v58 = vmul.f32 %v288_v42, %v912_v26 }
 0x139   :  { %v392_v30 = vmul.f32 0.5, %v391_v23 }
 0x13a   :  { %v323_v32 = vsub.f32 %v307_v20, %v315_v28  ;;  %v327_v34 = vmax.f32 %v319_v31, 0.0  ;;  %v438_v31 = vld [vmem:[%s1098_s3 + $0x8] sm:$0xff] }
 0x13b   :  { %v393_v29 = vsub.f32 1.5, %v392_v30 }
 0x13c   :  { %v730_v35 = vpop.eup %729  ;;  %v331_v36 = vmax.f32 %v323_v32, 0.0  ;;  %511 = vperm.xlu1 %720, %v453_v33   ;;  %v961_v41 = vadd.f32 1e-05, %v327_v34 }
 0x13d   :  { %v958_v37 = vpop.eup %731  ;;  %v360_v39 = vmul.f32 %v730_v35, %v940_v15  ;;  %v241_v43 = vpop.xlane.xlu1 %240  ;;  %v394_v44 = vmul.f32 %v728_v14, %v393_v29  ;;  %vm366_vm9 = vweird.f32 %v730_v35 }
 0x13e   :  { %v400_v45 = vmul.f32 %v958_v37, %v942_v16  ;;  %v965_v46 = vadd.f32 1e-05, %v331_v36  ;;  %v968_v48 = vmul.f32 %v912_v26, %v241_v43  ;;  %733 = vrsqrt.f32 %v961_v41  ;;  %v300_v6 = vpop.xlane.xlu0 %299  ;;  %vm367_vm11 = vmor %vm365_vm10, %vm366_vm9 }
 0x13f   :  { %v361_v52 = vmul.f32 %v730_v35, %v360_v39  ;;  %v398_v54 = vsel %vm397_vm8, %v728_v14, %v394_v44  ;;  %v308_v23 = vmul.f32 %v300_v6, %v912_v26  ;;  %vm406_vm12 = vweird.f32 %v958_v37  ;;  %v335_v44 = vld [vmem:[%s1097_s2 + $0x10] sm:$0xff] }
 0x140   :  { %v401_v55 = vmul.f32 %v958_v37, %v400_v45  ;;  %735 = vrsqrt.f32 %v965_v46  ;;  %v312_v59 = vmul.f32 %v968_v48, %v968_v48  ;;  %v433_v61 = vmul.f32 %v398_v54, %v337_v50  ;;  %vm1007_vm0 = vmor %vm405_vm13, %vm406_vm12  ;;  %v339_v50 = vld [vmem:[%s1097_s2 + $0x30] sm:$0xff] }
 0x141   :  { %v362_v60 = vmul.f32 0.5, %v361_v52  ;;  %vm375_vm1 = vweird.f32 %v961_v41  ;;  %vm415_vm2 = vweird.f32 %v965_v46  ;;  %vm589_vm12 = vcmask 666624  }
 0x142   :  { %v402_v62 = vmul.f32 0.5, %v401_v55  ;;  %v320_v63 = vsub.f32 %v304_v58, %v312_v59  ;;  %v449_v3 = vmul.f32 %v433_v61, %v917_v38  ;;  %v334_v38 = vld [vmem:[%s1097_s2 + $0x8] sm:$0xff] }
 0x143   :  { %v363_v2 = vsub.f32 1.5, %v362_v60 }
 0x144   :  { %v328_v4 = vmax.f32 %v320_v63, 0.0  ;;  %483 = vperm.xlu1 %720, %v433_v61   ;;  %v734_v5 = vpop.eup %733  ;;  %v457_v9 = vsub.f32 %v441_v0, %v449_v3  ;;  %v403_v14 = vsub.f32 1.5, %v402_v62  ;;  %v439_v0 = vld [vmem:[%s1098_s3 + $0x10] sm:$0xff] }
 0x145   :  { %v253_v8 = vpop.xlane.xlu1 %252  ;;  %v364_v10 = vmul.f32 %v730_v35, %v363_v2  ;;  %v370_v17 = vmul.f32 %v734_v5, %v961_v41  ;;  %vm376_vm14 = vweird.f32 %v734_v5  ;;  %v336_v2 = vld [vmem:[%s1097_s2 + $0x18] sm:$0xff] }
 0x146   :  { %v736_v12 = vpop.eup %735  ;;  %v986_v18 = vadd.f32 1e-05, %v328_v4  ;;  %v989_v19 = vmul.f32 %v912_v26, %v253_v8  ;;  %531 = vperm.xlu0 %722, %v457_v9   ;;  %v404_v32 = vmul.f32 %v958_v37, %v403_v14  ;;  %vm377_vm3 = vmor %vm375_vm1, %vm376_vm14 }
 0x147   :  { %v410_v15 = vmul.f32 %v736_v12, %v965_v46  ;;  %v368_v20 = vsel %vm367_vm11, %v730_v35, %v364_v10  ;;  %v371_v22 = vmul.f32 %v734_v5, %v370_v17  ;;  %vm416_vm15 = vweird.f32 %v736_v12  ;;  %v440_v10 = vld [vmem:[%s1098_s3 + $0x18] sm:$0xff] }
 0x148   :  { %737 = vrsqrt.f32 %v986_v18  ;;  %v316_v24 = vmul.f32 %v989_v19, %v989_v19  ;;  %v430_v27 = vmul.f32 %v368_v20, %v334_v38  ;;  %v408_v16 = vsel %vm1007_vm0, %v958_v37, %v404_v32  ;;  %vm417_vm4 = vmor %vm415_vm2, %vm416_vm15 }
 0x149   :  { %v411_v25 = vmul.f32 %v736_v12, %v410_v15  ;;  %v372_v28 = vmul.f32 0.5, %v371_v22  ;;  %vm385_vm6 = vweird.f32 %v986_v18 }
 0x14a   :  { %v324_v30 = vsub.f32 %v308_v23, %v316_v24  ;;  %468 = vperm.xlu2 %721, %v430_v27   ;;  %v446_v26 = vmul.f32 %v430_v27, %v923_v51  ;;  %v338_v51 = vld [vmem:[%s1097_s2 + $0x28] sm:$0xff]  ;;  %v444_v23 = vld [vmem:[%s1098_s3 + $0x38] sm:$0xff] }
 0x14b   :  { %v412_v33 = vmul.f32 0.5, %v411_v25  ;;  %v373_v29 = vsub.f32 1.5, %v372_v28  ;;  %v434_v58 = vmul.f32 %v408_v16, %v338_v51 }
 0x14c   :  { %v332_v34 = vmax.f32 %v324_v30, 0.0  ;;  %v454_v36 = vsub.f32 %v438_v31, %v446_v26 }
 0x14d   :  { %v413_v35 = vsub.f32 1.5, %v412_v33  ;;  %v374_v45 = vmul.f32 %v734_v5, %v373_v29  ;;  %v450_v28 = vmul.f32 %v434_v58, %v926_v53 }
 0x14e   :  { %v738_v42 = vpop.eup %737  ;;  %v348_v43 = vadd.f32 1e-05, %v332_v34  ;;  %516 = vperm.xlu0 %722, %v454_v36  }
 0x14f   :  { %v414_v52 = vmul.f32 %v736_v12, %v413_v35  ;;  %v380_v41 = vmul.f32 %v738_v42, %v986_v18  ;;  %v378_v37 = vsel %vm377_vm3, %v734_v5, %v374_v45  ;;  %vm386_vm5 = vweird.f32 %v738_v42  ;;  %v340_v18 = vld [vmem:[%s1097_s2 + $0x38] sm:$0xff] }
 0x150   :  { %739 = vrsqrt.f32 %v348_v43  ;;  %v431_v59 = vmul.f32 %v378_v37, %v335_v44  ;;  %vm387_vm7 = vmor %vm385_vm6, %vm386_vm5  ;;  %vm425_vm9 = vweird.f32 %v348_v43 }
 0x151   :  { %v418_v54 = vsel %vm417_vm4, %v736_v12, %v414_v52  ;;  %v381_v55 = vmul.f32 %v738_v42, %v380_v41 }
 0x152   :  { %v435_v60 = vmul.f32 %v418_v54, %v339_v50  ;;  %488 = vperm.xlu2 %721, %v434_v58   ;;  %v447_v46 = vmul.f32 %v431_v59, %v938_v11 }
 0x153   :  { %v382_v61 = vmul.f32 0.5, %v381_v55 }
 0x154   :  { %493 = vperm.xlu1 %720, %v435_v60   ;;  %v455_v8 = vsub.f32 %v439_v0, %v447_v46  ;;  %v451_v20 = vmul.f32 %v435_v60, %v947_v21  ;;  %v442_v21 = vld [vmem:[%s1098_s3 + $0x28] sm:$0xff] }
 0x155   :  { %v383_v62 = vsub.f32 1.5, %v382_v61  ;;  %v458_v30 = vsub.f32 %v442_v21, %v450_v28 }
 0x156   :  { %v740_v63 = vpop.eup %739  ;;  %473 = vperm.xlu0 %722, %v431_v59  }
 0x157   :  { %v384_v3 = vmul.f32 %v738_v42, %v383_v62  ;;  %v420_v4 = vmul.f32 %v740_v63, %v348_v43  ;;  %vm426_vm8 = vweird.f32 %v740_v63 }
 0x158   :  { %vm427_vm10 = vmor %vm425_vm9, %vm426_vm8 }
 0x159   :  { %v388_v5 = vsel %vm387_vm7, %v738_v42, %v384_v3  ;;  %v421_v6 = vmul.f32 %v740_v63, %v420_v4 }
 0x15a   :  { %v432_v9 = vmul.f32 %v388_v5, %v336_v2  ;;  %521 = vperm.xlu2 %721, %v455_v8  }
 0x15b   :  { %v422_v11 = vmul.f32 0.5, %v421_v6 }
 0x15c   :  { %v448_v12 = vmul.f32 %v432_v9, %v968_v48  ;;  %v443_v48 = vld [vmem:[%s1098_s3 + $0x30] sm:$0xff] }
 0x15d   :  { %v423_v14 = vsub.f32 1.5, %v422_v11  ;;  %v459_v25 = vsub.f32 %v443_v48, %v451_v20 }
 0x15e   :  { %v456_v17 = vsub.f32 %v440_v10, %v448_v12 }
 0x15f   :  { %v424_v38 = vmul.f32 %v740_v63, %v423_v14 }
 0x160   :  { %526 = vperm.xlu1 %720, %v456_v17  }
 0x161   :  { %v428_v15 = vsel %vm427_vm10, %v740_v63, %v424_v38 }
 0x162   :  { %v436_v22 = vmul.f32 %v428_v15, %v340_v18  ;;  %478 = vperm.xlu2 %721, %v432_v9  }
 0x164   :  { %v452_v24 = vmul.f32 %v436_v22, %v989_v19 }
 0x166   :  { %v460_v27 = vsub.f32 %v444_v23, %v452_v24 }
 0x168   :  { %541 = vperm.xlu1 %720, %v459_v25   ;;  %546 = vperm.xlu0 %722, %v460_v27  }
 0x16a   :  { %498 = vperm.xlu2 %721, %v436_v22  }
 0x172   :  { %536 = vperm.xlu2 %721, %v458_v30  }
 0x1a4   :  { %v469_v31 = vpop.permute.xlu2 %468 }
 0x1a5   :  { %v502_v50 = vmul.f32 %v469_v31, %v865_v49 }
 0x1a6   :  { %v464_v32 = vpop.permute.xlu1 %463 }
 0x1a7   :  { %v501_v33 = vmul.f32 %v464_v32, %v856_v40 }
 0x1ac   :  { %v489_v26 = vpop.permute.xlu2 %488 }
 0x1ad   :  { %v506_v60 = vmul.f32 %v489_v26, %v873_v56 }
 0x1ae   :  { %v512_v29 = vpop.permute.xlu1 %511 }
 0x1af   :  { %v549_v19 = vadd.f32 %v512_v29, %v501_v33 }
 0x1b1   :  { %vm557_vm11 = vcmp.ge.f32.partialorder %v549_v19, 0.0  ;;  %v565_v34 = vmul.f32 0.2, %v549_v19 }
 0x1b3   :  { %v573_v35 = vsel %vm557_vm11, %v549_v19, %v565_v34 }
 0x1b4   :  { %v581_v36 = vpack.c.bf16 %v573_v35, %v573_v35  ;;  %v522_v39 = vpop.permute.xlu2 %521 }
 0x1b6   :  { %590 = vst.msk [vmem:[%s1099_s4] sm:$0xf] %vm589_vm12, %v581_v36  ;;  %v484_v53 = vpop.permute.xlu1 %483 }
 0x1b7   :  { %v505_v42 = vmul.f32 %v484_v53, %v863_v47 }
 0x1b8   :  { %v532_v43 = vpop.permute.xlu0 %531 }
 0x1b9   :  { %v553_v51 = vadd.f32 %v532_v43, %v505_v42 }
 0x1bb   :  { %vm561_vm13 = vcmp.ge.f32.partialorder %v553_v51, 0.0  ;;  %v569_v40 = vmul.f32 0.2, %v553_v51 }
 0x1bc   :  { %v479_v16 = vpop.permute.xlu2 %478 }
 0x1bd   :  { %v577_v44 = vsel %vm561_vm13, %v553_v51, %v569_v40  ;;  %v504_v3 = vmul.f32 %v479_v16, %v893_v7 }
 0x1be   :  { %v585_v45 = vpack.c.bf16 %v577_v44, %v577_v44 }
 0x1c0   :  { %594 = vst.msk [vmem:[%s1099_s4 + $0x10] sm:$0xf] %vm589_vm12, %v585_v45  ;;  %v517_v52 = vpop.permute.xlu0 %516 }
 0x1c1   :  { %v550_v41 = vadd.f32 %v517_v52, %v502_v50 }
 0x1c3   :  { %vm558_vm14 = vcmp.ge.f32.partialorder %v550_v41, 0.0  ;;  %v566_v37 = vmul.f32 0.2, %v550_v41 }
 0x1c4   :  { %v499_v54 = vpop.permute.xlu2 %498 }
 0x1c5   :  { %v574_v47 = vsel %vm558_vm14, %v550_v41, %v566_v37  ;;  %v508_v7 = vmul.f32 %v499_v54, %v901_v13 }
 0x1c6   :  { %v582_v55 = vpack.c.bf16 %v574_v47, %v574_v47  ;;  %v494_v59 = vpop.permute.xlu1 %493 }
 0x1c7   :  { %v507_v10 = vmul.f32 %v494_v59, %v886_v1 }
 0x1c8   :  { %591 = vst.msk [vmem:[%s1099_s4 + $0x4] sm:$0xf] %vm589_vm12, %v582_v55  ;;  %v474_v58 = vpop.permute.xlu0 %473 }
 0x1c9   :  { %v503_v49 = vmul.f32 %v474_v58, %v875_v57 }
 0x1cb   :  { %v551_v61 = vadd.f32 %v522_v39, %v503_v49 }
 0x1cc   :  { %v537_v62 = vpop.permute.xlu2 %536 }
 0x1cd   :  { %vm559_vm15 = vcmp.ge.f32.partialorder %v551_v61, 0.0  ;;  %v567_v46 = vmul.f32 0.2, %v551_v61  ;;  %v554_v63 = vadd.f32 %v537_v62, %v506_v60 }
 0x1cf   :  { %v575_v0 = vsel %vm559_vm15, %v551_v61, %v567_v46  ;;  %vm562_vm0 = vcmp.ge.f32.partialorder %v554_v63, 0.0  ;;  %v570_v2 = vmul.f32 0.2, %v554_v63 }
 0x1d0   :  { %v583_v4 = vpack.c.bf16 %v575_v0, %v575_v0 }
 0x1d1   :  { %v578_v5 = vsel %vm562_vm0, %v554_v63, %v570_v2 }
 0x1d2   :  { %v527_v6 = vpop.permute.xlu1 %526  ;;  %592 = vst.msk [vmem:[%s1099_s4 + $0x8] sm:$0xf] %vm589_vm12, %v583_v4  ;;  %v586_v57 = vpack.c.bf16 %v578_v5, %v578_v5 }
 0x1d3   :  { %v552_v56 = vadd.f32 %v527_v6, %v504_v3 }
 0x1d4   :  { %595 = vst.msk [vmem:[%s1099_s4 + $0x14] sm:$0xf] %vm589_vm12, %v586_v57 }
 0x1d5   :  { %vm560_vm1 = vcmp.ge.f32.partialorder %v552_v56, 0.0  ;;  %v568_v8 = vmul.f32 0.2, %v552_v56 }
 0x1d7   :  { %v576_v9 = vsel %vm560_vm1, %v552_v56, %v568_v8 }
 0x1d8   :  { %v584_v11 = vpack.c.bf16 %v576_v9, %v576_v9 }
 0x1da   :  { %593 = vst.msk [vmem:[%s1099_s4 + $0xc] sm:$0xf] %vm589_vm12, %v584_v11  ;;  %v547_v12 = vpop.permute.xlu0 %546  ;;  %v542_v14 = vpop.permute.xlu1 %541 }
 0x1db   :  { %v556_v17 = vadd.f32 %v547_v12, %v508_v7  ;;  %v555_v18 = vadd.f32 %v542_v14, %v507_v10 }
 0x1dd   :  { %vm564_vm2 = vcmp.ge.f32.partialorder %v556_v17, 0.0  ;;  %v572_v38 = vmul.f32 0.2, %v556_v17  ;;  %vm563_vm3 = vcmp.ge.f32.partialorder %v555_v18, 0.0  ;;  %v571_v15 = vmul.f32 0.2, %v555_v18 }
 0x1df   :  { %v580_v20 = vsel %vm564_vm2, %v556_v17, %v572_v38  ;;  %v579_v22 = vsel %vm563_vm3, %v555_v18, %v571_v15 }
 0x1e0   :  { %v588_v48 = vpack.c.bf16 %v580_v20, %v580_v20  ;;  %v587_v23 = vpack.c.bf16 %v579_v22, %v579_v22 }
 0x1e2   :  { %597 = vst.msk [vmem:[%s1099_s4 + $0x1c] sm:$0xf] %vm589_vm12, %v588_v48 }
 0x1e3   :  { %596 = vst.msk [vmem:[%s1099_s4 + $0x18] sm:$0xf] %vm589_vm12, %v587_v23 }

// kernel: discriminator_forward.18
= control target key start
LH: loop header
LB: loop body
LE: loop exit
PB: predicated region body
PF: predicated region fallthrough
CT: control target
= control target key end

     0   :  { %vm158_vm0 = vcmask 523264   ;;  %vm229_vm1 = vcmask 326656   ;;  %s1095_s0 = inlined_call_operand.vmem [shape: bf16[192,40], index: 0, kind: input, shape index: {}]   ;;  %s1096_s1 = inlined_call_operand.vmem [shape: bf16[64,192], index: 1, kind: input, shape index: {}]   ;;  %s1097_s2 = inlined_call_operand.vmem [shape: f32[64,1], index: 2, kind: input, shape index: {}]   ;;  %s1098_s3 = inlined_call_operand.vmem [shape: f32[64,1], index: 3, kind: input, shape index: {}]   ;;  %s1099_s4 = inlined_call_operand.vmem [shape: bf16[64,40], index: 4, kind: output, shape index: {}]  }
   0x1   :  { %v701_v0 = vld [vmem:[%s1095_s0 + $0x38] sm:$0xff]  ;;  %v700_v2 = vld [vmem:[%s1095_s0 + $0x30] sm:$0xff]  ;;  %v699_v4 = vld [vmem:[%s1095_s0 + $0x28] sm:$0xff] }
   0x2   :  { %v705_v1 = vld [vmem:[%s1095_s0 + $0x58] sm:$0xff]  ;;  %171 = vmatpush.bf16.msra.mxu0 %v701_v0  ;;  %706 = vmatpush.bf16.msra.mxu2 %v701_v0  ;;  %v704_v3 = vld [vmem:[%s1095_s0 + $0x50] sm:$0xff]  ;;  %v703_v5 = vld [vmem:[%s1095_s0 + $0x48] sm:$0xff] }
   0x3   :  { %714 = vmatpush.bf16.msra.mxu3 %v705_v1  ;;  %204 = vmatpush.bf16.msra.mxu1 %v705_v1  ;;  %v698_v6 = vld [vmem:[%s1095_s0 + $0x20] sm:$0xff]  ;;  %v688_v8 = vld [vmem:[%s1096_s1 + $0x14] sm:$0xf]  ;;  %v614_v9 = vld [vmem:[%s1096_s1 + $0x18] sm:$0xf0] }
   0x4   :  { %v702_v7 = vld [vmem:[%s1095_s0 + $0x40] sm:$0xff]  ;;  %v606_v11 = vld [vmem:[%s1096_s1 + $0x8] sm:$0xf0]  ;;  %v617_v12 = vor.u32 %v688_v8, %v614_v9  ;;  %v697_v13 = vld [vmem:[%s1095_s0 + $0x18] sm:$0xff] }
   0x5   :  { %v686_v10 = vld [vmem:[%s1096_s1 + $0x4] sm:$0xf]  ;;  %v696_v15 = vld [vmem:[%s1095_s0 + $0x10] sm:$0xff]  ;;  %v695_v16 = vld [vmem:[%s1095_s0 + $0x8] sm:$0xff] }
   0x6   :  { %172 = vmatpush.bf16.msra.mxu0 %v700_v2  ;;  %707 = vmatpush.bf16.msra.mxu2 %v700_v2  ;;  %v609_v14 = vor.u32 %v686_v10, %v606_v11  ;;  %v694_v17 = vld [vmem:[%s1095_s0] sm:$0xff]  ;;  %v687_v19 = vld [vmem:[%s1096_s1 + $0x4] sm:$0xf0]  ;;  %v622_v23 = vld [vmem:[%s1096_s1 + $0x28] sm:$0xf0] }
   0x7   :  { %715 = vmatpush.bf16.msra.mxu3 %v704_v3  ;;  %205 = vmatpush.bf16.msra.mxu1 %v704_v3  ;;  %v604_v18 = vld [vmem:[%s1096_s1] sm:$0xf]  ;;  %v691_v21 = vld [vmem:[%s1096_s1 + $0x24] sm:$0xf0]  ;;  %v690_v22 = vld [vmem:[%s1096_s1 + $0x24] sm:$0xf] }
   0x8   :  { %v620_v20 = vld [vmem:[%s1096_s1 + $0x20] sm:$0xf]  ;;  %v605_v24 = vor.u32 %v687_v19, %v604_v18  ;;  %v625_v26 = vor.u32 %v690_v22, %v622_v23  ;;  %v612_v27 = vld [vmem:[%s1096_s1 + $0x10] sm:$0xf]  ;;  %v689_v28 = vld [vmem:[%s1096_s1 + $0x14] sm:$0xf0] }
   0x9   :  { %v621_v25 = vor.u32 %v691_v21, %v620_v20  ;;  %v628_v29 = vld [vmem:[%s1096_s1 + $0x30] sm:$0xf]  ;;  %v693_v30 = vld [vmem:[%s1096_s1 + $0x34] sm:$0xf0]  ;;  %v692_v31 = vld [vmem:[%s1096_s1 + $0x34] sm:$0xf]  ;;  %v613_v33 = vor.u32 %v689_v28, %v612_v27 }
   0xa   :  { %173 = vmatpush.bf16.msra.mxu0 %v699_v4  ;;  %708 = vmatpush.bf16.msra.mxu2 %v699_v4  ;;  %v630_v32 = vld [vmem:[%s1096_s1 + $0x38] sm:$0xf0]  ;;  %v629_v34 = vor.u32 %v693_v30, %v628_v29  ;;  %v741_v20 = vmov 40.0   ;;  %v742_v27 = vmov 0  }
   0xb   :  { %716 = vmatpush.bf16.msra.mxu3 %v703_v5  ;;  %206 = vmatpush.bf16.msra.mxu1 %v703_v5  ;;  %v633_v35 = vor.u32 %v692_v31, %v630_v32  ;;  %723 = vrcp.f32 %v741_v20 }
   0xc   :  { %720 = vset.pattern.permute.xlu1 %v742_v27  ;;  %722 = vset.pattern.permute.xlu0 %v742_v27 }
   0xd   :  { %721 = vset.pattern.permute.xlu2 %v742_v27  ;;  %v437_v27 = vld [vmem:[%s1098_s3] sm:$0xff] }
   0xe   :  { %174 = vmatpush.bf16.msra.mxu0 %v698_v6  ;;  %709 = vmatpush.bf16.msra.mxu2 %v698_v6 }
   0xf   :  { %717 = vmatpush.bf16.msra.mxu3 %v702_v7  ;;  %207 = vmatpush.bf16.msra.mxu1 %v702_v7 }
  0x11   :  { %v724_v21 = vpop.eup %723 }
  0x12   :  { %683 = vmatmul.msk.bf16.vlgmr.msra.gmra.mxu3 %vm158_vm0, %v617_v12  ;;  %175 = vmatpush.bf16.msra.mxu0 %v697_v13  ;;  %v255_v22 = vmul.f32 40.0, %v724_v21  ;;  %vm259_vm2 = vweird.f32 %v724_v21 }
  0x13   :  { %710 = vmatpush.bf16.msra.mxu2 %v697_v13  ;;  %682 = vmatmul.msk.bf16.vlgmr.msra.gmra.mxu1 %vm158_vm0, %v609_v14 }
  0x14   :  { %v256_v23 = vsub.f32 1.0, %v255_v22 }
  0x16   :  { %176 = vmatpush.bf16.msra.mxu0 %v696_v15 }
  0x17   :  { %711 = vmatpush.bf16.msra.mxu2 %v696_v15 }
  0x1a   :  { %177 = vmatpush.bf16.msra.mxu0 %v695_v16 }
  0x1b   :  { %712 = vmatpush.bf16.msra.mxu2 %v695_v16 }
  0x1e   :  { %178 = vmatpush.bf16.msra.mxu0 %v694_v17 }
  0x1f   :  { %713 = vmatpush.bf16.msra.mxu2 %v694_v17 }
  0x21   :  { %179 = vmatmul.bf16.vlgmr.msra.gmra.mxu0 %v605_v24  ;;  %v257_v24 = vmul.f32 %v724_v21, %v256_v23 }
  0x22   :  { %189 = vmatmul.bf16.vlgmr.msra.gmra.mxu2 %v621_v25  ;;  %684 = vmatmul.msk.bf16.gmra.mxu3 %vm158_vm0, %v625_v26 }
  0x23   :  { %v258_v25 = vadd.f32 %v724_v21, %v257_v24 }
  0x25   :  { %v912_v26 = vsel %vm259_vm2, %v724_v21, %v258_v25 }
  0x31   :  { %184 = vmatmul.bf16.gmra.mxu0 %v613_v33 }
  0x32   :  { %194 = vmatmul.bf16.gmra.mxu2 %v629_v34  ;;  %685 = vmatmul.msk.bf16.gmra.mxu3 %vm158_vm0, %v633_v35 }
  0x90   :  { %v209_v37 = vpop.f32.mrf.mxu1 }
  0x95   :  { %v214_v36 = vpop.f32.mrf.mxu3 }
  0x98   :  { %v211_v46 = vpop.f32.mrf.mxu1 }
  0x9d   :  { %v216_v38 = vpop.f32.mrf.mxu3 }
  0x9e   :  { %v180_v39 = vpop.f32.mrf.mxu0 }
  0x9f   :  { %v856_v40 = vadd.f32 %v209_v37, %v180_v39 }
  0xa1   :  { %v230_v41 = vsel %vm229_vm1, %v856_v40, 0.0  ;;  %v269_v42 = vmul.f32 %v856_v40, %v856_v40 }
  0xa2   :  { %231 = vadd.xlane.f32.xlu0 %v230_v41 }
  0xa3   :  { %v277_v43 = vsel %vm229_vm1, %v269_v42, 0.0 }
  0xa4   :  { %278 = vadd.xlane.f32.xlu2 %v277_v43 }
  0xa5   :  { %v190_v44 = vpop.f32.mrf.mxu2  ;;  %v219_v45 = vpop.f32.mrf.mxu3 }
  0xa6   :  { %v863_v47 = vadd.f32 %v219_v45, %v190_v44  ;;  %v182_v48 = vpop.f32.mrf.mxu0 }
  0xa7   :  { %v865_v49 = vadd.f32 %v211_v46, %v182_v48 }
  0xa8   :  { %v242_v51 = vsel %vm229_vm1, %v863_v47, 0.0  ;;  %v273_v52 = vmul.f32 %v863_v47, %v863_v47 }
  0xa9   :  { %v233_v50 = vsel %vm229_vm1, %v865_v49, 0.0  ;;  %v270_v63 = vmul.f32 %v865_v49, %v865_v49 }
  0xaa   :  { %234 = vadd.xlane.f32.xlu0 %v233_v50  ;;  %v289_v58 = vsel %vm229_vm1, %v273_v52, 0.0 }
  0xab   :  { %v280_v4 = vsel %vm229_vm1, %v270_v63, 0.0 }
  0xac   :  { %243 = vadd.xlane.f32.xlu2 %v242_v51 }
  0xad   :  { %v192_v53 = vpop.f32.mrf.mxu2  ;;  %v221_v54 = vpop.f32.mrf.mxu3 }
  0xae   :  { %v185_v55 = vpop.f32.mrf.mxu0  ;;  %v873_v56 = vadd.f32 %v221_v54, %v192_v53 }
  0xaf   :  { %v875_v57 = vadd.f32 %v214_v36, %v185_v55 }
  0xb0   :  { %v245_v60 = vsel %vm229_vm1, %v873_v56, 0.0  ;;  %v274_v0 = vmul.f32 %v873_v56, %v873_v56 }
  0xb1   :  { %v236_v59 = vsel %vm229_vm1, %v875_v57, 0.0  ;;  %v271_v8 = vmul.f32 %v875_v57, %v875_v57 }
  0xb2   :  { %290 = vadd.xlane.f32.xlu0 %v289_v58  ;;  %237 = vadd.xlane.f32.xlu1 %v236_v59  ;;  %v292_v5 = vsel %vm229_vm1, %v274_v0, 0.0 }
  0xb3   :  { %v283_v14 = vsel %vm229_vm1, %v271_v8, 0.0 }
  0xb4   :  { %246 = vadd.xlane.f32.xlu2 %v245_v60 }
  0xb5   :  { %v195_v61 = vpop.f32.mrf.mxu2  ;;  %v224_v62 = vpop.f32.mrf.mxu3 }
  0xb6   :  { %v886_v1 = vadd.f32 %v224_v62, %v195_v61  ;;  %v187_v2 = vpop.f32.mrf.mxu0 }
  0xb7   :  { %v893_v7 = vadd.f32 %v216_v38, %v187_v2  ;;  %v333_v2 = vld [vmem:[%s1097_s2] sm:$0xff] }
  0xb8   :  { %v275_v3 = vmul.f32 %v886_v1, %v886_v1  ;;  %v248_v11 = vsel %vm229_vm1, %v886_v1, 0.0 }
  0xb9   :  { %v272_v12 = vmul.f32 %v893_v7, %v893_v7  ;;  %v239_v18 = vsel %vm229_vm1, %v893_v7, 0.0 }
  0xba   :  { %281 = vadd.xlane.f32.xlu0 %v280_v4  ;;  %293 = vadd.xlane.f32.xlu1 %v292_v5  ;;  %v295_v6 = vsel %vm229_vm1, %v275_v3, 0.0 }
  0xbb   :  { %v286_v15 = vsel %vm229_vm1, %v272_v12, 0.0 }
  0xbc   :  { %296 = vadd.xlane.f32.xlu2 %v295_v6 }
  0xbd   :  { %v197_v9 = vpop.f32.mrf.mxu2  ;;  %v226_v10 = vpop.f32.mrf.mxu3 }
  0xbe   :  { %v901_v13 = vadd.f32 %v226_v10, %v197_v9 }
  0xc0   :  { %v276_v16 = vmul.f32 %v901_v13, %v901_v13  ;;  %v251_v19 = vsel %vm229_vm1, %v901_v13, 0.0 }
  0xc2   :  { %249 = vadd.xlane.f32.xlu0 %v248_v11  ;;  %284 = vadd.xlane.f32.xlu1 %v283_v14  ;;  %v298_v17 = vsel %vm229_vm1, %v276_v16, 0.0 }
  0xc4   :  { %287 = vadd.xlane.f32.xlu2 %v286_v15 }
  0xca   :  { %299 = vadd.xlane.f32.xlu0 %v298_v17  ;;  %240 = vadd.xlane.f32.xlu1 %v239_v18 }
  0xd2   :  { %252 = vadd.xlane.f32.xlu1 %v251_v19 }
 0x115   :  { %v232_v28 = vpop.xlane.xlu0 %231 }
 0x116   :  { %v261_v29 = vmul.f32 %v912_v26, %v232_v28 }
 0x117   :  { %v279_v30 = vpop.xlane.xlu2 %278 }
 0x118   :  { %v309_v31 = vmul.f32 %v261_v29, %v261_v29  ;;  %v301_v32 = vmul.f32 %v279_v30, %v912_v26 }
 0x11a   :  { %v317_v33 = vsub.f32 %v301_v32, %v309_v31 }
 0x11c   :  { %v325_v34 = vmax.f32 %v317_v33, 0.0 }
 0x11d   :  { %v235_v35 = vpop.xlane.xlu0 %234 }
 0x11e   :  { %v341_v36 = vadd.f32 1e-05, %v325_v34  ;;  %v923_v51 = vmul.f32 %v912_v26, %v235_v35 }
 0x11f   :  { %v244_v37 = vpop.xlane.xlu2 %243 }
 0x120   :  { %725 = vrsqrt.f32 %v341_v36  ;;  %v917_v38 = vmul.f32 %v912_v26, %v244_v37  ;;  %v310_v59 = vmul.f32 %v923_v51, %v923_v51  ;;  %vm355_vm4 = vweird.f32 %v341_v36 }
 0x122   :  { %v313_v39 = vmul.f32 %v917_v38, %v917_v38 }
 0x125   :  { %v291_v41 = vpop.xlane.xlu0 %290  ;;  %v238_v42 = vpop.xlane.xlu1 %237 }
 0x126   :  { %v726_v43 = vpop.eup %725  ;;  %v305_v44 = vmul.f32 %v291_v41, %v912_v26  ;;  %v938_v11 = vmul.f32 %v912_v26, %v238_v42 }
 0x127   :  { %v350_v45 = vmul.f32 %v726_v43, %v341_v36  ;;  %v247_v46 = vpop.xlane.xlu2 %246  ;;  %vm356_vm3 = vweird.f32 %v726_v43 }
 0x128   :  { %v321_v48 = vsub.f32 %v305_v44, %v313_v39  ;;  %v926_v53 = vmul.f32 %v912_v26, %v247_v46  ;;  %vm357_vm5 = vmor %vm355_vm4, %vm356_vm3  ;;  %v311_v24 = vmul.f32 %v938_v11, %v938_v11 }
 0x129   :  { %v351_v50 = vmul.f32 %v726_v43, %v350_v45 }
 0x12a   :  { %v329_v52 = vmax.f32 %v321_v48, 0.0  ;;  %v314_v62 = vmul.f32 %v926_v53, %v926_v53 }
 0x12b   :  { %v352_v54 = vmul.f32 0.5, %v351_v50  ;;  %v337_v50 = vld [vmem:[%s1097_s2 + $0x20] sm:$0xff] }
 0x12c   :  { %v345_v55 = vadd.f32 1e-05, %v329_v52 }
 0x12d   :  { %v353_v58 = vsub.f32 1.5, %v352_v54  ;;  %v282_v60 = vpop.xlane.xlu0 %281  ;;  %v294_v61 = vpop.xlane.xlu1 %293 }
 0x12e   :  { %727 = vrsqrt.f32 %v345_v55  ;;  %v302_v63 = vmul.f32 %v282_v60, %v912_v26  ;;  %v306_v0 = vmul.f32 %v294_v61, %v912_v26  ;;  %vm395_vm7 = vweird.f32 %v345_v55 }
 0x12f   :  { %v354_v3 = vmul.f32 %v726_v43, %v353_v58  ;;  %v297_v12 = vpop.xlane.xlu2 %296 }
 0x130   :  { %v318_v4 = vsub.f32 %v302_v63, %v310_v59  ;;  %v322_v5 = vsub.f32 %v306_v0, %v314_v62  ;;  %v307_v20 = vmul.f32 %v297_v12, %v912_v26  ;;  %v441_v0 = vld [vmem:[%s1098_s3 + $0x20] sm:$0xff] }
 0x131   :  { %v358_v6 = vsel %vm357_vm5, %v726_v43, %v354_v3 }
 0x132   :  { %v326_v8 = vmax.f32 %v318_v4, 0.0  ;;  %v330_v9 = vmax.f32 %v322_v5, 0.0  ;;  %v429_v10 = vmul.f32 %v358_v6, %v333_v2 }
 0x134   :  { %v728_v14 = vpop.eup %727  ;;  %v940_v15 = vadd.f32 1e-05, %v326_v8  ;;  %v942_v16 = vadd.f32 1e-05, %v330_v9  ;;  %463 = vperm.xlu1 %720, %v429_v10   ;;  %v445_v22 = vmul.f32 %v429_v10, %v261_v29 }
 0x135   :  { %v390_v17 = vmul.f32 %v728_v14, %v345_v55  ;;  %v250_v18 = vpop.xlane.xlu0 %249  ;;  %v285_v19 = vpop.xlane.xlu1 %284  ;;  %vm396_vm6 = vweird.f32 %v728_v14 }
 0x136   :  { %729 = vrsqrt.f32 %v940_v15  ;;  %v947_v21 = vmul.f32 %v912_v26, %v250_v18  ;;  %v303_v25 = vmul.f32 %v285_v19, %v912_v26  ;;  %v453_v33 = vsub.f32 %v437_v27, %v445_v22  ;;  %vm397_vm8 = vmor %vm395_vm7, %vm396_vm6 }
 0x137   :  { %v391_v23 = vmul.f32 %v728_v14, %v390_v17  ;;  %731 = vrsqrt.f32 %v942_v16  ;;  %v288_v42 = vpop.xlane.xlu2 %287  ;;  %vm365_vm10 = vweird.f32 %v940_v15  ;;  %vm405_vm13 = vweird.f32 %v942_v16 }
 0x138   :  { %v315_v28 = vmul.f32 %v947_v21, %v947_v21  ;;  %v319_v31 = vsub.f32 %v303_v25, %v311_v24  ;;  %v304_v58 = vmul.f32 %v288_v42, %v912_v26 }
 0x139   :  { %v392_v30 = vmul.f32 0.5, %v391_v23 }
 0x13a   :  { %v323_v32 = vsub.f32 %v307_v20, %v315_v28  ;;  %v327_v34 = vmax.f32 %v319_v31, 0.0  ;;  %v438_v31 = vld [vmem:[%s1098_s3 + $0x8] sm:$0xff] }
 0x13b   :  { %v393_v29 = vsub.f32 1.5, %v392_v30 }
 0x13c   :  { %v730_v35 = vpop.eup %729  ;;  %v331_v36 = vmax.f32 %v323_v32, 0.0  ;;  %511 = vperm.xlu1 %720, %v453_v33   ;;  %v961_v41 = vadd.f32 1e-05, %v327_v34 }
 0x13d   :  { %v958_v37 = vpop.eup %731  ;;  %v360_v39 = vmul.f32 %v730_v35, %v940_v15  ;;  %v241_v43 = vpop.xlane.xlu1 %240  ;;  %v394_v44 = vmul.f32 %v728_v14, %v393_v29  ;;  %vm366_vm9 = vweird.f32 %v730_v35 }
 0x13e   :  { %v400_v45 = vmul.f32 %v958_v37, %v942_v16  ;;  %v965_v46 = vadd.f32 1e-05, %v331_v36  ;;  %v968_v48 = vmul.f32 %v912_v26, %v241_v43  ;;  %733 = vrsqrt.f32 %v961_v41  ;;  %v300_v6 = vpop.xlane.xlu0 %299  ;;  %vm367_vm11 = vmor %vm365_vm10, %vm366_vm9 }
 0x13f   :  { %v361_v52 = vmul.f32 %v730_v35, %v360_v39  ;;  %v398_v54 = vsel %vm397_vm8, %v728_v14, %v394_v44  ;;  %v308_v23 = vmul.f32 %v300_v6, %v912_v26  ;;  %vm406_vm12 = vweird.f32 %v958_v37  ;;  %v335_v44 = vld [vmem:[%s1097_s2 + $0x10] sm:$0xff] }
 0x140   :  { %v401_v55 = vmul.f32 %v958_v37, %v400_v45  ;;  %735 = vrsqrt.f32 %v965_v46  ;;  %v312_v59 = vmul.f32 %v968_v48, %v968_v48  ;;  %v433_v61 = vmul.f32 %v398_v54, %v337_v50  ;;  %vm1007_vm0 = vmor %vm405_vm13, %vm406_vm12  ;;  %v339_v50 = vld [vmem:[%s1097_s2 + $0x30] sm:$0xff] }
 0x141   :  { %v362_v60 = vmul.f32 0.5, %v361_v52  ;;  %vm375_vm1 = vweird.f32 %v961_v41  ;;  %vm415_vm2 = vweird.f32 %v965_v46  ;;  %vm589_vm12 = vcmask 322560  }
 0x142   :  { %v402_v62 = vmul.f32 0.5, %v401_v55  ;;  %v320_v63 = vsub.f32 %v304_v58, %v312_v59  ;;  %v449_v3 = vmul.f32 %v433_v61, %v917_v38  ;;  %v334_v38 = vld [vmem:[%s1097_s2 + $0x8] sm:$0xff] }
 0x143   :  { %v363_v2 = vsub.f32 1.5, %v362_v60 }
 0x144   :  { %v328_v4 = vmax.f32 %v320_v63, 0.0  ;;  %483 = vperm.xlu1 %720, %v433_v61   ;;  %v734_v5 = vpop.eup %733  ;;  %v457_v9 = vsub.f32 %v441_v0, %v449_v3  ;;  %v403_v14 = vsub.f32 1.5, %v402_v62  ;;  %v439_v0 = vld [vmem:[%s1098_s3 + $0x10] sm:$0xff] }
 0x145   :  { %v253_v8 = vpop.xlane.xlu1 %252  ;;  %v364_v10 = vmul.f32 %v730_v35, %v363_v2  ;;  %v370_v17 = vmul.f32 %v734_v5, %v961_v41  ;;  %vm376_vm14 = vweird.f32 %v734_v5  ;;  %v336_v2 = vld [vmem:[%s1097_s2 + $0x18] sm:$0xff] }
 0x146   :  { %v736_v12 = vpop.eup %735  ;;  %v986_v18 = vadd.f32 1e-05, %v328_v4  ;;  %v989_v19 = vmul.f32 %v912_v26, %v253_v8  ;;  %531 = vperm.xlu0 %722, %v457_v9   ;;  %v404_v32 = vmul.f32 %v958_v37, %v403_v14  ;;  %vm377_vm3 = vmor %vm375_vm1, %vm376_vm14 }
 0x147   :  { %v410_v15 = vmul.f32 %v736_v12, %v965_v46  ;;  %v368_v20 = vsel %vm367_vm11, %v730_v35, %v364_v10  ;;  %v371_v22 = vmul.f32 %v734_v5, %v370_v17  ;;  %vm416_vm15 = vweird.f32 %v736_v12  ;;  %v440_v10 = vld [vmem:[%s1098_s3 + $0x18] sm:$0xff] }
 0x148   :  { %737 = vrsqrt.f32 %v986_v18  ;;  %v316_v24 = vmul.f32 %v989_v19, %v989_v19  ;;  %v430_v27 = vmul.f32 %v368_v20, %v334_v38  ;;  %v408_v16 = vsel %vm1007_vm0, %v958_v37, %v404_v32  ;;  %vm417_vm4 = vmor %vm415_vm2, %vm416_vm15 }
 0x149   :  { %v411_v25 = vmul.f32 %v736_v12, %v410_v15  ;;  %v372_v28 = vmul.f32 0.5, %v371_v22  ;;  %vm385_vm6 = vweird.f32 %v986_v18 }
 0x14a   :  { %v324_v30 = vsub.f32 %v308_v23, %v316_v24  ;;  %468 = vperm.xlu2 %721, %v430_v27   ;;  %v446_v26 = vmul.f32 %v430_v27, %v923_v51  ;;  %v338_v51 = vld [vmem:[%s1097_s2 + $0x28] sm:$0xff]  ;;  %v444_v23 = vld [vmem:[%s1098_s3 + $0x38] sm:$0xff] }
 0x14b   :  { %v412_v33 = vmul.f32 0.5, %v411_v25  ;;  %v373_v29 = vsub.f32 1.5, %v372_v28  ;;  %v434_v58 = vmul.f32 %v408_v16, %v338_v51 }
 0x14c   :  { %v332_v34 = vmax.f32 %v324_v30, 0.0  ;;  %v454_v36 = vsub.f32 %v438_v31, %v446_v26 }
 0x14d   :  { %v413_v35 = vsub.f32 1.5, %v412_v33  ;;  %v374_v45 = vmul.f32 %v734_v5, %v373_v29  ;;  %v450_v28 = vmul.f32 %v434_v58, %v926_v53 }
 0x14e   :  { %v738_v42 = vpop.eup %737  ;;  %v348_v43 = vadd.f32 1e-05, %v332_v34  ;;  %516 = vperm.xlu0 %722, %v454_v36  }
 0x14f   :  { %v414_v52 = vmul.f32 %v736_v12, %v413_v35  ;;  %v380_v41 = vmul.f32 %v738_v42, %v986_v18  ;;  %v378_v37 = vsel %vm377_vm3, %v734_v5, %v374_v45  ;;  %vm386_vm5 = vweird.f32 %v738_v42  ;;  %v340_v18 = vld [vmem:[%s1097_s2 + $0x38] sm:$0xff] }
 0x150   :  { %739 = vrsqrt.f32 %v348_v43  ;;  %v431_v59 = vmul.f32 %v378_v37, %v335_v44  ;;  %vm387_vm7 = vmor %vm385_vm6, %vm386_vm5  ;;  %vm425_vm9 = vweird.f32 %v348_v43 }
 0x151   :  { %v418_v54 = vsel %vm417_vm4, %v736_v12, %v414_v52  ;;  %v381_v55 = vmul.f32 %v738_v42, %v380_v41 }
 0x152   :  { %v435_v60 = vmul.f32 %v418_v54, %v339_v50  ;;  %488 = vperm.xlu2 %721, %v434_v58   ;;  %v447_v46 = vmul.f32 %v431_v59, %v938_v11 }
 0x153   :  { %v382_v61 = vmul.f32 0.5, %v381_v55 }
 0x154   :  { %493 = vperm.xlu1 %720, %v435_v60   ;;  %v455_v8 = vsub.f32 %v439_v0, %v447_v46  ;;  %v451_v20 = vmul.f32 %v435_v60, %v947_v21  ;;  %v442_v21 = vld [vmem:[%s1098_s3 + $0x28] sm:$0xff] }
 0x155   :  { %v383_v62 = vsub.f32 1.5, %v382_v61  ;;  %v458_v30 = vsub.f32 %v442_v21, %v450_v28 }
 0x156   :  { %v740_v63 = vpop.eup %739  ;;  %473 = vperm.xlu0 %722, %v431_v59  }
 0x157   :  { %v384_v3 = vmul.f32 %v738_v42, %v383_v62  ;;  %v420_v4 = vmul.f32 %v740_v63, %v348_v43  ;;  %vm426_vm8 = vweird.f32 %v740_v63 }
 0x158   :  { %vm427_vm10 = vmor %vm425_vm9, %vm426_vm8 }
 0x159   :  { %v388_v5 = vsel %vm387_vm7, %v738_v42, %v384_v3  ;;  %v421_v6 = vmul.f32 %v740_v63, %v420_v4 }
 0x15a   :  { %v432_v9 = vmul.f32 %v388_v5, %v336_v2  ;;  %521 = vperm.xlu2 %721, %v455_v8  }
 0x15b   :  { %v422_v11 = vmul.f32 0.5, %v421_v6 }
 0x15c   :  { %v448_v12 = vmul.f32 %v432_v9, %v968_v48  ;;  %v443_v48 = vld [vmem:[%s1098_s3 + $0x30] sm:$0xff] }
 0x15d   :  { %v423_v14 = vsub.f32 1.5, %v422_v11  ;;  %v459_v25 = vsub.f32 %v443_v48, %v451_v20 }
 0x15e   :  { %v456_v17 = vsub.f32 %v440_v10, %v448_v12 }
 0x15f   :  { %v424_v38 = vmul.f32 %v740_v63, %v423_v14 }
 0x160   :  { %526 = vperm.xlu1 %720, %v456_v17  }
 0x161   :  { %v428_v15 = vsel %vm427_vm10, %v740_v63, %v424_v38 }
 0x162   :  { %v436_v22 = vmul.f32 %v428_v15, %v340_v18  ;;  %478 = vperm.xlu2 %721, %v432_v9  }
 0x164   :  { %v452_v24 = vmul.f32 %v436_v22, %v989_v19 }
 0x166   :  { %v460_v27 = vsub.f32 %v444_v23, %v452_v24 }
 0x168   :  { %541 = vperm.xlu1 %720, %v459_v25   ;;  %546 = vperm.xlu0 %722, %v460_v27  }
 0x16a   :  { %498 = vperm.xlu2 %721, %v436_v22  }
 0x172   :  { %536 = vperm.xlu2 %721, %v458_v30  }
 0x1a4   :  { %v469_v31 = vpop.permute.xlu2 %468 }
 0x1a5   :  { %v502_v50 = vmul.f32 %v469_v31, %v865_v49 }
 0x1a6   :  { %v464_v32 = vpop.permute.xlu1 %463 }
 0x1a7   :  { %v501_v33 = vmul.f32 %v464_v32, %v856_v40 }
 0x1ac   :  { %v489_v26 = vpop.permute.xlu2 %488 }
 0x1ad   :  { %v506_v60 = vmul.f32 %v489_v26, %v873_v56 }
 0x1ae   :  { %v512_v29 = vpop.permute.xlu1 %511 }
 0x1af   :  { %v549_v19 = vadd.f32 %v512_v29, %v501_v33 }
 0x1b1   :  { %vm557_vm11 = vcmp.ge.f32.partialorder %v549_v19, 0.0  ;;  %v565_v34 = vmul.f32 0.2, %v549_v19 }
 0x1b3   :  { %v573_v35 = vsel %vm557_vm11, %v549_v19, %v565_v34 }
 0x1b4   :  { %v581_v36 = vpack.c.bf16 %v573_v35, %v573_v35  ;;  %v522_v39 = vpop.permute.xlu2 %521 }
 0x1b6   :  { %590 = vst.msk [vmem:[%s1099_s4] sm:$0xf] %vm589_vm12, %v581_v36  ;;  %v484_v53 = vpop.permute.xlu1 %483 }
 0x1b7   :  { %v505_v42 = vmul.f32 %v484_v53, %v863_v47 }
 0x1b8   :  { %v532_v43 = vpop.permute.xlu0 %531 }
 0x1b9   :  { %v553_v51 = vadd.f32 %v532_v43, %v505_v42 }
 0x1bb   :  { %vm561_vm13 = vcmp.ge.f32.partialorder %v553_v51, 0.0  ;;  %v569_v40 = vmul.f32 0.2, %v553_v51 }
 0x1bc   :  { %v479_v16 = vpop.permute.xlu2 %478 }
 0x1bd   :  { %v577_v44 = vsel %vm561_vm13, %v553_v51, %v569_v40  ;;  %v504_v3 = vmul.f32 %v479_v16, %v893_v7 }
 0x1be   :  { %v585_v45 = vpack.c.bf16 %v577_v44, %v577_v44 }
 0x1c0   :  { %594 = vst.msk [vmem:[%s1099_s4 + $0x10] sm:$0xf] %vm589_vm12, %v585_v45  ;;  %v517_v52 = vpop.permute.xlu0 %516 }
 0x1c1   :  { %v550_v41 = vadd.f32 %v517_v52, %v502_v50 }
 0x1c3   :  { %vm558_vm14 = vcmp.ge.f32.partialorder %v550_v41, 0.0  ;;  %v566_v37 = vmul.f32 0.2, %v550_v41 }
 0x1c4   :  { %v499_v54 = vpop.permute.xlu2 %498 }
 0x1c5   :  { %v574_v47 = vsel %vm558_vm14, %v550_v41, %v566_v37  ;;  %v508_v7 = vmul.f32 %v499_v54, %v901_v13 }
 0x1c6   :  { %v582_v55 = vpack.c.bf16 %v574_v47, %v574_v47  ;;  %v494_v59 = vpop.permute.xlu1 %493 }
 0x1c7   :  { %v507_v10 = vmul.f32 %v494_v59, %v886_v1 }
 0x1c8   :  { %591 = vst.msk [vmem:[%s1099_s4 + $0x4] sm:$0xf] %vm589_vm12, %v582_v55  ;;  %v474_v58 = vpop.permute.xlu0 %473 }
 0x1c9   :  { %v503_v49 = vmul.f32 %v474_v58, %v875_v57 }
 0x1cb   :  { %v551_v61 = vadd.f32 %v522_v39, %v503_v49 }
 0x1cc   :  { %v537_v62 = vpop.permute.xlu2 %536 }
 0x1cd   :  { %vm559_vm15 = vcmp.ge.f32.partialorder %v551_v61, 0.0  ;;  %v567_v46 = vmul.f32 0.2, %v551_v61  ;;  %v554_v63 = vadd.f32 %v537_v62, %v506_v60 }
 0x1cf   :  { %v575_v0 = vsel %vm559_vm15, %v551_v61, %v567_v46  ;;  %vm562_vm0 = vcmp.ge.f32.partialorder %v554_v63, 0.0  ;;  %v570_v2 = vmul.f32 0.2, %v554_v63 }
 0x1d0   :  { %v583_v4 = vpack.c.bf16 %v575_v0, %v575_v0 }
 0x1d1   :  { %v578_v5 = vsel %vm562_vm0, %v554_v63, %v570_v2 }
 0x1d2   :  { %v527_v6 = vpop.permute.xlu1 %526  ;;  %592 = vst.msk [vmem:[%s1099_s4 + $0x8] sm:$0xf] %vm589_vm12, %v583_v4  ;;  %v586_v57 = vpack.c.bf16 %v578_v5, %v578_v5 }
 0x1d3   :  { %v552_v56 = vadd.f32 %v527_v6, %v504_v3 }
 0x1d4   :  { %595 = vst.msk [vmem:[%s1099_s4 + $0x14] sm:$0xf] %vm589_vm12, %v586_v57 }
 0x1d5   :  { %vm560_vm1 = vcmp.ge.f32.partialorder %v552_v56, 0.0  ;;  %v568_v8 = vmul.f32 0.2, %v552_v56 }
 0x1d7   :  { %v576_v9 = vsel %vm560_vm1, %v552_v56, %v568_v8 }
 0x1d8   :  { %v584_v11 = vpack.c.bf16 %v576_v9, %v576_v9 }
 0x1da   :  { %593 = vst.msk [vmem:[%s1099_s4 + $0xc] sm:$0xf] %vm589_vm12, %v584_v11  ;;  %v547_v12 = vpop.permute.xlu0 %546  ;;  %v542_v14 = vpop.permute.xlu1 %541 }
 0x1db   :  { %v556_v17 = vadd.f32 %v547_v12, %v508_v7  ;;  %v555_v18 = vadd.f32 %v542_v14, %v507_v10 }
 0x1dd   :  { %vm564_vm2 = vcmp.ge.f32.partialorder %v556_v17, 0.0  ;;  %v572_v38 = vmul.f32 0.2, %v556_v17  ;;  %vm563_vm3 = vcmp.ge.f32.partialorder %v555_v18, 0.0  ;;  %v571_v15 = vmul.f32 0.2, %v555_v18 }
 0x1df   :  { %v580_v20 = vsel %vm564_vm2, %v556_v17, %v572_v38  ;;  %v579_v22 = vsel %vm563_vm3, %v555_v18, %v571_v15 }
 0x1e0   :  { %v588_v48 = vpack.c.bf16 %v580_v20, %v580_v20  ;;  %v587_v23 = vpack.c.bf16 %v579_v22, %v579_v22 }
 0x1e2   :  { %597 = vst.msk [vmem:[%s1099_s4 + $0x1c] sm:$0xf] %vm589_vm12, %v588_v48 }
 0x1e3   :  { %596 = vst.msk [vmem:[%s1099_s4 + $0x18] sm:$0xf] %vm589_vm12, %v587_v23 }

// kernel: discriminator_forward.19
= control target key start
LH: loop header
LB: loop body
LE: loop exit
PB: predicated region body
PF: predicated region fallthrough
CT: control target
= control target key end

     0   :  { %vm830_vm1 = vcmask 517120   ;;  %vm862_vm6 = vcmask 1024   ;;  %s1569_s1 = inlined_call_operand.vmem [shape: bf16[1280,64], index: 1, kind: input, shape index: {}]   ;;  %s1570_s0 = inlined_call_operand.vmem [shape: bf16[2,1280], index: 0, kind: input, shape index: {}]   ;;  %s1571_s2 = inlined_call_operand.vmem [shape: f32[1,64], index: 2, kind: input, shape index: {}]   ;;  %s1572_s3 = inlined_call_operand.vmem [shape: f32[1,64], index: 3, kind: input, shape index: {}]   ;;  %s1573_s4 = inlined_call_operand.<no memory space> [shape: f32[1,1], index: 4, kind: input, shape index: {}]   ;;  %s1574_s5 = inlined_call_operand.vmem [shape: f32[2,1], index: 5, kind: output, shape index: {}]  }
   0x1   :  { %v1195_v0 = vld [vmem:[%s1569_s1 + $0x38] sm:$0xff]  ;;  %v1194_v4 = vld [vmem:[%s1569_s1 + $0x30] sm:$0xff]  ;;  %v1193_v8 = vld [vmem:[%s1569_s1 + $0x28] sm:$0xff] }
   0x2   :  { %v1203_v1 = vld [vmem:[%s1569_s1 + $0x78] sm:$0xff]  ;;  %692 = vmatpush.bf16.msra.mxu0 %v1195_v0  ;;  %v1202_v5 = vld [vmem:[%s1569_s1 + $0x70] sm:$0xff]  ;;  %v1201_v9 = vld [vmem:[%s1569_s1 + $0x68] sm:$0xff] }
   0x3   :  { %v1211_v2 = vld [vmem:[%s1569_s1 + $0xb8] sm:$0xff]  ;;  %705 = vmatpush.bf16.msra.mxu1 %v1203_v1  ;;  %v1210_v6 = vld [vmem:[%s1569_s1 + $0xb0] sm:$0xff]  ;;  %v1209_v10 = vld [vmem:[%s1569_s1 + $0xa8] sm:$0xff] }
   0x4   :  { %v1219_v3 = vld [vmem:[%s1569_s1 + $0xf8] sm:$0xff]  ;;  %718 = vmatpush.bf16.msra.mxu2 %v1211_v2  ;;  %v1218_v7 = vld [vmem:[%s1569_s1 + $0xf0] sm:$0xff]  ;;  %v1217_v11 = vld [vmem:[%s1569_s1 + $0xe8] sm:$0xff] }
   0x5   :  { %731 = vmatpush.bf16.msra.mxu3 %v1219_v3  ;;  %v1192_v12 = vld [vmem:[%s1569_s1 + $0x20] sm:$0xff]  ;;  %v1191_v16 = vld [vmem:[%s1569_s1 + $0x18] sm:$0xff]  ;;  %v1190_v21 = vld [vmem:[%s1569_s1 + $0x10] sm:$0xff] }
   0x6   :  { %693 = vmatpush.bf16.msra.mxu0 %v1194_v4  ;;  %v1200_v13 = vld [vmem:[%s1569_s1 + $0x60] sm:$0xff]  ;;  %v1199_v17 = vld [vmem:[%s1569_s1 + $0x58] sm:$0xff]  ;;  %v1198_v22 = vld [vmem:[%s1569_s1 + $0x50] sm:$0xff] }
   0x7   :  { %706 = vmatpush.bf16.msra.mxu1 %v1202_v5  ;;  %v1208_v14 = vld [vmem:[%s1569_s1 + $0xa0] sm:$0xff]  ;;  %v1207_v18 = vld [vmem:[%s1569_s1 + $0x98] sm:$0xff]  ;;  %v1206_v23 = vld [vmem:[%s1569_s1 + $0x90] sm:$0xff] }
   0x8   :  { %719 = vmatpush.bf16.msra.mxu2 %v1210_v6  ;;  %v1216_v15 = vld [vmem:[%s1569_s1 + $0xe0] sm:$0xff]  ;;  %v1215_v19 = vld [vmem:[%s1569_s1 + $0xd8] sm:$0xff]  ;;  %v1214_v24 = vld [vmem:[%s1569_s1 + $0xd0] sm:$0xff] }
   0x9   :  { %732 = vmatpush.bf16.msra.mxu3 %v1218_v7  ;;  %v22_v20 = vld [vmem:[%s1570_s0] sm:$0xff]  ;;  %v1189_v25 = vld [vmem:[%s1569_s1 + $0x8] sm:$0xff]  ;;  %v1227_v31 = vld [vmem:[%s1569_s1 + $0x138] sm:$0xff] }
   0xa   :  { %694 = vmatpush.bf16.msra.mxu0 %v1193_v8  ;;  %189 = vst [vmem:[#allocation1] ss:$9 sm:$0xff] %v22_v20  ;;  %v1197_v26 = vld [vmem:[%s1569_s1 + $0x48] sm:$0xff]  ;;  %v1188_v29 = vld [vmem:[%s1569_s1] sm:$0xff]  ;;  %v1235_v32 = vld [vmem:[%s1569_s1 + $0x178] sm:$0xff] }
   0xb   :  { %707 = vmatpush.bf16.msra.mxu1 %v1201_v9  ;;  %v1205_v27 = vld [vmem:[%s1569_s1 + $0x88] sm:$0xff]  ;;  %v1196_v30 = vld [vmem:[%s1569_s1 + $0x40] sm:$0xff]  ;;  %v1243_v35 = vld [vmem:[%s1569_s1 + $0x1b8] sm:$0xff] }
   0xc   :  { %720 = vmatpush.bf16.msra.mxu2 %v1209_v10  ;;  %v1213_v28 = vld [vmem:[%s1569_s1 + $0xc8] sm:$0xff]  ;;  %v1204_v33 = vld [vmem:[%s1569_s1 + $0x80] sm:$0xff]  ;;  %v1251_v36 = vld [vmem:[%s1569_s1 + $0x1f8] sm:$0xff] }
   0xd   :  { %733 = vmatpush.bf16.msra.mxu3 %v1217_v11  ;;  %v1212_v34 = vld [vmem:[%s1569_s1 + $0xc0] sm:$0xff]  ;;  %v1226_v37 = vld [vmem:[%s1569_s1 + $0x130] sm:$0xff]  ;;  %v23_v45 = vld [vmem:[%s1570_s0 + $0x8] sm:$0x3] }
   0xe   :  { %695 = vmatpush.bf16.msra.mxu0 %v1192_v12  ;;  %v1234_v38 = vld [vmem:[%s1569_s1 + $0x170] sm:$0xff]  ;;  %v1225_v46 = vld [vmem:[%s1569_s1 + $0x128] sm:$0xff]  ;;  %v1224_v54 = vld [vmem:[%s1569_s1 + $0x120] sm:$0xff] }
   0xf   :  { %708 = vmatpush.bf16.msra.mxu1 %v1200_v13  ;;  %v1242_v41 = vld [vmem:[%s1569_s1 + $0x1b0] sm:$0xff]  ;;  %v1233_v47 = vld [vmem:[%s1569_s1 + $0x168] sm:$0xff]  ;;  %v1232_v55 = vld [vmem:[%s1569_s1 + $0x160] sm:$0xff] }
  0x10   :  { %721 = vmatpush.bf16.msra.mxu2 %v1208_v14  ;;  %v1250_v42 = vld [vmem:[%s1569_s1 + $0x1f0] sm:$0xff]  ;;  %v1241_v52 = vld [vmem:[%s1569_s1 + $0x1a8] sm:$0xff]  ;;  %v1240_v56 = vld [vmem:[%s1569_s1 + $0x1a0] sm:$0xff] }
  0x11   :  { %734 = vmatpush.bf16.msra.mxu3 %v1216_v15  ;;  %v190_v39 = vld [vmem:[#allocation1] sm:$0xff]  ;;  %v191_v40 = vld [vmem:[#allocation1 + $0x9] sm:$0xff]  ;;  %v192_v43 = vld [vmem:[#allocation1 + $0x12] sm:$0xff] }
  0x12   :  { %696 = vmatpush.bf16.msra.mxu0 %v1191_v16  ;;  %v193_v44 = vld [vmem:[#allocation1 + $0x1b] sm:$0xff]  ;;  %v194_v49 = vld [vmem:[#allocation1 + $0x24] sm:$0xff]  ;;  %v195_v51 = vld [vmem:[#allocation1 + $0x2d] sm:$0xff] }
  0x13   :  { %709 = vmatpush.bf16.msra.mxu1 %v1199_v17  ;;  %v1437_v48 = vld [vmem:[#allocation1 + $0x36] sm:$0xff]  ;;  %v1439_v50 = vld [vmem:[#allocation1 + $0x3f] sm:$0xff]  ;;  %v1249_v53 = vld [vmem:[%s1569_s1 + $0x1e8] sm:$0xff] }
  0x14   :  { %722 = vmatpush.bf16.msra.mxu2 %v1207_v18  ;;  %199 = vst [vmem:[#allocation1] ss:$9 sm:$0xff] %v23_v45  ;;  %v1248_v57 = vld [vmem:[%s1569_s1 + $0x1e0] sm:$0xff]  ;;  %v1223_v58 = vld [vmem:[%s1569_s1 + $0x118] sm:$0xff]  ;;  %v1222_v62 = vld [vmem:[%s1569_s1 + $0x110] sm:$0xff] }
  0x15   :  { %735 = vmatpush.bf16.msra.mxu3 %v1215_v19  ;;  %v1231_v59 = vld [vmem:[%s1569_s1 + $0x158] sm:$0xff]  ;;  %v1230_v63 = vld [vmem:[%s1569_s1 + $0x150] sm:$0xff]  ;;  %v1221_v2 = vld [vmem:[%s1569_s1 + $0x108] sm:$0xff] }
  0x16   :  { %697 = vmatpush.bf16.msra.mxu0 %v1190_v21  ;;  %v1239_v60 = vld [vmem:[%s1569_s1 + $0x198] sm:$0xff]  ;;  %v1238_v0 = vld [vmem:[%s1569_s1 + $0x190] sm:$0xff]  ;;  %v1229_v3 = vld [vmem:[%s1569_s1 + $0x148] sm:$0xff] }
  0x17   :  { %710 = vmatpush.bf16.msra.mxu1 %v1198_v22  ;;  %v1247_v61 = vld [vmem:[%s1569_s1 + $0x1d8] sm:$0xff]  ;;  %v1246_v1 = vld [vmem:[%s1569_s1 + $0x1d0] sm:$0xff]  ;;  %v1237_v4 = vld [vmem:[%s1569_s1 + $0x188] sm:$0xff] }
  0x18   :  { %723 = vmatpush.bf16.msra.mxu2 %v1206_v23  ;;  %v1245_v5 = vld [vmem:[%s1569_s1 + $0x1c8] sm:$0xff]  ;;  %v1220_v6 = vld [vmem:[%s1569_s1 + $0x100] sm:$0xff]  ;;  %v1259_v8 = vld [vmem:[%s1569_s1 + $0x238] sm:$0xff] }
  0x19   :  { %736 = vmatpush.bf16.msra.mxu3 %v1214_v24  ;;  %v1228_v7 = vld [vmem:[%s1569_s1 + $0x140] sm:$0xff]  ;;  %v1267_v9 = vld [vmem:[%s1569_s1 + $0x278] sm:$0xff]  ;;  %v1258_v12 = vld [vmem:[%s1569_s1 + $0x230] sm:$0xff] }
  0x1a   :  { %698 = vmatpush.bf16.msra.mxu0 %v1189_v25  ;;  %v1236_v10 = vld [vmem:[%s1569_s1 + $0x180] sm:$0xff]  ;;  %v1266_v13 = vld [vmem:[%s1569_s1 + $0x270] sm:$0xff]  ;;  %v1257_v14 = vld [vmem:[%s1569_s1 + $0x228] sm:$0xff] }
  0x1b   :  { %711 = vmatpush.bf16.msra.mxu1 %v1197_v26  ;;  %v1244_v11 = vld [vmem:[%s1569_s1 + $0x1c0] sm:$0xff]  ;;  %v1265_v15 = vld [vmem:[%s1569_s1 + $0x268] sm:$0xff]  ;;  %v1255_v18 = vld [vmem:[%s1569_s1 + $0x218] sm:$0xff] }
  0x1c   :  { %724 = vmatpush.bf16.msra.mxu2 %v1205_v27  ;;  %v1256_v16 = vld [vmem:[%s1569_s1 + $0x220] sm:$0xff]  ;;  %v1263_v19 = vld [vmem:[%s1569_s1 + $0x258] sm:$0xff]  ;;  %v1254_v20 = vld [vmem:[%s1569_s1 + $0x210] sm:$0xff] }
  0x1d   :  { %737 = vmatpush.bf16.msra.mxu3 %v1213_v28  ;;  %v1264_v17 = vld [vmem:[%s1569_s1 + $0x260] sm:$0xff]  ;;  %v1262_v21 = vld [vmem:[%s1569_s1 + $0x250] sm:$0xff]  ;;  %v1253_v22 = vld [vmem:[%s1569_s1 + $0x208] sm:$0xff] }
  0x1e   :  { %699 = vmatpush.bf16.msra.mxu0 %v1188_v29  ;;  %v1261_v23 = vld [vmem:[%s1569_s1 + $0x248] sm:$0xff]  ;;  %v1252_v24 = vld [vmem:[%s1569_s1 + $0x200] sm:$0xff] }
  0x1f   :  { %712 = vmatpush.bf16.msra.mxu1 %v1196_v30  ;;  %v1260_v25 = vld [vmem:[%s1569_s1 + $0x240] sm:$0xff]  ;;  %v201_v27 = vld [vmem:[#allocation1 + $0x9] sm:$0xff] }
  0x20   :  { %725 = vmatpush.bf16.msra.mxu2 %v1204_v33  ;;  %v200_v26 = vld [vmem:[#allocation1] sm:$0xff] }
  0x21   :  { %738 = vmatpush.bf16.msra.mxu3 %v1212_v34  ;;  %700 = vmatmul.bf16.vlgmr.msra.gmra.mxu0 %v190_v39 }
  0x22   :  { %744 = vmatpush.bf16.msrb.mxu0 %v1227_v31  ;;  %713 = vmatmul.bf16.vlgmr.msra.gmra.mxu1 %v191_v40 }
  0x23   :  { %757 = vmatpush.bf16.msrb.mxu1 %v1235_v32  ;;  %726 = vmatmul.bf16.vlgmr.msra.gmra.mxu2 %v192_v43 }
  0x24   :  { %770 = vmatpush.bf16.msrb.mxu2 %v1243_v35  ;;  %739 = vmatmul.bf16.vlgmr.msra.gmra.mxu3 %v193_v44  ;;  %v10_v44 = vstv %s1573_s4 }
  0x25   :  { %783 = vmatpush.bf16.msrb.mxu3 %v1251_v36  ;;  %v1268_v36 = vld [vmem:[%s1571_s2] ss:$0 sm:$0xff]  ;;  %11 = vst [vmem:[#allocation2] sm:$0x1] %v10_v44 }
  0x26   :  { %745 = vmatpush.bf16.msrb.mxu0 %v1226_v37 }
  0x27   :  { %758 = vmatpush.bf16.msrb.mxu1 %v1234_v38 }
  0x28   :  { %771 = vmatpush.bf16.msrb.mxu2 %v1242_v41 }
  0x29   :  { %784 = vmatpush.bf16.msrb.mxu3 %v1250_v42 }
  0x2a   :  { %746 = vmatpush.bf16.msrb.mxu0 %v1225_v46 }
  0x2b   :  { %759 = vmatpush.bf16.msrb.mxu1 %v1233_v47 }
  0x2c   :  { %772 = vmatpush.bf16.msrb.mxu2 %v1241_v52 }
  0x2d   :  { %785 = vmatpush.bf16.msrb.mxu3 %v1249_v53 }
  0x2e   :  { %747 = vmatpush.bf16.msrb.mxu0 %v1224_v54 }
  0x2f   :  { %760 = vmatpush.bf16.msrb.mxu1 %v1232_v55 }
  0x30   :  { %773 = vmatpush.bf16.msrb.mxu2 %v1240_v56 }
  0x31   :  { %786 = vmatpush.bf16.msrb.mxu3 %v1248_v57 }
  0x32   :  { %748 = vmatpush.bf16.msrb.mxu0 %v1223_v58  ;;  %v1269_v58 = vld [vmem:[%s1572_s3] ss:$0 sm:$0xff] }
  0x33   :  { %761 = vmatpush.bf16.msrb.mxu1 %v1231_v59 }
  0x34   :  { %774 = vmatpush.bf16.msrb.mxu2 %v1239_v60 }
  0x35   :  { %787 = vmatpush.bf16.msrb.mxu3 %v1247_v61 }
  0x36   :  { %749 = vmatpush.bf16.msrb.mxu0 %v1222_v62 }
  0x37   :  { %762 = vmatpush.bf16.msrb.mxu1 %v1230_v63 }
  0x38   :  { %775 = vmatpush.bf16.msrb.mxu2 %v1238_v0 }
  0x39   :  { %788 = vmatpush.bf16.msrb.mxu3 %v1246_v1  ;;  %v1270_v1 = vld [vmem:[#allocation2] ss:$0 sm:$0xff] }
  0x3a   :  { %750 = vmatpush.bf16.msrb.mxu0 %v1221_v2 }
  0x3b   :  { %763 = vmatpush.bf16.msrb.mxu1 %v1229_v3 }
  0x3c   :  { %776 = vmatpush.bf16.msrb.mxu2 %v1237_v4 }
  0x3d   :  { %789 = vmatpush.bf16.msrb.mxu3 %v1245_v5 }
  0x3e   :  { %751 = vmatpush.bf16.msrb.mxu0 %v1220_v6 }
  0x3f   :  { %764 = vmatpush.bf16.msrb.mxu1 %v1228_v7 }
  0x40   :  { %777 = vmatpush.bf16.msrb.mxu2 %v1236_v10 }
  0x41   :  { %790 = vmatpush.bf16.msrb.mxu3 %v1244_v11  ;;  %752 = vmatmul.bf16.vlgmr.msrb.gmra.mxu0 %v194_v49 }
  0x42   :  { %796 = vmatpush.bf16.msra.mxu0 %v1259_v8  ;;  %765 = vmatmul.bf16.vlgmr.msrb.gmra.mxu1 %v195_v51 }
  0x43   :  { %809 = vmatpush.bf16.msra.mxu1 %v1267_v9  ;;  %778 = vmatmul.bf16.vlgmr.msrb.gmra.mxu2 %v1437_v48 }
  0x44   :  { %791 = vmatmul.bf16.vlgmr.msrb.gmra.mxu3 %v1439_v50 }
  0x46   :  { %797 = vmatpush.bf16.msra.mxu0 %v1258_v12 }
  0x47   :  { %810 = vmatpush.bf16.msra.mxu1 %v1266_v13 }
  0x4a   :  { %798 = vmatpush.bf16.msra.mxu0 %v1257_v14 }
  0x4b   :  { %811 = vmatpush.bf16.msra.mxu1 %v1265_v15 }
  0x4e   :  { %799 = vmatpush.bf16.msra.mxu0 %v1256_v16 }
  0x4f   :  { %812 = vmatpush.bf16.msra.mxu1 %v1264_v17 }
  0x52   :  { %800 = vmatpush.bf16.msra.mxu0 %v1255_v18 }
  0x53   :  { %813 = vmatpush.bf16.msra.mxu1 %v1263_v19 }
  0x56   :  { %801 = vmatpush.bf16.msra.mxu0 %v1254_v20 }
  0x57   :  { %814 = vmatpush.bf16.msra.mxu1 %v1262_v21 }
  0x5a   :  { %802 = vmatpush.bf16.msra.mxu0 %v1253_v22 }
  0x5b   :  { %815 = vmatpush.bf16.msra.mxu1 %v1261_v23 }
  0x5e   :  { %803 = vmatpush.bf16.msra.mxu0 %v1252_v24 }
  0x5f   :  { %816 = vmatpush.bf16.msra.mxu1 %v1260_v25 }
  0x61   :  { %804 = vmatmul.bf16.vlgmr.msra.gmra.mxu0 %v200_v26 }
  0x62   :  { %817 = vmatmul.bf16.vlgmr.msra.gmra.mxu1 %v201_v27 }
  0x9e   :  { %v701_v28 = vpop.f32.mrf.mxu0 }
  0x9f   :  { %v714_v29 = vpop.f32.mrf.mxu1  ;;  %v702_v37 = vadd.f32 %v1268_v36, %v701_v28 }
  0xa1   :  { %v715_v40 = vadd.f32 %v714_v29, %v702_v37 }
  0xa6   :  { %v727_v30 = vpop.f32.mrf.mxu2  ;;  %v703_v32 = vpop.f32.mrf.mxu0 }
  0xa7   :  { %v740_v31 = vpop.f32.mrf.mxu3  ;;  %v716_v33 = vpop.f32.mrf.mxu1  ;;  %v728_v41 = vadd.f32 %v727_v30, %v715_v40 }
  0xa9   :  { %v741_v47 = vadd.f32 %v740_v31, %v728_v41 }
  0xae   :  { %v729_v34 = vpop.f32.mrf.mxu2 }
  0xaf   :  { %v742_v35 = vpop.f32.mrf.mxu3 }
  0xbe   :  { %v753_v38 = vpop.f32.mrf.mxu0 }
  0xbf   :  { %v766_v39 = vpop.f32.mrf.mxu1  ;;  %v754_v48 = vadd.f32 %v753_v38, %v741_v47 }
  0xc1   :  { %v767_v51 = vadd.f32 %v766_v39, %v754_v48 }
  0xc6   :  { %v755_v42 = vpop.f32.mrf.mxu0  ;;  %v779_v45 = vpop.f32.mrf.mxu2 }
  0xc7   :  { %v768_v43 = vpop.f32.mrf.mxu1  ;;  %v792_v46 = vpop.f32.mrf.mxu3  ;;  %v780_v52 = vadd.f32 %v779_v45, %v767_v51 }
  0xc9   :  { %v793_v53 = vadd.f32 %v792_v46, %v780_v52 }
  0xce   :  { %v781_v49 = vpop.f32.mrf.mxu2 }
  0xcf   :  { %v794_v50 = vpop.f32.mrf.mxu3 }
  0xde   :  { %v805_v54 = vpop.f32.mrf.mxu0 }
  0xdf   :  { %v818_v55 = vpop.f32.mrf.mxu1  ;;  %v806_v56 = vadd.f32 %v805_v54, %v793_v53 }
  0xe1   :  { %v819_v57 = vadd.f32 %v818_v55, %v806_v56 }
  0xe3   :  { %v823_v59 = vmul.f32 0.2, %v819_v57  ;;  %vm822_vm0 = vcmp.ge.f32.partialorder %v819_v57, 0.0 }
  0xe5   :  { %v824_v60 = vsel %vm822_vm0, %v819_v57, %v823_v59 }
  0xe6   :  { %v807_v61 = vpop.f32.mrf.mxu0  ;;  %v829_v63 = vmul.f32 %v1269_v58, %v824_v60 }
  0xe7   :  { %v820_v62 = vpop.f32.mrf.mxu1 }
  0xe8   :  { %v831_v0 = vsel %vm830_vm1, %v829_v63, 0.0 }
  0xe9   :  { %832 = vadd.xlane.f32.xlu0 %v831_v0 }
 0x15c   :  { %v833_v2 = vpop.xlane.xlu0 %832 }
 0x15d   :  { %v838_v3 = vadd.f32 %v1270_v1, %v833_v2 }
 0x15f   :  { %v839_v4 = vand.u32 2147483647, %v838_v3  ;;  %vm843_vm7 = vcmp.ge.f32.partialorder %v838_v3, 0.0 }
 0x161   :  { %v840_v5 = vsub.f32 0.0, %v839_v4 }
 0x163   :  { %v841_v6 = vmul.f32 1.442695, %v840_v5 }
 0x165   :  { %1271 = vpow2.f32 %v841_v6 }
 0x16b   :  { %v1272_v7 = vpop.eup %1271 }
 0x16c   :  { %v844_v8 = vadd.f32 1.0, %v1272_v7 }
 0x16e   :  { %1273 = vrcp.f32 %v844_v8  ;;  %v856_v12 = vand.u32 2147483648, %v844_v8  ;;  %v854_v14 = vand.u32 2147483647, %v844_v8  ;;  %vm850_vm3 = vweird.f32 %v844_v8 }
 0x170   :  { %v857_v16 = vor.u32 1.1754944e-38, %v856_v12  ;;  %vm855_vm5 = vcmp.eq.f32.partialorder %v854_v14, 8.507059e+37 }
 0x174   :  { %v1274_v9 = vpop.eup %1273 }
 0x175   :  { %v846_v10 = vmul.f32 %v1274_v9, %v844_v8  ;;  %vm851_vm2 = vweird.f32 %v1274_v9 }
 0x176   :  { %vm852_vm4 = vmor %vm850_vm3, %vm851_vm2 }
 0x177   :  { %v847_v11 = vsub.f32 1.0, %v846_v10 }
 0x179   :  { %v848_v13 = vmul.f32 %v1274_v9, %v847_v11 }
 0x17b   :  { %v849_v15 = vadd.f32 %v1274_v9, %v848_v13 }
 0x17d   :  { %v853_v17 = vsel %vm852_vm4, %v1274_v9, %v849_v15 }
 0x17e   :  { %v858_v18 = vsel %vm855_vm5, %v857_v16, %v853_v17 }
 0x17f   :  { %v860_v19 = vmul.f32 %v1272_v7, %v858_v18 }
 0x181   :  { %v861_v20 = vsel %vm843_vm7, %v858_v18, %v860_v19 }
 0x182   :  { %863 = vst.msk [vmem:[%s1574_s5] sm:$0x3] %vm862_vm6, %v861_v20 }

</bundles_post_ra>
